<compile_context>
chip_gen: v7x
topology: tpu7x:2x2x1
jax: 0.10.0
libtpu: 0.0.40
codegen_flags: <defaults>
</compile_context>

<pallas_src>
import math
import functools

import numpy as np
import jax
import jax.numpy as jnp
from jax import lax
from jax.experimental import pallas as pl
from jax.experimental.pallas import tpu as pltpu


def _round_up(x, m):
    return ((x + m - 1) // m) * m


def _conv_stats_kernel(x_ref, w_ref, conv_ref, ssum_ref, ssq_ref, patch_ref,
                       *, H, W, KH, KW, Cin, K):
    """Per-image conv (im2col + one MXU matmul) and per-image BN partial sums.

    x_ref:    (1, H+KH-1, W+KW-1, Cin)  spatially pre-padded input block
    w_ref:    (KP, CP)                  weight matrix, K and Cout zero-padded
    conv_ref: (1, H, W, CP)             conv output (f32, lane-dense channels)
    ssum_ref: (1, 1, CP)                per-image sum over H*W
    ssq_ref:  (1, 1, CP)                per-image sum of squares over H*W
    patch_ref: VMEM scratch (H*W, KP)   im2col patch matrix
    """
    HW = H * W
    KP = patch_ref.shape[1]
    CP = w_ref.shape[1]

    # Padded contraction columns must be exactly zero (weights there are zero,
    # but uninitialized VMEM could hold NaNs).
    if KP > K:
        patch_ref[:, K:] = jnp.zeros((HW, KP - K), patch_ref.dtype)

    # ---- im2col: build the (H*W, KP) patch matrix once from shifted views ----
    for kh in range(KH):
        for kw in range(KW):
            tap = kh * KW + kw
            sl = x_ref[:, kh:kh + H, kw:kw + W, :]            # (1, H, W, Cin)
            patch_ref[:, tap * Cin:(tap + 1) * Cin] = sl.reshape(HW, Cin)

    # ---- one K=128 MXU contraction (instead of 25 K=Cin matmuls) ----
    acc = jnp.dot(patch_ref[...], w_ref[...],
                  preferred_element_type=jnp.float32)          # (H*W, CP)

    conv_ref[...] = acc.reshape(1, H, W, CP)

    # ---- per-image partial sums for two-pass (global) batch-norm stats ----
    ssum_ref[...] = jnp.sum(acc, axis=0).reshape(1, 1, CP)
    ssq_ref[...] = jnp.sum(acc * acc, axis=0).reshape(1, 1, CP)


def _bn_relu_pool_kernel(conv_ref, scale_ref, shift_ref, o_ref,
                         *, H, W, neg_slope):
    """Apply folded BN (scale/shift), LeakyReLU, and 2x2 max-pool in-register.

    conv_ref:  (1, H, W, CP)
    scale_ref: (1, CP)
    shift_ref: (1, CP)
    o_ref:     (1, H//2, W//2, CP)
    """
    CP = conv_ref.shape[-1]
    Ho, Wo = H // 2, W // 2

    y = conv_ref[...].reshape(H, W, CP)
    y = y * scale_ref[...].reshape(1, 1, CP) + shift_ref[...].reshape(1, 1, CP)
    y = jnp.where(y > 0, y, neg_slope * y)

    # 2x2 max-pool on the live value; channels stay on the lane axis throughout.
    t = y.reshape(H, Wo, 2, CP)
    colmax = jnp.maximum(t[:, :, 0, :], t[:, :, 1, :])         # (H, Wo, CP)
    t2 = colmax.reshape(Ho, 2, Wo, CP)
    pooled = jnp.maximum(t2[:, 0, :, :], t2[:, 1, :, :])       # (Ho, Wo, CP)

    o_ref[...] = pooled.reshape(1, Ho, Wo, CP)


def conv_block_forward(x_nchw, w_oihw, gamma, beta, *, eps=1e-5, neg_slope=0.2,
                       conv_dtype=jnp.float32):
    """Pallas ConvBlock forward. Input/output use PyTorch's NCHW convention.

    conv_dtype: MXU operand dtype for the conv (use jnp.bfloat16 on v6e/v7x for
                2x MXU rate; accumulation stays f32 either way).
    """
    N, Cin, H, W = x_nchw.shape
    Cout, _, KH, KW = w_oihw.shape
    pad = KH // 2
    Ho, Wo = H // 2, W // 2
    K = KH * KW * Cin
    KP = _round_up(K, 128)      # contraction dim padded to a full MXU pass
    CP = _round_up(Cout, 128)   # output channels padded -> lane-dense stores

    # ---- wrapper glue: layout + spatial zero-padding + weight packing ----
    # TODO(synk): for large H/W, tile rows with a halo'd index_map / manual DMA
    # and fold the zero padding into the kernel instead of jnp.pad here.
    x_nhwc = jnp.transpose(x_nchw, (0, 2, 3, 1)).astype(conv_dtype)
    x_pad = jnp.pad(x_nhwc, ((0, 0), (pad, pad), (pad, pad), (0, 0)))

    w_km = jnp.transpose(w_oihw, (2, 3, 1, 0)).reshape(K, Cout).astype(conv_dtype)
    w_mat = jnp.zeros((KP, CP), conv_dtype).at[:K, :Cout].set(w_km)

    gamma_p = jnp.zeros((1, CP), jnp.float32).at[0, :Cout].set(
        gamma.astype(jnp.float32))
    beta_p = jnp.zeros((1, CP), jnp.float32).at[0, :Cout].set(
        beta.astype(jnp.float32))

    cparams = pltpu.CompilerParams(
        dimension_semantics=("parallel",),          # batch axis -> megacore
        vmem_limit_bytes=32 * 1024 * 1024,
    )

    # ---- pass 1: conv + per-image BN partial sums ----
    conv_kernel = functools.partial(_conv_stats_kernel, H=H, W=W, KH=KH, KW=KW,
                                    Cin=Cin, K=K)
    conv_out, ssum, ssq = pl.pallas_call(
        conv_kernel,
        grid=(N,),
        out_shape=(
            jax.ShapeDtypeStruct((N, H, W, CP), jnp.float32),
            jax.ShapeDtypeStruct((N, 1, CP), jnp.float32),
            jax.ShapeDtypeStruct((N, 1, CP), jnp.float32),
        ),
        in_specs=[
            pl.BlockSpec((1, H + 2 * pad, W + 2 * pad, Cin),
                         lambda n: (n, 0, 0, 0)),
            pl.BlockSpec((KP, CP), lambda n: (0, 0)),
        ],
        out_specs=(
            pl.BlockSpec((1, H, W, CP), lambda n: (n, 0, 0, 0)),
            pl.BlockSpec((1, 1, CP), lambda n: (n, 0, 0)),
            pl.BlockSpec((1, 1, CP), lambda n: (n, 0, 0)),
        ),
        scratch_shapes=[pltpu.VMEM((H * W, KP), conv_dtype)],
        compiler_params=cparams,
    )(x_pad, w_mat)

    # ---- tiny per-channel reduction: fold BN into scale/shift (f32 sums) ----
    count = float(N * H * W)
    mean = jnp.sum(ssum, axis=0) / count                        # (1, CP)
    ex2 = jnp.sum(ssq, axis=0) / count                          # (1, CP)
    var = jnp.maximum(ex2 - mean * mean, 0.0)                   # biased variance
    scale = gamma_p * lax.rsqrt(var + eps)
    shift = beta_p - mean * scale

    # ---- pass 2: scale/shift + LeakyReLU + 2x2 max-pool ----
    pool_kernel = functools.partial(_bn_relu_pool_kernel, H=H, W=W,
                                    neg_slope=neg_slope)
    out_padded = pl.pallas_call(
        pool_kernel,
        grid=(N,),
        out_shape=jax.ShapeDtypeStruct((N, Ho, Wo, CP), jnp.float32),
        in_specs=[
            pl.BlockSpec((1, H, W, CP), lambda n: (n, 0, 0, 0)),
            pl.BlockSpec((1, CP), lambda n: (0, 0)),
            pl.BlockSpec((1, CP), lambda n: (0, 0)),
        ],
        out_specs=pl.BlockSpec((1, Ho, Wo, CP), lambda n: (n, 0, 0, 0)),
        compiler_params=cparams,
    )(conv_out, scale, shift)

    out = out_padded[:, :, :, :Cout]                # drop channel padding
    return jnp.transpose(out, (0, 3, 1, 2))         # back to NCHW


def conv_block_reference(x_nchw, w_oihw, gamma, beta, *, eps=1e-5, neg_slope=0.2):
    """Pure-JAX reference matching PyTorch semantics (training-mode BN)."""
    y = lax.conv_general_dilated(
        x_nchw, w_oihw, window_strides=(1, 1), padding=((2, 2), (2, 2)),
        dimension_numbers=("NCHW", "OIHW", "NCHW"))
    mean = y.mean(axis=(0, 2, 3), keepdims=True)
    var = ((y - mean) ** 2).mean(axis=(0, 2, 3), keepdims=True)
    y = (y - mean) / jnp.sqrt(var + eps)
    y = y * gamma.reshape(1, -1, 1, 1) + beta.reshape(1, -1, 1, 1)
    y = jnp.where(y > 0, y, neg_slope * y)
    N, C, H, W = y.shape
    return y.reshape(N, C, H // 2, 2, W // 2, 2).max(axis=(3, 5))


if __name__ == "__main__":
    # Small shapes consistent with ConvBlock(in_channels=4, out_channels=8).
    N, Cin, Cout, H, W = 2, 4, 8, 16, 16
    KH = KW = 5

    key = jax.random.PRNGKey(0)
    kx, kw = jax.random.split(key)
    x = jax.random.normal(kx, (N, Cin, H, W), jnp.float32)

    # Deterministic Conv2d weight init (kaiming_uniform(a=sqrt(5)) bound).
    fan_in = Cin * KH * KW
    bound = 1.0 / math.sqrt(fan_in)
    w = jax.random.uniform(kw, (Cout, Cin, KH, KW), jnp.float32, -bound, bound)

    # BatchNorm2d default affine params.
    gamma = jnp.ones((Cout,), jnp.float32)
    beta = jnp.zeros((Cout,), jnp.float32)
    # TODO(synk): BatchNorm running-stat (running_mean/var, momentum) updates
    # are a training side effect and do not affect the forward output; they are
    # not reproduced here.

    out = conv_block_forward(x, w, gamma, beta)
    out = jax.block_until_ready(out)

    ref = conv_block_reference(x, w, gamma, beta)
    assert out.shape == (N, Cout, H // 2, W // 2), out.shape
    np.testing.assert_allclose(np.asarray(out), np.asarray(ref),
                               atol=2e-2, rtol=2e-2)
    print("KERNEL_OK")
</pallas_src>

<mosaic_0001>
module attributes {stable_mosaic.version = 11 : i64} {
  func.func @_conv_stats_kernel(%arg0: i32, %arg1: memref<1x20x20x4xf32, #tpu.memory_space<vmem>>, %arg2: memref<128x128xf32, #tpu.memory_space<vmem>>, %arg3: memref<1x16x16x128xf32, #tpu.memory_space<vmem>>, %arg4: memref<1x1x128xf32, #tpu.memory_space<vmem>>, %arg5: memref<1x1x128xf32, #tpu.memory_space<vmem>>, %arg6: memref<256x128xf32, #tpu.memory_space<vmem>>) attributes {dimension_semantics = [#tpu.dimension_semantics<parallel>], iteration_bounds = array<i64: 2>, scalar_prefetch = 0 : i64, scratch_operands = 1 : i64, tpu.core_type = #tpu.core_type<tc>, window_params = [{transform_indices = @transform_0, window_bounds = array<i64: 1, 20, 20, 4>}, {pipeline_mode = #tpu.pipeline_mode<synchronous>, transform_indices = @transform_1, window_bounds = array<i64: 128, 128>}, {transform_indices = @transform_2, window_bounds = array<i64: 1, 16, 16, 128>}, {transform_indices = @transform_3, window_bounds = array<i64: 1, 1, 128>}, {transform_indices = @transform_4, window_bounds = array<i64: 1, 1, 128>}]} {
    %cst = arith.constant 0.000000e+00 : f32
    %0 = vector.broadcast %cst : f32 to vector<256x28xf32>
    %c0 = arith.constant 0 : index
    %c100 = arith.constant 100 : index
    %1 = vector.load %arg6[%c0, %c100] : memref<256x128xf32, #tpu.memory_space<vmem>>, vector<256x28xf32>
    tpu.vector_store %arg6[%c0, %c100], %0 {strides = array<i32>} : memref<256x128xf32, #tpu.memory_space<vmem>>, vector<256x28xf32>,
    %c0_0 = arith.constant 0 : index
    %c0_1 = arith.constant 0 : index
    %c0_2 = arith.constant 0 : index
    %c0_3 = arith.constant 0 : index
    %2 = vector.load %arg1[%c0_0, %c0_1, %c0_2, %c0_3] : memref<1x20x20x4xf32, #tpu.memory_space<vmem>>, vector<1x16x16x4xf32>
    %3 = vector.shape_cast %2 : vector<1x16x16x4xf32> to vector<256x4xf32>
    %c0_4 = arith.constant 0 : index
    %c0_5 = arith.constant 0 : index
    %4 = vector.load %arg6[%c0_4, %c0_5] : memref<256x128xf32, #tpu.memory_space<vmem>>, vector<256x4xf32>
    tpu.vector_store %arg6[%c0_4, %c0_5], %3 {strides = array<i32>} : memref<256x128xf32, #tpu.memory_space<vmem>>, vector<256x4xf32>,
    %c0_6 = arith.constant 0 : index
    %c0_7 = arith.constant 0 : index
    %c1 = arith.constant 1 : index
    %c0_8 = arith.constant 0 : index
    %5 = vector.load %arg1[%c0_6, %c0_7, %c1, %c0_8] : memref<1x20x20x4xf32, #tpu.memory_space<vmem>>, vector<1x16x16x4xf32>
    %6 = vector.shape_cast %5 : vector<1x16x16x4xf32> to vector<256x4xf32>
    %c0_9 = arith.constant 0 : index
    %c4 = arith.constant 4 : index
    %7 = vector.load %arg6[%c0_9, %c4] : memref<256x128xf32, #tpu.memory_space<vmem>>, vector<256x4xf32>
    tpu.vector_store %arg6[%c0_9, %c4], %6 {strides = array<i32>} : memref<256x128xf32, #tpu.memory_space<vmem>>, vector<256x4xf32>,
    %c0_10 = arith.constant 0 : index
    %c0_11 = arith.constant 0 : index
    %c2 = arith.constant 2 : index
    %c0_12 = arith.constant 0 : index
    %8 = vector.load %arg1[%c0_10, %c0_11, %c2, %c0_12] : memref<1x20x20x4xf32, #tpu.memory_space<vmem>>, vector<1x16x16x4xf32>
    %9 = vector.shape_cast %8 : vector<1x16x16x4xf32> to vector<256x4xf32>
    %c0_13 = arith.constant 0 : index
    %c8 = arith.constant 8 : index
    %10 = vector.load %arg6[%c0_13, %c8] : memref<256x128xf32, #tpu.memory_space<vmem>>, vector<256x4xf32>
    tpu.vector_store %arg6[%c0_13, %c8], %9 {strides = array<i32>} : memref<256x128xf32, #tpu.memory_space<vmem>>, vector<256x4xf32>,
    %c0_14 = arith.constant 0 : index
    %c0_15 = arith.constant 0 : index
    %c3 = arith.constant 3 : index
    %c0_16 = arith.constant 0 : index
    %11 = vector.load %arg1[%c0_14, %c0_15, %c3, %c0_16] : memref<1x20x20x4xf32, #tpu.memory_space<vmem>>, vector<1x16x16x4xf32>
    %12 = vector.shape_cast %11 : vector<1x16x16x4xf32> to vector<256x4xf32>
    %c0_17 = arith.constant 0 : index
    %c12 = arith.constant 12 : index
    %13 = vector.load %arg6[%c0_17, %c12] : memref<256x128xf32, #tpu.memory_space<vmem>>, vector<256x4xf32>
    tpu.vector_store %arg6[%c0_17, %c12], %12 {strides = array<i32>} : memref<256x128xf32, #tpu.memory_space<vmem>>, vector<256x4xf32>,
    %c0_18 = arith.constant 0 : index
    %c0_19 = arith.constant 0 : index
    %c4_20 = arith.constant 4 : index
    %c0_21 = arith.constant 0 : index
    %14 = vector.load %arg1[%c0_18, %c0_19, %c4_20, %c0_21] : memref<1x20x20x4xf32, #tpu.memory_space<vmem>>, vector<1x16x16x4xf32>
    %15 = vector.shape_cast %14 : vector<1x16x16x4xf32> to vector<256x4xf32>
    %c0_22 = arith.constant 0 : index
    %c16 = arith.constant 16 : index
    %16 = vector.load %arg6[%c0_22, %c16] : memref<256x128xf32, #tpu.memory_space<vmem>>, vector<256x4xf32>
    tpu.vector_store %arg6[%c0_22, %c16], %15 {strides = array<i32>} : memref<256x128xf32, #tpu.memory_space<vmem>>, vector<256x4xf32>,
    %c0_23 = arith.constant 0 : index
    %c1_24 = arith.constant 1 : index
    %c0_25 = arith.constant 0 : index
    %c0_26 = arith.constant 0 : index
    %17 = vector.load %arg1[%c0_23, %c1_24, %c0_25, %c0_26] : memref<1x20x20x4xf32, #tpu.memory_space<vmem>>, vector<1x16x16x4xf32>
    %18 = vector.shape_cast %17 : vector<1x16x16x4xf32> to vector<256x4xf32>
    %c0_27 = arith.constant 0 : index
    %c20 = arith.constant 20 : index
    %19 = vector.load %arg6[%c0_27, %c20] : memref<256x128xf32, #tpu.memory_space<vmem>>, vector<256x4xf32>
    tpu.vector_store %arg6[%c0_27, %c20], %18 {strides = array<i32>} : memref<256x128xf32, #tpu.memory_space<vmem>>, vector<256x4xf32>,
    %c0_28 = arith.constant 0 : index
    %c1_29 = arith.constant 1 : index
    %c1_30 = arith.constant 1 : index
    %c0_31 = arith.constant 0 : index
    %20 = vector.load %arg1[%c0_28, %c1_29, %c1_30, %c0_31] : memref<1x20x20x4xf32, #tpu.memory_space<vmem>>, vector<1x16x16x4xf32>
    %21 = vector.shape_cast %20 : vector<1x16x16x4xf32> to vector<256x4xf32>
    %c0_32 = arith.constant 0 : index
    %c24 = arith.constant 24 : index
    %22 = vector.load %arg6[%c0_32, %c24] : memref<256x128xf32, #tpu.memory_space<vmem>>, vector<256x4xf32>
    tpu.vector_store %arg6[%c0_32, %c24], %21 {strides = array<i32>} : memref<256x128xf32, #tpu.memory_space<vmem>>, vector<256x4xf32>,
    %c0_33 = arith.constant 0 : index
    %c1_34 = arith.constant 1 : index
    %c2_35 = arith.constant 2 : index
    %c0_36 = arith.constant 0 : index
    %23 = vector.load %arg1[%c0_33, %c1_34, %c2_35, %c0_36] : memref<1x20x20x4xf32, #tpu.memory_space<vmem>>, vector<1x16x16x4xf32>
    %24 = vector.shape_cast %23 : vector<1x16x16x4xf32> to vector<256x4xf32>
    %c0_37 = arith.constant 0 : index
    %c28 = arith.constant 28 : index
    %25 = vector.load %arg6[%c0_37, %c28] : memref<256x128xf32, #tpu.memory_space<vmem>>, vector<256x4xf32>
    tpu.vector_store %arg6[%c0_37, %c28], %24 {strides = array<i32>} : memref<256x128xf32, #tpu.memory_space<vmem>>, vector<256x4xf32>,
    %c0_38 = arith.constant 0 : index
    %c1_39 = arith.constant 1 : index
    %c3_40 = arith.constant 3 : index
    %c0_41 = arith.constant 0 : index
    %26 = vector.load %arg1[%c0_38, %c1_39, %c3_40, %c0_41] : memref<1x20x20x4xf32, #tpu.memory_space<vmem>>, vector<1x16x16x4xf32>
    %27 = vector.shape_cast %26 : vector<1x16x16x4xf32> to vector<256x4xf32>
    %c0_42 = arith.constant 0 : index
    %c32 = arith.constant 32 : index
    %28 = vector.load %arg6[%c0_42, %c32] : memref<256x128xf32, #tpu.memory_space<vmem>>, vector<256x4xf32>
    tpu.vector_store %arg6[%c0_42, %c32], %27 {strides = array<i32>} : memref<256x128xf32, #tpu.memory_space<vmem>>, vector<256x4xf32>,
    %c0_43 = arith.constant 0 : index
    %c1_44 = arith.constant 1 : index
    %c4_45 = arith.constant 4 : index
    %c0_46 = arith.constant 0 : index
    %29 = vector.load %arg1[%c0_43, %c1_44, %c4_45, %c0_46] : memref<1x20x20x4xf32, #tpu.memory_space<vmem>>, vector<1x16x16x4xf32>
    %30 = vector.shape_cast %29 : vector<1x16x16x4xf32> to vector<256x4xf32>
    %c0_47 = arith.constant 0 : index
    %c36 = arith.constant 36 : index
    %31 = vector.load %arg6[%c0_47, %c36] : memref<256x128xf32, #tpu.memory_space<vmem>>, vector<256x4xf32>
    tpu.vector_store %arg6[%c0_47, %c36], %30 {strides = array<i32>} : memref<256x128xf32, #tpu.memory_space<vmem>>, vector<256x4xf32>,
    %c0_48 = arith.constant 0 : index
    %c2_49 = arith.constant 2 : index
    %c0_50 = arith.constant 0 : index
    %c0_51 = arith.constant 0 : index
    %32 = vector.load %arg1[%c0_48, %c2_49, %c0_50, %c0_51] : memref<1x20x20x4xf32, #tpu.memory_space<vmem>>, vector<1x16x16x4xf32>
    %33 = vector.shape_cast %32 : vector<1x16x16x4xf32> to vector<256x4xf32>
    %c0_52 = arith.constant 0 : index
    %c40 = arith.constant 40 : index
    %34 = vector.load %arg6[%c0_52, %c40] : memref<256x128xf32, #tpu.memory_space<vmem>>, vector<256x4xf32>
    tpu.vector_store %arg6[%c0_52, %c40], %33 {strides = array<i32>} : memref<256x128xf32, #tpu.memory_space<vmem>>, vector<256x4xf32>,
    %c0_53 = arith.constant 0 : index
    %c2_54 = arith.constant 2 : index
    %c1_55 = arith.constant 1 : index
    %c0_56 = arith.constant 0 : index
    %35 = vector.load %arg1[%c0_53, %c2_54, %c1_55, %c0_56] : memref<1x20x20x4xf32, #tpu.memory_space<vmem>>, vector<1x16x16x4xf32>
    %36 = vector.shape_cast %35 : vector<1x16x16x4xf32> to vector<256x4xf32>
    %c0_57 = arith.constant 0 : index
    %c44 = arith.constant 44 : index
    %37 = vector.load %arg6[%c0_57, %c44] : memref<256x128xf32, #tpu.memory_space<vmem>>, vector<256x4xf32>
    tpu.vector_store %arg6[%c0_57, %c44], %36 {strides = array<i32>} : memref<256x128xf32, #tpu.memory_space<vmem>>, vector<256x4xf32>,
    %c0_58 = arith.constant 0 : index
    %c2_59 = arith.constant 2 : index
    %c2_60 = arith.constant 2 : index
    %c0_61 = arith.constant 0 : index
    %38 = vector.load %arg1[%c0_58, %c2_59, %c2_60, %c0_61] : memref<1x20x20x4xf32, #tpu.memory_space<vmem>>, vector<1x16x16x4xf32>
    %39 = vector.shape_cast %38 : vector<1x16x16x4xf32> to vector<256x4xf32>
    %c0_62 = arith.constant 0 : index
    %c48 = arith.constant 48 : index
    %40 = vector.load %arg6[%c0_62, %c48] : memref<256x128xf32, #tpu.memory_space<vmem>>, vector<256x4xf32>
    tpu.vector_store %arg6[%c0_62, %c48], %39 {strides = array<i32>} : memref<256x128xf32, #tpu.memory_space<vmem>>, vector<256x4xf32>,
    %c0_63 = arith.constant 0 : index
    %c2_64 = arith.constant 2 : index
    %c3_65 = arith.constant 3 : index
    %c0_66 = arith.constant 0 : index
    %41 = vector.load %arg1[%c0_63, %c2_64, %c3_65, %c0_66] : memref<1x20x20x4xf32, #tpu.memory_space<vmem>>, vector<1x16x16x4xf32>
    %42 = vector.shape_cast %41 : vector<1x16x16x4xf32> to vector<256x4xf32>
    %c0_67 = arith.constant 0 : index
    %c52 = arith.constant 52 : index
    %43 = vector.load %arg6[%c0_67, %c52] : memref<256x128xf32, #tpu.memory_space<vmem>>, vector<256x4xf32>
    tpu.vector_store %arg6[%c0_67, %c52], %42 {strides = array<i32>} : memref<256x128xf32, #tpu.memory_space<vmem>>, vector<256x4xf32>,
    %c0_68 = arith.constant 0 : index
    %c2_69 = arith.constant 2 : index
    %c4_70 = arith.constant 4 : index
    %c0_71 = arith.constant 0 : index
    %44 = vector.load %arg1[%c0_68, %c2_69, %c4_70, %c0_71] : memref<1x20x20x4xf32, #tpu.memory_space<vmem>>, vector<1x16x16x4xf32>
    %45 = vector.shape_cast %44 : vector<1x16x16x4xf32> to vector<256x4xf32>
    %c0_72 = arith.constant 0 : index
    %c56 = arith.constant 56 : index
    %46 = vector.load %arg6[%c0_72, %c56] : memref<256x128xf32, #tpu.memory_space<vmem>>, vector<256x4xf32>
    tpu.vector_store %arg6[%c0_72, %c56], %45 {strides = array<i32>} : memref<256x128xf32, #tpu.memory_space<vmem>>, vector<256x4xf32>,
    %c0_73 = arith.constant 0 : index
    %c3_74 = arith.constant 3 : index
    %c0_75 = arith.constant 0 : index
    %c0_76 = arith.constant 0 : index
    %47 = vector.load %arg1[%c0_73, %c3_74, %c0_75, %c0_76] : memref<1x20x20x4xf32, #tpu.memory_space<vmem>>, vector<1x16x16x4xf32>
    %48 = vector.shape_cast %47 : vector<1x16x16x4xf32> to vector<256x4xf32>
    %c0_77 = arith.constant 0 : index
    %c60 = arith.constant 60 : index
    %49 = vector.load %arg6[%c0_77, %c60] : memref<256x128xf32, #tpu.memory_space<vmem>>, vector<256x4xf32>
    tpu.vector_store %arg6[%c0_77, %c60], %48 {strides = array<i32>} : memref<256x128xf32, #tpu.memory_space<vmem>>, vector<256x4xf32>,
    %c0_78 = arith.constant 0 : index
    %c3_79 = arith.constant 3 : index
    %c1_80 = arith.constant 1 : index
    %c0_81 = arith.constant 0 : index
    %50 = vector.load %arg1[%c0_78, %c3_79, %c1_80, %c0_81] : memref<1x20x20x4xf32, #tpu.memory_space<vmem>>, vector<1x16x16x4xf32>
    %51 = vector.shape_cast %50 : vector<1x16x16x4xf32> to vector<256x4xf32>
    %c0_82 = arith.constant 0 : index
    %c64 = arith.constant 64 : index
    %52 = vector.load %arg6[%c0_82, %c64] : memref<256x128xf32, #tpu.memory_space<vmem>>, vector<256x4xf32>
    tpu.vector_store %arg6[%c0_82, %c64], %51 {strides = array<i32>} : memref<256x128xf32, #tpu.memory_space<vmem>>, vector<256x4xf32>,
    %c0_83 = arith.constant 0 : index
    %c3_84 = arith.constant 3 : index
    %c2_85 = arith.constant 2 : index
    %c0_86 = arith.constant 0 : index
    %53 = vector.load %arg1[%c0_83, %c3_84, %c2_85, %c0_86] : memref<1x20x20x4xf32, #tpu.memory_space<vmem>>, vector<1x16x16x4xf32>
    %54 = vector.shape_cast %53 : vector<1x16x16x4xf32> to vector<256x4xf32>
    %c0_87 = arith.constant 0 : index
    %c68 = arith.constant 68 : index
    %55 = vector.load %arg6[%c0_87, %c68] : memref<256x128xf32, #tpu.memory_space<vmem>>, vector<256x4xf32>
    tpu.vector_store %arg6[%c0_87, %c68], %54 {strides = array<i32>} : memref<256x128xf32, #tpu.memory_space<vmem>>, vector<256x4xf32>,
    %c0_88 = arith.constant 0 : index
    %c3_89 = arith.constant 3 : index
    %c3_90 = arith.constant 3 : index
    %c0_91 = arith.constant 0 : index
    %56 = vector.load %arg1[%c0_88, %c3_89, %c3_90, %c0_91] : memref<1x20x20x4xf32, #tpu.memory_space<vmem>>, vector<1x16x16x4xf32>
    %57 = vector.shape_cast %56 : vector<1x16x16x4xf32> to vector<256x4xf32>
    %c0_92 = arith.constant 0 : index
    %c72 = arith.constant 72 : index
    %58 = vector.load %arg6[%c0_92, %c72] : memref<256x128xf32, #tpu.memory_space<vmem>>, vector<256x4xf32>
    tpu.vector_store %arg6[%c0_92, %c72], %57 {strides = array<i32>} : memref<256x128xf32, #tpu.memory_space<vmem>>, vector<256x4xf32>,
    %c0_93 = arith.constant 0 : index
    %c3_94 = arith.constant 3 : index
    %c4_95 = arith.constant 4 : index
    %c0_96 = arith.constant 0 : index
    %59 = vector.load %arg1[%c0_93, %c3_94, %c4_95, %c0_96] : memref<1x20x20x4xf32, #tpu.memory_space<vmem>>, vector<1x16x16x4xf32>
    %60 = vector.shape_cast %59 : vector<1x16x16x4xf32> to vector<256x4xf32>
    %c0_97 = arith.constant 0 : index
    %c76 = arith.constant 76 : index
    %61 = vector.load %arg6[%c0_97, %c76] : memref<256x128xf32, #tpu.memory_space<vmem>>, vector<256x4xf32>
    tpu.vector_store %arg6[%c0_97, %c76], %60 {strides = array<i32>} : memref<256x128xf32, #tpu.memory_space<vmem>>, vector<256x4xf32>,
    %c0_98 = arith.constant 0 : index
    %c4_99 = arith.constant 4 : index
    %c0_100 = arith.constant 0 : index
    %c0_101 = arith.constant 0 : index
    %62 = vector.load %arg1[%c0_98, %c4_99, %c0_100, %c0_101] : memref<1x20x20x4xf32, #tpu.memory_space<vmem>>, vector<1x16x16x4xf32>
    %63 = vector.shape_cast %62 : vector<1x16x16x4xf32> to vector<256x4xf32>
    %c0_102 = arith.constant 0 : index
    %c80 = arith.constant 80 : index
    %64 = vector.load %arg6[%c0_102, %c80] : memref<256x128xf32, #tpu.memory_space<vmem>>, vector<256x4xf32>
    tpu.vector_store %arg6[%c0_102, %c80], %63 {strides = array<i32>} : memref<256x128xf32, #tpu.memory_space<vmem>>, vector<256x4xf32>,
    %c0_103 = arith.constant 0 : index
    %c4_104 = arith.constant 4 : index
    %c1_105 = arith.constant 1 : index
    %c0_106 = arith.constant 0 : index
    %65 = vector.load %arg1[%c0_103, %c4_104, %c1_105, %c0_106] : memref<1x20x20x4xf32, #tpu.memory_space<vmem>>, vector<1x16x16x4xf32>
    %66 = vector.shape_cast %65 : vector<1x16x16x4xf32> to vector<256x4xf32>
    %c0_107 = arith.constant 0 : index
    %c84 = arith.constant 84 : index
    %67 = vector.load %arg6[%c0_107, %c84] : memref<256x128xf32, #tpu.memory_space<vmem>>, vector<256x4xf32>
    tpu.vector_store %arg6[%c0_107, %c84], %66 {strides = array<i32>} : memref<256x128xf32, #tpu.memory_space<vmem>>, vector<256x4xf32>,
    %c0_108 = arith.constant 0 : index
    %c4_109 = arith.constant 4 : index
    %c2_110 = arith.constant 2 : index
    %c0_111 = arith.constant 0 : index
    %68 = vector.load %arg1[%c0_108, %c4_109, %c2_110, %c0_111] : memref<1x20x20x4xf32, #tpu.memory_space<vmem>>, vector<1x16x16x4xf32>
    %69 = vector.shape_cast %68 : vector<1x16x16x4xf32> to vector<256x4xf32>
    %c0_112 = arith.constant 0 : index
    %c88 = arith.constant 88 : index
    %70 = vector.load %arg6[%c0_112, %c88] : memref<256x128xf32, #tpu.memory_space<vmem>>, vector<256x4xf32>
    tpu.vector_store %arg6[%c0_112, %c88], %69 {strides = array<i32>} : memref<256x128xf32, #tpu.memory_space<vmem>>, vector<256x4xf32>,
    %c0_113 = arith.constant 0 : index
    %c4_114 = arith.constant 4 : index
    %c3_115 = arith.constant 3 : index
    %c0_116 = arith.constant 0 : index
    %71 = vector.load %arg1[%c0_113, %c4_114, %c3_115, %c0_116] : memref<1x20x20x4xf32, #tpu.memory_space<vmem>>, vector<1x16x16x4xf32>
    %72 = vector.shape_cast %71 : vector<1x16x16x4xf32> to vector<256x4xf32>
    %c0_117 = arith.constant 0 : index
    %c92 = arith.constant 92 : index
    %73 = vector.load %arg6[%c0_117, %c92] : memref<256x128xf32, #tpu.memory_space<vmem>>, vector<256x4xf32>
    tpu.vector_store %arg6[%c0_117, %c92], %72 {strides = array<i32>} : memref<256x128xf32, #tpu.memory_space<vmem>>, vector<256x4xf32>,
    %c0_118 = arith.constant 0 : index
    %c4_119 = arith.constant 4 : index
    %c4_120 = arith.constant 4 : index
    %c0_121 = arith.constant 0 : index
    %74 = vector.load %arg1[%c0_118, %c4_119, %c4_120, %c0_121] : memref<1x20x20x4xf32, #tpu.memory_space<vmem>>, vector<1x16x16x4xf32>
    %75 = vector.shape_cast %74 : vector<1x16x16x4xf32> to vector<256x4xf32>
    %c0_122 = arith.constant 0 : index
    %c96 = arith.constant 96 : index
    %76 = vector.load %arg6[%c0_122, %c96] : memref<256x128xf32, #tpu.memory_space<vmem>>, vector<256x4xf32>
    tpu.vector_store %arg6[%c0_122, %c96], %75 {strides = array<i32>} : memref<256x128xf32, #tpu.memory_space<vmem>>, vector<256x4xf32>,
    %c0_123 = arith.constant 0 : index
    %c0_124 = arith.constant 0 : index
    %77 = vector.load %arg6[%c0_123, %c0_124] : memref<256x128xf32, #tpu.memory_space<vmem>>, vector<256x128xf32>
    %c0_125 = arith.constant 0 : index
    %c0_126 = arith.constant 0 : index
    %78 = vector.load %arg2[%c0_125, %c0_126] : memref<128x128xf32, #tpu.memory_space<vmem>>, vector<128x128xf32>
    %cst_127 = arith.constant dense<0.000000e+00> : vector<256x128xf32>
    %79 = tpu.matmul %77, %78, %cst_127 {dimension_numbers = #tpu.dot_dimension_numbers<[1], [0], [0], [1], [0, 0, 1, 1], [], []>} : vector<256x128xf32>, vector<128x128xf32>, vector<256x128xf32> -> vector<256x128xf32>
    %80 = vector.shape_cast %79 : vector<256x128xf32> to vector<1x16x16x128xf32>
    %c0_128 = arith.constant 0 : index
    %c0_129 = arith.constant 0 : index
    %c0_130 = arith.constant 0 : index
    %c0_131 = arith.constant 0 : index
    %81 = vector.load %arg3[%c0_128, %c0_129, %c0_130, %c0_131] : memref<1x16x16x128xf32, #tpu.memory_space<vmem>>, vector<1x16x16x128xf32>
    tpu.vector_store %arg3[%c0_128, %c0_129, %c0_130, %c0_131], %80 {strides = array<i32>} : memref<1x16x16x128xf32, #tpu.memory_space<vmem>>, vector<1x16x16x128xf32>,
    %cst_132 = arith.constant dense<0.000000e+00> : vector<128xf32>
    %82 = vector.multi_reduction <add>, %79, %cst_132 [0] : vector<256x128xf32> to vector<128xf32>
    %83 = vector.shape_cast %82 : vector<128xf32> to vector<1x1x128xf32>
    %c0_133 = arith.constant 0 : index
    %c0_134 = arith.constant 0 : index
    %c0_135 = arith.constant 0 : index
    %84 = vector.load %arg4[%c0_133, %c0_134, %c0_135] : memref<1x1x128xf32, #tpu.memory_space<vmem>>, vector<1x1x128xf32>
    tpu.vector_store %arg4[%c0_133, %c0_134, %c0_135], %83 {strides = array<i32>} : memref<1x1x128xf32, #tpu.memory_space<vmem>>, vector<1x1x128xf32>,
    %85 = arith.mulf %79, %79 : vector<256x128xf32>
    %cst_136 = arith.constant dense<0.000000e+00> : vector<128xf32>
    %86 = vector.multi_reduction <add>, %85, %cst_136 [0] : vector<256x128xf32> to vector<128xf32>
    %87 = vector.shape_cast %86 : vector<128xf32> to vector<1x1x128xf32>
    %c0_137 = arith.constant 0 : index
    %c0_138 = arith.constant 0 : index
    %c0_139 = arith.constant 0 : index
    %88 = vector.load %arg5[%c0_137, %c0_138, %c0_139] : memref<1x1x128xf32, #tpu.memory_space<vmem>>, vector<1x1x128xf32>
    tpu.vector_store %arg5[%c0_137, %c0_138, %c0_139], %87 {strides = array<i32>} : memref<1x1x128xf32, #tpu.memory_space<vmem>>, vector<1x1x128xf32>,
    return
  }
  func.func @transform_0(%arg0: i32) -> (i32, i32, i32, i32) {
    %c0_i32 = arith.constant 0 : i32
    %c0_i32_0 = arith.constant 0 : i32
    %c0_i32_1 = arith.constant 0 : i32
    %c0_i32_2 = arith.constant 0 : i32
    return %arg0, %c0_i32, %c0_i32_0, %c0_i32_1 : i32, i32, i32, i32
  }
  func.func @transform_1(%arg0: i32) -> (i32, i32) {
    %c0_i32 = arith.constant 0 : i32
    %c0_i32_0 = arith.constant 0 : i32
    %c0_i32_1 = arith.constant 0 : i32
    return %c0_i32, %c0_i32_0 : i32, i32
  }
  func.func @transform_2(%arg0: i32) -> (i32, i32, i32, i32) {
    %c0_i32 = arith.constant 0 : i32
    %c0_i32_0 = arith.constant 0 : i32
    %c0_i32_1 = arith.constant 0 : i32
    %c0_i32_2 = arith.constant 0 : i32
    return %arg0, %c0_i32, %c0_i32_0, %c0_i32_1 : i32, i32, i32, i32
  }
  func.func @transform_3(%arg0: i32) -> (i32, i32, i32) {
    %c0_i32 = arith.constant 0 : i32
    %c0_i32_0 = arith.constant 0 : i32
    %c0_i32_1 = arith.constant 0 : i32
    return %arg0, %c0_i32, %c0_i32_0 : i32, i32, i32
  }
  func.func @transform_4(%arg0: i32) -> (i32, i32, i32) {
    %c0_i32 = arith.constant 0 : i32
    %c0_i32_0 = arith.constant 0 : i32
    %c0_i32_1 = arith.constant 0 : i32
    return %arg0, %c0_i32, %c0_i32_0 : i32, i32, i32
  }
}

</mosaic_0001>

<bundles_post_ra>
// kernel: tpu_custom_call.1
= control target key start
LH: loop header
LB: loop body
LE: loop exit
PB: predicated region body
PF: predicated region fallthrough
CT: control target
= control target key end

     0   :  { %10 = vsyncpa [#allocation4], 0  ;;  %s9460_s0 = inlined_call_operand.vmem [shape: f32[2,20,20,4], index: 0, kind: input, shape index: {}]   ;;  %s9461_s1 = inlined_call_operand.vmem [shape: f32[128,128], index: 1, kind: input, shape index: {}]   ;;  %s9462_s2 = inlined_call_operand.hbm [shape: f32[2,16,16,128], index: 2, kind: output, shape index: {0}]   ;;  %s9463_s3 = inlined_call_operand.hbm [shape: f32[2,1,128], index: 3, kind: output, shape index: {1}]   ;;  %s9464_s4 = inlined_call_operand.hbm [shape: f32[2,1,128], index: 4, kind: output, shape index: {2}]  }
   0x1   :  { %12 = vsyncpa [#allocation4 + $0x1], 0 }
   0x2   :  { %13 = vsyncpa [#allocation6], 0 }
   0x3   :  { %15 = vsyncpa [#allocation6 + $0x1], 0  ;;  %s6611_s15 = smov 0   ;;  %s6613_s16 = smov 0  }
   0x4   :  { %s6615_s17 = smov 0   ;;  %s6617_s18 = smov 0  }
   0x5 LB: > { %s6632_s19 = sadd.s32 4294967295, %s6555_s18   ;;  %s5522_s20 = sadd.s32 4294967294, %s6555_s18   ;;  %s6555_s18 = sphi %s6617_s18, %s9470_s18   ;;  %s6551_s17 = sphi %s6615_s17, %s9469_s17   ;;  %s6547_s16 = sphi %s6613_s16, %s9468_s16   ;;  %s6543_s15 = sphi %s6611_s15, %s9467_s15  }
   0x6   : > { %s6636_s21 = sadd.s32 1, %s6555_s18   ;;  %s75_s22 = sadd.s32 1, %s6551_s17 }
   0x7   : > { %s72_s23 = ssub.s32 %s6555_s18, %s6636_s21  ;;  %p85_p0 = scmp.ne.s32.totalorder %s6551_s17, %s6547_s16 }
   0x8   : > { %p73_p1 = scmp.eq.s32.totalorder %s72_s23, 0  ;;  %p86_p2 = scmp.eq.s32.totalorder %s6632_s19, 1 }
   0x9   : > { %p91_p3 = scmp.ne.s32.totalorder %s6547_s16, %s6543_s15  ;;  %p92_p4 = scmp.eq.s32.totalorder %s5522_s20, 1 }
   0xa   : > { %s6649_s24 = scalar_select %p73_p1, %s6551_s17, %s75_s22  }
   0xb   : > { %p6651_p5 = por %p86_p2, %p85_p0  ;;  %p6655_p6 = por %p92_p4, %p91_p3 }
   0xc   : > { %p5525_p7 = scmp.ge.s32.totalorder %s6555_s18, 1  ;;  %p173_p8 = scmp.lt.s32.totalorder %s6555_s18, 3 }
   0xe   : > { %p174_p9 = pnand %p5525_p7, %p173_p8 }
   0xf   : > { %p207_p10 = scmp.lt.s32.totalorder (!%p174_p9), %s6632_s19, 1  ;;  %vm212_vm0 = vcmask (!%p174_p9), 1048352   ;;  %v6557_v0 = vmov (!%p174_p9), 0.0   ;;  %s6558_s6 = smov (!%p174_p9), 4   ;;  %vm277_vm1 = vcmask (!%p174_p9), 31744   ;;  %vm470_vm2 = vcmask (!%p174_p9), 64544  }
  0x10   : > { %177 = sbr.rel (%p174_p9) target bundleno = 1961 (0x7a9), region = 28  ;;  %215 = vst.msk [vmem:[#allocation2 + $0x10] sm:$0xff] (!%p174_p9), %vm212_vm0, %v6557_v0  ;;  %213 = vst.msk [vmem:[#allocation2] sm:$0xff] (!%p174_p9), %vm212_vm0, %v6557_v0  ;;  %s6559_s7 = smov (!%p174_p9), 8   ;;  %vm663_vm3 = vcmask (!%p174_p9), 97344   ;;  %vm856_vm4 = vcmask (!%p174_p9), 130144  }
  0x11   : > { %214 = vst.msk [vmem:[#allocation2 + $0x8] sm:$0xff] (!%p174_p9), %vm212_vm0, %v6557_v0  ;;  %216 = vst.msk [vmem:[#allocation2 + $0x18] sm:$0xff] (!%p174_p9), %vm212_vm0, %v6557_v0  ;;  %s6560_s8 = smov (!%p174_p9), 12   ;;  %s6561_s9 = smov (!%p174_p9), 16   ;;  %vm1049_vm5 = vcmask (!%p174_p9), 162944   ;;  %vm1243_vm6 = vcmask (!%p174_p9), 195744  }
  0x12   : > { %217 = vst.msk [vmem:[#allocation2 + $0x20] sm:$0xff] (!%p174_p9), %vm212_vm0, %v6557_v0  ;;  %218 = vst.msk [vmem:[#allocation2 + $0x28] sm:$0xff] (!%p174_p9), %vm212_vm0, %v6557_v0  ;;  %s6562_s10 = smov (!%p174_p9), 20   ;;  %s6563_s11 = smov (!%p174_p9), 24   ;;  %vm1436_vm7 = vcmask (!%p174_p9), 228544   ;;  %vm1629_vm8 = vcmask (!%p174_p9), 261344  }
  0x13   : > { %219 = vst.msk [vmem:[#allocation2 + $0x30] sm:$0xff] (!%p174_p9), %vm212_vm0, %v6557_v0  ;;  %220 = vst.msk [vmem:[#allocation2 + $0x38] sm:$0xff] (!%p174_p9), %vm212_vm0, %v6557_v0  ;;  %s6564_s12 = smov (!%p174_p9), 28   ;;  %s6565_s13 = smov (!%p174_p9), 32   ;;  %vm1822_vm9 = vcmask (!%p174_p9), 294144   ;;  %vm2015_vm10 = vcmask (!%p174_p9), 326944  }
  0x14   : > { %221 = vst.msk [vmem:[#allocation2 + $0x40] sm:$0xff] (!%p174_p9), %vm212_vm0, %v6557_v0  ;;  %222 = vst.msk [vmem:[#allocation2 + $0x48] sm:$0xff] (!%p174_p9), %vm212_vm0, %v6557_v0  ;;  %s6566_s14 = smov (!%p174_p9), 36   ;;  %s6567_s22 = smov (!%p174_p9), 40   ;;  %vm2209_vm11 = vcmask (!%p174_p9), 359744   ;;  %vm2402_vm12 = vcmask (!%p174_p9), 392544  }
  0x15   : > { %223 = vst.msk [vmem:[#allocation2 + $0x50] sm:$0xff] (!%p174_p9), %vm212_vm0, %v6557_v0  ;;  %224 = vst.msk [vmem:[#allocation2 + $0x58] sm:$0xff] (!%p174_p9), %vm212_vm0, %v6557_v0  ;;  %s6568_s23 = smov (!%p174_p9), 44   ;;  %vm2595_vm13 = vcmask (!%p174_p9), 425344   ;;  %s6571_s29 = smov (!%p174_p9), 56   ;;  %vm2788_vm14 = vcmask (!%p174_p9), 458144  }
  0x16   : > { %225 = vst.msk [vmem:[#allocation2 + $0x60] sm:$0xff] (!%p174_p9), %vm212_vm0, %v6557_v0  ;;  %226 = vst.msk [vmem:[#allocation2 + $0x68] sm:$0xff] (!%p174_p9), %vm212_vm0, %v6557_v0  ;;  %s6572_s30 = smov (!%p174_p9), 60   ;;  %vm2981_vm15 = vcmask (!%p174_p9), 490944  }
  0x17   : > { %227 = vst.msk [vmem:[#allocation2 + $0x70] sm:$0xff] %vm212_vm0, %v6557_v0  ;;  %228 = vst.msk [vmem:[#allocation2 + $0x78] sm:$0xff] %vm212_vm0, %v6557_v0  ;;  %s208_s27 = scalar_select %p207_p10, %s6632_s19, 1 }
  0x18   : > { %229 = vst.msk [vmem:[#allocation2 + $0x80] sm:$0xff] %vm212_vm0, %v6557_v0  ;;  %230 = vst.msk [vmem:[#allocation2 + $0x88] sm:$0xff] %vm212_vm0, %v6557_v0 }
  0x19   : > { %231 = vst.msk [vmem:[#allocation2 + $0x90] sm:$0xff] %vm212_vm0, %v6557_v0  ;;  %232 = vst.msk [vmem:[#allocation2 + $0x98] sm:$0xff] %vm212_vm0, %v6557_v0  ;;  %s6352_s28 = smul.u32 480, %s208_s27  ;;  %s6569_s27 = smov 48  }
  0x1a   : > { %233 = vst.msk [vmem:[#allocation2 + $0xa0] sm:$0xff] %vm212_vm0, %v6557_v0  ;;  %234 = vst.msk [vmem:[#allocation2 + $0xa8] sm:$0xff] %vm212_vm0, %v6557_v0 }
  0x1b   : > { %235 = vst.msk [vmem:[#allocation2 + $0xb0] sm:$0xff] %vm212_vm0, %v6557_v0  ;;  %236 = vst.msk [vmem:[#allocation2 + $0xb8] sm:$0xff] %vm212_vm0, %v6557_v0  ;;  %s6700_s5 = scalar_lea.vmem %s9460_s0, %s6352_s28  ;;  %s6570_s28 = smov 52  }
  0x1c   : > { %237 = vst.msk [vmem:[#allocation2 + $0xc0] sm:$0xff] %vm212_vm0, %v6557_v0  ;;  %238 = vst.msk [vmem:[#allocation2 + $0xc8] sm:$0xff] %vm212_vm0, %v6557_v0  ;;  %v312_v1 = vld [vmem:[%s6700_s5 + $0x19] sm:$0xff]  ;;  %v310_v2 = vld [vmem:[%s6700_s5 + $0x1] sm:$0xff] }
  0x1d   : > { %239 = vst.msk [vmem:[#allocation2 + $0xd0] sm:$0xff] %vm212_vm0, %v6557_v0  ;;  %240 = vst.msk [vmem:[#allocation2 + $0xd8] sm:$0xff] %vm212_vm0, %v6557_v0  ;;  %378 = vrot.lane.b32.xlu1 %v312_v1, %s6558_s6  ;;  %374 = vrot.lane.b32.xlu0 %v310_v2, %s6558_s6  ;;  %v313_v3 = vld [vmem:[%s6700_s5 + $0x21] sm:$0xff]  ;;  %v311_v4 = vld [vmem:[%s6700_s5 + $0x9] sm:$0xff] }
  0x1e   : > { %241 = vst.msk [vmem:[#allocation2 + $0xe0] sm:$0xff] %vm212_vm0, %v6557_v0  ;;  %242 = vst.msk [vmem:[#allocation2 + $0xe8] sm:$0xff] %vm212_vm0, %v6557_v0  ;;  %v315_v5 = vld [vmem:[%s6700_s5 + $0x39] sm:$0xff]  ;;  %v314_v6 = vld [vmem:[%s6700_s5 + $0x31] sm:$0xff] }
  0x1f   : > { %243 = vst.msk [vmem:[#allocation2 + $0xf0] sm:$0xff] %vm212_vm0, %v6557_v0  ;;  %244 = vst.msk [vmem:[#allocation2 + $0xf8] sm:$0xff] %vm212_vm0, %v6557_v0  ;;  %v317_v7 = vld [vmem:[%s6700_s5 + $0x51] sm:$0xff]  ;;  %v316_v8 = vld [vmem:[%s6700_s5 + $0x49] sm:$0xff]  ;;  %vm3175_vm0 = vcmask 523744  }
  0x20   : > { %v319_v9 = vld [vmem:[%s6700_s5 + $0x69] sm:$0xff]  ;;  %v318_v10 = vld [vmem:[%s6700_s5 + $0x61] sm:$0xff]  ;;  %v320_v12 = vld [vmem:[%s6700_s5 + $0x79] sm:$0xff] }
  0x21   : > { %380 = vrot.lane.b32.xlu1 %v313_v3, %s6558_s6  ;;  %376 = vrot.lane.b32.xlu0 %v311_v4, %s6558_s6  ;;  %v321_v11 = vld [vmem:[%s6700_s5 + $0x81] sm:$0xff]  ;;  %v6727_v13 = vld [vmem:[%s6700_s5 + $0x18] sm:$0xff] }
  0x22   : > { %v245_v14 = vld [vmem:[%s6700_s5] sm:$0xff]  ;;  %v322_v16 = vld [vmem:[%s6700_s5 + $0x91] sm:$0xff]  ;;  %280 = vst.msk [vmem:[#allocation2 + $0x10] sm:$0xff] %vm277_vm1, %v6727_v13  ;;  %v246_v18 = vld [vmem:[%s6700_s5 + $0x8] sm:$0xff] }
  0x23   : > { %v323_v15 = vld [vmem:[%s6700_s5 + $0x99] sm:$0xff]  ;;  %278 = vst.msk [vmem:[#allocation2] sm:$0xff] %vm277_vm1, %v245_v14  ;;  %279 = vst.msk [vmem:[#allocation2 + $0x8] sm:$0xff] %vm277_vm1, %v246_v18  ;;  %v6746_v20 = vld [vmem:[%s6700_s5 + $0x30] sm:$0xff] }
  0x24   : > { %v6736_v17 = vld [vmem:[%s6700_s5 + $0x20] sm:$0xff]  ;;  %v6743_v19 = vld [vmem:[%s6700_s5 + $0x38] sm:$0xff]  ;;  %282 = vst.msk [vmem:[#allocation2 + $0x20] sm:$0xff] %vm277_vm1, %v6746_v20  ;;  %v6755_v21 = vld [vmem:[%s6700_s5 + $0x50] sm:$0xff] }
  0x25   : > { %384 = vrot.lane.b32.xlu1 %v315_v5, %s6558_s6  ;;  %382 = vrot.lane.b32.xlu0 %v314_v6, %s6558_s6  ;;  %281 = vst.msk [vmem:[#allocation2 + $0x18] sm:$0xff] %vm277_vm1, %v6736_v17  ;;  %283 = vst.msk [vmem:[#allocation2 + $0x28] sm:$0xff] %vm277_vm1, %v6743_v19  ;;  %v325_v22 = vld [vmem:[%s6700_s5 + $0xb1] sm:$0xff]  ;;  %v324_v23 = vld [vmem:[%s6700_s5 + $0xa9] sm:$0xff] }
  0x26   : > { %285 = vst.msk [vmem:[#allocation2 + $0x38] sm:$0xff] %vm277_vm1, %v6755_v21  ;;  %v6762_v24 = vld [vmem:[%s6700_s5 + $0x48] sm:$0xff]  ;;  %v6770_v26 = vld [vmem:[%s6700_s5 + $0x60] sm:$0xff]  ;;  %v6780_v28 = vld [vmem:[%s6700_s5 + $0x78] sm:$0xff] }
  0x27   : > { %284 = vst.msk [vmem:[#allocation2 + $0x30] sm:$0xff] %vm277_vm1, %v6762_v24  ;;  %v6767_v25 = vld [vmem:[%s6700_s5 + $0x68] sm:$0xff]  ;;  %286 = vst.msk [vmem:[#allocation2 + $0x40] sm:$0xff] %vm277_vm1, %v6770_v26  ;;  %v6777_v27 = vld [vmem:[%s6700_s5 + $0x80] sm:$0xff] }
  0x28   : > { %287 = vst.msk [vmem:[#allocation2 + $0x48] sm:$0xff] %vm277_vm1, %v6767_v25  ;;  %v327_v29 = vld [vmem:[%s6700_s5 + $0xc9] sm:$0xff]  ;;  %289 = vst.msk [vmem:[#allocation2 + $0x58] sm:$0xff] %vm277_vm1, %v6777_v27  ;;  %v326_v30 = vld [vmem:[%s6700_s5 + $0xc1] sm:$0xff] }
  0x29   : > { %388 = vrot.lane.b32.xlu1 %v317_v7, %s6558_s6  ;;  %386 = vrot.lane.b32.xlu0 %v316_v8, %s6558_s6  ;;  %288 = vst.msk [vmem:[#allocation2 + $0x50] sm:$0xff] %vm277_vm1, %v6780_v28  ;;  %v6791_v31 = vld [vmem:[%s6700_s5 + $0x98] sm:$0xff]  ;;  %v6794_v32 = vld [vmem:[%s6700_s5 + $0x90] sm:$0xff] }
  0x2a   : > { %291 = vst.msk [vmem:[#allocation2 + $0x68] sm:$0xff] %vm277_vm1, %v6791_v31  ;;  %290 = vst.msk [vmem:[#allocation2 + $0x60] sm:$0xff] %vm277_vm1, %v6794_v32  ;;  %v6801_v33 = vld [vmem:[%s6700_s5 + $0xb0] sm:$0xff]  ;;  %v6804_v34 = vld [vmem:[%s6700_s5 + $0xa8] sm:$0xff] }
  0x2b   : > { %293 = vst.msk [vmem:[#allocation2 + $0x78] sm:$0xff] %vm277_vm1, %v6801_v33  ;;  %292 = vst.msk [vmem:[#allocation2 + $0x70] sm:$0xff] %vm277_vm1, %v6804_v34  ;;  %v6811_v35 = vld [vmem:[%s6700_s5 + $0xc8] sm:$0xff]  ;;  %v6819_v37 = vld [vmem:[%s6700_s5 + $0xc0] sm:$0xff] }
  0x2c   : > { %v329_v36 = vld [vmem:[%s6700_s5 + $0xe1] sm:$0xff]  ;;  %295 = vst.msk [vmem:[#allocation2 + $0x88] sm:$0xff] %vm277_vm1, %v6811_v35  ;;  %v328_v38 = vld [vmem:[%s6700_s5 + $0xd9] sm:$0xff]  ;;  %294 = vst.msk [vmem:[#allocation2 + $0x80] sm:$0xff] %vm277_vm1, %v6819_v37 }
  0x2d   : > { %392 = vrot.lane.b32.xlu1 %v319_v9, %s6558_s6  ;;  %390 = vrot.lane.b32.xlu0 %v318_v10, %s6558_s6  ;;  %v6825_v39 = vld [vmem:[%s6700_s5 + $0xe0] sm:$0xff]  ;;  %v6828_v40 = vld [vmem:[%s6700_s5 + $0xd8] sm:$0xff] }
  0x2e   : > { %297 = vst.msk [vmem:[#allocation2 + $0x98] sm:$0xff] %vm277_vm1, %v6825_v39  ;;  %296 = vst.msk [vmem:[#allocation2 + $0x90] sm:$0xff] %vm277_vm1, %v6828_v40  ;;  %v6835_v41 = vld [vmem:[%s6700_s5 + $0xf8] sm:$0xff]  ;;  %v6840_v42 = vld [vmem:[%s6700_s5 + $0xf0] sm:$0xff] }
  0x2f   : > { %299 = vst.msk [vmem:[#allocation2 + $0xa8] sm:$0xff] %vm277_vm1, %v6835_v41  ;;  %298 = vst.msk [vmem:[#allocation2 + $0xa0] sm:$0xff] %vm277_vm1, %v6840_v42  ;;  %v6847_v43 = vld [vmem:[%s6700_s5 + $0x110] sm:$0xff]  ;;  %v6850_v44 = vld [vmem:[%s6700_s5 + $0x108] sm:$0xff] }
  0x30   : > { %v331_v45 = vld [vmem:[%s6700_s5 + $0xf9] sm:$0xff]  ;;  %v330_v46 = vld [vmem:[%s6700_s5 + $0xf1] sm:$0xff]  ;;  %301 = vst.msk [vmem:[#allocation2 + $0xb8] sm:$0xff] %vm277_vm1, %v6847_v43  ;;  %300 = vst.msk [vmem:[#allocation2 + $0xb0] sm:$0xff] %vm277_vm1, %v6850_v44 }
  0x31   : > { %396 = vrot.lane.b32.xlu1 %v321_v11, %s6558_s6  ;;  %394 = vrot.lane.b32.xlu0 %v320_v12, %s6558_s6  ;;  %v6859_v47 = vld [vmem:[%s6700_s5 + $0x128] sm:$0xff]  ;;  %v6864_v48 = vld [vmem:[%s6700_s5 + $0x120] sm:$0xff] }
  0x32   : > { %303 = vst.msk [vmem:[#allocation2 + $0xc8] sm:$0xff] %vm277_vm1, %v6859_v47  ;;  %302 = vst.msk [vmem:[#allocation2 + $0xc0] sm:$0xff] %vm277_vm1, %v6864_v48  ;;  %v6869_v49 = vld [vmem:[%s6700_s5 + $0x140] sm:$0xff]  ;;  %v6872_v50 = vld [vmem:[%s6700_s5 + $0x138] sm:$0xff] }
  0x33   : > { %305 = vst.msk [vmem:[#allocation2 + $0xd8] sm:$0xff] %vm277_vm1, %v6869_v49  ;;  %304 = vst.msk [vmem:[#allocation2 + $0xd0] sm:$0xff] %vm277_vm1, %v6872_v50  ;;  %v333_v51 = vld [vmem:[%s6700_s5 + $0x111] sm:$0xff]  ;;  %v332_v52 = vld [vmem:[%s6700_s5 + $0x109] sm:$0xff] }
  0x34   : > { %v6883_v53 = vld [vmem:[%s6700_s5 + $0x150] sm:$0xff]  ;;  %v6886_v54 = vld [vmem:[%s6700_s5 + $0x158] sm:$0xff]  ;;  %v334_v56 = vld [vmem:[%s6700_s5 + $0x121] sm:$0xff] }
  0x35   : > { %400 = vrot.lane.b32.xlu1 %v323_v15, %s6558_s6  ;;  %398 = vrot.lane.b32.xlu0 %v322_v16, %s6558_s6  ;;  %306 = vst.msk [vmem:[#allocation2 + $0xe0] sm:$0xff] %vm277_vm1, %v6883_v53  ;;  %307 = vst.msk [vmem:[#allocation2 + $0xe8] sm:$0xff] %vm277_vm1, %v6886_v54  ;;  %v335_v55 = vld [vmem:[%s6700_s5 + $0x129] sm:$0xff]  ;;  %v337_v59 = vld [vmem:[%s6700_s5 + $0x141] sm:$0xff] }
  0x36   : > { %v6897_v57 = vld [vmem:[%s6700_s5 + $0x168] sm:$0xff]  ;;  %v6900_v58 = vld [vmem:[%s6700_s5 + $0x170] sm:$0xff]  ;;  %v336_v60 = vld [vmem:[%s6700_s5 + $0x139] sm:$0xff] }
  0x37   : > { %308 = vst.msk [vmem:[#allocation2 + $0xf0] sm:$0xff] %vm277_vm1, %v6897_v57  ;;  %309 = vst.msk [vmem:[#allocation2 + $0xf8] sm:$0xff] %vm277_vm1, %v6900_v58  ;;  %v339_v61 = vld [vmem:[%s6700_s5 + $0x159] sm:$0xff]  ;;  %v338_v62 = vld [vmem:[%s6700_s5 + $0x151] sm:$0xff]  ;;  %vm3368_vm1 = vcmask 556544  }
  0x38   : > { %v341_v63 = vld [vmem:[%s6700_s5 + $0x171] sm:$0xff]  ;;  %v340_v0 = vld [vmem:[%s6700_s5 + $0x169] sm:$0xff]  ;;  %v505_v4 = vld [vmem:[%s6700_s5 + $0x1a] sm:$0xff] }
  0x39   : > { %404 = vrot.lane.b32.xlu1 %v325_v22, %s6558_s6  ;;  %402 = vrot.lane.b32.xlu0 %v324_v23, %s6558_s6  ;;  %v504_v1 = vld [vmem:[%s6700_s5 + $0xa] sm:$0xff]  ;;  %v503_v2 = vld [vmem:[%s6700_s5 + $0x2] sm:$0xff] }
  0x3a   : > { %v506_v3 = vld [vmem:[%s6700_s5 + $0x22] sm:$0xff]  ;;  %v508_v5 = vld [vmem:[%s6700_s5 + $0x3a] sm:$0xff]  ;;  %v507_v6 = vld [vmem:[%s6700_s5 + $0x32] sm:$0xff] }
  0x3b   : > { %v510_v7 = vld [vmem:[%s6700_s5 + $0x52] sm:$0xff]  ;;  %v509_v8 = vld [vmem:[%s6700_s5 + $0x4a] sm:$0xff]  ;;  %v511_v10 = vld [vmem:[%s6700_s5 + $0x62] sm:$0xff] }
  0x3c   : > { %v512_v9 = vld [vmem:[%s6700_s5 + $0x6a] sm:$0xff]  ;;  %v514_v11 = vld [vmem:[%s6700_s5 + $0x82] sm:$0xff]  ;;  %v513_v12 = vld [vmem:[%s6700_s5 + $0x7a] sm:$0xff] }
  0x3d   : > { %408 = vrot.lane.b32.xlu1 %v327_v29, %s6558_s6  ;;  %406 = vrot.lane.b32.xlu0 %v326_v30, %s6558_s6  ;;  %v516_v14 = vld [vmem:[%s6700_s5 + $0x9a] sm:$0xff]  ;;  %v515_v15 = vld [vmem:[%s6700_s5 + $0x92] sm:$0xff] }
  0x3e   : > { %v518_v16 = vld [vmem:[%s6700_s5 + $0xb2] sm:$0xff]  ;;  %v517_v18 = vld [vmem:[%s6700_s5 + $0xaa] sm:$0xff]  ;;  %v519_v23 = vld [vmem:[%s6700_s5 + $0xc2] sm:$0xff] }
  0x3f   : > { %v520_v22 = vld [vmem:[%s6700_s5 + $0xca] sm:$0xff]  ;;  %v522_v29 = vld [vmem:[%s6700_s5 + $0xe2] sm:$0xff]  ;;  %v521_v30 = vld [vmem:[%s6700_s5 + $0xda] sm:$0xff] }
  0x41   : > { %412 = vrot.lane.b32.xlu1 %v329_v36, %s6558_s6  ;;  %410 = vrot.lane.b32.xlu0 %v328_v38, %s6558_s6  ;;  %v524_v36 = vld [vmem:[%s6700_s5 + $0xfa] sm:$0xff]  ;;  %v523_v38 = vld [vmem:[%s6700_s5 + $0xf2] sm:$0xff] }
  0x45   : > { %416 = vrot.lane.b32.xlu1 %v331_v45, %s6558_s6  ;;  %414 = vrot.lane.b32.xlu0 %v330_v46, %s6558_s6  ;;  %v526_v45 = vld [vmem:[%s6700_s5 + $0x112] sm:$0xff]  ;;  %v525_v46 = vld [vmem:[%s6700_s5 + $0x10a] sm:$0xff] }
  0x49   : > { %420 = vrot.lane.b32.xlu1 %v333_v51, %s6558_s6  ;;  %418 = vrot.lane.b32.xlu0 %v332_v52, %s6558_s6  ;;  %v528_v51 = vld [vmem:[%s6700_s5 + $0x12a] sm:$0xff]  ;;  %v527_v52 = vld [vmem:[%s6700_s5 + $0x122] sm:$0xff] }
  0x4d   : > { %424 = vrot.lane.b32.xlu1 %v335_v55, %s6558_s6  ;;  %422 = vrot.lane.b32.xlu0 %v334_v56, %s6558_s6  ;;  %v530_v55 = vld [vmem:[%s6700_s5 + $0x142] sm:$0xff]  ;;  %v529_v56 = vld [vmem:[%s6700_s5 + $0x13a] sm:$0xff] }
  0x51   : > { %428 = vrot.lane.b32.xlu1 %v337_v59, %s6558_s6  ;;  %426 = vrot.lane.b32.xlu0 %v336_v60, %s6558_s6 }
  0x55   : > { %432 = vrot.lane.b32.xlu1 %v339_v61, %s6558_s6  ;;  %430 = vrot.lane.b32.xlu0 %v338_v62, %s6558_s6  ;;  %v532_v61 = vld [vmem:[%s6700_s5 + $0x15a] sm:$0xff]  ;;  %v531_v62 = vld [vmem:[%s6700_s5 + $0x152] sm:$0xff] }
  0x59   : > { %436 = vrot.lane.b32.xlu1 %v341_v63, %s6558_s6  ;;  %434 = vrot.lane.b32.xlu0 %v340_v0, %s6558_s6  ;;  %s6573_s6 = smov 64  }
  0x5d   : > { %569 = vrot.lane.b32.xlu1 %v504_v1, %s6559_s7  ;;  %567 = vrot.lane.b32.xlu0 %v503_v2, %s6559_s7  ;;  %v534_v1 = vld [vmem:[%s6700_s5 + $0x172] sm:$0xff]  ;;  %v533_v2 = vld [vmem:[%s6700_s5 + $0x16a] sm:$0xff] }
  0x61   : > { %573 = vrot.lane.b32.xlu1 %v506_v3, %s6559_s7  ;;  %571 = vrot.lane.b32.xlu0 %v505_v4, %s6559_s7 }
  0x65   : > { %577 = vrot.lane.b32.xlu1 %v508_v5, %s6559_s7  ;;  %575 = vrot.lane.b32.xlu0 %v507_v6, %s6559_s7  ;;  %v697_v5 = vld [vmem:[%s6700_s5 + $0xb] sm:$0xff]  ;;  %v696_v6 = vld [vmem:[%s6700_s5 + $0x3] sm:$0xff] }
  0x69   : > { %581 = vrot.lane.b32.xlu1 %v510_v7, %s6559_s7  ;;  %579 = vrot.lane.b32.xlu0 %v509_v8, %s6559_s7 }
  0x6d   : > { %585 = vrot.lane.b32.xlu1 %v512_v9, %s6559_s7  ;;  %583 = vrot.lane.b32.xlu0 %v511_v10, %s6559_s7  ;;  %v699_v9 = vld [vmem:[%s6700_s5 + $0x23] sm:$0xff]  ;;  %v698_v10 = vld [vmem:[%s6700_s5 + $0x1b] sm:$0xff] }
  0x71   : > { %589 = vrot.lane.b32.xlu1 %v514_v11, %s6559_s7  ;;  %587 = vrot.lane.b32.xlu0 %v513_v12, %s6559_s7 }
  0x75   : > { %593 = vrot.lane.b32.xlu1 %v516_v14, %s6559_s7  ;;  %591 = vrot.lane.b32.xlu0 %v515_v15, %s6559_s7  ;;  %v701_v14 = vld [vmem:[%s6700_s5 + $0x3b] sm:$0xff]  ;;  %v700_v15 = vld [vmem:[%s6700_s5 + $0x33] sm:$0xff] }
  0x79   : > { %597 = vrot.lane.b32.xlu1 %v518_v16, %s6559_s7  ;;  %595 = vrot.lane.b32.xlu0 %v517_v18, %s6559_s7 }
  0x7d   : > { %601 = vrot.lane.b32.xlu1 %v520_v22, %s6559_s7  ;;  %599 = vrot.lane.b32.xlu0 %v519_v23, %s6559_s7  ;;  %v703_v22 = vld [vmem:[%s6700_s5 + $0x53] sm:$0xff]  ;;  %v702_v23 = vld [vmem:[%s6700_s5 + $0x4b] sm:$0xff] }
  0x81   : > { %605 = vrot.lane.b32.xlu1 %v522_v29, %s6559_s7  ;;  %603 = vrot.lane.b32.xlu0 %v521_v30, %s6559_s7 }
  0x85   : > { %609 = vrot.lane.b32.xlu1 %v524_v36, %s6559_s7  ;;  %607 = vrot.lane.b32.xlu0 %v523_v38, %s6559_s7  ;;  %v705_v36 = vld [vmem:[%s6700_s5 + $0x6b] sm:$0xff]  ;;  %v704_v38 = vld [vmem:[%s6700_s5 + $0x63] sm:$0xff] }
  0x89   : > { %613 = vrot.lane.b32.xlu1 %v526_v45, %s6559_s7  ;;  %611 = vrot.lane.b32.xlu0 %v525_v46, %s6559_s7 }
  0x8d   : > { %617 = vrot.lane.b32.xlu1 %v528_v51, %s6559_s7  ;;  %615 = vrot.lane.b32.xlu0 %v527_v52, %s6559_s7  ;;  %v707_v51 = vld [vmem:[%s6700_s5 + $0x83] sm:$0xff]  ;;  %v706_v52 = vld [vmem:[%s6700_s5 + $0x7b] sm:$0xff] }
  0x8f   : > { %v379_v59 = vpop.permute.xlu1 %378  ;;  %v375_v60 = vpop.permute.xlu0 %374 }
  0x90   : > { %473 = vst.msk [vmem:[#allocation2 + $0x10] sm:$0xff] %vm470_vm2, %v379_v59  ;;  %471 = vst.msk [vmem:[#allocation2] sm:$0xff] %vm470_vm2, %v375_v60  ;;  %v709_v59 = vld [vmem:[%s6700_s5 + $0x9b] sm:$0xff]  ;;  %v708_v60 = vld [vmem:[%s6700_s5 + $0x93] sm:$0xff] }
  0x91   : > { %621 = vrot.lane.b32.xlu1 %v530_v55, %s6559_s7  ;;  %619 = vrot.lane.b32.xlu0 %v529_v56, %s6559_s7 }
  0x93   : > { %v381_v63 = vpop.permute.xlu1 %380  ;;  %v377_v0 = vpop.permute.xlu0 %376 }
  0x94   : > { %474 = vst.msk [vmem:[#allocation2 + $0x18] sm:$0xff] %vm470_vm2, %v381_v63  ;;  %472 = vst.msk [vmem:[#allocation2 + $0x8] sm:$0xff] %vm470_vm2, %v377_v0  ;;  %v711_v63 = vld [vmem:[%s6700_s5 + $0xb3] sm:$0xff]  ;;  %v710_v0 = vld [vmem:[%s6700_s5 + $0xab] sm:$0xff] }
  0x95   : > { %625 = vrot.lane.b32.xlu1 %v532_v61, %s6559_s7  ;;  %623 = vrot.lane.b32.xlu0 %v531_v62, %s6559_s7 }
  0x97   : > { %v385_v3 = vpop.permute.xlu1 %384  ;;  %v383_v4 = vpop.permute.xlu0 %382 }
  0x98   : > { %476 = vst.msk [vmem:[#allocation2 + $0x28] sm:$0xff] %vm470_vm2, %v385_v3  ;;  %475 = vst.msk [vmem:[#allocation2 + $0x20] sm:$0xff] %vm470_vm2, %v383_v4  ;;  %v713_v3 = vld [vmem:[%s6700_s5 + $0xcb] sm:$0xff]  ;;  %v712_v4 = vld [vmem:[%s6700_s5 + $0xc3] sm:$0xff] }
  0x99   : > { %629 = vrot.lane.b32.xlu1 %v534_v1, %s6559_s7  ;;  %627 = vrot.lane.b32.xlu0 %v533_v2, %s6559_s7 }
  0x9b   : > { %v389_v7 = vpop.permute.xlu1 %388  ;;  %v387_v8 = vpop.permute.xlu0 %386 }
  0x9c   : > { %478 = vst.msk [vmem:[#allocation2 + $0x38] sm:$0xff] %vm470_vm2, %v389_v7  ;;  %477 = vst.msk [vmem:[#allocation2 + $0x30] sm:$0xff] %vm470_vm2, %v387_v8  ;;  %v715_v7 = vld [vmem:[%s6700_s5 + $0xe3] sm:$0xff]  ;;  %v714_v8 = vld [vmem:[%s6700_s5 + $0xdb] sm:$0xff] }
  0x9d   : > { %762 = vrot.lane.b32.xlu1 %v697_v5, %s6560_s8  ;;  %760 = vrot.lane.b32.xlu0 %v696_v6, %s6560_s8 }
  0x9f   : > { %v393_v11 = vpop.permute.xlu1 %392  ;;  %v391_v12 = vpop.permute.xlu0 %390 }
  0xa0   : > { %480 = vst.msk [vmem:[#allocation2 + $0x48] sm:$0xff] %vm470_vm2, %v393_v11  ;;  %479 = vst.msk [vmem:[#allocation2 + $0x40] sm:$0xff] %vm470_vm2, %v391_v12  ;;  %v717_v11 = vld [vmem:[%s6700_s5 + $0xfb] sm:$0xff]  ;;  %v716_v12 = vld [vmem:[%s6700_s5 + $0xf3] sm:$0xff] }
  0xa1   : > { %766 = vrot.lane.b32.xlu1 %v699_v9, %s6560_s8  ;;  %764 = vrot.lane.b32.xlu0 %v698_v10, %s6560_s8 }
  0xa3   : > { %v397_v16 = vpop.permute.xlu1 %396  ;;  %v395_v18 = vpop.permute.xlu0 %394 }
  0xa4   : > { %482 = vst.msk [vmem:[#allocation2 + $0x58] sm:$0xff] %vm470_vm2, %v397_v16  ;;  %481 = vst.msk [vmem:[#allocation2 + $0x50] sm:$0xff] %vm470_vm2, %v395_v18  ;;  %v719_v16 = vld [vmem:[%s6700_s5 + $0x113] sm:$0xff]  ;;  %v718_v18 = vld [vmem:[%s6700_s5 + $0x10b] sm:$0xff] }
  0xa5   : > { %770 = vrot.lane.b32.xlu1 %v701_v14, %s6560_s8  ;;  %768 = vrot.lane.b32.xlu0 %v700_v15, %s6560_s8 }
  0xa7   : > { %v401_v29 = vpop.permute.xlu1 %400  ;;  %v399_v30 = vpop.permute.xlu0 %398 }
  0xa8   : > { %484 = vst.msk [vmem:[#allocation2 + $0x68] sm:$0xff] %vm470_vm2, %v401_v29  ;;  %483 = vst.msk [vmem:[#allocation2 + $0x60] sm:$0xff] %vm470_vm2, %v399_v30  ;;  %v721_v29 = vld [vmem:[%s6700_s5 + $0x12b] sm:$0xff]  ;;  %v720_v30 = vld [vmem:[%s6700_s5 + $0x123] sm:$0xff] }
  0xa9   : > { %774 = vrot.lane.b32.xlu1 %v703_v22, %s6560_s8  ;;  %772 = vrot.lane.b32.xlu0 %v702_v23, %s6560_s8 }
  0xab   : > { %v405_v45 = vpop.permute.xlu1 %404  ;;  %v403_v46 = vpop.permute.xlu0 %402 }
  0xac   : > { %486 = vst.msk [vmem:[#allocation2 + $0x78] sm:$0xff] %vm470_vm2, %v405_v45  ;;  %485 = vst.msk [vmem:[#allocation2 + $0x70] sm:$0xff] %vm470_vm2, %v403_v46  ;;  %v723_v45 = vld [vmem:[%s6700_s5 + $0x143] sm:$0xff]  ;;  %v722_v46 = vld [vmem:[%s6700_s5 + $0x13b] sm:$0xff] }
  0xad   : > { %778 = vrot.lane.b32.xlu1 %v705_v36, %s6560_s8  ;;  %776 = vrot.lane.b32.xlu0 %v704_v38, %s6560_s8 }
  0xaf   : > { %v409_v55 = vpop.permute.xlu1 %408  ;;  %v407_v56 = vpop.permute.xlu0 %406 }
  0xb0   : > { %488 = vst.msk [vmem:[#allocation2 + $0x88] sm:$0xff] %vm470_vm2, %v409_v55  ;;  %487 = vst.msk [vmem:[#allocation2 + $0x80] sm:$0xff] %vm470_vm2, %v407_v56  ;;  %v725_v55 = vld [vmem:[%s6700_s5 + $0x15b] sm:$0xff]  ;;  %v724_v56 = vld [vmem:[%s6700_s5 + $0x153] sm:$0xff] }
  0xb1   : > { %782 = vrot.lane.b32.xlu1 %v707_v51, %s6560_s8  ;;  %780 = vrot.lane.b32.xlu0 %v706_v52, %s6560_s8 }
  0xb3   : > { %v413_v61 = vpop.permute.xlu1 %412  ;;  %v411_v62 = vpop.permute.xlu0 %410 }
  0xb4   : > { %490 = vst.msk [vmem:[#allocation2 + $0x98] sm:$0xff] %vm470_vm2, %v413_v61  ;;  %489 = vst.msk [vmem:[#allocation2 + $0x90] sm:$0xff] %vm470_vm2, %v411_v62  ;;  %v727_v61 = vld [vmem:[%s6700_s5 + $0x173] sm:$0xff]  ;;  %v726_v62 = vld [vmem:[%s6700_s5 + $0x16b] sm:$0xff] }
  0xb5   : > { %786 = vrot.lane.b32.xlu1 %v709_v59, %s6560_s8  ;;  %784 = vrot.lane.b32.xlu0 %v708_v60, %s6560_s8 }
  0xb7   : > { %v417_v1 = vpop.permute.xlu1 %416  ;;  %v415_v2 = vpop.permute.xlu0 %414 }
  0xb8   : > { %492 = vst.msk [vmem:[#allocation2 + $0xa8] sm:$0xff] %vm470_vm2, %v417_v1  ;;  %491 = vst.msk [vmem:[#allocation2 + $0xa0] sm:$0xff] %vm470_vm2, %v415_v2  ;;  %v890_v1 = vld [vmem:[%s6700_s5 + $0xc] sm:$0xff]  ;;  %v889_v2 = vld [vmem:[%s6700_s5 + $0x4] sm:$0xff] }
  0xb9   : > { %790 = vrot.lane.b32.xlu1 %v711_v63, %s6560_s8  ;;  %788 = vrot.lane.b32.xlu0 %v710_v0, %s6560_s8 }
  0xbb   : > { %v421_v5 = vpop.permute.xlu1 %420  ;;  %v419_v6 = vpop.permute.xlu0 %418 }
  0xbc   : > { %494 = vst.msk [vmem:[#allocation2 + $0xb8] sm:$0xff] %vm470_vm2, %v421_v5  ;;  %493 = vst.msk [vmem:[#allocation2 + $0xb0] sm:$0xff] %vm470_vm2, %v419_v6  ;;  %v892_v5 = vld [vmem:[%s6700_s5 + $0x24] sm:$0xff]  ;;  %v891_v6 = vld [vmem:[%s6700_s5 + $0x1c] sm:$0xff] }
  0xbd   : > { %794 = vrot.lane.b32.xlu1 %v713_v3, %s6560_s8  ;;  %792 = vrot.lane.b32.xlu0 %v712_v4, %s6560_s8 }
  0xbf   : > { %v425_v9 = vpop.permute.xlu1 %424  ;;  %v423_v10 = vpop.permute.xlu0 %422 }
  0xc0   : > { %496 = vst.msk [vmem:[#allocation2 + $0xc8] sm:$0xff] %vm470_vm2, %v425_v9  ;;  %495 = vst.msk [vmem:[#allocation2 + $0xc0] sm:$0xff] %vm470_vm2, %v423_v10  ;;  %v894_v9 = vld [vmem:[%s6700_s5 + $0x3c] sm:$0xff]  ;;  %v893_v10 = vld [vmem:[%s6700_s5 + $0x34] sm:$0xff] }
  0xc1   : > { %798 = vrot.lane.b32.xlu1 %v715_v7, %s6560_s8  ;;  %796 = vrot.lane.b32.xlu0 %v714_v8, %s6560_s8 }
  0xc3   : > { %v429_v14 = vpop.permute.xlu1 %428  ;;  %v427_v15 = vpop.permute.xlu0 %426 }
  0xc4   : > { %498 = vst.msk [vmem:[#allocation2 + $0xd8] sm:$0xff] %vm470_vm2, %v429_v14  ;;  %497 = vst.msk [vmem:[#allocation2 + $0xd0] sm:$0xff] %vm470_vm2, %v427_v15  ;;  %v896_v14 = vld [vmem:[%s6700_s5 + $0x54] sm:$0xff]  ;;  %v895_v15 = vld [vmem:[%s6700_s5 + $0x4c] sm:$0xff] }
  0xc5   : > { %802 = vrot.lane.b32.xlu1 %v717_v11, %s6560_s8  ;;  %800 = vrot.lane.b32.xlu0 %v716_v12, %s6560_s8 }
  0xc7   : > { %v433_v22 = vpop.permute.xlu1 %432  ;;  %v431_v23 = vpop.permute.xlu0 %430 }
  0xc8   : > { %500 = vst.msk [vmem:[#allocation2 + $0xe8] sm:$0xff] %vm470_vm2, %v433_v22  ;;  %499 = vst.msk [vmem:[#allocation2 + $0xe0] sm:$0xff] %vm470_vm2, %v431_v23  ;;  %v898_v22 = vld [vmem:[%s6700_s5 + $0x6c] sm:$0xff]  ;;  %v897_v23 = vld [vmem:[%s6700_s5 + $0x64] sm:$0xff] }
  0xc9   : > { %806 = vrot.lane.b32.xlu1 %v719_v16, %s6560_s8  ;;  %804 = vrot.lane.b32.xlu0 %v718_v18, %s6560_s8 }
  0xcb   : > { %v437_v36 = vpop.permute.xlu1 %436  ;;  %v435_v38 = vpop.permute.xlu0 %434 }
  0xcc   : > { %502 = vst.msk [vmem:[#allocation2 + $0xf8] sm:$0xff] %vm470_vm2, %v437_v36  ;;  %501 = vst.msk [vmem:[#allocation2 + $0xf0] sm:$0xff] %vm470_vm2, %v435_v38  ;;  %v900_v36 = vld [vmem:[%s6700_s5 + $0x84] sm:$0xff]  ;;  %v899_v38 = vld [vmem:[%s6700_s5 + $0x7c] sm:$0xff]  ;;  %vm3561_vm2 = vcmask 589344  }
  0xcd   : > { %810 = vrot.lane.b32.xlu1 %v721_v29, %s6560_s8  ;;  %808 = vrot.lane.b32.xlu0 %v720_v30, %s6560_s8 }
  0xcf   : > { %v570_v51 = vpop.permute.xlu1 %569  ;;  %v568_v52 = vpop.permute.xlu0 %567 }
  0xd0   : > { %665 = vst.msk [vmem:[#allocation2 + $0x8] sm:$0xff] %vm663_vm3, %v570_v51  ;;  %664 = vst.msk [vmem:[#allocation2] sm:$0xff] %vm663_vm3, %v568_v52  ;;  %v902_v51 = vld [vmem:[%s6700_s5 + $0x9c] sm:$0xff]  ;;  %v901_v52 = vld [vmem:[%s6700_s5 + $0x94] sm:$0xff] }
  0xd1   : > { %814 = vrot.lane.b32.xlu1 %v723_v45, %s6560_s8  ;;  %812 = vrot.lane.b32.xlu0 %v722_v46, %s6560_s8 }
  0xd3   : > { %v574_v59 = vpop.permute.xlu1 %573  ;;  %v572_v60 = vpop.permute.xlu0 %571 }
  0xd4   : > { %667 = vst.msk [vmem:[#allocation2 + $0x18] sm:$0xff] %vm663_vm3, %v574_v59  ;;  %666 = vst.msk [vmem:[#allocation2 + $0x10] sm:$0xff] %vm663_vm3, %v572_v60  ;;  %v904_v59 = vld [vmem:[%s6700_s5 + $0xb4] sm:$0xff]  ;;  %v903_v60 = vld [vmem:[%s6700_s5 + $0xac] sm:$0xff] }
  0xd5   : > { %818 = vrot.lane.b32.xlu1 %v725_v55, %s6560_s8  ;;  %816 = vrot.lane.b32.xlu0 %v724_v56, %s6560_s8 }
  0xd7   : > { %v578_v63 = vpop.permute.xlu1 %577  ;;  %v576_v0 = vpop.permute.xlu0 %575 }
  0xd8   : > { %669 = vst.msk [vmem:[#allocation2 + $0x28] sm:$0xff] %vm663_vm3, %v578_v63  ;;  %668 = vst.msk [vmem:[#allocation2 + $0x20] sm:$0xff] %vm663_vm3, %v576_v0  ;;  %v906_v63 = vld [vmem:[%s6700_s5 + $0xcc] sm:$0xff]  ;;  %v905_v0 = vld [vmem:[%s6700_s5 + $0xc4] sm:$0xff] }
  0xd9   : > { %822 = vrot.lane.b32.xlu1 %v727_v61, %s6560_s8  ;;  %820 = vrot.lane.b32.xlu0 %v726_v62, %s6560_s8  ;;  %s6574_s8 = smov 68  }
  0xdb   : > { %v582_v3 = vpop.permute.xlu1 %581  ;;  %v580_v4 = vpop.permute.xlu0 %579 }
  0xdc   : > { %671 = vst.msk [vmem:[#allocation2 + $0x38] sm:$0xff] %vm663_vm3, %v582_v3  ;;  %670 = vst.msk [vmem:[#allocation2 + $0x30] sm:$0xff] %vm663_vm3, %v580_v4  ;;  %v908_v3 = vld [vmem:[%s6700_s5 + $0xe4] sm:$0xff]  ;;  %v907_v4 = vld [vmem:[%s6700_s5 + $0xdc] sm:$0xff] }
  0xdd   : > { %955 = vrot.lane.b32.xlu1 %v890_v1, %s6561_s9  ;;  %953 = vrot.lane.b32.xlu0 %v889_v2, %s6561_s9 }
  0xdf   : > { %v586_v7 = vpop.permute.xlu1 %585  ;;  %v584_v8 = vpop.permute.xlu0 %583 }
  0xe0   : > { %673 = vst.msk [vmem:[#allocation2 + $0x48] sm:$0xff] %vm663_vm3, %v586_v7  ;;  %672 = vst.msk [vmem:[#allocation2 + $0x40] sm:$0xff] %vm663_vm3, %v584_v8  ;;  %v910_v7 = vld [vmem:[%s6700_s5 + $0xfc] sm:$0xff]  ;;  %v909_v8 = vld [vmem:[%s6700_s5 + $0xf4] sm:$0xff] }
  0xe1   : > { %959 = vrot.lane.b32.xlu1 %v892_v5, %s6561_s9  ;;  %957 = vrot.lane.b32.xlu0 %v891_v6, %s6561_s9 }
  0xe3   : > { %v590_v11 = vpop.permute.xlu1 %589  ;;  %v588_v12 = vpop.permute.xlu0 %587 }
  0xe4   : > { %675 = vst.msk [vmem:[#allocation2 + $0x58] sm:$0xff] %vm663_vm3, %v590_v11  ;;  %674 = vst.msk [vmem:[#allocation2 + $0x50] sm:$0xff] %vm663_vm3, %v588_v12  ;;  %v912_v11 = vld [vmem:[%s6700_s5 + $0x114] sm:$0xff]  ;;  %v911_v12 = vld [vmem:[%s6700_s5 + $0x10c] sm:$0xff] }
  0xe5   : > { %963 = vrot.lane.b32.xlu1 %v894_v9, %s6561_s9  ;;  %961 = vrot.lane.b32.xlu0 %v893_v10, %s6561_s9 }
  0xe7   : > { %v594_v16 = vpop.permute.xlu1 %593  ;;  %v592_v18 = vpop.permute.xlu0 %591 }
  0xe8   : > { %677 = vst.msk [vmem:[#allocation2 + $0x68] sm:$0xff] %vm663_vm3, %v594_v16  ;;  %676 = vst.msk [vmem:[#allocation2 + $0x60] sm:$0xff] %vm663_vm3, %v592_v18  ;;  %v914_v16 = vld [vmem:[%s6700_s5 + $0x12c] sm:$0xff]  ;;  %v913_v18 = vld [vmem:[%s6700_s5 + $0x124] sm:$0xff] }
  0xe9   : > { %967 = vrot.lane.b32.xlu1 %v896_v14, %s6561_s9  ;;  %965 = vrot.lane.b32.xlu0 %v895_v15, %s6561_s9 }
  0xeb   : > { %v598_v29 = vpop.permute.xlu1 %597  ;;  %v596_v30 = vpop.permute.xlu0 %595 }
  0xec   : > { %679 = vst.msk [vmem:[#allocation2 + $0x78] sm:$0xff] %vm663_vm3, %v598_v29  ;;  %678 = vst.msk [vmem:[#allocation2 + $0x70] sm:$0xff] %vm663_vm3, %v596_v30  ;;  %v916_v29 = vld [vmem:[%s6700_s5 + $0x144] sm:$0xff]  ;;  %v915_v30 = vld [vmem:[%s6700_s5 + $0x13c] sm:$0xff] }
  0xed   : > { %971 = vrot.lane.b32.xlu1 %v898_v22, %s6561_s9  ;;  %969 = vrot.lane.b32.xlu0 %v897_v23, %s6561_s9 }
  0xef   : > { %v602_v45 = vpop.permute.xlu1 %601  ;;  %v600_v46 = vpop.permute.xlu0 %599 }
  0xf0   : > { %681 = vst.msk [vmem:[#allocation2 + $0x88] sm:$0xff] %vm663_vm3, %v602_v45  ;;  %680 = vst.msk [vmem:[#allocation2 + $0x80] sm:$0xff] %vm663_vm3, %v600_v46  ;;  %v918_v45 = vld [vmem:[%s6700_s5 + $0x15c] sm:$0xff]  ;;  %v917_v46 = vld [vmem:[%s6700_s5 + $0x154] sm:$0xff] }
  0xf1   : > { %975 = vrot.lane.b32.xlu1 %v900_v36, %s6561_s9  ;;  %973 = vrot.lane.b32.xlu0 %v899_v38, %s6561_s9 }
  0xf3   : > { %v606_v55 = vpop.permute.xlu1 %605  ;;  %v604_v56 = vpop.permute.xlu0 %603 }
  0xf4   : > { %683 = vst.msk [vmem:[#allocation2 + $0x98] sm:$0xff] %vm663_vm3, %v606_v55  ;;  %682 = vst.msk [vmem:[#allocation2 + $0x90] sm:$0xff] %vm663_vm3, %v604_v56  ;;  %v920_v55 = vld [vmem:[%s6700_s5 + $0x174] sm:$0xff]  ;;  %v919_v56 = vld [vmem:[%s6700_s5 + $0x16c] sm:$0xff] }
  0xf5   : > { %979 = vrot.lane.b32.xlu1 %v902_v51, %s6561_s9  ;;  %977 = vrot.lane.b32.xlu0 %v901_v52, %s6561_s9 }
  0xf7   : > { %v610_v61 = vpop.permute.xlu1 %609  ;;  %v608_v62 = vpop.permute.xlu0 %607 }
  0xf8   : > { %685 = vst.msk [vmem:[#allocation2 + $0xa8] sm:$0xff] %vm663_vm3, %v610_v61  ;;  %684 = vst.msk [vmem:[#allocation2 + $0xa0] sm:$0xff] %vm663_vm3, %v608_v62 }
  0xf9   : > { %983 = vrot.lane.b32.xlu1 %v904_v59, %s6561_s9  ;;  %981 = vrot.lane.b32.xlu0 %v903_v60, %s6561_s9 }
  0xfb   : > { %v614_v1 = vpop.permute.xlu1 %613  ;;  %v612_v2 = vpop.permute.xlu0 %611 }
  0xfc   : > { %687 = vst.msk [vmem:[#allocation2 + $0xb8] sm:$0xff] %vm663_vm3, %v614_v1  ;;  %686 = vst.msk [vmem:[#allocation2 + $0xb0] sm:$0xff] %vm663_vm3, %v612_v2 }
  0xfd   : > { %987 = vrot.lane.b32.xlu1 %v906_v63, %s6561_s9  ;;  %985 = vrot.lane.b32.xlu0 %v905_v0, %s6561_s9 }
  0xff   : > { %v618_v5 = vpop.permute.xlu1 %617  ;;  %v616_v6 = vpop.permute.xlu0 %615 }
 0x100   : > { %689 = vst.msk [vmem:[#allocation2 + $0xc8] sm:$0xff] %vm663_vm3, %v618_v5  ;;  %688 = vst.msk [vmem:[#allocation2 + $0xc0] sm:$0xff] %vm663_vm3, %v616_v6  ;;  %v5563_v5 = vld [vmem:[%s6700_s5 + $0x39] sm:$0xff]  ;;  %v5562_v6 = vld [vmem:[%s6700_s5 + $0x31] sm:$0xff] }
 0x101   : > { %991 = vrot.lane.b32.xlu1 %v908_v3, %s6561_s9  ;;  %989 = vrot.lane.b32.xlu0 %v907_v4, %s6561_s9  ;;  %v5560_v4 = vld [vmem:[%s6700_s5 + $0x19] sm:$0xff] }
 0x103   : > { %v622_v9 = vpop.permute.xlu1 %621  ;;  %v620_v10 = vpop.permute.xlu0 %619 }
 0x104   : > { %691 = vst.msk [vmem:[#allocation2 + $0xd8] sm:$0xff] %vm663_vm3, %v622_v9  ;;  %690 = vst.msk [vmem:[#allocation2 + $0xd0] sm:$0xff] %vm663_vm3, %v620_v10  ;;  %v5565_v9 = vld [vmem:[%s6700_s5 + $0x51] sm:$0xff]  ;;  %v5564_v10 = vld [vmem:[%s6700_s5 + $0x49] sm:$0xff] }
 0x105   : > { %995 = vrot.lane.b32.xlu1 %v910_v7, %s6561_s9  ;;  %993 = vrot.lane.b32.xlu0 %v909_v8, %s6561_s9 }
 0x107   : > { %v626_v14 = vpop.permute.xlu1 %625  ;;  %v624_v15 = vpop.permute.xlu0 %623 }
 0x108   : > { %693 = vst.msk [vmem:[#allocation2 + $0xe8] sm:$0xff] %vm663_vm3, %v626_v14  ;;  %692 = vst.msk [vmem:[#allocation2 + $0xe0] sm:$0xff] %vm663_vm3, %v624_v15  ;;  %v5567_v14 = vld [vmem:[%s6700_s5 + $0x69] sm:$0xff]  ;;  %v5566_v15 = vld [vmem:[%s6700_s5 + $0x61] sm:$0xff] }
 0x109   : > { %999 = vrot.lane.b32.xlu1 %v912_v11, %s6561_s9  ;;  %997 = vrot.lane.b32.xlu0 %v911_v12, %s6561_s9 }
 0x10b   : > { %v630_v22 = vpop.permute.xlu1 %629  ;;  %v628_v23 = vpop.permute.xlu0 %627 }
 0x10c   : > { %695 = vst.msk [vmem:[#allocation2 + $0xf8] sm:$0xff] %vm663_vm3, %v630_v22  ;;  %694 = vst.msk [vmem:[#allocation2 + $0xf0] sm:$0xff] %vm663_vm3, %v628_v23  ;;  %v5569_v22 = vld [vmem:[%s6700_s5 + $0x81] sm:$0xff]  ;;  %v5568_v23 = vld [vmem:[%s6700_s5 + $0x79] sm:$0xff]  ;;  %vm3754_vm3 = vcmask 622144  }
 0x10d   : > { %1003 = vrot.lane.b32.xlu1 %v914_v16, %s6561_s9  ;;  %1001 = vrot.lane.b32.xlu0 %v913_v18, %s6561_s9 }
 0x10f   : > { %v763_v36 = vpop.permute.xlu1 %762  ;;  %v761_v38 = vpop.permute.xlu0 %760 }
 0x110   : > { %858 = vst.msk [vmem:[#allocation2 + $0x8] sm:$0xff] %vm856_vm4, %v763_v36  ;;  %857 = vst.msk [vmem:[#allocation2] sm:$0xff] %vm856_vm4, %v761_v38  ;;  %v5571_v36 = vld [vmem:[%s6700_s5 + $0x99] sm:$0xff]  ;;  %v5570_v38 = vld [vmem:[%s6700_s5 + $0x91] sm:$0xff] }
 0x111   : > { %1007 = vrot.lane.b32.xlu1 %v916_v29, %s6561_s9  ;;  %1005 = vrot.lane.b32.xlu0 %v915_v30, %s6561_s9 }
 0x113   : > { %v767_v51 = vpop.permute.xlu1 %766  ;;  %v765_v52 = vpop.permute.xlu0 %764 }
 0x114   : > { %860 = vst.msk [vmem:[#allocation2 + $0x18] sm:$0xff] %vm856_vm4, %v767_v51  ;;  %859 = vst.msk [vmem:[#allocation2 + $0x10] sm:$0xff] %vm856_vm4, %v765_v52  ;;  %v5573_v51 = vld [vmem:[%s6700_s5 + $0xb1] sm:$0xff]  ;;  %v5572_v52 = vld [vmem:[%s6700_s5 + $0xa9] sm:$0xff] }
 0x115   : > { %1011 = vrot.lane.b32.xlu1 %v918_v45, %s6561_s9  ;;  %1009 = vrot.lane.b32.xlu0 %v917_v46, %s6561_s9 }
 0x117   : > { %v771_v59 = vpop.permute.xlu1 %770  ;;  %v769_v60 = vpop.permute.xlu0 %768 }
 0x118   : > { %862 = vst.msk [vmem:[#allocation2 + $0x28] sm:$0xff] %vm856_vm4, %v771_v59  ;;  %861 = vst.msk [vmem:[#allocation2 + $0x20] sm:$0xff] %vm856_vm4, %v769_v60  ;;  %v5575_v59 = vld [vmem:[%s6700_s5 + $0xc9] sm:$0xff]  ;;  %v5574_v60 = vld [vmem:[%s6700_s5 + $0xc1] sm:$0xff] }
 0x119   : > { %1015 = vrot.lane.b32.xlu1 %v920_v55, %s6561_s9  ;;  %1013 = vrot.lane.b32.xlu0 %v919_v56, %s6561_s9  ;;  %s6575_s9 = smov 72  }
 0x11b   : > { %v775_v61 = vpop.permute.xlu1 %774  ;;  %v773_v62 = vpop.permute.xlu0 %772 }
 0x11c   : > { %864 = vst.msk [vmem:[#allocation2 + $0x38] sm:$0xff] %vm856_vm4, %v775_v61  ;;  %863 = vst.msk [vmem:[#allocation2 + $0x30] sm:$0xff] %vm856_vm4, %v773_v62 }
 0x11d   : > { %1149 = vrot.lane.b32.xlu1 %v6736_v17, %s6562_s10  ;;  %1147 = vrot.lane.b32.xlu0 %v6727_v13, %s6562_s10 }
 0x11f   : > { %v779_v63 = vpop.permute.xlu1 %778  ;;  %v777_v0 = vpop.permute.xlu0 %776 }
 0x120   : > { %866 = vst.msk [vmem:[#allocation2 + $0x48] sm:$0xff] %vm856_vm4, %v779_v63  ;;  %865 = vst.msk [vmem:[#allocation2 + $0x40] sm:$0xff] %vm856_vm4, %v777_v0  ;;  %v5577_v63 = vld [vmem:[%s6700_s5 + $0xe1] sm:$0xff]  ;;  %v5576_v0 = vld [vmem:[%s6700_s5 + $0xd9] sm:$0xff] }
 0x121   : > { %1153 = vrot.lane.b32.xlu1 %v6743_v19, %s6562_s10  ;;  %1151 = vrot.lane.b32.xlu0 %v6746_v20, %s6562_s10 }
 0x123   : > { %v783_v1 = vpop.permute.xlu1 %782  ;;  %v781_v2 = vpop.permute.xlu0 %780 }
 0x124   : > { %868 = vst.msk [vmem:[#allocation2 + $0x58] sm:$0xff] %vm856_vm4, %v783_v1  ;;  %867 = vst.msk [vmem:[#allocation2 + $0x50] sm:$0xff] %vm856_vm4, %v781_v2 }
 0x125   : > { %1157 = vrot.lane.b32.xlu1 %v6755_v21, %s6562_s10  ;;  %1155 = vrot.lane.b32.xlu0 %v6762_v24, %s6562_s10 }
 0x127   : > { %v787_v13 = vpop.permute.xlu1 %786  ;;  %v785_v17 = vpop.permute.xlu0 %784 }
 0x128   : > { %870 = vst.msk [vmem:[#allocation2 + $0x68] sm:$0xff] %vm856_vm4, %v787_v13  ;;  %869 = vst.msk [vmem:[#allocation2 + $0x60] sm:$0xff] %vm856_vm4, %v785_v17  ;;  %v5579_v13 = vld [vmem:[%s6700_s5 + $0xf9] sm:$0xff]  ;;  %v5578_v17 = vld [vmem:[%s6700_s5 + $0xf1] sm:$0xff] }
 0x129   : > { %1161 = vrot.lane.b32.xlu1 %v6767_v25, %s6562_s10  ;;  %1159 = vrot.lane.b32.xlu0 %v6770_v26, %s6562_s10 }
 0x12b   : > { %v791_v19 = vpop.permute.xlu1 %790  ;;  %v789_v20 = vpop.permute.xlu0 %788 }
 0x12c   : > { %872 = vst.msk [vmem:[#allocation2 + $0x78] sm:$0xff] %vm856_vm4, %v791_v19  ;;  %871 = vst.msk [vmem:[#allocation2 + $0x70] sm:$0xff] %vm856_vm4, %v789_v20 }
 0x12d   : > { %1165 = vrot.lane.b32.xlu1 %v6777_v27, %s6562_s10  ;;  %1163 = vrot.lane.b32.xlu0 %v6780_v28, %s6562_s10 }
 0x12f   : > { %v795_v21 = vpop.permute.xlu1 %794  ;;  %v793_v24 = vpop.permute.xlu0 %792 }
 0x130   : > { %874 = vst.msk [vmem:[#allocation2 + $0x88] sm:$0xff] %vm856_vm4, %v795_v21  ;;  %873 = vst.msk [vmem:[#allocation2 + $0x80] sm:$0xff] %vm856_vm4, %v793_v24  ;;  %v5581_v21 = vld [vmem:[%s6700_s5 + $0x111] sm:$0xff]  ;;  %v5580_v24 = vld [vmem:[%s6700_s5 + $0x109] sm:$0xff] }
 0x131   : > { %1169 = vrot.lane.b32.xlu1 %v6791_v31, %s6562_s10  ;;  %1167 = vrot.lane.b32.xlu0 %v6794_v32, %s6562_s10 }
 0x133   : > { %v799_v25 = vpop.permute.xlu1 %798  ;;  %v797_v26 = vpop.permute.xlu0 %796 }
 0x134   : > { %876 = vst.msk [vmem:[#allocation2 + $0x98] sm:$0xff] %vm856_vm4, %v799_v25  ;;  %875 = vst.msk [vmem:[#allocation2 + $0x90] sm:$0xff] %vm856_vm4, %v797_v26 }
 0x135   : > { %1173 = vrot.lane.b32.xlu1 %v6801_v33, %s6562_s10  ;;  %1171 = vrot.lane.b32.xlu0 %v6804_v34, %s6562_s10 }
 0x137   : > { %v803_v27 = vpop.permute.xlu1 %802  ;;  %v801_v28 = vpop.permute.xlu0 %800 }
 0x138   : > { %878 = vst.msk [vmem:[#allocation2 + $0xa8] sm:$0xff] %vm856_vm4, %v803_v27  ;;  %877 = vst.msk [vmem:[#allocation2 + $0xa0] sm:$0xff] %vm856_vm4, %v801_v28  ;;  %v5583_v27 = vld [vmem:[%s6700_s5 + $0x129] sm:$0xff]  ;;  %v5582_v28 = vld [vmem:[%s6700_s5 + $0x121] sm:$0xff] }
 0x139   : > { %1177 = vrot.lane.b32.xlu1 %v6811_v35, %s6562_s10  ;;  %1175 = vrot.lane.b32.xlu0 %v6819_v37, %s6562_s10 }
 0x13b   : > { %v807_v31 = vpop.permute.xlu1 %806  ;;  %v805_v32 = vpop.permute.xlu0 %804 }
 0x13c   : > { %880 = vst.msk [vmem:[#allocation2 + $0xb8] sm:$0xff] %vm856_vm4, %v807_v31  ;;  %879 = vst.msk [vmem:[#allocation2 + $0xb0] sm:$0xff] %vm856_vm4, %v805_v32 }
 0x13d   : > { %1181 = vrot.lane.b32.xlu1 %v6825_v39, %s6562_s10  ;;  %1179 = vrot.lane.b32.xlu0 %v6828_v40, %s6562_s10 }
 0x13f   : > { %v811_v33 = vpop.permute.xlu1 %810  ;;  %v809_v34 = vpop.permute.xlu0 %808 }
 0x140   : > { %882 = vst.msk [vmem:[#allocation2 + $0xc8] sm:$0xff] %vm856_vm4, %v811_v33  ;;  %881 = vst.msk [vmem:[#allocation2 + $0xc0] sm:$0xff] %vm856_vm4, %v809_v34  ;;  %v5585_v33 = vld [vmem:[%s6700_s5 + $0x141] sm:$0xff]  ;;  %v5584_v34 = vld [vmem:[%s6700_s5 + $0x139] sm:$0xff] }
 0x141   : > { %1185 = vrot.lane.b32.xlu1 %v6835_v41, %s6562_s10  ;;  %1183 = vrot.lane.b32.xlu0 %v6840_v42, %s6562_s10 }
 0x143   : > { %v815_v35 = vpop.permute.xlu1 %814  ;;  %v813_v37 = vpop.permute.xlu0 %812 }
 0x144   : > { %884 = vst.msk [vmem:[#allocation2 + $0xd8] sm:$0xff] %vm856_vm4, %v815_v35  ;;  %883 = vst.msk [vmem:[#allocation2 + $0xd0] sm:$0xff] %vm856_vm4, %v813_v37 }
 0x145   : > { %1189 = vrot.lane.b32.xlu1 %v6847_v43, %s6562_s10  ;;  %1187 = vrot.lane.b32.xlu0 %v6850_v44, %s6562_s10 }
 0x147   : > { %v819_v39 = vpop.permute.xlu1 %818  ;;  %v817_v40 = vpop.permute.xlu0 %816 }
 0x148   : > { %886 = vst.msk [vmem:[#allocation2 + $0xe8] sm:$0xff] %vm856_vm4, %v819_v39  ;;  %885 = vst.msk [vmem:[#allocation2 + $0xe0] sm:$0xff] %vm856_vm4, %v817_v40  ;;  %v5587_v39 = vld [vmem:[%s6700_s5 + $0x159] sm:$0xff]  ;;  %v5586_v40 = vld [vmem:[%s6700_s5 + $0x151] sm:$0xff] }
 0x149   : > { %1193 = vrot.lane.b32.xlu1 %v6859_v47, %s6562_s10  ;;  %1191 = vrot.lane.b32.xlu0 %v6864_v48, %s6562_s10 }
 0x14b   : > { %v823_v41 = vpop.permute.xlu1 %822  ;;  %v821_v42 = vpop.permute.xlu0 %820 }
 0x14c   : > { %888 = vst.msk [vmem:[#allocation2 + $0xf8] sm:$0xff] %vm856_vm4, %v823_v41  ;;  %887 = vst.msk [vmem:[#allocation2 + $0xf0] sm:$0xff] %vm856_vm4, %v821_v42  ;;  %vm3947_vm4 = vcmask 654944  }
 0x14d   : > { %1197 = vrot.lane.b32.xlu1 %v6869_v49, %s6562_s10  ;;  %1195 = vrot.lane.b32.xlu0 %v6872_v50, %s6562_s10  ;;  %v5559_v49 = vld [vmem:[%s6700_s5 + $0x188] sm:$0xff]  ;;  %v5558_v50 = vld [vmem:[%s6700_s5 + $0x180] sm:$0xff] }
 0x14f   : > { %v956_v43 = vpop.permute.xlu1 %955  ;;  %v954_v44 = vpop.permute.xlu0 %953 }
 0x150   : > { %1051 = vst.msk [vmem:[#allocation2 + $0x8] sm:$0xff] %vm1049_vm5, %v956_v43  ;;  %1050 = vst.msk [vmem:[#allocation2] sm:$0xff] %vm1049_vm5, %v954_v44  ;;  %v5589_v43 = vld [vmem:[%s6700_s5 + $0x171] sm:$0xff]  ;;  %v5588_v44 = vld [vmem:[%s6700_s5 + $0x169] sm:$0xff] }
 0x151   : > { %1201 = vrot.lane.b32.xlu1 %v6886_v54, %s6562_s10  ;;  %1199 = vrot.lane.b32.xlu0 %v6883_v53, %s6562_s10  ;;  %v5561_v53 = vld [vmem:[%s6700_s5 + $0x21] sm:$0xff] }
 0x153   : > { %v960_v47 = vpop.permute.xlu1 %959  ;;  %v958_v48 = vpop.permute.xlu0 %957 }
 0x154   : > { %1053 = vst.msk [vmem:[#allocation2 + $0x18] sm:$0xff] %vm1049_vm5, %v960_v47  ;;  %1052 = vst.msk [vmem:[#allocation2 + $0x10] sm:$0xff] %vm1049_vm5, %v958_v48 }
 0x155   : > { %1205 = vrot.lane.b32.xlu1 %v6900_v58, %s6562_s10  ;;  %1203 = vrot.lane.b32.xlu0 %v6897_v57, %s6562_s10 }
 0x157   : > { %v964_v54 = vpop.permute.xlu1 %963  ;;  %v962_v3 = vpop.permute.xlu0 %961 }
 0x158   : > { %1055 = vst.msk [vmem:[#allocation2 + $0x28] sm:$0xff] %vm1049_vm5, %v964_v54  ;;  %1054 = vst.msk [vmem:[#allocation2 + $0x20] sm:$0xff] %vm1049_vm5, %v962_v3 }
 0x159   : > { %1209 = vrot.lane.b32.xlu1 %v5559_v49, %s6562_s10  ;;  %1207 = vrot.lane.b32.xlu0 %v5558_v50, %s6562_s10  ;;  %v5591_v49 = vld [vmem:[%s6700_s5 + $0x189] sm:$0xff]  ;;  %v5590_v50 = vld [vmem:[%s6700_s5 + $0x181] sm:$0xff]  ;;  %s6576_s10 = smov 76  }
 0x15b   : > { %v968_v58 = vpop.permute.xlu1 %967  ;;  %v966_v57 = vpop.permute.xlu0 %965 }
 0x15c   : > { %1057 = vst.msk [vmem:[#allocation2 + $0x38] sm:$0xff] %vm1049_vm5, %v968_v58  ;;  %1056 = vst.msk [vmem:[#allocation2 + $0x30] sm:$0xff] %vm1049_vm5, %v966_v57 }
 0x15d   : > { %1342 = vrot.lane.b32.xlu1 %v5561_v53, %s6563_s11  ;;  %1340 = vrot.lane.b32.xlu0 %v5560_v4, %s6563_s11  ;;  %v5593_v53 = vld [vmem:[%s6700_s5 + $0x22] sm:$0xff]  ;;  %v5592_v4 = vld [vmem:[%s6700_s5 + $0x1a] sm:$0xff] }
 0x15f   : > { %v972_v7 = vpop.permute.xlu1 %971  ;;  %v970_v8 = vpop.permute.xlu0 %969 }
 0x160   : > { %1059 = vst.msk [vmem:[#allocation2 + $0x48] sm:$0xff] %vm1049_vm5, %v972_v7  ;;  %1058 = vst.msk [vmem:[#allocation2 + $0x40] sm:$0xff] %vm1049_vm5, %v970_v8 }
 0x161   : > { %1346 = vrot.lane.b32.xlu1 %v5563_v5, %s6563_s11  ;;  %1344 = vrot.lane.b32.xlu0 %v5562_v6, %s6563_s11  ;;  %v5595_v5 = vld [vmem:[%s6700_s5 + $0x3a] sm:$0xff]  ;;  %v5594_v6 = vld [vmem:[%s6700_s5 + $0x32] sm:$0xff] }
 0x163   : > { %v976_v11 = vpop.permute.xlu1 %975  ;;  %v974_v12 = vpop.permute.xlu0 %973 }
 0x164   : > { %1061 = vst.msk [vmem:[#allocation2 + $0x58] sm:$0xff] %vm1049_vm5, %v976_v11  ;;  %1060 = vst.msk [vmem:[#allocation2 + $0x50] sm:$0xff] %vm1049_vm5, %v974_v12 }
 0x165   : > { %1350 = vrot.lane.b32.xlu1 %v5565_v9, %s6563_s11  ;;  %1348 = vrot.lane.b32.xlu0 %v5564_v10, %s6563_s11  ;;  %v5597_v9 = vld [vmem:[%s6700_s5 + $0x52] sm:$0xff]  ;;  %v5596_v10 = vld [vmem:[%s6700_s5 + $0x4a] sm:$0xff] }
 0x167   : > { %v980_v16 = vpop.permute.xlu1 %979  ;;  %v978_v18 = vpop.permute.xlu0 %977 }
 0x168   : > { %1063 = vst.msk [vmem:[#allocation2 + $0x68] sm:$0xff] %vm1049_vm5, %v980_v16  ;;  %1062 = vst.msk [vmem:[#allocation2 + $0x60] sm:$0xff] %vm1049_vm5, %v978_v18 }
 0x169   : > { %1354 = vrot.lane.b32.xlu1 %v5567_v14, %s6563_s11  ;;  %1352 = vrot.lane.b32.xlu0 %v5566_v15, %s6563_s11  ;;  %v5599_v14 = vld [vmem:[%s6700_s5 + $0x6a] sm:$0xff]  ;;  %v5598_v15 = vld [vmem:[%s6700_s5 + $0x62] sm:$0xff] }
 0x16b   : > { %v984_v29 = vpop.permute.xlu1 %983  ;;  %v982_v30 = vpop.permute.xlu0 %981 }
 0x16c   : > { %1065 = vst.msk [vmem:[#allocation2 + $0x78] sm:$0xff] %vm1049_vm5, %v984_v29  ;;  %1064 = vst.msk [vmem:[#allocation2 + $0x70] sm:$0xff] %vm1049_vm5, %v982_v30 }
 0x16d   : > { %1358 = vrot.lane.b32.xlu1 %v5569_v22, %s6563_s11  ;;  %1356 = vrot.lane.b32.xlu0 %v5568_v23, %s6563_s11  ;;  %v5601_v22 = vld [vmem:[%s6700_s5 + $0x82] sm:$0xff]  ;;  %v5600_v23 = vld [vmem:[%s6700_s5 + $0x7a] sm:$0xff] }
 0x16f   : > { %v988_v45 = vpop.permute.xlu1 %987  ;;  %v986_v46 = vpop.permute.xlu0 %985 }
 0x170   : > { %1067 = vst.msk [vmem:[#allocation2 + $0x88] sm:$0xff] %vm1049_vm5, %v988_v45  ;;  %1066 = vst.msk [vmem:[#allocation2 + $0x80] sm:$0xff] %vm1049_vm5, %v986_v46 }
 0x171   : > { %1362 = vrot.lane.b32.xlu1 %v5571_v36, %s6563_s11  ;;  %1360 = vrot.lane.b32.xlu0 %v5570_v38, %s6563_s11  ;;  %v5603_v36 = vld [vmem:[%s6700_s5 + $0x9a] sm:$0xff]  ;;  %v5602_v38 = vld [vmem:[%s6700_s5 + $0x92] sm:$0xff] }
 0x173   : > { %v992_v55 = vpop.permute.xlu1 %991  ;;  %v990_v56 = vpop.permute.xlu0 %989 }
 0x174   : > { %1069 = vst.msk [vmem:[#allocation2 + $0x98] sm:$0xff] %vm1049_vm5, %v992_v55  ;;  %1068 = vst.msk [vmem:[#allocation2 + $0x90] sm:$0xff] %vm1049_vm5, %v990_v56 }
 0x175   : > { %1366 = vrot.lane.b32.xlu1 %v5573_v51, %s6563_s11  ;;  %1364 = vrot.lane.b32.xlu0 %v5572_v52, %s6563_s11  ;;  %v5605_v51 = vld [vmem:[%s6700_s5 + $0xb2] sm:$0xff]  ;;  %v5604_v52 = vld [vmem:[%s6700_s5 + $0xaa] sm:$0xff] }
 0x177   : > { %v996_v61 = vpop.permute.xlu1 %995  ;;  %v994_v62 = vpop.permute.xlu0 %993 }
 0x178   : > { %1071 = vst.msk [vmem:[#allocation2 + $0xa8] sm:$0xff] %vm1049_vm5, %v996_v61  ;;  %1070 = vst.msk [vmem:[#allocation2 + $0xa0] sm:$0xff] %vm1049_vm5, %v994_v62 }
 0x179   : > { %1370 = vrot.lane.b32.xlu1 %v5575_v59, %s6563_s11  ;;  %1368 = vrot.lane.b32.xlu0 %v5574_v60, %s6563_s11  ;;  %v5607_v59 = vld [vmem:[%s6700_s5 + $0xca] sm:$0xff]  ;;  %v5606_v60 = vld [vmem:[%s6700_s5 + $0xc2] sm:$0xff] }
 0x17b   : > { %v1000_v1 = vpop.permute.xlu1 %999  ;;  %v998_v2 = vpop.permute.xlu0 %997 }
 0x17c   : > { %1073 = vst.msk [vmem:[#allocation2 + $0xb8] sm:$0xff] %vm1049_vm5, %v1000_v1  ;;  %1072 = vst.msk [vmem:[#allocation2 + $0xb0] sm:$0xff] %vm1049_vm5, %v998_v2 }
 0x17d   : > { %1374 = vrot.lane.b32.xlu1 %v5577_v63, %s6563_s11  ;;  %1372 = vrot.lane.b32.xlu0 %v5576_v0, %s6563_s11  ;;  %v5609_v63 = vld [vmem:[%s6700_s5 + $0xe2] sm:$0xff]  ;;  %v5608_v0 = vld [vmem:[%s6700_s5 + $0xda] sm:$0xff] }
 0x17f   : > { %v1004_v19 = vpop.permute.xlu1 %1003  ;;  %v1002_v20 = vpop.permute.xlu0 %1001 }
 0x180   : > { %1075 = vst.msk [vmem:[#allocation2 + $0xc8] sm:$0xff] %vm1049_vm5, %v1004_v19  ;;  %1074 = vst.msk [vmem:[#allocation2 + $0xc0] sm:$0xff] %vm1049_vm5, %v1002_v20 }
 0x181   : > { %1378 = vrot.lane.b32.xlu1 %v5579_v13, %s6563_s11  ;;  %1376 = vrot.lane.b32.xlu0 %v5578_v17, %s6563_s11  ;;  %v5611_v13 = vld [vmem:[%s6700_s5 + $0xfa] sm:$0xff]  ;;  %v5610_v17 = vld [vmem:[%s6700_s5 + $0xf2] sm:$0xff] }
 0x183   : > { %v1008_v25 = vpop.permute.xlu1 %1007  ;;  %v1006_v26 = vpop.permute.xlu0 %1005 }
 0x184   : > { %1077 = vst.msk [vmem:[#allocation2 + $0xd8] sm:$0xff] %vm1049_vm5, %v1008_v25  ;;  %1076 = vst.msk [vmem:[#allocation2 + $0xd0] sm:$0xff] %vm1049_vm5, %v1006_v26 }
 0x185   : > { %1382 = vrot.lane.b32.xlu1 %v5581_v21, %s6563_s11  ;;  %1380 = vrot.lane.b32.xlu0 %v5580_v24, %s6563_s11  ;;  %v5613_v21 = vld [vmem:[%s6700_s5 + $0x112] sm:$0xff]  ;;  %v5612_v24 = vld [vmem:[%s6700_s5 + $0x10a] sm:$0xff] }
 0x187   : > { %v1012_v31 = vpop.permute.xlu1 %1011  ;;  %v1010_v32 = vpop.permute.xlu0 %1009 }
 0x188   : > { %1079 = vst.msk [vmem:[#allocation2 + $0xe8] sm:$0xff] %vm1049_vm5, %v1012_v31  ;;  %1078 = vst.msk [vmem:[#allocation2 + $0xe0] sm:$0xff] %vm1049_vm5, %v1010_v32 }
 0x189   : > { %1386 = vrot.lane.b32.xlu1 %v5583_v27, %s6563_s11  ;;  %1384 = vrot.lane.b32.xlu0 %v5582_v28, %s6563_s11  ;;  %v5615_v27 = vld [vmem:[%s6700_s5 + $0x12a] sm:$0xff]  ;;  %v5614_v28 = vld [vmem:[%s6700_s5 + $0x122] sm:$0xff] }
 0x18b   : > { %v1016_v35 = vpop.permute.xlu1 %1015  ;;  %v1014_v37 = vpop.permute.xlu0 %1013 }
 0x18c   : > { %1081 = vst.msk [vmem:[#allocation2 + $0xf8] sm:$0xff] %vm1049_vm5, %v1016_v35  ;;  %1080 = vst.msk [vmem:[#allocation2 + $0xf0] sm:$0xff] %vm1049_vm5, %v1014_v37  ;;  %vm4141_vm5 = vcmask 687744  }
 0x18d   : > { %1390 = vrot.lane.b32.xlu1 %v5585_v33, %s6563_s11  ;;  %1388 = vrot.lane.b32.xlu0 %v5584_v34, %s6563_s11  ;;  %v5617_v33 = vld [vmem:[%s6700_s5 + $0x142] sm:$0xff]  ;;  %v5616_v34 = vld [vmem:[%s6700_s5 + $0x13a] sm:$0xff] }
 0x18f   : > { %v1150_v41 = vpop.permute.xlu1 %1149  ;;  %v1148_v42 = vpop.permute.xlu0 %1147 }
 0x190   : > { %1245 = vst.msk [vmem:[#allocation2 + $0x8] sm:$0xff] %vm1243_vm6, %v1150_v41  ;;  %1244 = vst.msk [vmem:[#allocation2] sm:$0xff] %vm1243_vm6, %v1148_v42 }
 0x191   : > { %1394 = vrot.lane.b32.xlu1 %v5587_v39, %s6563_s11  ;;  %1392 = vrot.lane.b32.xlu0 %v5586_v40, %s6563_s11  ;;  %v5619_v39 = vld [vmem:[%s6700_s5 + $0x15a] sm:$0xff]  ;;  %v5618_v40 = vld [vmem:[%s6700_s5 + $0x152] sm:$0xff] }
 0x193   : > { %v1154_v47 = vpop.permute.xlu1 %1153  ;;  %v1152_v48 = vpop.permute.xlu0 %1151 }
 0x194   : > { %1247 = vst.msk [vmem:[#allocation2 + $0x18] sm:$0xff] %vm1243_vm6, %v1154_v47  ;;  %1246 = vst.msk [vmem:[#allocation2 + $0x10] sm:$0xff] %vm1243_vm6, %v1152_v48 }
 0x195   : > { %1398 = vrot.lane.b32.xlu1 %v5589_v43, %s6563_s11  ;;  %1396 = vrot.lane.b32.xlu0 %v5588_v44, %s6563_s11  ;;  %v5621_v43 = vld [vmem:[%s6700_s5 + $0x172] sm:$0xff]  ;;  %v5620_v44 = vld [vmem:[%s6700_s5 + $0x16a] sm:$0xff] }
 0x197   : > { %v1158_v54 = vpop.permute.xlu1 %1157  ;;  %v1156_v3 = vpop.permute.xlu0 %1155 }
 0x198   : > { %1249 = vst.msk [vmem:[#allocation2 + $0x28] sm:$0xff] %vm1243_vm6, %v1158_v54  ;;  %1248 = vst.msk [vmem:[#allocation2 + $0x20] sm:$0xff] %vm1243_vm6, %v1156_v3 }
 0x199   : > { %1402 = vrot.lane.b32.xlu1 %v5591_v49, %s6563_s11  ;;  %1400 = vrot.lane.b32.xlu0 %v5590_v50, %s6563_s11  ;;  %v5623_v49 = vld [vmem:[%s6700_s5 + $0x18a] sm:$0xff]  ;;  %v5622_v50 = vld [vmem:[%s6700_s5 + $0x182] sm:$0xff]  ;;  %s6579_s11 = smov 88  }
 0x19b   : > { %v1162_v58 = vpop.permute.xlu1 %1161  ;;  %v1160_v57 = vpop.permute.xlu0 %1159 }
 0x19c   : > { %1251 = vst.msk [vmem:[#allocation2 + $0x38] sm:$0xff] %vm1243_vm6, %v1162_v58  ;;  %1250 = vst.msk [vmem:[#allocation2 + $0x30] sm:$0xff] %vm1243_vm6, %v1160_v57 }
 0x19d   : > { %1535 = vrot.lane.b32.xlu1 %v5593_v53, %s6564_s12  ;;  %1533 = vrot.lane.b32.xlu0 %v5592_v4, %s6564_s12  ;;  %v5625_v53 = vld [vmem:[%s6700_s5 + $0x23] sm:$0xff]  ;;  %v5624_v4 = vld [vmem:[%s6700_s5 + $0x1b] sm:$0xff] }
 0x19f   : > { %v1166_v7 = vpop.permute.xlu1 %1165  ;;  %v1164_v8 = vpop.permute.xlu0 %1163 }
 0x1a0   : > { %1253 = vst.msk [vmem:[#allocation2 + $0x48] sm:$0xff] %vm1243_vm6, %v1166_v7  ;;  %1252 = vst.msk [vmem:[#allocation2 + $0x40] sm:$0xff] %vm1243_vm6, %v1164_v8 }
 0x1a1   : > { %1539 = vrot.lane.b32.xlu1 %v5595_v5, %s6564_s12  ;;  %1537 = vrot.lane.b32.xlu0 %v5594_v6, %s6564_s12  ;;  %v5627_v5 = vld [vmem:[%s6700_s5 + $0x3b] sm:$0xff]  ;;  %v5626_v6 = vld [vmem:[%s6700_s5 + $0x33] sm:$0xff] }
 0x1a3   : > { %v1170_v11 = vpop.permute.xlu1 %1169  ;;  %v1168_v12 = vpop.permute.xlu0 %1167 }
 0x1a4   : > { %1255 = vst.msk [vmem:[#allocation2 + $0x58] sm:$0xff] %vm1243_vm6, %v1170_v11  ;;  %1254 = vst.msk [vmem:[#allocation2 + $0x50] sm:$0xff] %vm1243_vm6, %v1168_v12 }
 0x1a5   : > { %1543 = vrot.lane.b32.xlu1 %v5597_v9, %s6564_s12  ;;  %1541 = vrot.lane.b32.xlu0 %v5596_v10, %s6564_s12  ;;  %v5629_v9 = vld [vmem:[%s6700_s5 + $0x53] sm:$0xff]  ;;  %v5628_v10 = vld [vmem:[%s6700_s5 + $0x4b] sm:$0xff] }
 0x1a7   : > { %v1174_v16 = vpop.permute.xlu1 %1173  ;;  %v1172_v18 = vpop.permute.xlu0 %1171 }
 0x1a8   : > { %1257 = vst.msk [vmem:[#allocation2 + $0x68] sm:$0xff] %vm1243_vm6, %v1174_v16  ;;  %1256 = vst.msk [vmem:[#allocation2 + $0x60] sm:$0xff] %vm1243_vm6, %v1172_v18 }
 0x1a9   : > { %1547 = vrot.lane.b32.xlu1 %v5599_v14, %s6564_s12  ;;  %1545 = vrot.lane.b32.xlu0 %v5598_v15, %s6564_s12  ;;  %v5631_v14 = vld [vmem:[%s6700_s5 + $0x6b] sm:$0xff]  ;;  %v5630_v15 = vld [vmem:[%s6700_s5 + $0x63] sm:$0xff] }
 0x1ab   : > { %v1178_v29 = vpop.permute.xlu1 %1177  ;;  %v1176_v30 = vpop.permute.xlu0 %1175 }
 0x1ac   : > { %1259 = vst.msk [vmem:[#allocation2 + $0x78] sm:$0xff] %vm1243_vm6, %v1178_v29  ;;  %1258 = vst.msk [vmem:[#allocation2 + $0x70] sm:$0xff] %vm1243_vm6, %v1176_v30 }
 0x1ad   : > { %1551 = vrot.lane.b32.xlu1 %v5601_v22, %s6564_s12  ;;  %1549 = vrot.lane.b32.xlu0 %v5600_v23, %s6564_s12  ;;  %v5633_v22 = vld [vmem:[%s6700_s5 + $0x83] sm:$0xff]  ;;  %v5632_v23 = vld [vmem:[%s6700_s5 + $0x7b] sm:$0xff] }
 0x1af   : > { %v1182_v45 = vpop.permute.xlu1 %1181  ;;  %v1180_v46 = vpop.permute.xlu0 %1179 }
 0x1b0   : > { %1261 = vst.msk [vmem:[#allocation2 + $0x88] sm:$0xff] %vm1243_vm6, %v1182_v45  ;;  %1260 = vst.msk [vmem:[#allocation2 + $0x80] sm:$0xff] %vm1243_vm6, %v1180_v46 }
 0x1b1   : > { %1555 = vrot.lane.b32.xlu1 %v5603_v36, %s6564_s12  ;;  %1553 = vrot.lane.b32.xlu0 %v5602_v38, %s6564_s12  ;;  %v5635_v36 = vld [vmem:[%s6700_s5 + $0x9b] sm:$0xff]  ;;  %v5634_v38 = vld [vmem:[%s6700_s5 + $0x93] sm:$0xff] }
 0x1b3   : > { %v1186_v55 = vpop.permute.xlu1 %1185  ;;  %v1184_v56 = vpop.permute.xlu0 %1183 }
 0x1b4   : > { %1263 = vst.msk [vmem:[#allocation2 + $0x98] sm:$0xff] %vm1243_vm6, %v1186_v55  ;;  %1262 = vst.msk [vmem:[#allocation2 + $0x90] sm:$0xff] %vm1243_vm6, %v1184_v56 }
 0x1b5   : > { %1559 = vrot.lane.b32.xlu1 %v5605_v51, %s6564_s12  ;;  %1557 = vrot.lane.b32.xlu0 %v5604_v52, %s6564_s12  ;;  %v5637_v51 = vld [vmem:[%s6700_s5 + $0xb3] sm:$0xff]  ;;  %v5636_v52 = vld [vmem:[%s6700_s5 + $0xab] sm:$0xff] }
 0x1b7   : > { %v1190_v61 = vpop.permute.xlu1 %1189  ;;  %v1188_v62 = vpop.permute.xlu0 %1187 }
 0x1b8   : > { %1265 = vst.msk [vmem:[#allocation2 + $0xa8] sm:$0xff] %vm1243_vm6, %v1190_v61  ;;  %1264 = vst.msk [vmem:[#allocation2 + $0xa0] sm:$0xff] %vm1243_vm6, %v1188_v62 }
 0x1b9   : > { %1563 = vrot.lane.b32.xlu1 %v5607_v59, %s6564_s12  ;;  %1561 = vrot.lane.b32.xlu0 %v5606_v60, %s6564_s12  ;;  %v5639_v59 = vld [vmem:[%s6700_s5 + $0xcb] sm:$0xff]  ;;  %v5638_v60 = vld [vmem:[%s6700_s5 + $0xc3] sm:$0xff] }
 0x1bb   : > { %v1194_v1 = vpop.permute.xlu1 %1193  ;;  %v1192_v2 = vpop.permute.xlu0 %1191 }
 0x1bc   : > { %1267 = vst.msk [vmem:[#allocation2 + $0xb8] sm:$0xff] %vm1243_vm6, %v1194_v1  ;;  %1266 = vst.msk [vmem:[#allocation2 + $0xb0] sm:$0xff] %vm1243_vm6, %v1192_v2 }
 0x1bd   : > { %1567 = vrot.lane.b32.xlu1 %v5609_v63, %s6564_s12  ;;  %1565 = vrot.lane.b32.xlu0 %v5608_v0, %s6564_s12  ;;  %v5641_v63 = vld [vmem:[%s6700_s5 + $0xe3] sm:$0xff]  ;;  %v5640_v0 = vld [vmem:[%s6700_s5 + $0xdb] sm:$0xff] }
 0x1bf   : > { %v1198_v19 = vpop.permute.xlu1 %1197  ;;  %v1196_v20 = vpop.permute.xlu0 %1195 }
 0x1c0   : > { %1269 = vst.msk [vmem:[#allocation2 + $0xc8] sm:$0xff] %vm1243_vm6, %v1198_v19  ;;  %1268 = vst.msk [vmem:[#allocation2 + $0xc0] sm:$0xff] %vm1243_vm6, %v1196_v20 }
 0x1c1   : > { %1571 = vrot.lane.b32.xlu1 %v5611_v13, %s6564_s12  ;;  %1569 = vrot.lane.b32.xlu0 %v5610_v17, %s6564_s12  ;;  %v5643_v13 = vld [vmem:[%s6700_s5 + $0xfb] sm:$0xff]  ;;  %v5642_v17 = vld [vmem:[%s6700_s5 + $0xf3] sm:$0xff] }
 0x1c3   : > { %v1202_v25 = vpop.permute.xlu1 %1201  ;;  %v1200_v26 = vpop.permute.xlu0 %1199 }
 0x1c4   : > { %1271 = vst.msk [vmem:[#allocation2 + $0xd8] sm:$0xff] %vm1243_vm6, %v1202_v25  ;;  %1270 = vst.msk [vmem:[#allocation2 + $0xd0] sm:$0xff] %vm1243_vm6, %v1200_v26 }
 0x1c5   : > { %1575 = vrot.lane.b32.xlu1 %v5613_v21, %s6564_s12  ;;  %1573 = vrot.lane.b32.xlu0 %v5612_v24, %s6564_s12  ;;  %v5645_v21 = vld [vmem:[%s6700_s5 + $0x113] sm:$0xff]  ;;  %v5644_v24 = vld [vmem:[%s6700_s5 + $0x10b] sm:$0xff] }
 0x1c7   : > { %v1206_v31 = vpop.permute.xlu1 %1205  ;;  %v1204_v32 = vpop.permute.xlu0 %1203 }
 0x1c8   : > { %1273 = vst.msk [vmem:[#allocation2 + $0xe8] sm:$0xff] %vm1243_vm6, %v1206_v31  ;;  %1272 = vst.msk [vmem:[#allocation2 + $0xe0] sm:$0xff] %vm1243_vm6, %v1204_v32 }
 0x1c9   : > { %1579 = vrot.lane.b32.xlu1 %v5615_v27, %s6564_s12  ;;  %1577 = vrot.lane.b32.xlu0 %v5614_v28, %s6564_s12  ;;  %v5647_v27 = vld [vmem:[%s6700_s5 + $0x12b] sm:$0xff]  ;;  %v5646_v28 = vld [vmem:[%s6700_s5 + $0x123] sm:$0xff] }
 0x1cb   : > { %v1210_v35 = vpop.permute.xlu1 %1209  ;;  %v1208_v37 = vpop.permute.xlu0 %1207 }
 0x1cc   : > { %1275 = vst.msk [vmem:[#allocation2 + $0xf8] sm:$0xff] %vm1243_vm6, %v1210_v35  ;;  %1274 = vst.msk [vmem:[#allocation2 + $0xf0] sm:$0xff] %vm1243_vm6, %v1208_v37  ;;  %vm4334_vm6 = vcmask 720544  }
 0x1cd   : > { %1583 = vrot.lane.b32.xlu1 %v5617_v33, %s6564_s12  ;;  %1581 = vrot.lane.b32.xlu0 %v5616_v34, %s6564_s12  ;;  %v5649_v33 = vld [vmem:[%s6700_s5 + $0x143] sm:$0xff]  ;;  %v5648_v34 = vld [vmem:[%s6700_s5 + $0x13b] sm:$0xff] }
 0x1cf   : > { %v1343_v41 = vpop.permute.xlu1 %1342  ;;  %v1341_v42 = vpop.permute.xlu0 %1340 }
 0x1d0   : > { %1438 = vst.msk [vmem:[#allocation2 + $0x8] sm:$0xff] %vm1436_vm7, %v1343_v41  ;;  %1437 = vst.msk [vmem:[#allocation2] sm:$0xff] %vm1436_vm7, %v1341_v42 }
 0x1d1   : > { %1587 = vrot.lane.b32.xlu1 %v5619_v39, %s6564_s12  ;;  %1585 = vrot.lane.b32.xlu0 %v5618_v40, %s6564_s12  ;;  %v5651_v39 = vld [vmem:[%s6700_s5 + $0x15b] sm:$0xff]  ;;  %v5650_v40 = vld [vmem:[%s6700_s5 + $0x153] sm:$0xff] }
 0x1d3   : > { %v1347_v47 = vpop.permute.xlu1 %1346  ;;  %v1345_v48 = vpop.permute.xlu0 %1344 }
 0x1d4   : > { %1440 = vst.msk [vmem:[#allocation2 + $0x18] sm:$0xff] %vm1436_vm7, %v1347_v47  ;;  %1439 = vst.msk [vmem:[#allocation2 + $0x10] sm:$0xff] %vm1436_vm7, %v1345_v48 }
 0x1d5   : > { %1591 = vrot.lane.b32.xlu1 %v5621_v43, %s6564_s12  ;;  %1589 = vrot.lane.b32.xlu0 %v5620_v44, %s6564_s12  ;;  %v5653_v43 = vld [vmem:[%s6700_s5 + $0x173] sm:$0xff]  ;;  %v5652_v44 = vld [vmem:[%s6700_s5 + $0x16b] sm:$0xff] }
 0x1d7   : > { %v1351_v54 = vpop.permute.xlu1 %1350  ;;  %v1349_v3 = vpop.permute.xlu0 %1348 }
 0x1d8   : > { %1442 = vst.msk [vmem:[#allocation2 + $0x28] sm:$0xff] %vm1436_vm7, %v1351_v54  ;;  %1441 = vst.msk [vmem:[#allocation2 + $0x20] sm:$0xff] %vm1436_vm7, %v1349_v3 }
 0x1d9   : > { %1595 = vrot.lane.b32.xlu1 %v5623_v49, %s6564_s12  ;;  %1593 = vrot.lane.b32.xlu0 %v5622_v50, %s6564_s12  ;;  %v5655_v49 = vld [vmem:[%s6700_s5 + $0x18b] sm:$0xff]  ;;  %v5654_v50 = vld [vmem:[%s6700_s5 + $0x183] sm:$0xff] }
 0x1db   : > { %v1355_v58 = vpop.permute.xlu1 %1354  ;;  %v1353_v57 = vpop.permute.xlu0 %1352 }
 0x1dc   : > { %1444 = vst.msk [vmem:[#allocation2 + $0x38] sm:$0xff] %vm1436_vm7, %v1355_v58  ;;  %1443 = vst.msk [vmem:[#allocation2 + $0x30] sm:$0xff] %vm1436_vm7, %v1353_v57 }
 0x1dd   : > { %1728 = vrot.lane.b32.xlu1 %v5625_v53, %s6565_s13  ;;  %1726 = vrot.lane.b32.xlu0 %v5624_v4, %s6565_s13  ;;  %v5657_v53 = vld [vmem:[%s6700_s5 + $0x24] sm:$0xff]  ;;  %v5656_v4 = vld [vmem:[%s6700_s5 + $0x1c] sm:$0xff] }
 0x1df   : > { %v1359_v7 = vpop.permute.xlu1 %1358  ;;  %v1357_v8 = vpop.permute.xlu0 %1356 }
 0x1e0   : > { %1446 = vst.msk [vmem:[#allocation2 + $0x48] sm:$0xff] %vm1436_vm7, %v1359_v7  ;;  %1445 = vst.msk [vmem:[#allocation2 + $0x40] sm:$0xff] %vm1436_vm7, %v1357_v8 }
 0x1e1   : > { %1732 = vrot.lane.b32.xlu1 %v5627_v5, %s6565_s13  ;;  %1730 = vrot.lane.b32.xlu0 %v5626_v6, %s6565_s13  ;;  %v5659_v5 = vld [vmem:[%s6700_s5 + $0x3c] sm:$0xff]  ;;  %v5658_v6 = vld [vmem:[%s6700_s5 + $0x34] sm:$0xff] }
 0x1e3   : > { %v1363_v11 = vpop.permute.xlu1 %1362  ;;  %v1361_v12 = vpop.permute.xlu0 %1360 }
 0x1e4   : > { %1448 = vst.msk [vmem:[#allocation2 + $0x58] sm:$0xff] %vm1436_vm7, %v1363_v11  ;;  %1447 = vst.msk [vmem:[#allocation2 + $0x50] sm:$0xff] %vm1436_vm7, %v1361_v12 }
 0x1e5   : > { %1736 = vrot.lane.b32.xlu1 %v5629_v9, %s6565_s13  ;;  %1734 = vrot.lane.b32.xlu0 %v5628_v10, %s6565_s13  ;;  %v5661_v9 = vld [vmem:[%s6700_s5 + $0x54] sm:$0xff]  ;;  %v5660_v10 = vld [vmem:[%s6700_s5 + $0x4c] sm:$0xff] }
 0x1e7   : > { %v1367_v16 = vpop.permute.xlu1 %1366  ;;  %v1365_v18 = vpop.permute.xlu0 %1364 }
 0x1e8   : > { %1450 = vst.msk [vmem:[#allocation2 + $0x68] sm:$0xff] %vm1436_vm7, %v1367_v16  ;;  %1449 = vst.msk [vmem:[#allocation2 + $0x60] sm:$0xff] %vm1436_vm7, %v1365_v18 }
 0x1e9   : > { %1740 = vrot.lane.b32.xlu1 %v5631_v14, %s6565_s13  ;;  %1738 = vrot.lane.b32.xlu0 %v5630_v15, %s6565_s13  ;;  %v5663_v14 = vld [vmem:[%s6700_s5 + $0x6c] sm:$0xff]  ;;  %v5662_v15 = vld [vmem:[%s6700_s5 + $0x64] sm:$0xff] }
 0x1eb   : > { %v1371_v29 = vpop.permute.xlu1 %1370  ;;  %v1369_v30 = vpop.permute.xlu0 %1368 }
 0x1ec   : > { %1452 = vst.msk [vmem:[#allocation2 + $0x78] sm:$0xff] %vm1436_vm7, %v1371_v29  ;;  %1451 = vst.msk [vmem:[#allocation2 + $0x70] sm:$0xff] %vm1436_vm7, %v1369_v30 }
 0x1ed   : > { %1744 = vrot.lane.b32.xlu1 %v5633_v22, %s6565_s13  ;;  %1742 = vrot.lane.b32.xlu0 %v5632_v23, %s6565_s13  ;;  %v5665_v22 = vld [vmem:[%s6700_s5 + $0x84] sm:$0xff]  ;;  %v5664_v23 = vld [vmem:[%s6700_s5 + $0x7c] sm:$0xff] }
 0x1ef   : > { %v1375_v45 = vpop.permute.xlu1 %1374  ;;  %v1373_v46 = vpop.permute.xlu0 %1372 }
 0x1f0   : > { %1454 = vst.msk [vmem:[#allocation2 + $0x88] sm:$0xff] %vm1436_vm7, %v1375_v45  ;;  %1453 = vst.msk [vmem:[#allocation2 + $0x80] sm:$0xff] %vm1436_vm7, %v1373_v46 }
 0x1f1   : > { %1748 = vrot.lane.b32.xlu1 %v5635_v36, %s6565_s13  ;;  %1746 = vrot.lane.b32.xlu0 %v5634_v38, %s6565_s13  ;;  %v5667_v36 = vld [vmem:[%s6700_s5 + $0x9c] sm:$0xff]  ;;  %v5666_v38 = vld [vmem:[%s6700_s5 + $0x94] sm:$0xff] }
 0x1f3   : > { %v1379_v55 = vpop.permute.xlu1 %1378  ;;  %v1377_v56 = vpop.permute.xlu0 %1376 }
 0x1f4   : > { %1456 = vst.msk [vmem:[#allocation2 + $0x98] sm:$0xff] %vm1436_vm7, %v1379_v55  ;;  %1455 = vst.msk [vmem:[#allocation2 + $0x90] sm:$0xff] %vm1436_vm7, %v1377_v56 }
 0x1f5   : > { %1752 = vrot.lane.b32.xlu1 %v5637_v51, %s6565_s13  ;;  %1750 = vrot.lane.b32.xlu0 %v5636_v52, %s6565_s13  ;;  %v5669_v51 = vld [vmem:[%s6700_s5 + $0xb4] sm:$0xff]  ;;  %v5668_v52 = vld [vmem:[%s6700_s5 + $0xac] sm:$0xff] }
 0x1f7   : > { %v1383_v61 = vpop.permute.xlu1 %1382  ;;  %v1381_v62 = vpop.permute.xlu0 %1380 }
 0x1f8   : > { %1458 = vst.msk [vmem:[#allocation2 + $0xa8] sm:$0xff] %vm1436_vm7, %v1383_v61  ;;  %1457 = vst.msk [vmem:[#allocation2 + $0xa0] sm:$0xff] %vm1436_vm7, %v1381_v62 }
 0x1f9   : > { %1756 = vrot.lane.b32.xlu1 %v5639_v59, %s6565_s13  ;;  %1754 = vrot.lane.b32.xlu0 %v5638_v60, %s6565_s13  ;;  %v5671_v59 = vld [vmem:[%s6700_s5 + $0xcc] sm:$0xff]  ;;  %v5670_v60 = vld [vmem:[%s6700_s5 + $0xc4] sm:$0xff] }
 0x1fb   : > { %v1387_v1 = vpop.permute.xlu1 %1386  ;;  %v1385_v2 = vpop.permute.xlu0 %1384 }
 0x1fc   : > { %1460 = vst.msk [vmem:[#allocation2 + $0xb8] sm:$0xff] %vm1436_vm7, %v1387_v1  ;;  %1459 = vst.msk [vmem:[#allocation2 + $0xb0] sm:$0xff] %vm1436_vm7, %v1385_v2 }
 0x1fd   : > { %1760 = vrot.lane.b32.xlu1 %v5641_v63, %s6565_s13  ;;  %1758 = vrot.lane.b32.xlu0 %v5640_v0, %s6565_s13  ;;  %v5673_v63 = vld [vmem:[%s6700_s5 + $0xe4] sm:$0xff]  ;;  %v5672_v0 = vld [vmem:[%s6700_s5 + $0xdc] sm:$0xff] }
 0x1ff   : > { %v1391_v19 = vpop.permute.xlu1 %1390  ;;  %v1389_v20 = vpop.permute.xlu0 %1388 }
 0x200   : > { %1462 = vst.msk [vmem:[#allocation2 + $0xc8] sm:$0xff] %vm1436_vm7, %v1391_v19  ;;  %1461 = vst.msk [vmem:[#allocation2 + $0xc0] sm:$0xff] %vm1436_vm7, %v1389_v20 }
 0x201   : > { %1764 = vrot.lane.b32.xlu1 %v5643_v13, %s6565_s13  ;;  %1762 = vrot.lane.b32.xlu0 %v5642_v17, %s6565_s13  ;;  %v5675_v13 = vld [vmem:[%s6700_s5 + $0xfc] sm:$0xff]  ;;  %v5674_v17 = vld [vmem:[%s6700_s5 + $0xf4] sm:$0xff] }
 0x203   : > { %v1395_v25 = vpop.permute.xlu1 %1394  ;;  %v1393_v26 = vpop.permute.xlu0 %1392 }
 0x204   : > { %1464 = vst.msk [vmem:[#allocation2 + $0xd8] sm:$0xff] %vm1436_vm7, %v1395_v25  ;;  %1463 = vst.msk [vmem:[#allocation2 + $0xd0] sm:$0xff] %vm1436_vm7, %v1393_v26 }
 0x205   : > { %1768 = vrot.lane.b32.xlu1 %v5645_v21, %s6565_s13  ;;  %1766 = vrot.lane.b32.xlu0 %v5644_v24, %s6565_s13  ;;  %v5677_v21 = vld [vmem:[%s6700_s5 + $0x114] sm:$0xff]  ;;  %v5676_v24 = vld [vmem:[%s6700_s5 + $0x10c] sm:$0xff] }
 0x207   : > { %v1399_v31 = vpop.permute.xlu1 %1398  ;;  %v1397_v32 = vpop.permute.xlu0 %1396 }
 0x208   : > { %1466 = vst.msk [vmem:[#allocation2 + $0xe8] sm:$0xff] %vm1436_vm7, %v1399_v31  ;;  %1465 = vst.msk [vmem:[#allocation2 + $0xe0] sm:$0xff] %vm1436_vm7, %v1397_v32 }
 0x209   : > { %1772 = vrot.lane.b32.xlu1 %v5647_v27, %s6565_s13  ;;  %1770 = vrot.lane.b32.xlu0 %v5646_v28, %s6565_s13  ;;  %v5679_v27 = vld [vmem:[%s6700_s5 + $0x12c] sm:$0xff]  ;;  %v5678_v28 = vld [vmem:[%s6700_s5 + $0x124] sm:$0xff] }
 0x20b   : > { %v1403_v35 = vpop.permute.xlu1 %1402  ;;  %v1401_v37 = vpop.permute.xlu0 %1400 }
 0x20c   : > { %1468 = vst.msk [vmem:[#allocation2 + $0xf8] sm:$0xff] %vm1436_vm7, %v1403_v35  ;;  %1467 = vst.msk [vmem:[#allocation2 + $0xf0] sm:$0xff] %vm1436_vm7, %v1401_v37  ;;  %vm4527_vm7 = vcmask 753344  }
 0x20d   : > { %1776 = vrot.lane.b32.xlu1 %v5649_v33, %s6565_s13  ;;  %1774 = vrot.lane.b32.xlu0 %v5648_v34, %s6565_s13  ;;  %v5681_v33 = vld [vmem:[%s6700_s5 + $0x144] sm:$0xff]  ;;  %v5680_v34 = vld [vmem:[%s6700_s5 + $0x13c] sm:$0xff] }
 0x20f   : > { %v1536_v41 = vpop.permute.xlu1 %1535  ;;  %v1534_v42 = vpop.permute.xlu0 %1533 }
 0x210   : > { %1631 = vst.msk [vmem:[#allocation2 + $0x8] sm:$0xff] %vm1629_vm8, %v1536_v41  ;;  %1630 = vst.msk [vmem:[#allocation2] sm:$0xff] %vm1629_vm8, %v1534_v42 }
 0x211   : > { %1780 = vrot.lane.b32.xlu1 %v5651_v39, %s6565_s13  ;;  %1778 = vrot.lane.b32.xlu0 %v5650_v40, %s6565_s13  ;;  %v5683_v39 = vld [vmem:[%s6700_s5 + $0x15c] sm:$0xff]  ;;  %v5682_v40 = vld [vmem:[%s6700_s5 + $0x154] sm:$0xff] }
 0x213   : > { %v1540_v47 = vpop.permute.xlu1 %1539  ;;  %v1538_v48 = vpop.permute.xlu0 %1537 }
 0x214   : > { %1633 = vst.msk [vmem:[#allocation2 + $0x18] sm:$0xff] %vm1629_vm8, %v1540_v47  ;;  %1632 = vst.msk [vmem:[#allocation2 + $0x10] sm:$0xff] %vm1629_vm8, %v1538_v48 }
 0x215   : > { %1784 = vrot.lane.b32.xlu1 %v5653_v43, %s6565_s13  ;;  %1782 = vrot.lane.b32.xlu0 %v5652_v44, %s6565_s13  ;;  %v5685_v43 = vld [vmem:[%s6700_s5 + $0x174] sm:$0xff]  ;;  %v5684_v44 = vld [vmem:[%s6700_s5 + $0x16c] sm:$0xff] }
 0x217   : > { %v1544_v54 = vpop.permute.xlu1 %1543  ;;  %v1542_v3 = vpop.permute.xlu0 %1541 }
 0x218   : > { %1635 = vst.msk [vmem:[#allocation2 + $0x28] sm:$0xff] %vm1629_vm8, %v1544_v54  ;;  %1634 = vst.msk [vmem:[#allocation2 + $0x20] sm:$0xff] %vm1629_vm8, %v1542_v3 }
 0x219   : > { %1788 = vrot.lane.b32.xlu1 %v5655_v49, %s6565_s13  ;;  %1786 = vrot.lane.b32.xlu0 %v5654_v50, %s6565_s13  ;;  %v5687_v49 = vld [vmem:[%s6700_s5 + $0x18c] sm:$0xff]  ;;  %v5686_v50 = vld [vmem:[%s6700_s5 + $0x184] sm:$0xff] }
 0x21b   : > { %v1548_v58 = vpop.permute.xlu1 %1547  ;;  %v1546_v57 = vpop.permute.xlu0 %1545 }
 0x21c   : > { %1637 = vst.msk [vmem:[#allocation2 + $0x38] sm:$0xff] %vm1629_vm8, %v1548_v58  ;;  %1636 = vst.msk [vmem:[#allocation2 + $0x30] sm:$0xff] %vm1629_vm8, %v1546_v57 }
 0x21d   : > { %1921 = vrot.lane.b32.xlu1 %v5657_v53, %s6566_s14  ;;  %1919 = vrot.lane.b32.xlu0 %v5656_v4, %s6566_s14  ;;  %v5689_v53 = vld [vmem:[%s6700_s5 + $0x38] sm:$0xff]  ;;  %v5688_v4 = vld [vmem:[%s6700_s5 + $0x30] sm:$0xff] }
 0x21f   : > { %v1552_v7 = vpop.permute.xlu1 %1551  ;;  %v1550_v8 = vpop.permute.xlu0 %1549 }
 0x220   : > { %1639 = vst.msk [vmem:[#allocation2 + $0x48] sm:$0xff] %vm1629_vm8, %v1552_v7  ;;  %1638 = vst.msk [vmem:[#allocation2 + $0x40] sm:$0xff] %vm1629_vm8, %v1550_v8 }
 0x221   : > { %1925 = vrot.lane.b32.xlu1 %v5659_v5, %s6566_s14  ;;  %1923 = vrot.lane.b32.xlu0 %v5658_v6, %s6566_s14  ;;  %v5691_v5 = vld [vmem:[%s6700_s5 + $0x50] sm:$0xff]  ;;  %v5690_v6 = vld [vmem:[%s6700_s5 + $0x48] sm:$0xff] }
 0x223   : > { %v1556_v11 = vpop.permute.xlu1 %1555  ;;  %v1554_v12 = vpop.permute.xlu0 %1553 }
 0x224   : > { %1641 = vst.msk [vmem:[#allocation2 + $0x58] sm:$0xff] %vm1629_vm8, %v1556_v11  ;;  %1640 = vst.msk [vmem:[#allocation2 + $0x50] sm:$0xff] %vm1629_vm8, %v1554_v12 }
 0x225   : > { %1929 = vrot.lane.b32.xlu1 %v5661_v9, %s6566_s14  ;;  %1927 = vrot.lane.b32.xlu0 %v5660_v10, %s6566_s14  ;;  %v5693_v9 = vld [vmem:[%s6700_s5 + $0x68] sm:$0xff]  ;;  %v5692_v10 = vld [vmem:[%s6700_s5 + $0x60] sm:$0xff] }
 0x227   : > { %v1560_v16 = vpop.permute.xlu1 %1559  ;;  %v1558_v18 = vpop.permute.xlu0 %1557 }
 0x228   : > { %1643 = vst.msk [vmem:[#allocation2 + $0x68] sm:$0xff] %vm1629_vm8, %v1560_v16  ;;  %1642 = vst.msk [vmem:[#allocation2 + $0x60] sm:$0xff] %vm1629_vm8, %v1558_v18 }
 0x229   : > { %1933 = vrot.lane.b32.xlu1 %v5663_v14, %s6566_s14  ;;  %1931 = vrot.lane.b32.xlu0 %v5662_v15, %s6566_s14  ;;  %v5695_v14 = vld [vmem:[%s6700_s5 + $0x80] sm:$0xff]  ;;  %v5694_v15 = vld [vmem:[%s6700_s5 + $0x78] sm:$0xff] }
 0x22b   : > { %v1564_v29 = vpop.permute.xlu1 %1563  ;;  %v1562_v30 = vpop.permute.xlu0 %1561 }
 0x22c   : > { %1645 = vst.msk [vmem:[#allocation2 + $0x78] sm:$0xff] %vm1629_vm8, %v1564_v29  ;;  %1644 = vst.msk [vmem:[#allocation2 + $0x70] sm:$0xff] %vm1629_vm8, %v1562_v30 }
 0x22d   : > { %1937 = vrot.lane.b32.xlu1 %v5665_v22, %s6566_s14  ;;  %1935 = vrot.lane.b32.xlu0 %v5664_v23, %s6566_s14  ;;  %v5697_v22 = vld [vmem:[%s6700_s5 + $0x98] sm:$0xff]  ;;  %v5696_v23 = vld [vmem:[%s6700_s5 + $0x90] sm:$0xff] }
 0x22f   : > { %v1568_v45 = vpop.permute.xlu1 %1567  ;;  %v1566_v46 = vpop.permute.xlu0 %1565 }
 0x230   : > { %1647 = vst.msk [vmem:[#allocation2 + $0x88] sm:$0xff] %vm1629_vm8, %v1568_v45  ;;  %1646 = vst.msk [vmem:[#allocation2 + $0x80] sm:$0xff] %vm1629_vm8, %v1566_v46 }
 0x231   : > { %1941 = vrot.lane.b32.xlu1 %v5667_v36, %s6566_s14  ;;  %1939 = vrot.lane.b32.xlu0 %v5666_v38, %s6566_s14  ;;  %v5699_v36 = vld [vmem:[%s6700_s5 + $0xb0] sm:$0xff]  ;;  %v5698_v38 = vld [vmem:[%s6700_s5 + $0xa8] sm:$0xff] }
 0x233   : > { %v1572_v55 = vpop.permute.xlu1 %1571  ;;  %v1570_v56 = vpop.permute.xlu0 %1569 }
 0x234   : > { %1649 = vst.msk [vmem:[#allocation2 + $0x98] sm:$0xff] %vm1629_vm8, %v1572_v55  ;;  %1648 = vst.msk [vmem:[#allocation2 + $0x90] sm:$0xff] %vm1629_vm8, %v1570_v56 }
 0x235   : > { %1945 = vrot.lane.b32.xlu1 %v5669_v51, %s6566_s14  ;;  %1943 = vrot.lane.b32.xlu0 %v5668_v52, %s6566_s14  ;;  %v5701_v51 = vld [vmem:[%s6700_s5 + $0xc8] sm:$0xff]  ;;  %v5700_v52 = vld [vmem:[%s6700_s5 + $0xc0] sm:$0xff] }
 0x237   : > { %v1576_v61 = vpop.permute.xlu1 %1575  ;;  %v1574_v62 = vpop.permute.xlu0 %1573 }
 0x238   : > { %1651 = vst.msk [vmem:[#allocation2 + $0xa8] sm:$0xff] %vm1629_vm8, %v1576_v61  ;;  %1650 = vst.msk [vmem:[#allocation2 + $0xa0] sm:$0xff] %vm1629_vm8, %v1574_v62 }
 0x239   : > { %1949 = vrot.lane.b32.xlu1 %v5671_v59, %s6566_s14  ;;  %1947 = vrot.lane.b32.xlu0 %v5670_v60, %s6566_s14  ;;  %v5703_v59 = vld [vmem:[%s6700_s5 + $0xe0] sm:$0xff]  ;;  %v5702_v60 = vld [vmem:[%s6700_s5 + $0xd8] sm:$0xff] }
 0x23b   : > { %v1580_v1 = vpop.permute.xlu1 %1579  ;;  %v1578_v2 = vpop.permute.xlu0 %1577 }
 0x23c   : > { %1653 = vst.msk [vmem:[#allocation2 + $0xb8] sm:$0xff] %vm1629_vm8, %v1580_v1  ;;  %1652 = vst.msk [vmem:[#allocation2 + $0xb0] sm:$0xff] %vm1629_vm8, %v1578_v2 }
 0x23d   : > { %1953 = vrot.lane.b32.xlu1 %v5673_v63, %s6566_s14  ;;  %1951 = vrot.lane.b32.xlu0 %v5672_v0, %s6566_s14  ;;  %v5705_v63 = vld [vmem:[%s6700_s5 + $0xf8] sm:$0xff]  ;;  %v5704_v0 = vld [vmem:[%s6700_s5 + $0xf0] sm:$0xff] }
 0x23f   : > { %v1584_v19 = vpop.permute.xlu1 %1583  ;;  %v1582_v20 = vpop.permute.xlu0 %1581 }
 0x240   : > { %1655 = vst.msk [vmem:[#allocation2 + $0xc8] sm:$0xff] %vm1629_vm8, %v1584_v19  ;;  %1654 = vst.msk [vmem:[#allocation2 + $0xc0] sm:$0xff] %vm1629_vm8, %v1582_v20 }
 0x241   : > { %1957 = vrot.lane.b32.xlu1 %v5675_v13, %s6566_s14  ;;  %1955 = vrot.lane.b32.xlu0 %v5674_v17, %s6566_s14  ;;  %v5707_v13 = vld [vmem:[%s6700_s5 + $0x110] sm:$0xff]  ;;  %v5706_v17 = vld [vmem:[%s6700_s5 + $0x108] sm:$0xff] }
 0x243   : > { %v1588_v25 = vpop.permute.xlu1 %1587  ;;  %v1586_v26 = vpop.permute.xlu0 %1585 }
 0x244   : > { %1657 = vst.msk [vmem:[#allocation2 + $0xd8] sm:$0xff] %vm1629_vm8, %v1588_v25  ;;  %1656 = vst.msk [vmem:[#allocation2 + $0xd0] sm:$0xff] %vm1629_vm8, %v1586_v26 }
 0x245   : > { %1961 = vrot.lane.b32.xlu1 %v5677_v21, %s6566_s14  ;;  %1959 = vrot.lane.b32.xlu0 %v5676_v24, %s6566_s14  ;;  %v5709_v21 = vld [vmem:[%s6700_s5 + $0x128] sm:$0xff]  ;;  %v5708_v24 = vld [vmem:[%s6700_s5 + $0x120] sm:$0xff] }
 0x247   : > { %v1592_v31 = vpop.permute.xlu1 %1591  ;;  %v1590_v32 = vpop.permute.xlu0 %1589 }
 0x248   : > { %1659 = vst.msk [vmem:[#allocation2 + $0xe8] sm:$0xff] %vm1629_vm8, %v1592_v31  ;;  %1658 = vst.msk [vmem:[#allocation2 + $0xe0] sm:$0xff] %vm1629_vm8, %v1590_v32 }
 0x249   : > { %1965 = vrot.lane.b32.xlu1 %v5679_v27, %s6566_s14  ;;  %1963 = vrot.lane.b32.xlu0 %v5678_v28, %s6566_s14  ;;  %v5711_v27 = vld [vmem:[%s6700_s5 + $0x140] sm:$0xff]  ;;  %v5710_v28 = vld [vmem:[%s6700_s5 + $0x138] sm:$0xff] }
 0x24b   : > { %v1596_v35 = vpop.permute.xlu1 %1595  ;;  %v1594_v37 = vpop.permute.xlu0 %1593 }
 0x24c   : > { %1661 = vst.msk [vmem:[#allocation2 + $0xf8] sm:$0xff] %vm1629_vm8, %v1596_v35  ;;  %1660 = vst.msk [vmem:[#allocation2 + $0xf0] sm:$0xff] %vm1629_vm8, %v1594_v37  ;;  %vm4720_vm8 = vcmask 786144  }
 0x24d   : > { %1969 = vrot.lane.b32.xlu1 %v5681_v33, %s6566_s14  ;;  %1967 = vrot.lane.b32.xlu0 %v5680_v34, %s6566_s14  ;;  %v5713_v33 = vld [vmem:[%s6700_s5 + $0x158] sm:$0xff]  ;;  %v5712_v34 = vld [vmem:[%s6700_s5 + $0x150] sm:$0xff] }
 0x24f   : > { %v1729_v41 = vpop.permute.xlu1 %1728  ;;  %v1727_v42 = vpop.permute.xlu0 %1726 }
 0x250   : > { %1824 = vst.msk [vmem:[#allocation2 + $0x8] sm:$0xff] %vm1822_vm9, %v1729_v41  ;;  %1823 = vst.msk [vmem:[#allocation2] sm:$0xff] %vm1822_vm9, %v1727_v42 }
 0x251   : > { %1973 = vrot.lane.b32.xlu1 %v5683_v39, %s6566_s14  ;;  %1971 = vrot.lane.b32.xlu0 %v5682_v40, %s6566_s14  ;;  %v5715_v39 = vld [vmem:[%s6700_s5 + $0x170] sm:$0xff]  ;;  %v5714_v40 = vld [vmem:[%s6700_s5 + $0x168] sm:$0xff] }
 0x253   : > { %v1733_v47 = vpop.permute.xlu1 %1732  ;;  %v1731_v48 = vpop.permute.xlu0 %1730 }
 0x254   : > { %1826 = vst.msk [vmem:[#allocation2 + $0x18] sm:$0xff] %vm1822_vm9, %v1733_v47  ;;  %1825 = vst.msk [vmem:[#allocation2 + $0x10] sm:$0xff] %vm1822_vm9, %v1731_v48 }
 0x255   : > { %1977 = vrot.lane.b32.xlu1 %v5685_v43, %s6566_s14  ;;  %1975 = vrot.lane.b32.xlu0 %v5684_v44, %s6566_s14  ;;  %v5717_v43 = vld [vmem:[%s6700_s5 + $0x188] sm:$0xff]  ;;  %v5716_v44 = vld [vmem:[%s6700_s5 + $0x180] sm:$0xff] }
 0x257   : > { %v1737_v54 = vpop.permute.xlu1 %1736  ;;  %v1735_v3 = vpop.permute.xlu0 %1734 }
 0x258   : > { %1828 = vst.msk [vmem:[#allocation2 + $0x28] sm:$0xff] %vm1822_vm9, %v1737_v54  ;;  %1827 = vst.msk [vmem:[#allocation2 + $0x20] sm:$0xff] %vm1822_vm9, %v1735_v3 }
 0x259   : > { %1981 = vrot.lane.b32.xlu1 %v5687_v49, %s6566_s14  ;;  %1979 = vrot.lane.b32.xlu0 %v5686_v50, %s6566_s14  ;;  %v5719_v49 = vld [vmem:[%s6700_s5 + $0x1a0] sm:$0xff]  ;;  %v5718_v50 = vld [vmem:[%s6700_s5 + $0x198] sm:$0xff]  ;;  %s6577_s14 = smov 80  }
 0x25b   : > { %v1741_v58 = vpop.permute.xlu1 %1740  ;;  %v1739_v57 = vpop.permute.xlu0 %1738 }
 0x25c   : > { %1830 = vst.msk [vmem:[#allocation2 + $0x38] sm:$0xff] %vm1822_vm9, %v1741_v58  ;;  %1829 = vst.msk [vmem:[#allocation2 + $0x30] sm:$0xff] %vm1822_vm9, %v1739_v57 }
 0x25d   : > { %2115 = vrot.lane.b32.xlu1 %v5689_v53, %s6567_s22  ;;  %2113 = vrot.lane.b32.xlu0 %v5688_v4, %s6567_s22  ;;  %v5721_v53 = vld [vmem:[%s6700_s5 + $0x39] sm:$0xff]  ;;  %v5720_v4 = vld [vmem:[%s6700_s5 + $0x31] sm:$0xff] }
 0x25f   : > { %v1745_v7 = vpop.permute.xlu1 %1744  ;;  %v1743_v8 = vpop.permute.xlu0 %1742 }
 0x260   : > { %1832 = vst.msk [vmem:[#allocation2 + $0x48] sm:$0xff] %vm1822_vm9, %v1745_v7  ;;  %1831 = vst.msk [vmem:[#allocation2 + $0x40] sm:$0xff] %vm1822_vm9, %v1743_v8 }
 0x261   : > { %2119 = vrot.lane.b32.xlu1 %v5691_v5, %s6567_s22  ;;  %2117 = vrot.lane.b32.xlu0 %v5690_v6, %s6567_s22  ;;  %v5723_v5 = vld [vmem:[%s6700_s5 + $0x51] sm:$0xff]  ;;  %v5722_v6 = vld [vmem:[%s6700_s5 + $0x49] sm:$0xff] }
 0x263   : > { %v1749_v11 = vpop.permute.xlu1 %1748  ;;  %v1747_v12 = vpop.permute.xlu0 %1746 }
 0x264   : > { %1834 = vst.msk [vmem:[#allocation2 + $0x58] sm:$0xff] %vm1822_vm9, %v1749_v11  ;;  %1833 = vst.msk [vmem:[#allocation2 + $0x50] sm:$0xff] %vm1822_vm9, %v1747_v12 }
 0x265   : > { %2123 = vrot.lane.b32.xlu1 %v5693_v9, %s6567_s22  ;;  %2121 = vrot.lane.b32.xlu0 %v5692_v10, %s6567_s22  ;;  %v5725_v9 = vld [vmem:[%s6700_s5 + $0x69] sm:$0xff]  ;;  %v5724_v10 = vld [vmem:[%s6700_s5 + $0x61] sm:$0xff] }
 0x267   : > { %v1753_v16 = vpop.permute.xlu1 %1752  ;;  %v1751_v18 = vpop.permute.xlu0 %1750 }
 0x268   : > { %1836 = vst.msk [vmem:[#allocation2 + $0x68] sm:$0xff] %vm1822_vm9, %v1753_v16  ;;  %1835 = vst.msk [vmem:[#allocation2 + $0x60] sm:$0xff] %vm1822_vm9, %v1751_v18 }
 0x269   : > { %2127 = vrot.lane.b32.xlu1 %v5695_v14, %s6567_s22  ;;  %2125 = vrot.lane.b32.xlu0 %v5694_v15, %s6567_s22  ;;  %v5727_v14 = vld [vmem:[%s6700_s5 + $0x81] sm:$0xff]  ;;  %v5726_v15 = vld [vmem:[%s6700_s5 + $0x79] sm:$0xff] }
 0x26b   : > { %v1757_v29 = vpop.permute.xlu1 %1756  ;;  %v1755_v30 = vpop.permute.xlu0 %1754 }
 0x26c   : > { %1838 = vst.msk [vmem:[#allocation2 + $0x78] sm:$0xff] %vm1822_vm9, %v1757_v29  ;;  %1837 = vst.msk [vmem:[#allocation2 + $0x70] sm:$0xff] %vm1822_vm9, %v1755_v30 }
 0x26d   : > { %2131 = vrot.lane.b32.xlu1 %v5697_v22, %s6567_s22  ;;  %2129 = vrot.lane.b32.xlu0 %v5696_v23, %s6567_s22  ;;  %v5729_v22 = vld [vmem:[%s6700_s5 + $0x99] sm:$0xff]  ;;  %v5728_v23 = vld [vmem:[%s6700_s5 + $0x91] sm:$0xff] }
 0x26f   : > { %v1761_v45 = vpop.permute.xlu1 %1760  ;;  %v1759_v46 = vpop.permute.xlu0 %1758 }
 0x270   : > { %1840 = vst.msk [vmem:[#allocation2 + $0x88] sm:$0xff] %vm1822_vm9, %v1761_v45  ;;  %1839 = vst.msk [vmem:[#allocation2 + $0x80] sm:$0xff] %vm1822_vm9, %v1759_v46 }
 0x271   : > { %2135 = vrot.lane.b32.xlu1 %v5699_v36, %s6567_s22  ;;  %2133 = vrot.lane.b32.xlu0 %v5698_v38, %s6567_s22  ;;  %v5731_v36 = vld [vmem:[%s6700_s5 + $0xb1] sm:$0xff]  ;;  %v5730_v38 = vld [vmem:[%s6700_s5 + $0xa9] sm:$0xff] }
 0x273   : > { %v1765_v55 = vpop.permute.xlu1 %1764  ;;  %v1763_v56 = vpop.permute.xlu0 %1762 }
 0x274   : > { %1842 = vst.msk [vmem:[#allocation2 + $0x98] sm:$0xff] %vm1822_vm9, %v1765_v55  ;;  %1841 = vst.msk [vmem:[#allocation2 + $0x90] sm:$0xff] %vm1822_vm9, %v1763_v56 }
 0x275   : > { %2139 = vrot.lane.b32.xlu1 %v5701_v51, %s6567_s22  ;;  %2137 = vrot.lane.b32.xlu0 %v5700_v52, %s6567_s22  ;;  %v5733_v51 = vld [vmem:[%s6700_s5 + $0xc9] sm:$0xff]  ;;  %v5732_v52 = vld [vmem:[%s6700_s5 + $0xc1] sm:$0xff] }
 0x277   : > { %v1769_v61 = vpop.permute.xlu1 %1768  ;;  %v1767_v62 = vpop.permute.xlu0 %1766 }
 0x278   : > { %1844 = vst.msk [vmem:[#allocation2 + $0xa8] sm:$0xff] %vm1822_vm9, %v1769_v61  ;;  %1843 = vst.msk [vmem:[#allocation2 + $0xa0] sm:$0xff] %vm1822_vm9, %v1767_v62 }
 0x279   : > { %2143 = vrot.lane.b32.xlu1 %v5703_v59, %s6567_s22  ;;  %2141 = vrot.lane.b32.xlu0 %v5702_v60, %s6567_s22  ;;  %v5735_v59 = vld [vmem:[%s6700_s5 + $0xe1] sm:$0xff]  ;;  %v5734_v60 = vld [vmem:[%s6700_s5 + $0xd9] sm:$0xff] }
 0x27b   : > { %v1773_v1 = vpop.permute.xlu1 %1772  ;;  %v1771_v2 = vpop.permute.xlu0 %1770 }
 0x27c   : > { %1846 = vst.msk [vmem:[#allocation2 + $0xb8] sm:$0xff] %vm1822_vm9, %v1773_v1  ;;  %1845 = vst.msk [vmem:[#allocation2 + $0xb0] sm:$0xff] %vm1822_vm9, %v1771_v2 }
 0x27d   : > { %2147 = vrot.lane.b32.xlu1 %v5705_v63, %s6567_s22  ;;  %2145 = vrot.lane.b32.xlu0 %v5704_v0, %s6567_s22  ;;  %v5737_v63 = vld [vmem:[%s6700_s5 + $0xf9] sm:$0xff]  ;;  %v5736_v0 = vld [vmem:[%s6700_s5 + $0xf1] sm:$0xff] }
 0x27f   : > { %v1777_v19 = vpop.permute.xlu1 %1776  ;;  %v1775_v20 = vpop.permute.xlu0 %1774 }
 0x280   : > { %1848 = vst.msk [vmem:[#allocation2 + $0xc8] sm:$0xff] %vm1822_vm9, %v1777_v19  ;;  %1847 = vst.msk [vmem:[#allocation2 + $0xc0] sm:$0xff] %vm1822_vm9, %v1775_v20 }
 0x281   : > { %2151 = vrot.lane.b32.xlu1 %v5707_v13, %s6567_s22  ;;  %2149 = vrot.lane.b32.xlu0 %v5706_v17, %s6567_s22  ;;  %v5739_v13 = vld [vmem:[%s6700_s5 + $0x111] sm:$0xff]  ;;  %v5738_v17 = vld [vmem:[%s6700_s5 + $0x109] sm:$0xff] }
 0x283   : > { %v1781_v25 = vpop.permute.xlu1 %1780  ;;  %v1779_v26 = vpop.permute.xlu0 %1778 }
 0x284   : > { %1850 = vst.msk [vmem:[#allocation2 + $0xd8] sm:$0xff] %vm1822_vm9, %v1781_v25  ;;  %1849 = vst.msk [vmem:[#allocation2 + $0xd0] sm:$0xff] %vm1822_vm9, %v1779_v26 }
 0x285   : > { %2155 = vrot.lane.b32.xlu1 %v5709_v21, %s6567_s22  ;;  %2153 = vrot.lane.b32.xlu0 %v5708_v24, %s6567_s22  ;;  %v5741_v21 = vld [vmem:[%s6700_s5 + $0x129] sm:$0xff]  ;;  %v5740_v24 = vld [vmem:[%s6700_s5 + $0x121] sm:$0xff] }
 0x287   : > { %v1785_v31 = vpop.permute.xlu1 %1784  ;;  %v1783_v32 = vpop.permute.xlu0 %1782 }
 0x288   : > { %1852 = vst.msk [vmem:[#allocation2 + $0xe8] sm:$0xff] %vm1822_vm9, %v1785_v31  ;;  %1851 = vst.msk [vmem:[#allocation2 + $0xe0] sm:$0xff] %vm1822_vm9, %v1783_v32 }
 0x289   : > { %2159 = vrot.lane.b32.xlu1 %v5711_v27, %s6567_s22  ;;  %2157 = vrot.lane.b32.xlu0 %v5710_v28, %s6567_s22  ;;  %v5743_v27 = vld [vmem:[%s6700_s5 + $0x141] sm:$0xff]  ;;  %v5742_v28 = vld [vmem:[%s6700_s5 + $0x139] sm:$0xff] }
 0x28b   : > { %v1789_v35 = vpop.permute.xlu1 %1788  ;;  %v1787_v37 = vpop.permute.xlu0 %1786 }
 0x28c   : > { %1854 = vst.msk [vmem:[#allocation2 + $0xf8] sm:$0xff] %vm1822_vm9, %v1789_v35  ;;  %1853 = vst.msk [vmem:[#allocation2 + $0xf0] sm:$0xff] %vm1822_vm9, %v1787_v37  ;;  %vm4913_vm9 = vcmask 818944  }
 0x28d   : > { %2163 = vrot.lane.b32.xlu1 %v5713_v33, %s6567_s22  ;;  %2161 = vrot.lane.b32.xlu0 %v5712_v34, %s6567_s22  ;;  %v5745_v33 = vld [vmem:[%s6700_s5 + $0x159] sm:$0xff]  ;;  %v5744_v34 = vld [vmem:[%s6700_s5 + $0x151] sm:$0xff] }
 0x28f   : > { %v1922_v41 = vpop.permute.xlu1 %1921  ;;  %v1920_v42 = vpop.permute.xlu0 %1919 }
 0x290   : > { %2017 = vst.msk [vmem:[#allocation2 + $0x8] sm:$0xff] %vm2015_vm10, %v1922_v41  ;;  %2016 = vst.msk [vmem:[#allocation2] sm:$0xff] %vm2015_vm10, %v1920_v42 }
 0x291   : > { %2167 = vrot.lane.b32.xlu1 %v5715_v39, %s6567_s22  ;;  %2165 = vrot.lane.b32.xlu0 %v5714_v40, %s6567_s22  ;;  %v5747_v39 = vld [vmem:[%s6700_s5 + $0x171] sm:$0xff]  ;;  %v5746_v40 = vld [vmem:[%s6700_s5 + $0x169] sm:$0xff] }
 0x293   : > { %v1926_v47 = vpop.permute.xlu1 %1925  ;;  %v1924_v48 = vpop.permute.xlu0 %1923 }
 0x294   : > { %2019 = vst.msk [vmem:[#allocation2 + $0x18] sm:$0xff] %vm2015_vm10, %v1926_v47  ;;  %2018 = vst.msk [vmem:[#allocation2 + $0x10] sm:$0xff] %vm2015_vm10, %v1924_v48 }
 0x295   : > { %2171 = vrot.lane.b32.xlu1 %v5717_v43, %s6567_s22  ;;  %2169 = vrot.lane.b32.xlu0 %v5716_v44, %s6567_s22  ;;  %v5749_v43 = vld [vmem:[%s6700_s5 + $0x189] sm:$0xff]  ;;  %v5748_v44 = vld [vmem:[%s6700_s5 + $0x181] sm:$0xff] }
 0x297   : > { %v1930_v54 = vpop.permute.xlu1 %1929  ;;  %v1928_v3 = vpop.permute.xlu0 %1927 }
 0x298   : > { %2021 = vst.msk [vmem:[#allocation2 + $0x28] sm:$0xff] %vm2015_vm10, %v1930_v54  ;;  %2020 = vst.msk [vmem:[#allocation2 + $0x20] sm:$0xff] %vm2015_vm10, %v1928_v3 }
 0x299   : > { %2175 = vrot.lane.b32.xlu1 %v5719_v49, %s6567_s22  ;;  %2173 = vrot.lane.b32.xlu0 %v5718_v50, %s6567_s22  ;;  %v5751_v49 = vld [vmem:[%s6700_s5 + $0x1a1] sm:$0xff]  ;;  %v5750_v50 = vld [vmem:[%s6700_s5 + $0x199] sm:$0xff] }
 0x29b   : > { %v1934_v58 = vpop.permute.xlu1 %1933  ;;  %v1932_v57 = vpop.permute.xlu0 %1931 }
 0x29c   : > { %2023 = vst.msk [vmem:[#allocation2 + $0x38] sm:$0xff] %vm2015_vm10, %v1934_v58  ;;  %2022 = vst.msk [vmem:[#allocation2 + $0x30] sm:$0xff] %vm2015_vm10, %v1932_v57 }
 0x29d   : > { %2308 = vrot.lane.b32.xlu1 %v5721_v53, %s6568_s23  ;;  %2306 = vrot.lane.b32.xlu0 %v5720_v4, %s6568_s23  ;;  %v5753_v53 = vld [vmem:[%s6700_s5 + $0x3a] sm:$0xff]  ;;  %v5752_v4 = vld [vmem:[%s6700_s5 + $0x32] sm:$0xff] }
 0x29f   : > { %v1938_v7 = vpop.permute.xlu1 %1937  ;;  %v1936_v8 = vpop.permute.xlu0 %1935 }
 0x2a0   : > { %2025 = vst.msk [vmem:[#allocation2 + $0x48] sm:$0xff] %vm2015_vm10, %v1938_v7  ;;  %2024 = vst.msk [vmem:[#allocation2 + $0x40] sm:$0xff] %vm2015_vm10, %v1936_v8 }
 0x2a1   : > { %2312 = vrot.lane.b32.xlu1 %v5723_v5, %s6568_s23  ;;  %2310 = vrot.lane.b32.xlu0 %v5722_v6, %s6568_s23  ;;  %v5755_v5 = vld [vmem:[%s6700_s5 + $0x52] sm:$0xff]  ;;  %v5754_v6 = vld [vmem:[%s6700_s5 + $0x4a] sm:$0xff] }
 0x2a3   : > { %v1942_v11 = vpop.permute.xlu1 %1941  ;;  %v1940_v12 = vpop.permute.xlu0 %1939 }
 0x2a4   : > { %2027 = vst.msk [vmem:[#allocation2 + $0x58] sm:$0xff] %vm2015_vm10, %v1942_v11  ;;  %2026 = vst.msk [vmem:[#allocation2 + $0x50] sm:$0xff] %vm2015_vm10, %v1940_v12 }
 0x2a5   : > { %2316 = vrot.lane.b32.xlu1 %v5725_v9, %s6568_s23  ;;  %2314 = vrot.lane.b32.xlu0 %v5724_v10, %s6568_s23  ;;  %v5757_v9 = vld [vmem:[%s6700_s5 + $0x6a] sm:$0xff]  ;;  %v5756_v10 = vld [vmem:[%s6700_s5 + $0x62] sm:$0xff] }
 0x2a7   : > { %v1946_v16 = vpop.permute.xlu1 %1945  ;;  %v1944_v18 = vpop.permute.xlu0 %1943 }
 0x2a8   : > { %2029 = vst.msk [vmem:[#allocation2 + $0x68] sm:$0xff] %vm2015_vm10, %v1946_v16  ;;  %2028 = vst.msk [vmem:[#allocation2 + $0x60] sm:$0xff] %vm2015_vm10, %v1944_v18 }
 0x2a9   : > { %2320 = vrot.lane.b32.xlu1 %v5727_v14, %s6568_s23  ;;  %2318 = vrot.lane.b32.xlu0 %v5726_v15, %s6568_s23  ;;  %v5759_v14 = vld [vmem:[%s6700_s5 + $0x82] sm:$0xff]  ;;  %v5758_v15 = vld [vmem:[%s6700_s5 + $0x7a] sm:$0xff] }
 0x2ab   : > { %v1950_v29 = vpop.permute.xlu1 %1949  ;;  %v1948_v30 = vpop.permute.xlu0 %1947 }
 0x2ac   : > { %2031 = vst.msk [vmem:[#allocation2 + $0x78] sm:$0xff] %vm2015_vm10, %v1950_v29  ;;  %2030 = vst.msk [vmem:[#allocation2 + $0x70] sm:$0xff] %vm2015_vm10, %v1948_v30 }
 0x2ad   : > { %2324 = vrot.lane.b32.xlu1 %v5729_v22, %s6568_s23  ;;  %2322 = vrot.lane.b32.xlu0 %v5728_v23, %s6568_s23  ;;  %v5761_v22 = vld [vmem:[%s6700_s5 + $0x9a] sm:$0xff]  ;;  %v5760_v23 = vld [vmem:[%s6700_s5 + $0x92] sm:$0xff] }
 0x2af   : > { %v1954_v45 = vpop.permute.xlu1 %1953  ;;  %v1952_v46 = vpop.permute.xlu0 %1951 }
 0x2b0   : > { %2033 = vst.msk [vmem:[#allocation2 + $0x88] sm:$0xff] %vm2015_vm10, %v1954_v45  ;;  %2032 = vst.msk [vmem:[#allocation2 + $0x80] sm:$0xff] %vm2015_vm10, %v1952_v46 }
 0x2b1   : > { %2328 = vrot.lane.b32.xlu1 %v5731_v36, %s6568_s23  ;;  %2326 = vrot.lane.b32.xlu0 %v5730_v38, %s6568_s23  ;;  %v5763_v36 = vld [vmem:[%s6700_s5 + $0xb2] sm:$0xff]  ;;  %v5762_v38 = vld [vmem:[%s6700_s5 + $0xaa] sm:$0xff] }
 0x2b3   : > { %v1958_v55 = vpop.permute.xlu1 %1957  ;;  %v1956_v56 = vpop.permute.xlu0 %1955 }
 0x2b4   : > { %2035 = vst.msk [vmem:[#allocation2 + $0x98] sm:$0xff] %vm2015_vm10, %v1958_v55  ;;  %2034 = vst.msk [vmem:[#allocation2 + $0x90] sm:$0xff] %vm2015_vm10, %v1956_v56 }
 0x2b5   : > { %2332 = vrot.lane.b32.xlu1 %v5733_v51, %s6568_s23  ;;  %2330 = vrot.lane.b32.xlu0 %v5732_v52, %s6568_s23  ;;  %v5765_v51 = vld [vmem:[%s6700_s5 + $0xca] sm:$0xff]  ;;  %v5764_v52 = vld [vmem:[%s6700_s5 + $0xc2] sm:$0xff] }
 0x2b7   : > { %v1962_v61 = vpop.permute.xlu1 %1961  ;;  %v1960_v62 = vpop.permute.xlu0 %1959 }
 0x2b8   : > { %2037 = vst.msk [vmem:[#allocation2 + $0xa8] sm:$0xff] %vm2015_vm10, %v1962_v61  ;;  %2036 = vst.msk [vmem:[#allocation2 + $0xa0] sm:$0xff] %vm2015_vm10, %v1960_v62 }
 0x2b9   : > { %2336 = vrot.lane.b32.xlu1 %v5735_v59, %s6568_s23  ;;  %2334 = vrot.lane.b32.xlu0 %v5734_v60, %s6568_s23  ;;  %v5767_v59 = vld [vmem:[%s6700_s5 + $0xe2] sm:$0xff]  ;;  %v5766_v60 = vld [vmem:[%s6700_s5 + $0xda] sm:$0xff] }
 0x2bb   : > { %v1966_v1 = vpop.permute.xlu1 %1965  ;;  %v1964_v2 = vpop.permute.xlu0 %1963 }
 0x2bc   : > { %2039 = vst.msk [vmem:[#allocation2 + $0xb8] sm:$0xff] %vm2015_vm10, %v1966_v1  ;;  %2038 = vst.msk [vmem:[#allocation2 + $0xb0] sm:$0xff] %vm2015_vm10, %v1964_v2 }
 0x2bd   : > { %2340 = vrot.lane.b32.xlu1 %v5737_v63, %s6568_s23  ;;  %2338 = vrot.lane.b32.xlu0 %v5736_v0, %s6568_s23  ;;  %v5769_v63 = vld [vmem:[%s6700_s5 + $0xfa] sm:$0xff]  ;;  %v5768_v0 = vld [vmem:[%s6700_s5 + $0xf2] sm:$0xff] }
 0x2bf   : > { %v1970_v19 = vpop.permute.xlu1 %1969  ;;  %v1968_v20 = vpop.permute.xlu0 %1967 }
 0x2c0   : > { %2041 = vst.msk [vmem:[#allocation2 + $0xc8] sm:$0xff] %vm2015_vm10, %v1970_v19  ;;  %2040 = vst.msk [vmem:[#allocation2 + $0xc0] sm:$0xff] %vm2015_vm10, %v1968_v20 }
 0x2c1   : > { %2344 = vrot.lane.b32.xlu1 %v5739_v13, %s6568_s23  ;;  %2342 = vrot.lane.b32.xlu0 %v5738_v17, %s6568_s23  ;;  %v5771_v13 = vld [vmem:[%s6700_s5 + $0x112] sm:$0xff]  ;;  %v5770_v17 = vld [vmem:[%s6700_s5 + $0x10a] sm:$0xff] }
 0x2c3   : > { %v1974_v25 = vpop.permute.xlu1 %1973  ;;  %v1972_v26 = vpop.permute.xlu0 %1971 }
 0x2c4   : > { %2043 = vst.msk [vmem:[#allocation2 + $0xd8] sm:$0xff] %vm2015_vm10, %v1974_v25  ;;  %2042 = vst.msk [vmem:[#allocation2 + $0xd0] sm:$0xff] %vm2015_vm10, %v1972_v26 }
 0x2c5   : > { %2348 = vrot.lane.b32.xlu1 %v5741_v21, %s6568_s23  ;;  %2346 = vrot.lane.b32.xlu0 %v5740_v24, %s6568_s23  ;;  %v5773_v21 = vld [vmem:[%s6700_s5 + $0x12a] sm:$0xff]  ;;  %v5772_v24 = vld [vmem:[%s6700_s5 + $0x122] sm:$0xff] }
 0x2c7   : > { %v1978_v31 = vpop.permute.xlu1 %1977  ;;  %v1976_v32 = vpop.permute.xlu0 %1975 }
 0x2c8   : > { %2045 = vst.msk [vmem:[#allocation2 + $0xe8] sm:$0xff] %vm2015_vm10, %v1978_v31  ;;  %2044 = vst.msk [vmem:[#allocation2 + $0xe0] sm:$0xff] %vm2015_vm10, %v1976_v32 }
 0x2c9   : > { %2352 = vrot.lane.b32.xlu1 %v5743_v27, %s6568_s23  ;;  %2350 = vrot.lane.b32.xlu0 %v5742_v28, %s6568_s23  ;;  %v5775_v27 = vld [vmem:[%s6700_s5 + $0x142] sm:$0xff]  ;;  %v5774_v28 = vld [vmem:[%s6700_s5 + $0x13a] sm:$0xff] }
 0x2cb   : > { %v1982_v35 = vpop.permute.xlu1 %1981  ;;  %v1980_v37 = vpop.permute.xlu0 %1979 }
 0x2cc   : > { %2047 = vst.msk [vmem:[#allocation2 + $0xf8] sm:$0xff] %vm2015_vm10, %v1982_v35  ;;  %2046 = vst.msk [vmem:[#allocation2 + $0xf0] sm:$0xff] %vm2015_vm10, %v1980_v37 }
 0x2cd   : > { %2356 = vrot.lane.b32.xlu1 %v5745_v33, %s6568_s23  ;;  %2354 = vrot.lane.b32.xlu0 %v5744_v34, %s6568_s23  ;;  %v5777_v33 = vld [vmem:[%s6700_s5 + $0x15a] sm:$0xff]  ;;  %v5776_v34 = vld [vmem:[%s6700_s5 + $0x152] sm:$0xff] }
 0x2cf   : > { %v2116_v41 = vpop.permute.xlu1 %2115  ;;  %v2114_v42 = vpop.permute.xlu0 %2113 }
 0x2d0   : > { %2211 = vst.msk [vmem:[#allocation2 + $0x8] sm:$0xff] %vm2209_vm11, %v2116_v41  ;;  %2210 = vst.msk [vmem:[#allocation2] sm:$0xff] %vm2209_vm11, %v2114_v42 }
 0x2d1   : > { %2360 = vrot.lane.b32.xlu1 %v5747_v39, %s6568_s23  ;;  %2358 = vrot.lane.b32.xlu0 %v5746_v40, %s6568_s23  ;;  %v5779_v39 = vld [vmem:[%s6700_s5 + $0x172] sm:$0xff]  ;;  %v5778_v40 = vld [vmem:[%s6700_s5 + $0x16a] sm:$0xff] }
 0x2d3   : > { %v2120_v47 = vpop.permute.xlu1 %2119  ;;  %v2118_v48 = vpop.permute.xlu0 %2117 }
 0x2d4   : > { %2213 = vst.msk [vmem:[#allocation2 + $0x18] sm:$0xff] %vm2209_vm11, %v2120_v47  ;;  %2212 = vst.msk [vmem:[#allocation2 + $0x10] sm:$0xff] %vm2209_vm11, %v2118_v48 }
 0x2d5   : > { %2364 = vrot.lane.b32.xlu1 %v5749_v43, %s6568_s23  ;;  %2362 = vrot.lane.b32.xlu0 %v5748_v44, %s6568_s23  ;;  %v5781_v43 = vld [vmem:[%s6700_s5 + $0x18a] sm:$0xff]  ;;  %v5780_v44 = vld [vmem:[%s6700_s5 + $0x182] sm:$0xff] }
 0x2d7   : > { %v2124_v54 = vpop.permute.xlu1 %2123  ;;  %v2122_v3 = vpop.permute.xlu0 %2121 }
 0x2d8   : > { %2215 = vst.msk [vmem:[#allocation2 + $0x28] sm:$0xff] %vm2209_vm11, %v2124_v54  ;;  %2214 = vst.msk [vmem:[#allocation2 + $0x20] sm:$0xff] %vm2209_vm11, %v2122_v3 }
 0x2d9   : > { %2368 = vrot.lane.b32.xlu1 %v5751_v49, %s6568_s23  ;;  %2366 = vrot.lane.b32.xlu0 %v5750_v50, %s6568_s23  ;;  %v5783_v49 = vld [vmem:[%s6700_s5 + $0x1a2] sm:$0xff]  ;;  %v5782_v50 = vld [vmem:[%s6700_s5 + $0x19a] sm:$0xff] }
 0x2db   : > { %v2128_v58 = vpop.permute.xlu1 %2127  ;;  %v2126_v57 = vpop.permute.xlu0 %2125 }
 0x2dc   : > { %2217 = vst.msk [vmem:[#allocation2 + $0x38] sm:$0xff] %vm2209_vm11, %v2128_v58  ;;  %2216 = vst.msk [vmem:[#allocation2 + $0x30] sm:$0xff] %vm2209_vm11, %v2126_v57 }
 0x2dd   : > { %2501 = vrot.lane.b32.xlu1 %v5753_v53, %s6569_s27  ;;  %2499 = vrot.lane.b32.xlu0 %v5752_v4, %s6569_s27  ;;  %v5785_v53 = vld [vmem:[%s6700_s5 + $0x3b] sm:$0xff]  ;;  %v5784_v4 = vld [vmem:[%s6700_s5 + $0x33] sm:$0xff] }
 0x2df   : > { %v2132_v7 = vpop.permute.xlu1 %2131  ;;  %v2130_v8 = vpop.permute.xlu0 %2129 }
 0x2e0   : > { %2219 = vst.msk [vmem:[#allocation2 + $0x48] sm:$0xff] %vm2209_vm11, %v2132_v7  ;;  %2218 = vst.msk [vmem:[#allocation2 + $0x40] sm:$0xff] %vm2209_vm11, %v2130_v8 }
 0x2e1   : > { %2505 = vrot.lane.b32.xlu1 %v5755_v5, %s6569_s27  ;;  %2503 = vrot.lane.b32.xlu0 %v5754_v6, %s6569_s27  ;;  %v5787_v5 = vld [vmem:[%s6700_s5 + $0x53] sm:$0xff]  ;;  %v5786_v6 = vld [vmem:[%s6700_s5 + $0x4b] sm:$0xff] }
 0x2e3   : > { %v2136_v11 = vpop.permute.xlu1 %2135  ;;  %v2134_v12 = vpop.permute.xlu0 %2133 }
 0x2e4   : > { %2221 = vst.msk [vmem:[#allocation2 + $0x58] sm:$0xff] %vm2209_vm11, %v2136_v11  ;;  %2220 = vst.msk [vmem:[#allocation2 + $0x50] sm:$0xff] %vm2209_vm11, %v2134_v12 }
 0x2e5   : > { %2509 = vrot.lane.b32.xlu1 %v5757_v9, %s6569_s27  ;;  %2507 = vrot.lane.b32.xlu0 %v5756_v10, %s6569_s27  ;;  %v5789_v9 = vld [vmem:[%s6700_s5 + $0x6b] sm:$0xff]  ;;  %v5788_v10 = vld [vmem:[%s6700_s5 + $0x63] sm:$0xff] }
 0x2e7   : > { %v2140_v16 = vpop.permute.xlu1 %2139  ;;  %v2138_v18 = vpop.permute.xlu0 %2137 }
 0x2e8   : > { %2223 = vst.msk [vmem:[#allocation2 + $0x68] sm:$0xff] %vm2209_vm11, %v2140_v16  ;;  %2222 = vst.msk [vmem:[#allocation2 + $0x60] sm:$0xff] %vm2209_vm11, %v2138_v18 }
 0x2e9   : > { %2513 = vrot.lane.b32.xlu1 %v5759_v14, %s6569_s27  ;;  %2511 = vrot.lane.b32.xlu0 %v5758_v15, %s6569_s27  ;;  %v5791_v14 = vld [vmem:[%s6700_s5 + $0x83] sm:$0xff]  ;;  %v5790_v15 = vld [vmem:[%s6700_s5 + $0x7b] sm:$0xff] }
 0x2eb   : > { %v2144_v29 = vpop.permute.xlu1 %2143  ;;  %v2142_v30 = vpop.permute.xlu0 %2141 }
 0x2ec   : > { %2225 = vst.msk [vmem:[#allocation2 + $0x78] sm:$0xff] %vm2209_vm11, %v2144_v29  ;;  %2224 = vst.msk [vmem:[#allocation2 + $0x70] sm:$0xff] %vm2209_vm11, %v2142_v30 }
 0x2ed   : > { %2517 = vrot.lane.b32.xlu1 %v5761_v22, %s6569_s27  ;;  %2515 = vrot.lane.b32.xlu0 %v5760_v23, %s6569_s27  ;;  %v5793_v22 = vld [vmem:[%s6700_s5 + $0x9b] sm:$0xff]  ;;  %v5792_v23 = vld [vmem:[%s6700_s5 + $0x93] sm:$0xff] }
 0x2ef   : > { %v2148_v45 = vpop.permute.xlu1 %2147  ;;  %v2146_v46 = vpop.permute.xlu0 %2145 }
 0x2f0   : > { %2227 = vst.msk [vmem:[#allocation2 + $0x88] sm:$0xff] %vm2209_vm11, %v2148_v45  ;;  %2226 = vst.msk [vmem:[#allocation2 + $0x80] sm:$0xff] %vm2209_vm11, %v2146_v46 }
 0x2f1   : > { %2521 = vrot.lane.b32.xlu1 %v5763_v36, %s6569_s27  ;;  %2519 = vrot.lane.b32.xlu0 %v5762_v38, %s6569_s27  ;;  %v5795_v36 = vld [vmem:[%s6700_s5 + $0xb3] sm:$0xff]  ;;  %v5794_v38 = vld [vmem:[%s6700_s5 + $0xab] sm:$0xff] }
 0x2f3   : > { %v2152_v55 = vpop.permute.xlu1 %2151  ;;  %v2150_v56 = vpop.permute.xlu0 %2149 }
 0x2f4   : > { %2229 = vst.msk [vmem:[#allocation2 + $0x98] sm:$0xff] %vm2209_vm11, %v2152_v55  ;;  %2228 = vst.msk [vmem:[#allocation2 + $0x90] sm:$0xff] %vm2209_vm11, %v2150_v56 }
 0x2f5   : > { %2525 = vrot.lane.b32.xlu1 %v5765_v51, %s6569_s27  ;;  %2523 = vrot.lane.b32.xlu0 %v5764_v52, %s6569_s27  ;;  %v5797_v51 = vld [vmem:[%s6700_s5 + $0xcb] sm:$0xff]  ;;  %v5796_v52 = vld [vmem:[%s6700_s5 + $0xc3] sm:$0xff] }
 0x2f7   : > { %v2156_v61 = vpop.permute.xlu1 %2155  ;;  %v2154_v62 = vpop.permute.xlu0 %2153 }
 0x2f8   : > { %2231 = vst.msk [vmem:[#allocation2 + $0xa8] sm:$0xff] %vm2209_vm11, %v2156_v61  ;;  %2230 = vst.msk [vmem:[#allocation2 + $0xa0] sm:$0xff] %vm2209_vm11, %v2154_v62 }
 0x2f9   : > { %2529 = vrot.lane.b32.xlu1 %v5767_v59, %s6569_s27  ;;  %2527 = vrot.lane.b32.xlu0 %v5766_v60, %s6569_s27  ;;  %v5799_v59 = vld [vmem:[%s6700_s5 + $0xe3] sm:$0xff]  ;;  %v5798_v60 = vld [vmem:[%s6700_s5 + $0xdb] sm:$0xff] }
 0x2fb   : > { %v2160_v1 = vpop.permute.xlu1 %2159  ;;  %v2158_v2 = vpop.permute.xlu0 %2157 }
 0x2fc   : > { %2233 = vst.msk [vmem:[#allocation2 + $0xb8] sm:$0xff] %vm2209_vm11, %v2160_v1  ;;  %2232 = vst.msk [vmem:[#allocation2 + $0xb0] sm:$0xff] %vm2209_vm11, %v2158_v2 }
 0x2fd   : > { %2533 = vrot.lane.b32.xlu1 %v5769_v63, %s6569_s27  ;;  %2531 = vrot.lane.b32.xlu0 %v5768_v0, %s6569_s27  ;;  %v5801_v63 = vld [vmem:[%s6700_s5 + $0xfb] sm:$0xff]  ;;  %v5800_v0 = vld [vmem:[%s6700_s5 + $0xf3] sm:$0xff] }
 0x2ff   : > { %v2164_v19 = vpop.permute.xlu1 %2163  ;;  %v2162_v20 = vpop.permute.xlu0 %2161 }
 0x300   : > { %2235 = vst.msk [vmem:[#allocation2 + $0xc8] sm:$0xff] %vm2209_vm11, %v2164_v19  ;;  %2234 = vst.msk [vmem:[#allocation2 + $0xc0] sm:$0xff] %vm2209_vm11, %v2162_v20 }
 0x301   : > { %2537 = vrot.lane.b32.xlu1 %v5771_v13, %s6569_s27  ;;  %2535 = vrot.lane.b32.xlu0 %v5770_v17, %s6569_s27  ;;  %v5803_v13 = vld [vmem:[%s6700_s5 + $0x113] sm:$0xff]  ;;  %v5802_v17 = vld [vmem:[%s6700_s5 + $0x10b] sm:$0xff] }
 0x303   : > { %v2168_v25 = vpop.permute.xlu1 %2167  ;;  %v2166_v26 = vpop.permute.xlu0 %2165 }
 0x304   : > { %2237 = vst.msk [vmem:[#allocation2 + $0xd8] sm:$0xff] %vm2209_vm11, %v2168_v25  ;;  %2236 = vst.msk [vmem:[#allocation2 + $0xd0] sm:$0xff] %vm2209_vm11, %v2166_v26 }
 0x305   : > { %2541 = vrot.lane.b32.xlu1 %v5773_v21, %s6569_s27  ;;  %2539 = vrot.lane.b32.xlu0 %v5772_v24, %s6569_s27  ;;  %v5805_v21 = vld [vmem:[%s6700_s5 + $0x12b] sm:$0xff]  ;;  %v5804_v24 = vld [vmem:[%s6700_s5 + $0x123] sm:$0xff] }
 0x307   : > { %v2172_v31 = vpop.permute.xlu1 %2171  ;;  %v2170_v32 = vpop.permute.xlu0 %2169 }
 0x308   : > { %2239 = vst.msk [vmem:[#allocation2 + $0xe8] sm:$0xff] %vm2209_vm11, %v2172_v31  ;;  %2238 = vst.msk [vmem:[#allocation2 + $0xe0] sm:$0xff] %vm2209_vm11, %v2170_v32 }
 0x309   : > { %2545 = vrot.lane.b32.xlu1 %v5775_v27, %s6569_s27  ;;  %2543 = vrot.lane.b32.xlu0 %v5774_v28, %s6569_s27  ;;  %v5807_v27 = vld [vmem:[%s6700_s5 + $0x143] sm:$0xff]  ;;  %v5806_v28 = vld [vmem:[%s6700_s5 + $0x13b] sm:$0xff] }
 0x30b   : > { %v2176_v35 = vpop.permute.xlu1 %2175  ;;  %v2174_v37 = vpop.permute.xlu0 %2173 }
 0x30c   : > { %2241 = vst.msk [vmem:[#allocation2 + $0xf8] sm:$0xff] %vm2209_vm11, %v2176_v35  ;;  %2240 = vst.msk [vmem:[#allocation2 + $0xf0] sm:$0xff] %vm2209_vm11, %v2174_v37 }
 0x30d   : > { %2549 = vrot.lane.b32.xlu1 %v5777_v33, %s6569_s27  ;;  %2547 = vrot.lane.b32.xlu0 %v5776_v34, %s6569_s27  ;;  %v5809_v33 = vld [vmem:[%s6700_s5 + $0x15b] sm:$0xff]  ;;  %v5808_v34 = vld [vmem:[%s6700_s5 + $0x153] sm:$0xff] }
 0x30f   : > { %v2309_v41 = vpop.permute.xlu1 %2308  ;;  %v2307_v42 = vpop.permute.xlu0 %2306 }
 0x310   : > { %2404 = vst.msk [vmem:[#allocation2 + $0x8] sm:$0xff] %vm2402_vm12, %v2309_v41  ;;  %2403 = vst.msk [vmem:[#allocation2] sm:$0xff] %vm2402_vm12, %v2307_v42 }
 0x311   : > { %2553 = vrot.lane.b32.xlu1 %v5779_v39, %s6569_s27  ;;  %2551 = vrot.lane.b32.xlu0 %v5778_v40, %s6569_s27  ;;  %v5811_v39 = vld [vmem:[%s6700_s5 + $0x173] sm:$0xff]  ;;  %v5810_v40 = vld [vmem:[%s6700_s5 + $0x16b] sm:$0xff] }
 0x313   : > { %v2313_v47 = vpop.permute.xlu1 %2312  ;;  %v2311_v48 = vpop.permute.xlu0 %2310 }
 0x314   : > { %2406 = vst.msk [vmem:[#allocation2 + $0x18] sm:$0xff] %vm2402_vm12, %v2313_v47  ;;  %2405 = vst.msk [vmem:[#allocation2 + $0x10] sm:$0xff] %vm2402_vm12, %v2311_v48 }
 0x315   : > { %2557 = vrot.lane.b32.xlu1 %v5781_v43, %s6569_s27  ;;  %2555 = vrot.lane.b32.xlu0 %v5780_v44, %s6569_s27  ;;  %v5813_v43 = vld [vmem:[%s6700_s5 + $0x18b] sm:$0xff]  ;;  %v5812_v44 = vld [vmem:[%s6700_s5 + $0x183] sm:$0xff] }
 0x317   : > { %v2317_v54 = vpop.permute.xlu1 %2316  ;;  %v2315_v3 = vpop.permute.xlu0 %2314 }
 0x318   : > { %2408 = vst.msk [vmem:[#allocation2 + $0x28] sm:$0xff] %vm2402_vm12, %v2317_v54  ;;  %2407 = vst.msk [vmem:[#allocation2 + $0x20] sm:$0xff] %vm2402_vm12, %v2315_v3 }
 0x319   : > { %2561 = vrot.lane.b32.xlu1 %v5783_v49, %s6569_s27  ;;  %2559 = vrot.lane.b32.xlu0 %v5782_v50, %s6569_s27  ;;  %v5815_v49 = vld [vmem:[%s6700_s5 + $0x1a3] sm:$0xff]  ;;  %v5814_v50 = vld [vmem:[%s6700_s5 + $0x19b] sm:$0xff]  ;;  %s6580_s27 = smov 92  }
 0x31b   : > { %v2321_v58 = vpop.permute.xlu1 %2320  ;;  %v2319_v57 = vpop.permute.xlu0 %2318 }
 0x31c   : > { %2410 = vst.msk [vmem:[#allocation2 + $0x38] sm:$0xff] %vm2402_vm12, %v2321_v58  ;;  %2409 = vst.msk [vmem:[#allocation2 + $0x30] sm:$0xff] %vm2402_vm12, %v2319_v57 }
 0x31d   : > { %2694 = vrot.lane.b32.xlu1 %v5785_v53, %s6570_s28  ;;  %2692 = vrot.lane.b32.xlu0 %v5784_v4, %s6570_s28  ;;  %v5817_v53 = vld [vmem:[%s6700_s5 + $0x3c] sm:$0xff]  ;;  %v5816_v4 = vld [vmem:[%s6700_s5 + $0x34] sm:$0xff] }
 0x31f   : > { %v2325_v7 = vpop.permute.xlu1 %2324  ;;  %v2323_v8 = vpop.permute.xlu0 %2322 }
 0x320   : > { %2412 = vst.msk [vmem:[#allocation2 + $0x48] sm:$0xff] %vm2402_vm12, %v2325_v7  ;;  %2411 = vst.msk [vmem:[#allocation2 + $0x40] sm:$0xff] %vm2402_vm12, %v2323_v8 }
 0x321   : > { %2698 = vrot.lane.b32.xlu1 %v5787_v5, %s6570_s28  ;;  %2696 = vrot.lane.b32.xlu0 %v5786_v6, %s6570_s28  ;;  %v5819_v5 = vld [vmem:[%s6700_s5 + $0x54] sm:$0xff]  ;;  %v5818_v6 = vld [vmem:[%s6700_s5 + $0x4c] sm:$0xff] }
 0x323   : > { %v2329_v11 = vpop.permute.xlu1 %2328  ;;  %v2327_v12 = vpop.permute.xlu0 %2326 }
 0x324   : > { %2414 = vst.msk [vmem:[#allocation2 + $0x58] sm:$0xff] %vm2402_vm12, %v2329_v11  ;;  %2413 = vst.msk [vmem:[#allocation2 + $0x50] sm:$0xff] %vm2402_vm12, %v2327_v12 }
 0x325   : > { %2702 = vrot.lane.b32.xlu1 %v5789_v9, %s6570_s28  ;;  %2700 = vrot.lane.b32.xlu0 %v5788_v10, %s6570_s28  ;;  %v5821_v9 = vld [vmem:[%s6700_s5 + $0x6c] sm:$0xff]  ;;  %v5820_v10 = vld [vmem:[%s6700_s5 + $0x64] sm:$0xff] }
 0x327   : > { %v2333_v16 = vpop.permute.xlu1 %2332  ;;  %v2331_v18 = vpop.permute.xlu0 %2330 }
 0x328   : > { %2416 = vst.msk [vmem:[#allocation2 + $0x68] sm:$0xff] %vm2402_vm12, %v2333_v16  ;;  %2415 = vst.msk [vmem:[#allocation2 + $0x60] sm:$0xff] %vm2402_vm12, %v2331_v18 }
 0x329   : > { %2706 = vrot.lane.b32.xlu1 %v5791_v14, %s6570_s28  ;;  %2704 = vrot.lane.b32.xlu0 %v5790_v15, %s6570_s28  ;;  %v5823_v14 = vld [vmem:[%s6700_s5 + $0x84] sm:$0xff]  ;;  %v5822_v15 = vld [vmem:[%s6700_s5 + $0x7c] sm:$0xff] }
 0x32b   : > { %v2337_v29 = vpop.permute.xlu1 %2336  ;;  %v2335_v30 = vpop.permute.xlu0 %2334 }
 0x32c   : > { %2418 = vst.msk [vmem:[#allocation2 + $0x78] sm:$0xff] %vm2402_vm12, %v2337_v29  ;;  %2417 = vst.msk [vmem:[#allocation2 + $0x70] sm:$0xff] %vm2402_vm12, %v2335_v30 }
 0x32d   : > { %2710 = vrot.lane.b32.xlu1 %v5793_v22, %s6570_s28  ;;  %2708 = vrot.lane.b32.xlu0 %v5792_v23, %s6570_s28  ;;  %v5825_v22 = vld [vmem:[%s6700_s5 + $0x9c] sm:$0xff]  ;;  %v5824_v23 = vld [vmem:[%s6700_s5 + $0x94] sm:$0xff] }
 0x32f   : > { %v2341_v45 = vpop.permute.xlu1 %2340  ;;  %v2339_v46 = vpop.permute.xlu0 %2338 }
 0x330   : > { %2420 = vst.msk [vmem:[#allocation2 + $0x88] sm:$0xff] %vm2402_vm12, %v2341_v45  ;;  %2419 = vst.msk [vmem:[#allocation2 + $0x80] sm:$0xff] %vm2402_vm12, %v2339_v46 }
 0x331   : > { %2714 = vrot.lane.b32.xlu1 %v5795_v36, %s6570_s28  ;;  %2712 = vrot.lane.b32.xlu0 %v5794_v38, %s6570_s28  ;;  %v5827_v36 = vld [vmem:[%s6700_s5 + $0xb4] sm:$0xff]  ;;  %v5826_v38 = vld [vmem:[%s6700_s5 + $0xac] sm:$0xff] }
 0x333   : > { %v2345_v55 = vpop.permute.xlu1 %2344  ;;  %v2343_v56 = vpop.permute.xlu0 %2342 }
 0x334   : > { %2422 = vst.msk [vmem:[#allocation2 + $0x98] sm:$0xff] %vm2402_vm12, %v2345_v55  ;;  %2421 = vst.msk [vmem:[#allocation2 + $0x90] sm:$0xff] %vm2402_vm12, %v2343_v56 }
 0x335   : > { %2718 = vrot.lane.b32.xlu1 %v5797_v51, %s6570_s28  ;;  %2716 = vrot.lane.b32.xlu0 %v5796_v52, %s6570_s28  ;;  %v5829_v51 = vld [vmem:[%s6700_s5 + $0xcc] sm:$0xff]  ;;  %v5828_v52 = vld [vmem:[%s6700_s5 + $0xc4] sm:$0xff] }
 0x337   : > { %v2349_v61 = vpop.permute.xlu1 %2348  ;;  %v2347_v62 = vpop.permute.xlu0 %2346 }
 0x338   : > { %2424 = vst.msk [vmem:[#allocation2 + $0xa8] sm:$0xff] %vm2402_vm12, %v2349_v61  ;;  %2423 = vst.msk [vmem:[#allocation2 + $0xa0] sm:$0xff] %vm2402_vm12, %v2347_v62 }
 0x339   : > { %2722 = vrot.lane.b32.xlu1 %v5799_v59, %s6570_s28  ;;  %2720 = vrot.lane.b32.xlu0 %v5798_v60, %s6570_s28  ;;  %v5831_v59 = vld [vmem:[%s6700_s5 + $0xe4] sm:$0xff]  ;;  %v5830_v60 = vld [vmem:[%s6700_s5 + $0xdc] sm:$0xff] }
 0x33b   : > { %v2353_v1 = vpop.permute.xlu1 %2352  ;;  %v2351_v2 = vpop.permute.xlu0 %2350 }
 0x33c   : > { %2426 = vst.msk [vmem:[#allocation2 + $0xb8] sm:$0xff] %vm2402_vm12, %v2353_v1  ;;  %2425 = vst.msk [vmem:[#allocation2 + $0xb0] sm:$0xff] %vm2402_vm12, %v2351_v2 }
 0x33d   : > { %2726 = vrot.lane.b32.xlu1 %v5801_v63, %s6570_s28  ;;  %2724 = vrot.lane.b32.xlu0 %v5800_v0, %s6570_s28  ;;  %v5833_v63 = vld [vmem:[%s6700_s5 + $0xfc] sm:$0xff]  ;;  %v5832_v0 = vld [vmem:[%s6700_s5 + $0xf4] sm:$0xff] }
 0x33f   : > { %v2357_v19 = vpop.permute.xlu1 %2356  ;;  %v2355_v20 = vpop.permute.xlu0 %2354 }
 0x340   : > { %2428 = vst.msk [vmem:[#allocation2 + $0xc8] sm:$0xff] %vm2402_vm12, %v2357_v19  ;;  %2427 = vst.msk [vmem:[#allocation2 + $0xc0] sm:$0xff] %vm2402_vm12, %v2355_v20 }
 0x341   : > { %2730 = vrot.lane.b32.xlu1 %v5803_v13, %s6570_s28  ;;  %2728 = vrot.lane.b32.xlu0 %v5802_v17, %s6570_s28  ;;  %v5835_v13 = vld [vmem:[%s6700_s5 + $0x114] sm:$0xff]  ;;  %v5834_v17 = vld [vmem:[%s6700_s5 + $0x10c] sm:$0xff] }
 0x343   : > { %v2361_v25 = vpop.permute.xlu1 %2360  ;;  %v2359_v26 = vpop.permute.xlu0 %2358 }
 0x344   : > { %2430 = vst.msk [vmem:[#allocation2 + $0xd8] sm:$0xff] %vm2402_vm12, %v2361_v25  ;;  %2429 = vst.msk [vmem:[#allocation2 + $0xd0] sm:$0xff] %vm2402_vm12, %v2359_v26 }
 0x345   : > { %2734 = vrot.lane.b32.xlu1 %v5805_v21, %s6570_s28  ;;  %2732 = vrot.lane.b32.xlu0 %v5804_v24, %s6570_s28  ;;  %v5837_v21 = vld [vmem:[%s6700_s5 + $0x12c] sm:$0xff]  ;;  %v5836_v24 = vld [vmem:[%s6700_s5 + $0x124] sm:$0xff] }
 0x347   : > { %v2365_v31 = vpop.permute.xlu1 %2364  ;;  %v2363_v32 = vpop.permute.xlu0 %2362 }
 0x348   : > { %2432 = vst.msk [vmem:[#allocation2 + $0xe8] sm:$0xff] %vm2402_vm12, %v2365_v31  ;;  %2431 = vst.msk [vmem:[#allocation2 + $0xe0] sm:$0xff] %vm2402_vm12, %v2363_v32 }
 0x349   : > { %2738 = vrot.lane.b32.xlu1 %v5807_v27, %s6570_s28  ;;  %2736 = vrot.lane.b32.xlu0 %v5806_v28, %s6570_s28  ;;  %v5839_v27 = vld [vmem:[%s6700_s5 + $0x144] sm:$0xff]  ;;  %v5838_v28 = vld [vmem:[%s6700_s5 + $0x13c] sm:$0xff] }
 0x34b   : > { %v2369_v35 = vpop.permute.xlu1 %2368  ;;  %v2367_v37 = vpop.permute.xlu0 %2366 }
 0x34c   : > { %2434 = vst.msk [vmem:[#allocation2 + $0xf8] sm:$0xff] %vm2402_vm12, %v2369_v35  ;;  %2433 = vst.msk [vmem:[#allocation2 + $0xf0] sm:$0xff] %vm2402_vm12, %v2367_v37 }
 0x34d   : > { %2742 = vrot.lane.b32.xlu1 %v5809_v33, %s6570_s28  ;;  %2740 = vrot.lane.b32.xlu0 %v5808_v34, %s6570_s28  ;;  %v5841_v33 = vld [vmem:[%s6700_s5 + $0x15c] sm:$0xff]  ;;  %v5840_v34 = vld [vmem:[%s6700_s5 + $0x154] sm:$0xff] }
 0x34f   : > { %v2502_v41 = vpop.permute.xlu1 %2501  ;;  %v2500_v42 = vpop.permute.xlu0 %2499 }
 0x350   : > { %2597 = vst.msk [vmem:[#allocation2 + $0x8] sm:$0xff] %vm2595_vm13, %v2502_v41  ;;  %2596 = vst.msk [vmem:[#allocation2] sm:$0xff] %vm2595_vm13, %v2500_v42 }
 0x351   : > { %2746 = vrot.lane.b32.xlu1 %v5811_v39, %s6570_s28  ;;  %2744 = vrot.lane.b32.xlu0 %v5810_v40, %s6570_s28  ;;  %v5843_v39 = vld [vmem:[%s6700_s5 + $0x174] sm:$0xff]  ;;  %v5842_v40 = vld [vmem:[%s6700_s5 + $0x16c] sm:$0xff] }
 0x353   : > { %v2506_v47 = vpop.permute.xlu1 %2505  ;;  %v2504_v48 = vpop.permute.xlu0 %2503 }
 0x354   : > { %2599 = vst.msk [vmem:[#allocation2 + $0x18] sm:$0xff] %vm2595_vm13, %v2506_v47  ;;  %2598 = vst.msk [vmem:[#allocation2 + $0x10] sm:$0xff] %vm2595_vm13, %v2504_v48 }
 0x355   : > { %2750 = vrot.lane.b32.xlu1 %v5813_v43, %s6570_s28  ;;  %2748 = vrot.lane.b32.xlu0 %v5812_v44, %s6570_s28  ;;  %v5845_v43 = vld [vmem:[%s6700_s5 + $0x18c] sm:$0xff]  ;;  %v5844_v44 = vld [vmem:[%s6700_s5 + $0x184] sm:$0xff] }
 0x357   : > { %v2510_v54 = vpop.permute.xlu1 %2509  ;;  %v2508_v3 = vpop.permute.xlu0 %2507 }
 0x358   : > { %2601 = vst.msk [vmem:[#allocation2 + $0x28] sm:$0xff] %vm2595_vm13, %v2510_v54  ;;  %2600 = vst.msk [vmem:[#allocation2 + $0x20] sm:$0xff] %vm2595_vm13, %v2508_v3 }
 0x359   : > { %2754 = vrot.lane.b32.xlu1 %v5815_v49, %s6570_s28  ;;  %2752 = vrot.lane.b32.xlu0 %v5814_v50, %s6570_s28  ;;  %v5847_v49 = vld [vmem:[%s6700_s5 + $0x1a4] sm:$0xff]  ;;  %v5846_v50 = vld [vmem:[%s6700_s5 + $0x19c] sm:$0xff]  ;;  %s6582_s28 = smov [#allocation3]  }
 0x35b   : > { %v2514_v58 = vpop.permute.xlu1 %2513  ;;  %v2512_v57 = vpop.permute.xlu0 %2511 }
 0x35c   : > { %2603 = vst.msk [vmem:[#allocation2 + $0x38] sm:$0xff] %vm2595_vm13, %v2514_v58  ;;  %2602 = vst.msk [vmem:[#allocation2 + $0x30] sm:$0xff] %vm2595_vm13, %v2512_v57 }
 0x35d   : > { %2887 = vrot.lane.b32.xlu1 %v5817_v53, %s6571_s29  ;;  %2885 = vrot.lane.b32.xlu0 %v5816_v4, %s6571_s29  ;;  %v5849_v53 = vld [vmem:[%s6700_s5 + $0x50] sm:$0xff]  ;;  %v5848_v4 = vld [vmem:[%s6700_s5 + $0x48] sm:$0xff] }
 0x35f   : > { %v2518_v7 = vpop.permute.xlu1 %2517  ;;  %v2516_v8 = vpop.permute.xlu0 %2515 }
 0x360   : > { %2605 = vst.msk [vmem:[#allocation2 + $0x48] sm:$0xff] %vm2595_vm13, %v2518_v7  ;;  %2604 = vst.msk [vmem:[#allocation2 + $0x40] sm:$0xff] %vm2595_vm13, %v2516_v8 }
 0x361   : > { %2891 = vrot.lane.b32.xlu1 %v5819_v5, %s6571_s29  ;;  %2889 = vrot.lane.b32.xlu0 %v5818_v6, %s6571_s29  ;;  %v5851_v5 = vld [vmem:[%s6700_s5 + $0x68] sm:$0xff]  ;;  %v5850_v6 = vld [vmem:[%s6700_s5 + $0x60] sm:$0xff] }
 0x363   : > { %v2522_v11 = vpop.permute.xlu1 %2521  ;;  %v2520_v12 = vpop.permute.xlu0 %2519 }
 0x364   : > { %2607 = vst.msk [vmem:[#allocation2 + $0x58] sm:$0xff] %vm2595_vm13, %v2522_v11  ;;  %2606 = vst.msk [vmem:[#allocation2 + $0x50] sm:$0xff] %vm2595_vm13, %v2520_v12 }
 0x365   : > { %2895 = vrot.lane.b32.xlu1 %v5821_v9, %s6571_s29  ;;  %2893 = vrot.lane.b32.xlu0 %v5820_v10, %s6571_s29  ;;  %v5853_v9 = vld [vmem:[%s6700_s5 + $0x80] sm:$0xff]  ;;  %v5852_v10 = vld [vmem:[%s6700_s5 + $0x78] sm:$0xff] }
 0x367   : > { %v2526_v16 = vpop.permute.xlu1 %2525  ;;  %v2524_v18 = vpop.permute.xlu0 %2523 }
 0x368   : > { %2609 = vst.msk [vmem:[#allocation2 + $0x68] sm:$0xff] %vm2595_vm13, %v2526_v16  ;;  %2608 = vst.msk [vmem:[#allocation2 + $0x60] sm:$0xff] %vm2595_vm13, %v2524_v18 }
 0x369   : > { %2899 = vrot.lane.b32.xlu1 %v5823_v14, %s6571_s29  ;;  %2897 = vrot.lane.b32.xlu0 %v5822_v15, %s6571_s29  ;;  %v5855_v14 = vld [vmem:[%s6700_s5 + $0x98] sm:$0xff]  ;;  %v5854_v15 = vld [vmem:[%s6700_s5 + $0x90] sm:$0xff] }
 0x36b   : > { %v2530_v29 = vpop.permute.xlu1 %2529  ;;  %v2528_v30 = vpop.permute.xlu0 %2527 }
 0x36c   : > { %2611 = vst.msk [vmem:[#allocation2 + $0x78] sm:$0xff] %vm2595_vm13, %v2530_v29  ;;  %2610 = vst.msk [vmem:[#allocation2 + $0x70] sm:$0xff] %vm2595_vm13, %v2528_v30 }
 0x36d   : > { %2903 = vrot.lane.b32.xlu1 %v5825_v22, %s6571_s29  ;;  %2901 = vrot.lane.b32.xlu0 %v5824_v23, %s6571_s29  ;;  %v5857_v22 = vld [vmem:[%s6700_s5 + $0xb0] sm:$0xff]  ;;  %v5856_v23 = vld [vmem:[%s6700_s5 + $0xa8] sm:$0xff] }
 0x36f   : > { %v2534_v45 = vpop.permute.xlu1 %2533  ;;  %v2532_v46 = vpop.permute.xlu0 %2531 }
 0x370   : > { %2613 = vst.msk [vmem:[#allocation2 + $0x88] sm:$0xff] %vm2595_vm13, %v2534_v45  ;;  %2612 = vst.msk [vmem:[#allocation2 + $0x80] sm:$0xff] %vm2595_vm13, %v2532_v46 }
 0x371   : > { %2907 = vrot.lane.b32.xlu1 %v5827_v36, %s6571_s29  ;;  %2905 = vrot.lane.b32.xlu0 %v5826_v38, %s6571_s29  ;;  %v5859_v36 = vld [vmem:[%s6700_s5 + $0xc8] sm:$0xff]  ;;  %v5858_v38 = vld [vmem:[%s6700_s5 + $0xc0] sm:$0xff] }
 0x373   : > { %v2538_v55 = vpop.permute.xlu1 %2537  ;;  %v2536_v56 = vpop.permute.xlu0 %2535 }
 0x374   : > { %2615 = vst.msk [vmem:[#allocation2 + $0x98] sm:$0xff] %vm2595_vm13, %v2538_v55  ;;  %2614 = vst.msk [vmem:[#allocation2 + $0x90] sm:$0xff] %vm2595_vm13, %v2536_v56 }
 0x375   : > { %2911 = vrot.lane.b32.xlu1 %v5829_v51, %s6571_s29  ;;  %2909 = vrot.lane.b32.xlu0 %v5828_v52, %s6571_s29  ;;  %v5861_v51 = vld [vmem:[%s6700_s5 + $0xe0] sm:$0xff]  ;;  %v5860_v52 = vld [vmem:[%s6700_s5 + $0xd8] sm:$0xff] }
 0x377   : > { %v2542_v61 = vpop.permute.xlu1 %2541  ;;  %v2540_v62 = vpop.permute.xlu0 %2539 }
 0x378   : > { %2617 = vst.msk [vmem:[#allocation2 + $0xa8] sm:$0xff] %vm2595_vm13, %v2542_v61  ;;  %2616 = vst.msk [vmem:[#allocation2 + $0xa0] sm:$0xff] %vm2595_vm13, %v2540_v62 }
 0x379   : > { %2915 = vrot.lane.b32.xlu1 %v5831_v59, %s6571_s29  ;;  %2913 = vrot.lane.b32.xlu0 %v5830_v60, %s6571_s29  ;;  %v5863_v59 = vld [vmem:[%s6700_s5 + $0xf8] sm:$0xff]  ;;  %v5862_v60 = vld [vmem:[%s6700_s5 + $0xf0] sm:$0xff] }
 0x37b   : > { %v2546_v1 = vpop.permute.xlu1 %2545  ;;  %v2544_v2 = vpop.permute.xlu0 %2543 }
 0x37c   : > { %2619 = vst.msk [vmem:[#allocation2 + $0xb8] sm:$0xff] %vm2595_vm13, %v2546_v1  ;;  %2618 = vst.msk [vmem:[#allocation2 + $0xb0] sm:$0xff] %vm2595_vm13, %v2544_v2 }
 0x37d   : > { %2919 = vrot.lane.b32.xlu1 %v5833_v63, %s6571_s29  ;;  %2917 = vrot.lane.b32.xlu0 %v5832_v0, %s6571_s29  ;;  %v5865_v63 = vld [vmem:[%s6700_s5 + $0x110] sm:$0xff]  ;;  %v5864_v0 = vld [vmem:[%s6700_s5 + $0x108] sm:$0xff] }
 0x37f   : > { %v2550_v19 = vpop.permute.xlu1 %2549  ;;  %v2548_v20 = vpop.permute.xlu0 %2547 }
 0x380   : > { %2621 = vst.msk [vmem:[#allocation2 + $0xc8] sm:$0xff] %vm2595_vm13, %v2550_v19  ;;  %2620 = vst.msk [vmem:[#allocation2 + $0xc0] sm:$0xff] %vm2595_vm13, %v2548_v20 }
 0x381   : > { %2923 = vrot.lane.b32.xlu1 %v5835_v13, %s6571_s29  ;;  %2921 = vrot.lane.b32.xlu0 %v5834_v17, %s6571_s29  ;;  %v5867_v13 = vld [vmem:[%s6700_s5 + $0x128] sm:$0xff]  ;;  %v5866_v17 = vld [vmem:[%s6700_s5 + $0x120] sm:$0xff] }
 0x383   : > { %v2554_v25 = vpop.permute.xlu1 %2553  ;;  %v2552_v26 = vpop.permute.xlu0 %2551 }
 0x384   : > { %2623 = vst.msk [vmem:[#allocation2 + $0xd8] sm:$0xff] %vm2595_vm13, %v2554_v25  ;;  %2622 = vst.msk [vmem:[#allocation2 + $0xd0] sm:$0xff] %vm2595_vm13, %v2552_v26 }
 0x385   : > { %2927 = vrot.lane.b32.xlu1 %v5837_v21, %s6571_s29  ;;  %2925 = vrot.lane.b32.xlu0 %v5836_v24, %s6571_s29  ;;  %v5869_v21 = vld [vmem:[%s6700_s5 + $0x140] sm:$0xff]  ;;  %v5868_v24 = vld [vmem:[%s6700_s5 + $0x138] sm:$0xff] }
 0x387   : > { %v2558_v31 = vpop.permute.xlu1 %2557  ;;  %v2556_v32 = vpop.permute.xlu0 %2555 }
 0x388   : > { %2625 = vst.msk [vmem:[#allocation2 + $0xe8] sm:$0xff] %vm2595_vm13, %v2558_v31  ;;  %2624 = vst.msk [vmem:[#allocation2 + $0xe0] sm:$0xff] %vm2595_vm13, %v2556_v32 }
 0x389   : > { %2931 = vrot.lane.b32.xlu1 %v5839_v27, %s6571_s29  ;;  %2929 = vrot.lane.b32.xlu0 %v5838_v28, %s6571_s29  ;;  %v5871_v27 = vld [vmem:[%s6700_s5 + $0x158] sm:$0xff]  ;;  %v5870_v28 = vld [vmem:[%s6700_s5 + $0x150] sm:$0xff] }
 0x38b   : > { %v2562_v35 = vpop.permute.xlu1 %2561  ;;  %v2560_v37 = vpop.permute.xlu0 %2559 }
 0x38c   : > { %2627 = vst.msk [vmem:[#allocation2 + $0xf8] sm:$0xff] %vm2595_vm13, %v2562_v35  ;;  %2626 = vst.msk [vmem:[#allocation2 + $0xf0] sm:$0xff] %vm2595_vm13, %v2560_v37 }
 0x38d   : > { %2935 = vrot.lane.b32.xlu1 %v5841_v33, %s6571_s29  ;;  %2933 = vrot.lane.b32.xlu0 %v5840_v34, %s6571_s29  ;;  %v5873_v33 = vld [vmem:[%s6700_s5 + $0x170] sm:$0xff]  ;;  %v5872_v34 = vld [vmem:[%s6700_s5 + $0x168] sm:$0xff] }
 0x38f   : > { %v2695_v41 = vpop.permute.xlu1 %2694  ;;  %v2693_v42 = vpop.permute.xlu0 %2692 }
 0x390   : > { %2790 = vst.msk [vmem:[#allocation2 + $0x8] sm:$0xff] %vm2788_vm14, %v2695_v41  ;;  %2789 = vst.msk [vmem:[#allocation2] sm:$0xff] %vm2788_vm14, %v2693_v42 }
 0x391   : > { %2939 = vrot.lane.b32.xlu1 %v5843_v39, %s6571_s29  ;;  %2937 = vrot.lane.b32.xlu0 %v5842_v40, %s6571_s29  ;;  %v5875_v39 = vld [vmem:[%s6700_s5 + $0x188] sm:$0xff]  ;;  %v5874_v40 = vld [vmem:[%s6700_s5 + $0x180] sm:$0xff] }
 0x393   : > { %v2699_v47 = vpop.permute.xlu1 %2698  ;;  %v2697_v48 = vpop.permute.xlu0 %2696 }
 0x394   : > { %2792 = vst.msk [vmem:[#allocation2 + $0x18] sm:$0xff] %vm2788_vm14, %v2699_v47  ;;  %2791 = vst.msk [vmem:[#allocation2 + $0x10] sm:$0xff] %vm2788_vm14, %v2697_v48 }
 0x395   : > { %2943 = vrot.lane.b32.xlu1 %v5845_v43, %s6571_s29  ;;  %2941 = vrot.lane.b32.xlu0 %v5844_v44, %s6571_s29  ;;  %v5877_v43 = vld [vmem:[%s6700_s5 + $0x1a0] sm:$0xff]  ;;  %v5876_v44 = vld [vmem:[%s6700_s5 + $0x198] sm:$0xff] }
 0x397   : > { %v2703_v54 = vpop.permute.xlu1 %2702  ;;  %v2701_v3 = vpop.permute.xlu0 %2700 }
 0x398   : > { %2794 = vst.msk [vmem:[#allocation2 + $0x28] sm:$0xff] %vm2788_vm14, %v2703_v54  ;;  %2793 = vst.msk [vmem:[#allocation2 + $0x20] sm:$0xff] %vm2788_vm14, %v2701_v3 }
 0x399   : > { %2947 = vrot.lane.b32.xlu1 %v5847_v49, %s6571_s29  ;;  %2945 = vrot.lane.b32.xlu0 %v5846_v50, %s6571_s29  ;;  %v5879_v49 = vld [vmem:[%s6700_s5 + $0x1b8] sm:$0xff]  ;;  %v5878_v50 = vld [vmem:[%s6700_s5 + $0x1b0] sm:$0xff]  ;;  %s6578_s29 = smov 84  }
 0x39b   : > { %v2707_v58 = vpop.permute.xlu1 %2706  ;;  %v2705_v57 = vpop.permute.xlu0 %2704 }
 0x39c   : > { %2796 = vst.msk [vmem:[#allocation2 + $0x38] sm:$0xff] %vm2788_vm14, %v2707_v58  ;;  %2795 = vst.msk [vmem:[#allocation2 + $0x30] sm:$0xff] %vm2788_vm14, %v2705_v57 }
 0x39d   : > { %3081 = vrot.lane.b32.xlu1 %v5849_v53, %s6572_s30  ;;  %3079 = vrot.lane.b32.xlu0 %v5848_v4, %s6572_s30  ;;  %v5881_v53 = vld [vmem:[%s6700_s5 + $0x51] sm:$0xff]  ;;  %v5880_v4 = vld [vmem:[%s6700_s5 + $0x49] sm:$0xff] }
 0x39f   : > { %v2711_v7 = vpop.permute.xlu1 %2710  ;;  %v2709_v8 = vpop.permute.xlu0 %2708 }
 0x3a0   : > { %2798 = vst.msk [vmem:[#allocation2 + $0x48] sm:$0xff] %vm2788_vm14, %v2711_v7  ;;  %2797 = vst.msk [vmem:[#allocation2 + $0x40] sm:$0xff] %vm2788_vm14, %v2709_v8 }
 0x3a1   : > { %3085 = vrot.lane.b32.xlu1 %v5851_v5, %s6572_s30  ;;  %3083 = vrot.lane.b32.xlu0 %v5850_v6, %s6572_s30  ;;  %v8245_v5 = vld [vmem:[%s6700_s5 + $0x69] sm:$0xff]  ;;  %v8248_v6 = vld [vmem:[%s6700_s5 + $0x61] sm:$0xff] }
 0x3a3   : > { %v2715_v11 = vpop.permute.xlu1 %2714  ;;  %v2713_v12 = vpop.permute.xlu0 %2712 }
 0x3a4   : > { %2800 = vst.msk [vmem:[#allocation2 + $0x58] sm:$0xff] %vm2788_vm14, %v2715_v11  ;;  %2799 = vst.msk [vmem:[#allocation2 + $0x50] sm:$0xff] %vm2788_vm14, %v2713_v12 }
 0x3a5   : > { %3089 = vrot.lane.b32.xlu1 %v5853_v9, %s6572_s30  ;;  %3087 = vrot.lane.b32.xlu0 %v5852_v10, %s6572_s30  ;;  %v5885_v9 = vld [vmem:[%s6700_s5 + $0x81] sm:$0xff]  ;;  %v5884_v10 = vld [vmem:[%s6700_s5 + $0x79] sm:$0xff] }
 0x3a7   : > { %v2719_v16 = vpop.permute.xlu1 %2718  ;;  %v2717_v18 = vpop.permute.xlu0 %2716 }
 0x3a8   : > { %2802 = vst.msk [vmem:[#allocation2 + $0x68] sm:$0xff] %vm2788_vm14, %v2719_v16  ;;  %2801 = vst.msk [vmem:[#allocation2 + $0x60] sm:$0xff] %vm2788_vm14, %v2717_v18 }
 0x3a9   : > { %3093 = vrot.lane.b32.xlu1 %v5855_v14, %s6572_s30  ;;  %3091 = vrot.lane.b32.xlu0 %v5854_v15, %s6572_s30  ;;  %v5887_v14 = vld [vmem:[%s6700_s5 + $0x99] sm:$0xff]  ;;  %v5886_v15 = vld [vmem:[%s6700_s5 + $0x91] sm:$0xff] }
 0x3ab   : > { %v2723_v29 = vpop.permute.xlu1 %2722  ;;  %v2721_v30 = vpop.permute.xlu0 %2720 }
 0x3ac   : > { %2804 = vst.msk [vmem:[#allocation2 + $0x78] sm:$0xff] %vm2788_vm14, %v2723_v29  ;;  %2803 = vst.msk [vmem:[#allocation2 + $0x70] sm:$0xff] %vm2788_vm14, %v2721_v30 }
 0x3ad   : > { %3097 = vrot.lane.b32.xlu1 %v5857_v22, %s6572_s30  ;;  %3095 = vrot.lane.b32.xlu0 %v5856_v23, %s6572_s30  ;;  %v5889_v22 = vld [vmem:[%s6700_s5 + $0xb1] sm:$0xff]  ;;  %v5888_v23 = vld [vmem:[%s6700_s5 + $0xa9] sm:$0xff] }
 0x3af   : > { %v2727_v45 = vpop.permute.xlu1 %2726  ;;  %v2725_v46 = vpop.permute.xlu0 %2724 }
 0x3b0   : > { %2806 = vst.msk [vmem:[#allocation2 + $0x88] sm:$0xff] %vm2788_vm14, %v2727_v45  ;;  %2805 = vst.msk [vmem:[#allocation2 + $0x80] sm:$0xff] %vm2788_vm14, %v2725_v46 }
 0x3b1   : > { %3101 = vrot.lane.b32.xlu1 %v5859_v36, %s6572_s30  ;;  %3099 = vrot.lane.b32.xlu0 %v5858_v38, %s6572_s30  ;;  %v5891_v36 = vld [vmem:[%s6700_s5 + $0xc9] sm:$0xff]  ;;  %v5890_v38 = vld [vmem:[%s6700_s5 + $0xc1] sm:$0xff] }
 0x3b3   : > { %v2731_v55 = vpop.permute.xlu1 %2730  ;;  %v2729_v56 = vpop.permute.xlu0 %2728 }
 0x3b4   : > { %2808 = vst.msk [vmem:[#allocation2 + $0x98] sm:$0xff] %vm2788_vm14, %v2731_v55  ;;  %2807 = vst.msk [vmem:[#allocation2 + $0x90] sm:$0xff] %vm2788_vm14, %v2729_v56 }
 0x3b5   : > { %3105 = vrot.lane.b32.xlu1 %v5861_v51, %s6572_s30  ;;  %3103 = vrot.lane.b32.xlu0 %v5860_v52, %s6572_s30  ;;  %v5893_v51 = vld [vmem:[%s6700_s5 + $0xe1] sm:$0xff]  ;;  %v5892_v52 = vld [vmem:[%s6700_s5 + $0xd9] sm:$0xff] }
 0x3b7   : > { %v2735_v61 = vpop.permute.xlu1 %2734  ;;  %v2733_v62 = vpop.permute.xlu0 %2732 }
 0x3b8   : > { %2810 = vst.msk [vmem:[#allocation2 + $0xa8] sm:$0xff] %vm2788_vm14, %v2735_v61  ;;  %2809 = vst.msk [vmem:[#allocation2 + $0xa0] sm:$0xff] %vm2788_vm14, %v2733_v62 }
 0x3b9   : > { %3109 = vrot.lane.b32.xlu1 %v5863_v59, %s6572_s30  ;;  %3107 = vrot.lane.b32.xlu0 %v5862_v60, %s6572_s30  ;;  %v5895_v59 = vld [vmem:[%s6700_s5 + $0xf9] sm:$0xff]  ;;  %v5894_v60 = vld [vmem:[%s6700_s5 + $0xf1] sm:$0xff] }
 0x3bb   : > { %v2739_v1 = vpop.permute.xlu1 %2738  ;;  %v2737_v2 = vpop.permute.xlu0 %2736 }
 0x3bc   : > { %2812 = vst.msk [vmem:[#allocation2 + $0xb8] sm:$0xff] %vm2788_vm14, %v2739_v1  ;;  %2811 = vst.msk [vmem:[#allocation2 + $0xb0] sm:$0xff] %vm2788_vm14, %v2737_v2 }
 0x3bd   : > { %3113 = vrot.lane.b32.xlu1 %v5865_v63, %s6572_s30  ;;  %3111 = vrot.lane.b32.xlu0 %v5864_v0, %s6572_s30  ;;  %v5897_v63 = vld [vmem:[%s6700_s5 + $0x111] sm:$0xff]  ;;  %v5896_v0 = vld [vmem:[%s6700_s5 + $0x109] sm:$0xff] }
 0x3bf   : > { %v2743_v19 = vpop.permute.xlu1 %2742  ;;  %v2741_v20 = vpop.permute.xlu0 %2740 }
 0x3c0   : > { %2814 = vst.msk [vmem:[#allocation2 + $0xc8] sm:$0xff] %vm2788_vm14, %v2743_v19  ;;  %2813 = vst.msk [vmem:[#allocation2 + $0xc0] sm:$0xff] %vm2788_vm14, %v2741_v20 }
 0x3c1   : > { %3117 = vrot.lane.b32.xlu1 %v5867_v13, %s6572_s30  ;;  %3115 = vrot.lane.b32.xlu0 %v5866_v17, %s6572_s30  ;;  %v5899_v13 = vld [vmem:[%s6700_s5 + $0x129] sm:$0xff]  ;;  %v5898_v17 = vld [vmem:[%s6700_s5 + $0x121] sm:$0xff] }
 0x3c3   : > { %v2747_v25 = vpop.permute.xlu1 %2746  ;;  %v2745_v26 = vpop.permute.xlu0 %2744 }
 0x3c4   : > { %2816 = vst.msk [vmem:[#allocation2 + $0xd8] sm:$0xff] %vm2788_vm14, %v2747_v25  ;;  %2815 = vst.msk [vmem:[#allocation2 + $0xd0] sm:$0xff] %vm2788_vm14, %v2745_v26 }
 0x3c5   : > { %3121 = vrot.lane.b32.xlu1 %v5869_v21, %s6572_s30  ;;  %3119 = vrot.lane.b32.xlu0 %v5868_v24, %s6572_s30  ;;  %v5901_v21 = vld [vmem:[%s6700_s5 + $0x141] sm:$0xff]  ;;  %v5900_v24 = vld [vmem:[%s6700_s5 + $0x139] sm:$0xff] }
 0x3c7   : > { %v2751_v31 = vpop.permute.xlu1 %2750  ;;  %v2749_v32 = vpop.permute.xlu0 %2748 }
 0x3c8   : > { %2818 = vst.msk [vmem:[#allocation2 + $0xe8] sm:$0xff] %vm2788_vm14, %v2751_v31  ;;  %2817 = vst.msk [vmem:[#allocation2 + $0xe0] sm:$0xff] %vm2788_vm14, %v2749_v32 }
 0x3c9   : > { %3125 = vrot.lane.b32.xlu1 %v5871_v27, %s6572_s30  ;;  %3123 = vrot.lane.b32.xlu0 %v5870_v28, %s6572_s30  ;;  %v5903_v27 = vld [vmem:[%s6700_s5 + $0x159] sm:$0xff]  ;;  %v5902_v28 = vld [vmem:[%s6700_s5 + $0x151] sm:$0xff] }
 0x3cb   : > { %v2755_v35 = vpop.permute.xlu1 %2754  ;;  %v2753_v37 = vpop.permute.xlu0 %2752 }
 0x3cc   : > { %2820 = vst.msk [vmem:[#allocation2 + $0xf8] sm:$0xff] %vm2788_vm14, %v2755_v35  ;;  %2819 = vst.msk [vmem:[#allocation2 + $0xf0] sm:$0xff] %vm2788_vm14, %v2753_v37 }
 0x3cd   : > { %3129 = vrot.lane.b32.xlu1 %v5873_v33, %s6572_s30  ;;  %3127 = vrot.lane.b32.xlu0 %v5872_v34, %s6572_s30  ;;  %v5905_v33 = vld [vmem:[%s6700_s5 + $0x171] sm:$0xff]  ;;  %v5904_v34 = vld [vmem:[%s6700_s5 + $0x169] sm:$0xff] }
 0x3cf   : > { %v2888_v41 = vpop.permute.xlu1 %2887  ;;  %v2886_v42 = vpop.permute.xlu0 %2885 }
 0x3d0   : > { %2983 = vst.msk [vmem:[#allocation2 + $0x8] sm:$0xff] %vm2981_vm15, %v2888_v41  ;;  %2982 = vst.msk [vmem:[#allocation2] sm:$0xff] %vm2981_vm15, %v2886_v42 }
 0x3d1   : > { %3133 = vrot.lane.b32.xlu1 %v5875_v39, %s6572_s30  ;;  %3131 = vrot.lane.b32.xlu0 %v5874_v40, %s6572_s30  ;;  %v5907_v39 = vld [vmem:[%s6700_s5 + $0x189] sm:$0xff]  ;;  %v5906_v40 = vld [vmem:[%s6700_s5 + $0x181] sm:$0xff] }
 0x3d3   : > { %v2892_v47 = vpop.permute.xlu1 %2891  ;;  %v2890_v48 = vpop.permute.xlu0 %2889 }
 0x3d4   : > { %2985 = vst.msk [vmem:[#allocation2 + $0x18] sm:$0xff] %vm2981_vm15, %v2892_v47  ;;  %2984 = vst.msk [vmem:[#allocation2 + $0x10] sm:$0xff] %vm2981_vm15, %v2890_v48 }
 0x3d5   : > { %3137 = vrot.lane.b32.xlu1 %v5877_v43, %s6572_s30  ;;  %3135 = vrot.lane.b32.xlu0 %v5876_v44, %s6572_s30  ;;  %v5909_v43 = vld [vmem:[%s6700_s5 + $0x1a1] sm:$0xff]  ;;  %v5908_v44 = vld [vmem:[%s6700_s5 + $0x199] sm:$0xff] }
 0x3d7   : > { %v2896_v54 = vpop.permute.xlu1 %2895  ;;  %v2894_v3 = vpop.permute.xlu0 %2893 }
 0x3d8   : > { %2987 = vst.msk [vmem:[#allocation2 + $0x28] sm:$0xff] %vm2981_vm15, %v2896_v54  ;;  %2986 = vst.msk [vmem:[#allocation2 + $0x20] sm:$0xff] %vm2981_vm15, %v2894_v3 }
 0x3d9   : > { %3141 = vrot.lane.b32.xlu1 %v5879_v49, %s6572_s30  ;;  %3139 = vrot.lane.b32.xlu0 %v5878_v50, %s6572_s30  ;;  %v5911_v49 = vld [vmem:[%s6700_s5 + $0x1b9] sm:$0xff]  ;;  %v5910_v50 = vld [vmem:[%s6700_s5 + $0x1b1] sm:$0xff]  ;;  %s6437_s30 = sshll.u32 %s6582_s28, 4  ;;  %s6438_s30 = int_to_ptr.vmem [resolvable:$false] %s6437_s30 }
 0x3db   : > { %v2900_v58 = vpop.permute.xlu1 %2899  ;;  %v2898_v57 = vpop.permute.xlu0 %2897 }
 0x3dc   : > { %2989 = vst.msk [vmem:[#allocation2 + $0x38] sm:$0xff] %vm2981_vm15, %v2900_v58  ;;  %2988 = vst.msk [vmem:[#allocation2 + $0x30] sm:$0xff] %vm2981_vm15, %v2898_v57 }
 0x3dd   : > { %3274 = vrot.lane.b32.xlu1 %v5881_v53, %s6573_s6  ;;  %3272 = vrot.lane.b32.xlu0 %v5880_v4, %s6573_s6  ;;  %v5913_v53 = vld [vmem:[%s6700_s5 + $0x52] sm:$0xff]  ;;  %v5912_v4 = vld [vmem:[%s6700_s5 + $0x4a] sm:$0xff] }
 0x3df   : > { %v2904_v7 = vpop.permute.xlu1 %2903  ;;  %v2902_v8 = vpop.permute.xlu0 %2901 }
 0x3e0   : > { %2991 = vst.msk [vmem:[#allocation2 + $0x48] sm:$0xff] %vm2981_vm15, %v2904_v7  ;;  %2990 = vst.msk [vmem:[#allocation2 + $0x40] sm:$0xff] %vm2981_vm15, %v2902_v8  ;;  %v8347_v7 = vld [vmem:[%s6700_s5 + $0x6a] sm:$0xff]  ;;  %v8350_v8 = vld [vmem:[%s6700_s5 + $0x62] sm:$0xff] }
 0x3e1   : > { %3278 = vrot.lane.b32.xlu1 %v8245_v5, %s6573_s6  ;;  %3276 = vrot.lane.b32.xlu0 %v8248_v6, %s6573_s6 }
 0x3e3   : > { %v2908_v11 = vpop.permute.xlu1 %2907  ;;  %v2906_v12 = vpop.permute.xlu0 %2905 }
 0x3e4   : > { %2993 = vst.msk [vmem:[#allocation2 + $0x58] sm:$0xff] %vm2981_vm15, %v2908_v11  ;;  %2992 = vst.msk [vmem:[#allocation2 + $0x50] sm:$0xff] %vm2981_vm15, %v2906_v12  ;;  %v8359_v11 = vld [vmem:[%s6700_s5 + $0x82] sm:$0xff]  ;;  %v8362_v12 = vld [vmem:[%s6700_s5 + $0x7a] sm:$0xff] }
 0x3e5   : > { %3282 = vrot.lane.b32.xlu1 %v5885_v9, %s6573_s6  ;;  %3280 = vrot.lane.b32.xlu0 %v5884_v10, %s6573_s6 }
 0x3e7   : > { %v2912_v16 = vpop.permute.xlu1 %2911  ;;  %v2910_v18 = vpop.permute.xlu0 %2909 }
 0x3e8   : > { %2995 = vst.msk [vmem:[#allocation2 + $0x68] sm:$0xff] %vm2981_vm15, %v2912_v16  ;;  %2994 = vst.msk [vmem:[#allocation2 + $0x60] sm:$0xff] %vm2981_vm15, %v2910_v18  ;;  %v8371_v16 = vld [vmem:[%s6700_s5 + $0x9a] sm:$0xff]  ;;  %v8374_v18 = vld [vmem:[%s6700_s5 + $0x92] sm:$0xff] }
 0x3e9   : > { %3286 = vrot.lane.b32.xlu1 %v5887_v14, %s6573_s6  ;;  %3284 = vrot.lane.b32.xlu0 %v5886_v15, %s6573_s6 }
 0x3eb   : > { %v2916_v29 = vpop.permute.xlu1 %2915  ;;  %v2914_v30 = vpop.permute.xlu0 %2913 }
 0x3ec   : > { %2997 = vst.msk [vmem:[#allocation2 + $0x78] sm:$0xff] %vm2981_vm15, %v2916_v29  ;;  %2996 = vst.msk [vmem:[#allocation2 + $0x70] sm:$0xff] %vm2981_vm15, %v2914_v30  ;;  %v8383_v29 = vld [vmem:[%s6700_s5 + $0xb2] sm:$0xff]  ;;  %v8386_v30 = vld [vmem:[%s6700_s5 + $0xaa] sm:$0xff] }
 0x3ed   : > { %3290 = vrot.lane.b32.xlu1 %v5889_v22, %s6573_s6  ;;  %3288 = vrot.lane.b32.xlu0 %v5888_v23, %s6573_s6 }
 0x3ef   : > { %v2920_v45 = vpop.permute.xlu1 %2919  ;;  %v2918_v46 = vpop.permute.xlu0 %2917 }
 0x3f0   : > { %2999 = vst.msk [vmem:[#allocation2 + $0x88] sm:$0xff] %vm2981_vm15, %v2920_v45  ;;  %2998 = vst.msk [vmem:[#allocation2 + $0x80] sm:$0xff] %vm2981_vm15, %v2918_v46  ;;  %v8395_v45 = vld [vmem:[%s6700_s5 + $0xca] sm:$0xff]  ;;  %v8398_v46 = vld [vmem:[%s6700_s5 + $0xc2] sm:$0xff] }
 0x3f1   : > { %3294 = vrot.lane.b32.xlu1 %v5891_v36, %s6573_s6  ;;  %3292 = vrot.lane.b32.xlu0 %v5890_v38, %s6573_s6 }
 0x3f3   : > { %v2924_v55 = vpop.permute.xlu1 %2923  ;;  %v2922_v56 = vpop.permute.xlu0 %2921 }
 0x3f4   : > { %3001 = vst.msk [vmem:[#allocation2 + $0x98] sm:$0xff] %vm2981_vm15, %v2924_v55  ;;  %3000 = vst.msk [vmem:[#allocation2 + $0x90] sm:$0xff] %vm2981_vm15, %v2922_v56  ;;  %v5925_v55 = vld [vmem:[%s6700_s5 + $0xe2] sm:$0xff]  ;;  %v8408_v56 = vld [vmem:[%s6700_s5 + $0xda] sm:$0xff] }
 0x3f5   : > { %3298 = vrot.lane.b32.xlu1 %v5893_v51, %s6573_s6  ;;  %3296 = vrot.lane.b32.xlu0 %v5892_v52, %s6573_s6 }
 0x3f7   : > { %v2928_v61 = vpop.permute.xlu1 %2927  ;;  %v2926_v62 = vpop.permute.xlu0 %2925 }
 0x3f8   : > { %3003 = vst.msk [vmem:[#allocation2 + $0xa8] sm:$0xff] %vm2981_vm15, %v2928_v61  ;;  %3002 = vst.msk [vmem:[#allocation2 + $0xa0] sm:$0xff] %vm2981_vm15, %v2926_v62  ;;  %v5927_v61 = vld [vmem:[%s6700_s5 + $0xfa] sm:$0xff]  ;;  %v5926_v62 = vld [vmem:[%s6700_s5 + $0xf2] sm:$0xff] }
 0x3f9   : > { %3302 = vrot.lane.b32.xlu1 %v5895_v59, %s6573_s6  ;;  %3300 = vrot.lane.b32.xlu0 %v5894_v60, %s6573_s6 }
 0x3fb   : > { %v2932_v1 = vpop.permute.xlu1 %2931  ;;  %v2930_v2 = vpop.permute.xlu0 %2929 }
 0x3fc   : > { %3005 = vst.msk [vmem:[#allocation2 + $0xb8] sm:$0xff] %vm2981_vm15, %v2932_v1  ;;  %3004 = vst.msk [vmem:[#allocation2 + $0xb0] sm:$0xff] %vm2981_vm15, %v2930_v2  ;;  %v5929_v1 = vld [vmem:[%s6700_s5 + $0x112] sm:$0xff]  ;;  %v5928_v2 = vld [vmem:[%s6700_s5 + $0x10a] sm:$0xff] }
 0x3fd   : > { %3306 = vrot.lane.b32.xlu1 %v5897_v63, %s6573_s6  ;;  %3304 = vrot.lane.b32.xlu0 %v5896_v0, %s6573_s6 }
 0x3ff   : > { %v2936_v19 = vpop.permute.xlu1 %2935  ;;  %v2934_v20 = vpop.permute.xlu0 %2933 }
 0x400   : > { %3007 = vst.msk [vmem:[#allocation2 + $0xc8] sm:$0xff] %vm2981_vm15, %v2936_v19  ;;  %3006 = vst.msk [vmem:[#allocation2 + $0xc0] sm:$0xff] %vm2981_vm15, %v2934_v20  ;;  %v5931_v19 = vld [vmem:[%s6700_s5 + $0x12a] sm:$0xff]  ;;  %v5930_v20 = vld [vmem:[%s6700_s5 + $0x122] sm:$0xff] }
 0x401   : > { %3310 = vrot.lane.b32.xlu1 %v5899_v13, %s6573_s6  ;;  %3308 = vrot.lane.b32.xlu0 %v5898_v17, %s6573_s6 }
 0x403   : > { %v2940_v25 = vpop.permute.xlu1 %2939  ;;  %v2938_v26 = vpop.permute.xlu0 %2937 }
 0x404   : > { %3009 = vst.msk [vmem:[#allocation2 + $0xd8] sm:$0xff] %vm2981_vm15, %v2940_v25  ;;  %3008 = vst.msk [vmem:[#allocation2 + $0xd0] sm:$0xff] %vm2981_vm15, %v2938_v26  ;;  %v5933_v25 = vld [vmem:[%s6700_s5 + $0x142] sm:$0xff]  ;;  %v5932_v26 = vld [vmem:[%s6700_s5 + $0x13a] sm:$0xff] }
 0x405   : > { %3314 = vrot.lane.b32.xlu1 %v5901_v21, %s6573_s6  ;;  %3312 = vrot.lane.b32.xlu0 %v5900_v24, %s6573_s6 }
 0x407   : > { %v2944_v31 = vpop.permute.xlu1 %2943  ;;  %v2942_v32 = vpop.permute.xlu0 %2941 }
 0x408   : > { %3011 = vst.msk [vmem:[#allocation2 + $0xe8] sm:$0xff] %vm2981_vm15, %v2944_v31  ;;  %3010 = vst.msk [vmem:[#allocation2 + $0xe0] sm:$0xff] %vm2981_vm15, %v2942_v32  ;;  %v5935_v31 = vld [vmem:[%s6700_s5 + $0x15a] sm:$0xff]  ;;  %v5934_v32 = vld [vmem:[%s6700_s5 + $0x152] sm:$0xff] }
 0x409   : > { %3318 = vrot.lane.b32.xlu1 %v5903_v27, %s6573_s6  ;;  %3316 = vrot.lane.b32.xlu0 %v5902_v28, %s6573_s6 }
 0x40b   : > { %v2948_v35 = vpop.permute.xlu1 %2947  ;;  %v2946_v37 = vpop.permute.xlu0 %2945 }
 0x40c   : > { %3013 = vst.msk [vmem:[#allocation2 + $0xf8] sm:$0xff] %vm2981_vm15, %v2948_v35  ;;  %3012 = vst.msk [vmem:[#allocation2 + $0xf0] sm:$0xff] %vm2981_vm15, %v2946_v37  ;;  %v5937_v35 = vld [vmem:[%s6700_s5 + $0x172] sm:$0xff]  ;;  %v5936_v37 = vld [vmem:[%s6700_s5 + $0x16a] sm:$0xff] }
 0x40d   : > { %3322 = vrot.lane.b32.xlu1 %v5905_v33, %s6573_s6  ;;  %3320 = vrot.lane.b32.xlu0 %v5904_v34, %s6573_s6 }
 0x40f   : > { %v3082_v41 = vpop.permute.xlu1 %3081  ;;  %v3080_v42 = vpop.permute.xlu0 %3079 }
 0x410   : > { %3177 = vst.msk [vmem:[#allocation2 + $0x8] sm:$0xff] %vm3175_vm0, %v3082_v41  ;;  %3176 = vst.msk [vmem:[#allocation2] sm:$0xff] %vm3175_vm0, %v3080_v42  ;;  %v5939_v41 = vld [vmem:[%s6700_s5 + $0x18a] sm:$0xff]  ;;  %v5938_v42 = vld [vmem:[%s6700_s5 + $0x182] sm:$0xff] }
 0x411   : > { %3326 = vrot.lane.b32.xlu1 %v5907_v39, %s6573_s6  ;;  %3324 = vrot.lane.b32.xlu0 %v5906_v40, %s6573_s6 }
 0x413   : > { %v3086_v47 = vpop.permute.xlu1 %3085  ;;  %v3084_v48 = vpop.permute.xlu0 %3083 }
 0x414   : > { %3179 = vst.msk [vmem:[#allocation2 + $0x18] sm:$0xff] %vm3175_vm0, %v3086_v47  ;;  %3178 = vst.msk [vmem:[#allocation2 + $0x10] sm:$0xff] %vm3175_vm0, %v3084_v48  ;;  %v5941_v47 = vld [vmem:[%s6700_s5 + $0x1a2] sm:$0xff]  ;;  %v5940_v48 = vld [vmem:[%s6700_s5 + $0x19a] sm:$0xff] }
 0x415   : > { %3330 = vrot.lane.b32.xlu1 %v5909_v43, %s6573_s6  ;;  %3328 = vrot.lane.b32.xlu0 %v5908_v44, %s6573_s6 }
 0x417   : > { %v3090_v54 = vpop.permute.xlu1 %3089  ;;  %v3088_v3 = vpop.permute.xlu0 %3087 }
 0x418   : > { %3181 = vst.msk [vmem:[#allocation2 + $0x28] sm:$0xff] %vm3175_vm0, %v3090_v54  ;;  %3180 = vst.msk [vmem:[#allocation2 + $0x20] sm:$0xff] %vm3175_vm0, %v3088_v3  ;;  %v5943_v54 = vld [vmem:[%s6700_s5 + $0x1ba] sm:$0xff]  ;;  %v5942_v3 = vld [vmem:[%s6700_s5 + $0x1b2] sm:$0xff] }
 0x419   : > { %3334 = vrot.lane.b32.xlu1 %v5911_v49, %s6573_s6  ;;  %3332 = vrot.lane.b32.xlu0 %v5910_v50, %s6573_s6  ;;  %s6439_s6 = scalar_lea.vmem %s6438_s30, 8192 }
 0x41b   : > { %v3094_v58 = vpop.permute.xlu1 %3093  ;;  %v3092_v57 = vpop.permute.xlu0 %3091 }
 0x41c   : > { %3183 = vst.msk [vmem:[#allocation2 + $0x38] sm:$0xff] %vm3175_vm0, %v3094_v58  ;;  %3182 = vst.msk [vmem:[#allocation2 + $0x30] sm:$0xff] %vm3175_vm0, %v3092_v57  ;;  %v5945_v58 = vld [vmem:[%s6700_s5 + $0x53] sm:$0xff]  ;;  %v5944_v57 = vld [vmem:[%s6700_s5 + $0x4b] sm:$0xff] }
 0x41d   : > { %3467 = vrot.lane.b32.xlu1 %v5913_v53, %s6574_s8  ;;  %3465 = vrot.lane.b32.xlu0 %v5912_v4, %s6574_s8 }
 0x41f   : > { %v3098_v9 = vpop.permute.xlu1 %3097  ;;  %v3096_v10 = vpop.permute.xlu0 %3095 }
 0x420   : > { %3185 = vst.msk [vmem:[#allocation2 + $0x48] sm:$0xff] %vm3175_vm0, %v3098_v9  ;;  %3184 = vst.msk [vmem:[#allocation2 + $0x40] sm:$0xff] %vm3175_vm0, %v3096_v10 }
 0x421   : > { %3471 = vrot.lane.b32.xlu1 %v8347_v7, %s6574_s8  ;;  %3469 = vrot.lane.b32.xlu0 %v8350_v8, %s6574_s8 }
 0x423   : > { %v3102_v14 = vpop.permute.xlu1 %3101  ;;  %v3100_v15 = vpop.permute.xlu0 %3099 }
 0x424   : > { %3187 = vst.msk [vmem:[#allocation2 + $0x58] sm:$0xff] %vm3175_vm0, %v3102_v14  ;;  %3186 = vst.msk [vmem:[#allocation2 + $0x50] sm:$0xff] %vm3175_vm0, %v3100_v15  ;;  %v8476_v14 = vld [vmem:[%s6700_s5 + $0x6b] sm:$0xff]  ;;  %v8479_v15 = vld [vmem:[%s6700_s5 + $0x63] sm:$0xff] }
 0x425   : > { %3475 = vrot.lane.b32.xlu1 %v8359_v11, %s6574_s8  ;;  %3473 = vrot.lane.b32.xlu0 %v8362_v12, %s6574_s8 }
 0x427   : > { %v3106_v22 = vpop.permute.xlu1 %3105  ;;  %v3104_v23 = vpop.permute.xlu0 %3103 }
 0x428   : > { %3189 = vst.msk [vmem:[#allocation2 + $0x68] sm:$0xff] %vm3175_vm0, %v3106_v22  ;;  %3188 = vst.msk [vmem:[#allocation2 + $0x60] sm:$0xff] %vm3175_vm0, %v3104_v23 }
 0x429   : > { %3479 = vrot.lane.b32.xlu1 %v8371_v16, %s6574_s8  ;;  %3477 = vrot.lane.b32.xlu0 %v8374_v18, %s6574_s8 }
 0x42b   : > { %v3110_v36 = vpop.permute.xlu1 %3109  ;;  %v3108_v38 = vpop.permute.xlu0 %3107 }
 0x42c   : > { %3191 = vst.msk [vmem:[#allocation2 + $0x78] sm:$0xff] %vm3175_vm0, %v3110_v36  ;;  %3190 = vst.msk [vmem:[#allocation2 + $0x70] sm:$0xff] %vm3175_vm0, %v3108_v38  ;;  %v8488_v36 = vld [vmem:[%s6700_s5 + $0x83] sm:$0xff]  ;;  %v8491_v38 = vld [vmem:[%s6700_s5 + $0x7b] sm:$0xff] }
 0x42d   : > { %3483 = vrot.lane.b32.xlu1 %v8383_v29, %s6574_s8  ;;  %3481 = vrot.lane.b32.xlu0 %v8386_v30, %s6574_s8 }
 0x42f   : > { %v3114_v51 = vpop.permute.xlu1 %3113  ;;  %v3112_v52 = vpop.permute.xlu0 %3111 }
 0x430   : > { %3193 = vst.msk [vmem:[#allocation2 + $0x88] sm:$0xff] %vm3175_vm0, %v3114_v51  ;;  %3192 = vst.msk [vmem:[#allocation2 + $0x80] sm:$0xff] %vm3175_vm0, %v3112_v52 }
 0x431   : > { %3487 = vrot.lane.b32.xlu1 %v8395_v45, %s6574_s8  ;;  %3485 = vrot.lane.b32.xlu0 %v8398_v46, %s6574_s8 }
 0x433   : > { %v3118_v59 = vpop.permute.xlu1 %3117  ;;  %v3116_v60 = vpop.permute.xlu0 %3115 }
 0x434   : > { %3195 = vst.msk [vmem:[#allocation2 + $0x98] sm:$0xff] %vm3175_vm0, %v3118_v59  ;;  %3194 = vst.msk [vmem:[#allocation2 + $0x90] sm:$0xff] %vm3175_vm0, %v3116_v60  ;;  %v8503_v59 = vld [vmem:[%s6700_s5 + $0x93] sm:$0xff] }
 0x435   : > { %3491 = vrot.lane.b32.xlu1 %v5925_v55, %s6574_s8  ;;  %3489 = vrot.lane.b32.xlu0 %v8408_v56, %s6574_s8  ;;  %v8500_v55 = vld [vmem:[%s6700_s5 + $0x9b] sm:$0xff] }
 0x437   : > { %v3122_v63 = vpop.permute.xlu1 %3121  ;;  %v3120_v0 = vpop.permute.xlu0 %3119 }
 0x438   : > { %3197 = vst.msk [vmem:[#allocation2 + $0xa8] sm:$0xff] %vm3175_vm0, %v3122_v63  ;;  %3196 = vst.msk [vmem:[#allocation2 + $0xa0] sm:$0xff] %vm3175_vm0, %v3120_v0  ;;  %v8515_v63 = vld [vmem:[%s6700_s5 + $0xab] sm:$0xff] }
 0x439   : > { %3495 = vrot.lane.b32.xlu1 %v5927_v61, %s6574_s8  ;;  %3493 = vrot.lane.b32.xlu0 %v5926_v62, %s6574_s8  ;;  %v8512_v62 = vld [vmem:[%s6700_s5 + $0xb3] sm:$0xff] }
 0x43b   : > { %v3126_v13 = vpop.permute.xlu1 %3125  ;;  %v3124_v17 = vpop.permute.xlu0 %3123 }
 0x43c   : > { %3199 = vst.msk [vmem:[#allocation2 + $0xb8] sm:$0xff] %vm3175_vm0, %v3126_v13  ;;  %3198 = vst.msk [vmem:[#allocation2 + $0xb0] sm:$0xff] %vm3175_vm0, %v3124_v17  ;;  %v8527_v13 = vld [vmem:[%s6700_s5 + $0xc3] sm:$0xff] }
 0x43d   : > { %3499 = vrot.lane.b32.xlu1 %v5929_v1, %s6574_s8  ;;  %3497 = vrot.lane.b32.xlu0 %v5928_v2, %s6574_s8  ;;  %v8524_v2 = vld [vmem:[%s6700_s5 + $0xcb] sm:$0xff] }
 0x43f   : > { %v3130_v21 = vpop.permute.xlu1 %3129  ;;  %v3128_v24 = vpop.permute.xlu0 %3127 }
 0x440   : > { %3201 = vst.msk [vmem:[#allocation2 + $0xc8] sm:$0xff] %vm3175_vm0, %v3130_v21  ;;  %3200 = vst.msk [vmem:[#allocation2 + $0xc0] sm:$0xff] %vm3175_vm0, %v3128_v24  ;;  %v8539_v21 = vld [vmem:[%s6700_s5 + $0xdb] sm:$0xff] }
 0x441   : > { %3503 = vrot.lane.b32.xlu1 %v5931_v19, %s6574_s8  ;;  %3501 = vrot.lane.b32.xlu0 %v5930_v20, %s6574_s8  ;;  %v8536_v20 = vld [vmem:[%s6700_s5 + $0xe3] sm:$0xff] }
 0x443   : > { %v3134_v27 = vpop.permute.xlu1 %3133  ;;  %v3132_v28 = vpop.permute.xlu0 %3131 }
 0x444   : > { %3203 = vst.msk [vmem:[#allocation2 + $0xd8] sm:$0xff] %vm3175_vm0, %v3134_v27  ;;  %3202 = vst.msk [vmem:[#allocation2 + $0xd0] sm:$0xff] %vm3175_vm0, %v3132_v28  ;;  %v8551_v27 = vld [vmem:[%s6700_s5 + $0xf3] sm:$0xff] }
 0x445   : > { %3507 = vrot.lane.b32.xlu1 %v5933_v25, %s6574_s8  ;;  %3505 = vrot.lane.b32.xlu0 %v5932_v26, %s6574_s8  ;;  %v8548_v26 = vld [vmem:[%s6700_s5 + $0xfb] sm:$0xff] }
 0x447   : > { %v3138_v33 = vpop.permute.xlu1 %3137  ;;  %v3136_v34 = vpop.permute.xlu0 %3135 }
 0x448   : > { %3205 = vst.msk [vmem:[#allocation2 + $0xe8] sm:$0xff] %vm3175_vm0, %v3138_v33  ;;  %3204 = vst.msk [vmem:[#allocation2 + $0xe0] sm:$0xff] %vm3175_vm0, %v3136_v34  ;;  %v8563_v33 = vld [vmem:[%s6700_s5 + $0x10b] sm:$0xff] }
 0x449   : > { %3511 = vrot.lane.b32.xlu1 %v5935_v31, %s6574_s8  ;;  %3509 = vrot.lane.b32.xlu0 %v5934_v32, %s6574_s8  ;;  %v8560_v32 = vld [vmem:[%s6700_s5 + $0x113] sm:$0xff] }
 0x44b   : > { %v3142_v39 = vpop.permute.xlu1 %3141  ;;  %v3140_v40 = vpop.permute.xlu0 %3139 }
 0x44c   : > { %3207 = vst.msk [vmem:[#allocation2 + $0xf8] sm:$0xff] %vm3175_vm0, %v3142_v39  ;;  %3206 = vst.msk [vmem:[#allocation2 + $0xf0] sm:$0xff] %vm3175_vm0, %v3140_v40  ;;  %v5962_v39 = vld [vmem:[%s6700_s5 + $0x123] sm:$0xff] }
 0x44d   : > { %3515 = vrot.lane.b32.xlu1 %v5937_v35, %s6574_s8  ;;  %3513 = vrot.lane.b32.xlu0 %v5936_v37, %s6574_s8  ;;  %v5963_v37 = vld [vmem:[%s6700_s5 + $0x12b] sm:$0xff] }
 0x44f   : > { %v3275_v43 = vpop.permute.xlu1 %3274  ;;  %v3273_v44 = vpop.permute.xlu0 %3272 }
 0x450   : > { %3370 = vst.msk [vmem:[#allocation2 + $0x8] sm:$0xff] %vm3368_vm1, %v3275_v43  ;;  %3369 = vst.msk [vmem:[#allocation2] sm:$0xff] %vm3368_vm1, %v3273_v44  ;;  %v5964_v43 = vld [vmem:[%s6700_s5 + $0x13b] sm:$0xff] }
 0x451   : > { %3519 = vrot.lane.b32.xlu1 %v5939_v41, %s6574_s8  ;;  %3517 = vrot.lane.b32.xlu0 %v5938_v42, %s6574_s8  ;;  %v5965_v42 = vld [vmem:[%s6700_s5 + $0x143] sm:$0xff] }
 0x453   : > { %v3279_v49 = vpop.permute.xlu1 %3278  ;;  %v3277_v50 = vpop.permute.xlu0 %3276 }
 0x454   : > { %3372 = vst.msk [vmem:[#allocation2 + $0x18] sm:$0xff] %vm3368_vm1, %v3279_v49  ;;  %3371 = vst.msk [vmem:[#allocation2 + $0x10] sm:$0xff] %vm3368_vm1, %v3277_v50  ;;  %v5966_v49 = vld [vmem:[%s6700_s5 + $0x153] sm:$0xff] }
 0x455   : > { %3523 = vrot.lane.b32.xlu1 %v5941_v47, %s6574_s8  ;;  %3521 = vrot.lane.b32.xlu0 %v5940_v48, %s6574_s8  ;;  %v5967_v48 = vld [vmem:[%s6700_s5 + $0x15b] sm:$0xff] }
 0x457   : > { %v3283_v53 = vpop.permute.xlu1 %3282  ;;  %v3281_v4 = vpop.permute.xlu0 %3280 }
 0x458   : > { %3374 = vst.msk [vmem:[#allocation2 + $0x28] sm:$0xff] %vm3368_vm1, %v3283_v53  ;;  %3373 = vst.msk [vmem:[#allocation2 + $0x20] sm:$0xff] %vm3368_vm1, %v3281_v4  ;;  %v5968_v53 = vld [vmem:[%s6700_s5 + $0x16b] sm:$0xff] }
 0x459   : > { %3527 = vrot.lane.b32.xlu1 %v5943_v54, %s6574_s8  ;;  %3525 = vrot.lane.b32.xlu0 %v5942_v3, %s6574_s8  ;;  %v5969_v3 = vld [vmem:[%s6700_s5 + $0x173] sm:$0xff] }
 0x45b   : > { %v3287_v9 = vpop.permute.xlu1 %3286  ;;  %v3285_v10 = vpop.permute.xlu0 %3284 }
 0x45c   : > { %3376 = vst.msk [vmem:[#allocation2 + $0x38] sm:$0xff] %vm3368_vm1, %v3287_v9  ;;  %3375 = vst.msk [vmem:[#allocation2 + $0x30] sm:$0xff] %vm3368_vm1, %v3285_v10  ;;  %v5970_v9 = vld [vmem:[%s6700_s5 + $0x183] sm:$0xff] }
 0x45d   : > { %3660 = vrot.lane.b32.xlu1 %v5945_v58, %s6575_s9  ;;  %3658 = vrot.lane.b32.xlu0 %v5944_v57, %s6575_s9  ;;  %v5971_v57 = vld [vmem:[%s6700_s5 + $0x18b] sm:$0xff] }
 0x45f   : > { %v3291_v22 = vpop.permute.xlu1 %3290  ;;  %v3289_v23 = vpop.permute.xlu0 %3288 }
 0x460   : > { %3378 = vst.msk [vmem:[#allocation2 + $0x48] sm:$0xff] %vm3368_vm1, %v3291_v22  ;;  %3377 = vst.msk [vmem:[#allocation2 + $0x40] sm:$0xff] %vm3368_vm1, %v3289_v23  ;;  %v5973_v23 = vld [vmem:[%s6700_s5 + $0x1a3] sm:$0xff] }
 0x461   : > { %3664 = vrot.lane.b32.xlu1 %v8476_v14, %s6575_s9  ;;  %3662 = vrot.lane.b32.xlu0 %v8479_v15, %s6575_s9 }
 0x463   : > { %v3295_v51 = vpop.permute.xlu1 %3294  ;;  %v3293_v52 = vpop.permute.xlu0 %3292 }
 0x464   : > { %3380 = vst.msk [vmem:[#allocation2 + $0x58] sm:$0xff] %vm3368_vm1, %v3295_v51  ;;  %3379 = vst.msk [vmem:[#allocation2 + $0x50] sm:$0xff] %vm3368_vm1, %v3293_v52  ;;  %v5972_v51 = vld [vmem:[%s6700_s5 + $0x19b] sm:$0xff] }
 0x465   : > { %3668 = vrot.lane.b32.xlu1 %v8488_v36, %s6575_s9  ;;  %3666 = vrot.lane.b32.xlu0 %v8491_v38, %s6575_s9 }
 0x467   : > { %v3299_v60 = vpop.permute.xlu1 %3298  ;;  %v3297_v61 = vpop.permute.xlu0 %3296 }
 0x468   : > { %3382 = vst.msk [vmem:[#allocation2 + $0x68] sm:$0xff] %vm3368_vm1, %v3299_v60  ;;  %3381 = vst.msk [vmem:[#allocation2 + $0x60] sm:$0xff] %vm3368_vm1, %v3297_v61  ;;  %v5975_v61 = vld [vmem:[%s6700_s5 + $0x1bb] sm:$0xff] }
 0x469   : > { %3672 = vrot.lane.b32.xlu1 %v8500_v55, %s6575_s9  ;;  %3670 = vrot.lane.b32.xlu0 %v8503_v59, %s6575_s9 }
 0x46b   : > { %v3303_v0 = vpop.permute.xlu1 %3302  ;;  %v3301_v1 = vpop.permute.xlu0 %3300 }
 0x46c   : > { %3384 = vst.msk [vmem:[#allocation2 + $0x78] sm:$0xff] %vm3368_vm1, %v3303_v0  ;;  %3383 = vst.msk [vmem:[#allocation2 + $0x70] sm:$0xff] %vm3368_vm1, %v3301_v1  ;;  %v5974_v0 = vld [vmem:[%s6700_s5 + $0x1b3] sm:$0xff] }
 0x46d   : > { %3676 = vrot.lane.b32.xlu1 %v8512_v62, %s6575_s9  ;;  %3674 = vrot.lane.b32.xlu0 %v8515_v63, %s6575_s9 }
 0x46f   : > { %v3307_v17 = vpop.permute.xlu1 %3306  ;;  %v3305_v19 = vpop.permute.xlu0 %3304 }
 0x470   : > { %3386 = vst.msk [vmem:[#allocation2 + $0x88] sm:$0xff] %vm3368_vm1, %v3307_v17  ;;  %3385 = vst.msk [vmem:[#allocation2 + $0x80] sm:$0xff] %vm3368_vm1, %v3305_v19  ;;  %v5977_v19 = vld [vmem:[%s6700_s5 + $0x54] sm:$0xff] }
 0x471   : > { %3680 = vrot.lane.b32.xlu1 %v8524_v2, %s6575_s9  ;;  %3678 = vrot.lane.b32.xlu0 %v8527_v13, %s6575_s9 }
 0x473   : > { %v3311_v24 = vpop.permute.xlu1 %3310  ;;  %v3309_v25 = vpop.permute.xlu0 %3308 }
 0x474   : > { %3388 = vst.msk [vmem:[#allocation2 + $0x98] sm:$0xff] %vm3368_vm1, %v3311_v24  ;;  %3387 = vst.msk [vmem:[#allocation2 + $0x90] sm:$0xff] %vm3368_vm1, %v3309_v25  ;;  %v5976_v24 = vld [vmem:[%s6700_s5 + $0x4c] sm:$0xff] }
 0x475   : > { %3684 = vrot.lane.b32.xlu1 %v8536_v20, %s6575_s9  ;;  %3682 = vrot.lane.b32.xlu0 %v8539_v21, %s6575_s9 }
 0x477   : > { %v3315_v28 = vpop.permute.xlu1 %3314  ;;  %v3313_v31 = vpop.permute.xlu0 %3312 }
 0x478   : > { %3390 = vst.msk [vmem:[#allocation2 + $0xa8] sm:$0xff] %vm3368_vm1, %v3315_v28  ;;  %3389 = vst.msk [vmem:[#allocation2 + $0xa0] sm:$0xff] %vm3368_vm1, %v3313_v31  ;;  %v8620_v31 = vld [vmem:[%s6700_s5 + $0x6c] sm:$0xff] }
 0x479   : > { %3688 = vrot.lane.b32.xlu1 %v8548_v26, %s6575_s9  ;;  %3686 = vrot.lane.b32.xlu0 %v8551_v27, %s6575_s9 }
 0x47b   : > { %v3319_v34 = vpop.permute.xlu1 %3318  ;;  %v3317_v35 = vpop.permute.xlu0 %3316 }
 0x47c   : > { %3392 = vst.msk [vmem:[#allocation2 + $0xb8] sm:$0xff] %vm3368_vm1, %v3319_v34  ;;  %3391 = vst.msk [vmem:[#allocation2 + $0xb0] sm:$0xff] %vm3368_vm1, %v3317_v35  ;;  %v8623_v34 = vld [vmem:[%s6700_s5 + $0x64] sm:$0xff] }
 0x47d   : > { %3692 = vrot.lane.b32.xlu1 %v8560_v32, %s6575_s9  ;;  %3690 = vrot.lane.b32.xlu0 %v8563_v33, %s6575_s9 }
 0x47f   : > { %v3323_v40 = vpop.permute.xlu1 %3322  ;;  %v3321_v41 = vpop.permute.xlu0 %3320 }
 0x480   : > { %3394 = vst.msk [vmem:[#allocation2 + $0xc8] sm:$0xff] %vm3368_vm1, %v3323_v40  ;;  %3393 = vst.msk [vmem:[#allocation2 + $0xc0] sm:$0xff] %vm3368_vm1, %v3321_v41  ;;  %v8635_v40 = vld [vmem:[%s6700_s5 + $0x84] sm:$0xff]  ;;  %v8638_v41 = vld [vmem:[%s6700_s5 + $0x7c] sm:$0xff] }
 0x481   : > { %3696 = vrot.lane.b32.xlu1 %v5963_v37, %s6575_s9  ;;  %3694 = vrot.lane.b32.xlu0 %v5962_v39, %s6575_s9  ;;  %v4978_v39 = vld [vmem:[%s9461_s1] sm:$0xff] }
 0x483   : > { %v3327_v44 = vpop.permute.xlu1 %3326  ;;  %v3325_v47 = vpop.permute.xlu0 %3324 }
 0x484   : > { %3396 = vst.msk [vmem:[#allocation2 + $0xd8] sm:$0xff] %vm3368_vm1, %v3327_v44  ;;  %3395 = vst.msk [vmem:[#allocation2 + $0xd0] sm:$0xff] %vm3368_vm1, %v3325_v47 }
 0x485   : > { %3700 = vrot.lane.b32.xlu1 %v5965_v42, %s6575_s9  ;;  %3698 = vrot.lane.b32.xlu0 %v5964_v43, %s6575_s9  ;;  %v4979_v42 = vld [vmem:[%s9461_s1 + $0x8] sm:$0xff] }
 0x486   : > { %v6304_v47 = vpack.c.bf16 %v4979_v42, %v4978_v39  ;;  %v4988_v42 = vld [vmem:[%s9461_s1 + $0x50] sm:$0xff] }
 0x487   : > { %v3331_v50 = vpop.permute.xlu1 %3330  ;;  %v3329_v54 = vpop.permute.xlu0 %3328 }
 0x488   : > { %3398 = vst.msk [vmem:[#allocation2 + $0xe8] sm:$0xff] %vm3368_vm1, %v3331_v50  ;;  %3397 = vst.msk [vmem:[#allocation2 + $0xe0] sm:$0xff] %vm3368_vm1, %v3329_v54  ;;  %v8656_v50 = vld [vmem:[%s6700_s5 + $0x9c] sm:$0xff]  ;;  %v8659_v54 = vld [vmem:[%s6700_s5 + $0x94] sm:$0xff]  ;;  %6305 = vmatprep.subr.bf16.mxu0 %v6304_v47  ;;  %6336 = vmatprep.subr.bf16.mxu1 %v6304_v47 }
 0x489   : > { %3704 = vrot.lane.b32.xlu1 %v5967_v48, %s6575_s9  ;;  %3702 = vrot.lane.b32.xlu0 %v5966_v49, %s6575_s9  ;;  %v4980_v48 = vld [vmem:[%s9461_s1 + $0x10] sm:$0xff]  ;;  %v4981_v49 = vld [vmem:[%s9461_s1 + $0x18] sm:$0xff] }
 0x48a   : > { %6307 = vmatpush3.bf16.msra.mxu0 %v6304_v47  ;;  %6344 = vmatpush3.bf16.msra.mxu1 %v6304_v47 }
 0x48b   : > { %v3335_v4 = vpop.permute.xlu1 %3334  ;;  %v3333_v58 = vpop.permute.xlu0 %3332 }
 0x48c   : > { %3400 = vst.msk [vmem:[#allocation2 + $0xf8] sm:$0xff] %vm3368_vm1, %v3335_v4  ;;  %3399 = vst.msk [vmem:[#allocation2 + $0xf0] sm:$0xff] %vm3368_vm1, %v3333_v58  ;;  %v4982_v58 = vld [vmem:[%s9461_s1 + $0x20] sm:$0xff] }
 0x48d   : > { %3708 = vrot.lane.b32.xlu1 %v5969_v3, %s6575_s9  ;;  %3706 = vrot.lane.b32.xlu0 %v5968_v53, %s6575_s9  ;;  %v6308_v3 = vpack.c.bf16 %v4981_v49, %v4980_v48  ;;  %v4991_v49 = vld [vmem:[%s9461_s1 + $0x68] sm:$0xff] }
 0x48f   : > { %v3468_v10 = vpop.permute.xlu1 %3467  ;;  %v3466_v22 = vpop.permute.xlu0 %3465  ;;  %6309 = vmatprep.subr.bf16.mxu0 %v6308_v3  ;;  %6337 = vmatprep.subr.bf16.mxu1 %v6308_v3 }
 0x490   : > { %3563 = vst.msk [vmem:[#allocation2 + $0x8] sm:$0xff] %vm3561_vm2, %v3468_v10  ;;  %3562 = vst.msk [vmem:[#allocation2] sm:$0xff] %vm3561_vm2, %v3466_v22  ;;  %v4983_v10 = vld [vmem:[%s9461_s1 + $0x28] sm:$0xff]  ;;  %6311 = vmatpush3.bf16.msra.mxu0 %v6308_v3  ;;  %6345 = vmatpush3.bf16.msra.mxu1 %v6308_v3 }
 0x491   : > { %3712 = vrot.lane.b32.xlu1 %v5971_v57, %s6575_s9  ;;  %3710 = vrot.lane.b32.xlu0 %v5970_v9, %s6575_s9  ;;  %v8671_v57 = vld [vmem:[%s6700_s5 + $0xb4] sm:$0xff]  ;;  %v8674_v9 = vld [vmem:[%s6700_s5 + $0xac] sm:$0xff] }
 0x493   : > { %v3472_v52 = vpop.permute.xlu1 %3471  ;;  %v3470_v60 = vpop.permute.xlu0 %3469 }
 0x494   : > { %3565 = vst.msk [vmem:[#allocation2 + $0x18] sm:$0xff] %vm3561_vm2, %v3472_v52  ;;  %3564 = vst.msk [vmem:[#allocation2 + $0x10] sm:$0xff] %vm3561_vm2, %v3470_v60  ;;  %v4984_v52 = vld [vmem:[%s9461_s1 + $0x30] sm:$0xff]  ;;  %v4985_v60 = vld [vmem:[%s9461_s1 + $0x38] sm:$0xff] }
 0x495   : > { %3716 = vrot.lane.b32.xlu1 %v5973_v23, %s6575_s9  ;;  %3714 = vrot.lane.b32.xlu0 %v5972_v51, %s6575_s9  ;;  %v6312_v51 = vpack.c.bf16 %v4983_v10, %v4982_v58  ;;  %v6010_v58 = vld [vmem:[%s6700_s5 + $0x78] sm:$0xff] }
 0x497   : > { %v3476_v1 = vpop.permute.xlu1 %3475  ;;  %v3474_v17 = vpop.permute.xlu0 %3473  ;;  %6313 = vmatprep.subr.bf16.mxu0 %v6312_v51  ;;  %6338 = vmatprep.subr.bf16.mxu1 %v6312_v51 }
 0x498   : > { %3567 = vst.msk [vmem:[#allocation2 + $0x28] sm:$0xff] %vm3561_vm2, %v3476_v1  ;;  %3566 = vst.msk [vmem:[#allocation2 + $0x20] sm:$0xff] %vm3561_vm2, %v3474_v17  ;;  %v6316_v1 = vpack.c.bf16 %v4985_v60, %v4984_v52  ;;  %6315 = vmatpush3.bf16.msra.mxu0 %v6312_v51  ;;  %6346 = vmatpush3.bf16.msra.mxu1 %v6312_v51  ;;  %v6428_v60 = vld [vmem:[%s6700_s5 + $0x79] sm:$0xff] }
 0x499   : > { %3720 = vrot.lane.b32.xlu1 %v5975_v61, %s6575_s9  ;;  %3718 = vrot.lane.b32.xlu0 %v5974_v0, %s6575_s9  ;;  %v6008_v61 = vld [vmem:[%s6700_s5 + $0x60] sm:$0xff]  ;;  %s6581_s9 = smov 96  }
 0x49a   : > { %v8693_v0 = vld [vmem:[%s6700_s5 + $0xc4] sm:$0xff]  ;;  %6317 = vmatprep.subr.bf16.mxu0 %v6316_v1  ;;  %6339 = vmatprep.subr.bf16.mxu1 %v6316_v1 }
 0x49b   : > { %v3480_v25 = vpop.permute.xlu1 %3479  ;;  %v3478_v28 = vpop.permute.xlu0 %3477 }
 0x49c   : > { %3569 = vst.msk [vmem:[#allocation2 + $0x38] sm:$0xff] %vm3561_vm2, %v3480_v25  ;;  %3568 = vst.msk [vmem:[#allocation2 + $0x30] sm:$0xff] %vm3561_vm2, %v3478_v28  ;;  %v6009_v25 = vld [vmem:[%s6700_s5 + $0x68] sm:$0xff]  ;;  %6319 = vmatpush3.bf16.msra.mxu0 %v6316_v1  ;;  %6347 = vmatpush3.bf16.msra.mxu1 %v6316_v1 }
 0x49d   : > { %3853 = vrot.lane.b32.xlu1 %v5977_v19, %s6576_s10  ;;  %3851 = vrot.lane.b32.xlu0 %v5976_v24, %s6576_s10  ;;  %v4986_v24 = vld [vmem:[%s9461_s1 + $0x40] sm:$0xff]  ;;  %v4987_v28 = vld [vmem:[%s9461_s1 + $0x48] sm:$0xff] }
 0x49e   : > { %v6320_v39 = vpack.c.bf16 %v4987_v28, %v4986_v24 }
 0x49f   : > { %v3484_v35 = vpop.permute.xlu1 %3483  ;;  %v3482_v37 = vpop.permute.xlu0 %3481 }
 0x4a0   : > { %3571 = vst.msk [vmem:[#allocation2 + $0x48] sm:$0xff] %vm3561_vm2, %v3484_v35  ;;  %3570 = vst.msk [vmem:[#allocation2 + $0x40] sm:$0xff] %vm3561_vm2, %v3482_v37  ;;  %6321 = vmatprep.subr.bf16.mxu0 %v6320_v39  ;;  %6340 = vmatprep.subr.bf16.mxu1 %v6320_v39 }
 0x4a1   : > { %3857 = vrot.lane.b32.xlu1 %v8620_v31, %s6576_s10  ;;  %3855 = vrot.lane.b32.xlu0 %v8623_v34, %s6576_s10 }
 0x4a2   : > { %6323 = vmatpush3.bf16.msra.mxu0 %v6320_v39  ;;  %6348 = vmatpush3.bf16.msra.mxu1 %v6320_v39 }
 0x4a3   : > { %v3488_v43 = vpop.permute.xlu1 %3487  ;;  %v3486_v44 = vpop.permute.xlu0 %3485 }
 0x4a4   : > { %3573 = vst.msk [vmem:[#allocation2 + $0x58] sm:$0xff] %vm3561_vm2, %v3488_v43  ;;  %3572 = vst.msk [vmem:[#allocation2 + $0x50] sm:$0xff] %vm3561_vm2, %v3486_v44  ;;  %v4989_v43 = vld [vmem:[%s9461_s1 + $0x58] sm:$0xff] }
 0x4a5   : > { %3861 = vrot.lane.b32.xlu1 %v8635_v40, %s6576_s10  ;;  %3859 = vrot.lane.b32.xlu0 %v8638_v41, %s6576_s10  ;;  %v6324_v48 = vpack.c.bf16 %v4989_v43, %v4988_v42 }
 0x4a7   : > { %v3492_v53 = vpop.permute.xlu1 %3491  ;;  %v3490_v4 = vpop.permute.xlu0 %3489  ;;  %6325 = vmatprep.subr.bf16.mxu0 %v6324_v48  ;;  %6341 = vmatprep.subr.bf16.mxu1 %v6324_v48 }
 0x4a8   : > { %3575 = vst.msk [vmem:[#allocation2 + $0x68] sm:$0xff] %vm3561_vm2, %v3492_v53  ;;  %3574 = vst.msk [vmem:[#allocation2 + $0x60] sm:$0xff] %vm3561_vm2, %v3490_v4  ;;  %6327 = vmatpush3.bf16.msra.mxu0 %v6324_v48  ;;  %6349 = vmatpush3.bf16.msra.mxu1 %v6324_v48 }
 0x4a9   : > { %3865 = vrot.lane.b32.xlu1 %v8656_v50, %s6576_s10  ;;  %3863 = vrot.lane.b32.xlu0 %v8659_v54, %s6576_s10 }
 0x4ab   : > { %v3496_v22 = vpop.permute.xlu1 %3495  ;;  %v3494_v23 = vpop.permute.xlu0 %3493 }
 0x4ac   : > { %3577 = vst.msk [vmem:[#allocation2 + $0x78] sm:$0xff] %vm3561_vm2, %v3496_v22  ;;  %3576 = vst.msk [vmem:[#allocation2 + $0x70] sm:$0xff] %vm3561_vm2, %v3494_v23 }
 0x4ad   : > { %3869 = vrot.lane.b32.xlu1 %v8671_v57, %s6576_s10  ;;  %3867 = vrot.lane.b32.xlu0 %v8674_v9, %s6576_s10 }
 0x4af   : > { %v3500_v17 = vpop.permute.xlu1 %3499  ;;  %v3498_v19 = vpop.permute.xlu0 %3497 }
 0x4b0   : > { %3579 = vst.msk [vmem:[#allocation2 + $0x88] sm:$0xff] %vm3561_vm2, %v3500_v17  ;;  %3578 = vst.msk [vmem:[#allocation2 + $0x80] sm:$0xff] %vm3561_vm2, %v3498_v19  ;;  %v6012_v19 = vld [vmem:[%s6700_s5 + $0x90] sm:$0xff] }
 0x4b1   : > { %4045 = vrot.lane.b32.xlu1 %v6008_v61, %s6577_s14  ;;  %3871 = vrot.lane.b32.xlu0 %v8693_v0, %s6576_s10 }
 0x4b3   : > { %v3504_v35 = vpop.permute.xlu1 %3503  ;;  %v3502_v37 = vpop.permute.xlu0 %3501 }
 0x4b4   : > { %3581 = vst.msk [vmem:[#allocation2 + $0x98] sm:$0xff] %vm3561_vm2, %v3504_v35  ;;  %3580 = vst.msk [vmem:[#allocation2 + $0x90] sm:$0xff] %vm3561_vm2, %v3502_v37 }
 0x4b5   : > { %4238 = vrot.lane.b32.xlu1 %v8248_v6, %s6578_s29  ;;  %4047 = vrot.lane.b32.xlu0 %v6009_v25, %s6577_s14  ;;  %v4990_v6 = vld [vmem:[%s9461_s1 + $0x60] sm:$0xff]  ;;  %v6013_v25 = vld [vmem:[%s6700_s5 + $0x98] sm:$0xff] }
 0x4b6   : > { %v6328_v4 = vpack.c.bf16 %v4991_v49, %v4990_v6 }
 0x4b7   : > { %v3508_v44 = vpop.permute.xlu1 %3507  ;;  %v3506_v47 = vpop.permute.xlu0 %3505 }
 0x4b8   : > { %3583 = vst.msk [vmem:[#allocation2 + $0xa8] sm:$0xff] %vm3561_vm2, %v3508_v44  ;;  %3582 = vst.msk [vmem:[#allocation2 + $0xa0] sm:$0xff] %vm3561_vm2, %v3506_v47  ;;  %6329 = vmatprep.subr.bf16.mxu0 %v6328_v4  ;;  %6342 = vmatprep.subr.bf16.mxu1 %v6328_v4  ;;  %v6015_v47 = vld [vmem:[%s6700_s5 + $0xb0] sm:$0xff] }
 0x4b9   : > { %4431 = vrot.lane.b32.xlu1 %v8350_v8, %s6579_s11  ;;  %4240 = vrot.lane.b32.xlu0 %v8245_v5, %s6578_s29  ;;  %v4992_v5 = vld [vmem:[%s9461_s1 + $0x70] sm:$0xff]  ;;  %v4993_v8 = vld [vmem:[%s9461_s1 + $0x78] sm:$0xff] }
 0x4ba   : > { %v6332_v10 = vpack.c.bf16 %v4993_v8, %v4992_v5  ;;  %6331 = vmatpush3.bf16.msra.mxu0 %v6328_v4  ;;  %6350 = vmatpush3.bf16.msra.mxu1 %v6328_v4 }
 0x4bb   : > { %v3512_v3 = vpop.permute.xlu1 %3511  ;;  %v3510_v53 = vpop.permute.xlu0 %3509 }
 0x4bc   : > { %3585 = vst.msk [vmem:[#allocation2 + $0xb8] sm:$0xff] %vm3561_vm2, %v3512_v3  ;;  %3584 = vst.msk [vmem:[#allocation2 + $0xb0] sm:$0xff] %vm3561_vm2, %v3510_v53  ;;  %6333 = vmatprep.subr.bf16.mxu0 %v6332_v10  ;;  %6343 = vmatprep.subr.bf16.mxu1 %v6332_v10 }
 0x4bd   : > { %4624 = vrot.lane.b32.xlu1 %v8479_v15, %s6580_s27  ;;  %4433 = vrot.lane.b32.xlu0 %v8347_v7, %s6579_s11  ;;  %v6011_v7 = vld [vmem:[%s6700_s5 + $0x80] sm:$0xff] }
 0x4be   : > { %6335 = vmatpush3.bf16.msra.mxu0 %v6332_v10  ;;  %6351 = vmatpush3.bf16.msra.mxu1 %v6332_v10 }
 0x4bf   : > { %v3516_v22 = vpop.permute.xlu1 %3515  ;;  %v3514_v23 = vpop.permute.xlu0 %3513 }
 0x4c0   : > { %3587 = vst.msk [vmem:[#allocation2 + $0xc8] sm:$0xff] %vm3561_vm2, %v3516_v22  ;;  %3586 = vst.msk [vmem:[#allocation2 + $0xc0] sm:$0xff] %vm3561_vm2, %v3514_v23 }
 0x4c1   : > { %4626 = vrot.lane.b32.xlu1 %v8476_v14, %s6580_s27  ;;  %4049 = vrot.lane.b32.xlu0 %v6010_v58, %s6577_s14 }
 0x4c3   : > { %v3520_v15 = vpop.permute.xlu1 %3519  ;;  %v3518_v51 = vpop.permute.xlu0 %3517 }
 0x4c4   : > { %3589 = vst.msk [vmem:[#allocation2 + $0xd8] sm:$0xff] %vm3561_vm2, %v3520_v15  ;;  %3588 = vst.msk [vmem:[#allocation2 + $0xd0] sm:$0xff] %vm3561_vm2, %v3518_v51  ;;  %v6018_v51 = vld [vmem:[%s6700_s5 + $0xd8] sm:$0xff] }
 0x4c5   : > { %4051 = vrot.lane.b32.xlu1 %v6011_v7, %s6577_s14  ;;  %4817 = vrot.lane.b32.xlu0 %v8623_v34, %s6581_s9  ;;  %v6429_v34 = vld [vmem:[%s6700_s5 + $0x81] sm:$0xff] }
 0x4c7   : > { %v3524_v14 = vpop.permute.xlu1 %3523  ;;  %v3522_v52 = vpop.permute.xlu0 %3521 }
 0x4c8   : > { %3591 = vst.msk [vmem:[#allocation2 + $0xe8] sm:$0xff] %vm3561_vm2, %v3524_v14  ;;  %3590 = vst.msk [vmem:[#allocation2 + $0xe0] sm:$0xff] %vm3561_vm2, %v3522_v52 }
 0x4c9   : > { %4819 = vrot.lane.b32.xlu1 %v8620_v31, %s6581_s9  ;;  %4242 = vrot.lane.b32.xlu0 %v6428_v60, %s6578_s29  ;;  %v6050_v60 = vld [vmem:[%s6700_s5 + $0xd9] sm:$0xff] }
 0x4cb   : > { %v3528_v61 = vpop.permute.xlu1 %3527  ;;  %v3526_v1 = vpop.permute.xlu0 %3525 }
 0x4cc   : > { %3593 = vst.msk [vmem:[#allocation2 + $0xf8] sm:$0xff] %vm3561_vm2, %v3528_v61  ;;  %3592 = vst.msk [vmem:[#allocation2 + $0xf0] sm:$0xff] %vm3561_vm2, %v3526_v1 }
 0x4cd   : > { %4435 = vrot.lane.b32.xlu1 %v8362_v12, %s6579_s11  ;;  %4244 = vrot.lane.b32.xlu0 %v6429_v34, %s6578_s29  ;;  %v6051_v34 = vld [vmem:[%s6700_s5 + $0xe1] sm:$0xff] }
 0x4cf   : > { %v3661_v17 = vpop.permute.xlu1 %3660  ;;  %v3659_v31 = vpop.permute.xlu0 %3658 }
 0x4d0   : > { %3756 = vst.msk [vmem:[#allocation2 + $0x8] sm:$0xff] %vm3754_vm3, %v3661_v17  ;;  %3755 = vst.msk [vmem:[#allocation2] sm:$0xff] %vm3754_vm3, %v3659_v31 }
 0x4d1   : > { %4628 = vrot.lane.b32.xlu1 %v8491_v38, %s6580_s27  ;;  %4437 = vrot.lane.b32.xlu0 %v8359_v11, %s6579_s11 }
 0x4d3   : > { %v3665_v24 = vpop.permute.xlu1 %3664  ;;  %v3663_v12 = vpop.permute.xlu0 %3662 }
 0x4d4   : > { %3758 = vst.msk [vmem:[#allocation2 + $0x18] sm:$0xff] %vm3754_vm3, %v3665_v24  ;;  %3757 = vst.msk [vmem:[#allocation2 + $0x10] sm:$0xff] %vm3754_vm3, %v3663_v12 }
 0x4d5   : > { %4630 = vrot.lane.b32.xlu1 %v8488_v36, %s6580_s27  ;;  %4053 = vrot.lane.b32.xlu0 %v6012_v19, %s6577_s14  ;;  %v6430_v36 = vld [vmem:[%s6700_s5 + $0x91] sm:$0xff] }
 0x4d7   : > { %v3669_v28 = vpop.permute.xlu1 %3668  ;;  %v3667_v35 = vpop.permute.xlu0 %3666 }
 0x4d8   : > { %3760 = vst.msk [vmem:[#allocation2 + $0x28] sm:$0xff] %vm3754_vm3, %v3669_v28  ;;  %3759 = vst.msk [vmem:[#allocation2 + $0x20] sm:$0xff] %vm3754_vm3, %v3667_v35  ;;  %v5989_v28 = vld [vmem:[%s6700_s5 + $0xe4] sm:$0xff]  ;;  %v6020_v35 = vld [vmem:[%s6700_s5 + $0xf0] sm:$0xff] }
 0x4d9   : > { %4055 = vrot.lane.b32.xlu1 %v6013_v25, %s6577_s14  ;;  %4821 = vrot.lane.b32.xlu0 %v8638_v41, %s6581_s9  ;;  %v6431_v41 = vld [vmem:[%s6700_s5 + $0x99] sm:$0xff]  ;;  %v6432_v25 = vld [vmem:[%s6700_s5 + $0xe2] sm:$0xff] }
 0x4db   : > { %v3673_v11 = vpop.permute.xlu1 %3672  ;;  %v3671_v38 = vpop.permute.xlu0 %3670 }
 0x4dc   : > { %3762 = vst.msk [vmem:[#allocation2 + $0x38] sm:$0xff] %vm3754_vm3, %v3673_v11  ;;  %3761 = vst.msk [vmem:[#allocation2 + $0x30] sm:$0xff] %vm3754_vm3, %v3671_v38 }
 0x4dd   : > { %4823 = vrot.lane.b32.xlu1 %v8635_v40, %s6581_s9  ;;  %4246 = vrot.lane.b32.xlu0 %v6430_v36, %s6578_s29  ;;  %v6014_v40 = vld [vmem:[%s6700_s5 + $0xa8] sm:$0xff] }
 0x4df   : > { %v3677_v37 = vpop.permute.xlu1 %3676  ;;  %v3675_v39 = vpop.permute.xlu0 %3674 }
 0x4e0   : > { %3764 = vst.msk [vmem:[#allocation2 + $0x48] sm:$0xff] %vm3754_vm3, %v3677_v37  ;;  %3763 = vst.msk [vmem:[#allocation2 + $0x40] sm:$0xff] %vm3754_vm3, %v3675_v39  ;;  %v6052_v37 = vld [vmem:[%s6700_s5 + $0xf1] sm:$0xff] }
 0x4e1   : > { %4439 = vrot.lane.b32.xlu1 %v8374_v18, %s6579_s11  ;;  %4248 = vrot.lane.b32.xlu0 %v6431_v41, %s6578_s29 }
 0x4e3   : > { %v3681_v42 = vpop.permute.xlu1 %3680  ;;  %v3679_v43 = vpop.permute.xlu0 %3678 }
 0x4e4   : > { %3766 = vst.msk [vmem:[#allocation2 + $0x58] sm:$0xff] %vm3754_vm3, %v3681_v42  ;;  %3765 = vst.msk [vmem:[#allocation2 + $0x50] sm:$0xff] %vm3754_vm3, %v3679_v43  ;;  %v6053_v42 = vld [vmem:[%s6700_s5 + $0xf9] sm:$0xff] }
 0x4e5   : > { %4632 = vrot.lane.b32.xlu1 %v8503_v59, %s6580_s27  ;;  %4441 = vrot.lane.b32.xlu0 %v8371_v16, %s6579_s11  ;;  %v6046_v16 = vld [vmem:[%s6700_s5 + $0xa9] sm:$0xff] }
 0x4e7   : > { %v3685_v44 = vpop.permute.xlu1 %3684  ;;  %v3683_v18 = vpop.permute.xlu0 %3682 }
 0x4e8   : > { %3768 = vst.msk [vmem:[#allocation2 + $0x68] sm:$0xff] %vm3754_vm3, %v3685_v44  ;;  %3767 = vst.msk [vmem:[#allocation2 + $0x60] sm:$0xff] %vm3754_vm3, %v3683_v18  ;;  %v5990_v44 = vld [vmem:[%s6700_s5 + $0xf4] sm:$0xff] }
 0x4e9   : > { %4634 = vrot.lane.b32.xlu1 %v8500_v55, %s6580_s27  ;;  %4057 = vrot.lane.b32.xlu0 %v6014_v40, %s6577_s14  ;;  %v6047_v55 = vld [vmem:[%s6700_s5 + $0xb1] sm:$0xff] }
 0x4ea   : > { %v6084_v40 = vld [vmem:[%s6700_s5 + $0xf2] sm:$0xff] }
 0x4eb   : > { %v3689_v48 = vpop.permute.xlu1 %3688  ;;  %v3687_v59 = vpop.permute.xlu0 %3686 }
 0x4ec   : > { %3770 = vst.msk [vmem:[#allocation2 + $0x78] sm:$0xff] %vm3754_vm3, %v3689_v48  ;;  %3769 = vst.msk [vmem:[#allocation2 + $0x70] sm:$0xff] %vm3754_vm3, %v3687_v59  ;;  %v6085_v48 = vld [vmem:[%s6700_s5 + $0xfa] sm:$0xff] }
 0x4ed   : > { %4059 = vrot.lane.b32.xlu1 %v6015_v47, %s6577_s14  ;;  %4825 = vrot.lane.b32.xlu0 %v8659_v54, %s6581_s9 }
 0x4ef   : > { %v3693_v6 = vpop.permute.xlu1 %3692  ;;  %v3691_v49 = vpop.permute.xlu0 %3690 }
 0x4f0   : > { %3772 = vst.msk [vmem:[#allocation2 + $0x88] sm:$0xff] %vm3754_vm3, %v3693_v6  ;;  %3771 = vst.msk [vmem:[#allocation2 + $0x80] sm:$0xff] %vm3754_vm3, %v3691_v49  ;;  %v5991_v6 = vld [vmem:[%s6700_s5 + $0xfc] sm:$0xff]  ;;  %v6022_v49 = vld [vmem:[%s6700_s5 + $0x108] sm:$0xff] }
 0x4f1   : > { %4827 = vrot.lane.b32.xlu1 %v8656_v50, %s6581_s9  ;;  %4250 = vrot.lane.b32.xlu0 %v6046_v16, %s6578_s29  ;;  %v6016_v50 = vld [vmem:[%s6700_s5 + $0xc0] sm:$0xff] }
 0x4f3   : > { %v3697_v3 = vpop.permute.xlu1 %3696  ;;  %v3695_v53 = vpop.permute.xlu0 %3694 }
 0x4f4   : > { %3774 = vst.msk [vmem:[#allocation2 + $0x98] sm:$0xff] %vm3754_vm3, %v3697_v3  ;;  %3773 = vst.msk [vmem:[#allocation2 + $0x90] sm:$0xff] %vm3754_vm3, %v3695_v53 }
 0x4f5   : > { %4443 = vrot.lane.b32.xlu1 %v8386_v30, %s6579_s11  ;;  %4252 = vrot.lane.b32.xlu0 %v6047_v55, %s6578_s29  ;;  %v6017_v30 = vld [vmem:[%s6700_s5 + $0xc8] sm:$0xff] }
 0x4f7   : > { %v3701_v54 = vpop.permute.xlu1 %3700  ;;  %v3699_v4 = vpop.permute.xlu0 %3698 }
 0x4f8   : > { %3776 = vst.msk [vmem:[#allocation2 + $0xa8] sm:$0xff] %vm3754_vm3, %v3701_v54  ;;  %3775 = vst.msk [vmem:[#allocation2 + $0xa0] sm:$0xff] %vm3754_vm3, %v3699_v4 }
 0x4f9   : > { %4636 = vrot.lane.b32.xlu1 %v8515_v63, %s6580_s27  ;;  %4445 = vrot.lane.b32.xlu0 %v8383_v29, %s6579_s11  ;;  %v6048_v29 = vld [vmem:[%s6700_s5 + $0xc1] sm:$0xff] }
 0x4fb   : > { %v3705_v5 = vpop.permute.xlu1 %3704  ;;  %v3703_v8 = vpop.permute.xlu0 %3702 }
 0x4fc   : > { %3778 = vst.msk [vmem:[#allocation2 + $0xb8] sm:$0xff] %vm3754_vm3, %v3705_v5  ;;  %3777 = vst.msk [vmem:[#allocation2 + $0xb0] sm:$0xff] %vm3754_vm3, %v3703_v8  ;;  %v6054_v5 = vld [vmem:[%s6700_s5 + $0x109] sm:$0xff] }
 0x4fd   : > { %4638 = vrot.lane.b32.xlu1 %v8512_v62, %s6580_s27  ;;  %4061 = vrot.lane.b32.xlu0 %v6016_v50, %s6577_s14  ;;  %v6049_v62 = vld [vmem:[%s6700_s5 + $0xc9] sm:$0xff] }
 0x4fe   : > { %v6023_v50 = vld [vmem:[%s6700_s5 + $0x110] sm:$0xff] }
 0x4ff   : > { %v3709_v58 = vpop.permute.xlu1 %3708  ;;  %v3707_v63 = vpop.permute.xlu0 %3706 }
 0x500   : > { %3780 = vst.msk [vmem:[#allocation2 + $0xc8] sm:$0xff] %vm3754_vm3, %v3709_v58  ;;  %3779 = vst.msk [vmem:[#allocation2 + $0xc0] sm:$0xff] %vm3754_vm3, %v3707_v63  ;;  %v6055_v58 = vld [vmem:[%s6700_s5 + $0x111] sm:$0xff] }
 0x501   : > { %4063 = vrot.lane.b32.xlu1 %v6017_v30, %s6577_s14  ;;  %4829 = vrot.lane.b32.xlu0 %v8674_v9, %s6581_s9 }
 0x503   : > { %v3713_v10 = vpop.permute.xlu1 %3712  ;;  %v3711_v22 = vpop.permute.xlu0 %3710 }
 0x504   : > { %3782 = vst.msk [vmem:[#allocation2 + $0xd8] sm:$0xff] %vm3754_vm3, %v3713_v10  ;;  %3781 = vst.msk [vmem:[#allocation2 + $0xd0] sm:$0xff] %vm3754_vm3, %v3711_v22  ;;  %v5992_v10 = vld [vmem:[%s6700_s5 + $0x10c] sm:$0xff] }
 0x505   : > { %4831 = vrot.lane.b32.xlu1 %v8671_v57, %s6581_s9  ;;  %4254 = vrot.lane.b32.xlu0 %v6048_v29, %s6578_s29  ;;  %v5987_v57 = vld [vmem:[%s6700_s5 + $0xcc] sm:$0xff] }
 0x506   : > { %v6086_v29 = vld [vmem:[%s6700_s5 + $0x10a] sm:$0xff] }
 0x507   : > { %v3717_v23 = vpop.permute.xlu1 %3716  ;;  %v3715_v7 = vpop.permute.xlu0 %3714 }
 0x508   : > { %3784 = vst.msk [vmem:[#allocation2 + $0xe8] sm:$0xff] %vm3754_vm3, %v3717_v23  ;;  %3783 = vst.msk [vmem:[#allocation2 + $0xe0] sm:$0xff] %vm3754_vm3, %v3715_v7  ;;  %v6087_v23 = vld [vmem:[%s6700_s5 + $0x112] sm:$0xff] }
 0x509   : > { %4256 = vrot.lane.b32.xlu0 %v6049_v62, %s6578_s29  ;;  %4447 = vrot.lane.b32.xlu1 %v8398_v46, %s6579_s11 }
 0x50b   : > { %v3721_v9 = vpop.permute.xlu1 %3720  ;;  %v3719_v15 = vpop.permute.xlu0 %3718 }
 0x50c   : > { %3786 = vst.msk [vmem:[#allocation2 + $0xf8] sm:$0xff] %vm3754_vm3, %v3721_v9  ;;  %3785 = vst.msk [vmem:[#allocation2 + $0xf0] sm:$0xff] %vm3754_vm3, %v3719_v15 }
 0x50d   : > { %4449 = vrot.lane.b32.xlu0 %v8395_v45, %s6579_s11  ;;  %4640 = vrot.lane.b32.xlu1 %v8527_v13, %s6580_s27  ;;  %v6019_v13 = vld [vmem:[%s6700_s5 + $0xe0] sm:$0xff] }
 0x50f   : > { %v3854_v14 = vpop.permute.xlu1 %3853  ;;  %v3852_v52 = vpop.permute.xlu0 %3851 }
 0x510   : > { %3949 = vst.msk [vmem:[#allocation2 + $0x8] sm:$0xff] %vm3947_vm4, %v3854_v14  ;;  %3948 = vst.msk [vmem:[#allocation2] sm:$0xff] %vm3947_vm4, %v3852_v52 }
 0x511   : > { %3873 = vrot.lane.b32.xlu0 %v5987_v57, %s6576_s10  ;;  %4065 = vrot.lane.b32.xlu1 %v6018_v51, %s6577_s14  ;;  %v6024_v51 = vld [vmem:[%s6700_s5 + $0x120] sm:$0xff] }
 0x513   : > { %v3858_v45 = vpop.permute.xlu1 %3857  ;;  %v3856_v46 = vpop.permute.xlu0 %3855 }
 0x514   : > { %3951 = vst.msk [vmem:[#allocation2 + $0x18] sm:$0xff] %vm3947_vm4, %v3858_v45  ;;  %3950 = vst.msk [vmem:[#allocation2 + $0x10] sm:$0xff] %vm3947_vm4, %v3856_v46 }
 0x515   : > { %4642 = vrot.lane.b32.xlu0 %v8524_v2, %s6580_s27  ;;  %4833 = vrot.lane.b32.xlu1 %v8693_v0, %s6581_s9  ;;  %v5988_v2 = vld [vmem:[%s6700_s5 + $0xdc] sm:$0xff] }
 0x517   : > { %v3862_v61 = vpop.permute.xlu1 %3861  ;;  %v3860_v1 = vpop.permute.xlu0 %3859 }
 0x518   : > { %3953 = vst.msk [vmem:[#allocation2 + $0x28] sm:$0xff] %vm3947_vm4, %v3862_v61  ;;  %3952 = vst.msk [vmem:[#allocation2 + $0x20] sm:$0xff] %vm3947_vm4, %v3860_v1 }
 0x519   : > { %4067 = vrot.lane.b32.xlu0 %v6019_v13, %s6577_s14  ;;  %4258 = vrot.lane.b32.xlu1 %v6050_v60, %s6578_s29  ;;  %v6056_v60 = vld [vmem:[%s6700_s5 + $0x121] sm:$0xff] }
 0x51b   : > { %v3866_v17 = vpop.permute.xlu1 %3865  ;;  %v3864_v31 = vpop.permute.xlu0 %3863 }
 0x51c   : > { %3955 = vst.msk [vmem:[#allocation2 + $0x38] sm:$0xff] %vm3947_vm4, %v3866_v17  ;;  %3954 = vst.msk [vmem:[#allocation2 + $0x30] sm:$0xff] %vm3947_vm4, %v3864_v31  ;;  %v6088_v31 = vld [vmem:[%s6700_s5 + $0x122] sm:$0xff] }
 0x51d   : > { %4835 = vrot.lane.b32.xlu0 %v5987_v57, %s6581_s9  ;;  %4260 = vrot.lane.b32.xlu1 %v6051_v34, %s6578_s29  ;;  %v5993_v57 = vld [vmem:[%s6700_s5 + $0x114] sm:$0xff]  ;;  %v6057_v34 = vld [vmem:[%s6700_s5 + $0x129] sm:$0xff] }
 0x51f   : > { %v3870_v0 = vpop.permute.xlu1 %3869  ;;  %v3868_v19 = vpop.permute.xlu0 %3867 }
 0x520   : > { %3957 = vst.msk [vmem:[#allocation2 + $0x48] sm:$0xff] %vm3947_vm4, %v3870_v0  ;;  %3956 = vst.msk [vmem:[#allocation2 + $0x40] sm:$0xff] %vm3947_vm4, %v3868_v19 }
 0x521   : > { %4451 = vrot.lane.b32.xlu0 %v8408_v56, %s6579_s11  ;;  %3875 = vrot.lane.b32.xlu1 %v5988_v2, %s6576_s10 }
 0x523   : > { %v4046_v24 = vpop.permute.xlu1 %4045  ;;  %v3872_v12 = vpop.permute.xlu0 %3871 }
 0x524   : > { %4142 = vst.msk [vmem:[#allocation2] sm:$0xff] %vm4141_vm5, %v4046_v24 }
 0x525   : > { %3958 = vst.msk [vmem:[#allocation2 + $0x50] sm:$0xff] %vm3947_vm4, %v3872_v12  ;;  %4453 = vrot.lane.b32.xlu0 %v6432_v25, %s6579_s11  ;;  %4644 = vrot.lane.b32.xlu1 %v8539_v21, %s6580_s27  ;;  %v6021_v21 = vld [vmem:[%s6700_s5 + $0xf8] sm:$0xff]  ;;  %v6089_v12 = vld [vmem:[%s6700_s5 + $0x12a] sm:$0xff] }
 0x526   : > { %v6120_v25 = vld [vmem:[%s6700_s5 + $0x123] sm:$0xff] }
 0x527   : > { %v4239_v56 = vpop.permute.xlu1 %4238  ;;  %v4048_v11 = vpop.permute.xlu0 %4047 }
 0x528   : > { %4335 = vst.msk [vmem:[#allocation2] sm:$0xff] %vm4334_vm6, %v4239_v56 }
 0x529   : > { %4143 = vst.msk [vmem:[#allocation2 + $0x8] sm:$0xff] %vm4141_vm5, %v4048_v11  ;;  %3877 = vrot.lane.b32.xlu0 %v5989_v28, %s6576_s10  ;;  %4069 = vrot.lane.b32.xlu1 %v6020_v35, %s6577_s14  ;;  %v5995_v11 = vld [vmem:[%s6700_s5 + $0x12c] sm:$0xff] }
 0x52b   : > { %v4432_v38 = vpop.permute.xlu1 %4431  ;;  %v4241_v36 = vpop.permute.xlu0 %4240 }
 0x52c   : > { %4528 = vst.msk [vmem:[#allocation2] sm:$0xff] %vm4527_vm7, %v4432_v38  ;;  %v6026_v38 = vld [vmem:[%s6700_s5 + $0x138] sm:$0xff] }
 0x52d   : > { %4336 = vst.msk [vmem:[#allocation2 + $0x8] sm:$0xff] %vm4334_vm6, %v4241_v36  ;;  %4646 = vrot.lane.b32.xlu0 %v8536_v20, %s6580_s27  ;;  %4837 = vrot.lane.b32.xlu1 %v5988_v2, %s6581_s9  ;;  %v5994_v2 = vld [vmem:[%s6700_s5 + $0x124] sm:$0xff] }
 0x52f   : > { %v4625_v39 = vpop.permute.xlu1 %4624  ;;  %v4434_v41 = vpop.permute.xlu0 %4433 }
 0x530   : > { %4721 = vst.msk [vmem:[#allocation2] sm:$0xff] %vm4720_vm8, %v4625_v39 }
 0x531   : > { %4529 = vst.msk [vmem:[#allocation2 + $0x8] sm:$0xff] %vm4527_vm7, %v4434_v41  ;;  %4071 = vrot.lane.b32.xlu0 %v6021_v21, %s6577_s14  ;;  %4262 = vrot.lane.b32.xlu1 %v6052_v37, %s6578_s29  ;;  %v6121_v37 = vld [vmem:[%s6700_s5 + $0x12b] sm:$0xff] }
 0x533   : > { %v4627_v20 = vpop.permute.xlu1 %4626  ;;  %v4050_v43 = vpop.permute.xlu0 %4049 }
 0x534   : > { %4722 = vst.msk [vmem:[#allocation2 + $0x8] sm:$0xff] %vm4720_vm8, %v4627_v20  ;;  %v6058_v20 = vld [vmem:[%s6700_s5 + $0x139] sm:$0xff] }
 0x535   : > { %4144 = vst.msk [vmem:[#allocation2 + $0x10] sm:$0xff] %vm4141_vm5, %v4050_v43  ;;  %4839 = vrot.lane.b32.xlu0 %v5989_v28, %s6581_s9  ;;  %4264 = vrot.lane.b32.xlu1 %v6053_v42, %s6578_s29  ;;  %v6027_v42 = vld [vmem:[%s6700_s5 + $0x140] sm:$0xff] }
 0x537   : > { %v4052_v18 = vpop.permute.xlu1 %4051  ;;  %v4818_v47 = vpop.permute.xlu0 %4817 }
 0x538   : > { %4145 = vst.msk [vmem:[#allocation2 + $0x18] sm:$0xff] %vm4141_vm5, %v4052_v18 }
 0x539   : > { %4914 = vst.msk [vmem:[#allocation2] sm:$0xff] %vm4913_vm9, %v4818_v47  ;;  %4455 = vrot.lane.b32.xlu0 %v6084_v40, %s6579_s11  ;;  %3879 = vrot.lane.b32.xlu1 %v5990_v44, %s6576_s10 }
 0x53b   : > { %v4820_v59 = vpop.permute.xlu1 %4819  ;;  %v4243_v16 = vpop.permute.xlu0 %4242 }
 0x53c   : > { %4915 = vst.msk [vmem:[#allocation2 + $0x8] sm:$0xff] %vm4913_vm9, %v4820_v59  ;;  %v6090_v59 = vld [vmem:[%s6700_s5 + $0x13a] sm:$0xff] }
 0x53d   : > { %4337 = vst.msk [vmem:[#allocation2 + $0x10] sm:$0xff] %vm4334_vm6, %v4243_v16  ;;  %4457 = vrot.lane.b32.xlu0 %v6085_v48, %s6579_s11  ;;  %4648 = vrot.lane.b32.xlu1 %v8551_v27, %s6580_s27  ;;  %v5996_v16 = vld [vmem:[%s6700_s5 + $0x13c] sm:$0xff] }
 0x53f   : > { %v4436_v55 = vpop.permute.xlu1 %4435  ;;  %v4245_v3 = vpop.permute.xlu0 %4244 }
 0x540   : > { %v4946_v53 = vld [vmem:[#allocation2] sm:$0xff]  ;;  %4530 = vst.msk [vmem:[#allocation2 + $0x10] sm:$0xff] %vm4527_vm7, %v4436_v55 }
 0x541   : > { %4338 = vst.msk [vmem:[#allocation2 + $0x18] sm:$0xff] %vm4334_vm6, %v4245_v3  ;;  %6256 = vmatprep.mubr.f32.mxu0 %v4946_v53  ;;  %3881 = vrot.lane.b32.xlu0 %v5991_v6, %s6576_s10  ;;  %v6091_v3 = vld [vmem:[%s6700_s5 + $0x142] sm:$0xff] }
 0x542   : > { %4073 = vrot.lane.b32.xlu1 %v6022_v49, %s6577_s14  ;;  %v6122_v53 = vld [vmem:[%s6700_s5 + $0x13b] sm:$0xff] }
 0x543   : > { %v4629_v54 = vpop.permute.xlu1 %4628  ;;  %v4438_v4 = vpop.permute.xlu0 %4437  ;;  %v4947_v27 = vld [vmem:[#allocation2 + $0x8] sm:$0xff] }
 0x544   : > { %4723 = vst.msk [vmem:[#allocation2 + $0x10] sm:$0xff] %vm4720_vm8, %v4629_v54  ;;  %6257 = vmatmul.mubr.f32.vlgmr.msra.gmra.mrb[0].mxu0 %v4947_v27  ;;  %v5997_v27 = vld [vmem:[%s6700_s5 + $0x144] sm:$0xff] }
 0x545   : > { %4531 = vst.msk [vmem:[#allocation2 + $0x18] sm:$0xff] %vm4527_vm7, %v4438_v4  ;;  %4650 = vrot.lane.b32.xlu0 %v8548_v26, %s6580_s27 }
 0x546   : > { %4841 = vrot.lane.b32.xlu1 %v5990_v44, %s6581_s9  ;;  %v6059_v44 = vld [vmem:[%s6700_s5 + $0x141] sm:$0xff] }
 0x547   : > { %v4631_v8 = vpop.permute.xlu1 %4630  ;;  %v4054_v30 = vpop.permute.xlu0 %4053 }
 0x548   : > { %4724 = vst.msk [vmem:[#allocation2 + $0x18] sm:$0xff] %vm4720_vm8, %v4631_v8 }
 0x549   : > { %4146 = vst.msk [vmem:[#allocation2 + $0x20] sm:$0xff] %vm4141_vm5, %v4054_v30  ;;  %4075 = vrot.lane.b32.xlu0 %v6023_v50, %s6577_s14  ;;  %v6028_v50 = vld [vmem:[%s6700_s5 + $0x150] sm:$0xff]  ;;  %v6123_v30 = vld [vmem:[%s6700_s5 + $0x143] sm:$0xff] }
 0x54a   : > { %4266 = vrot.lane.b32.xlu1 %v6054_v5, %s6578_s29 }
 0x54b   : > { %v4056_v63 = vpop.permute.xlu1 %4055  ;;  %v4822_v26 = vpop.permute.xlu0 %4821 }
 0x54c   : > { %4147 = vst.msk [vmem:[#allocation2 + $0x28] sm:$0xff] %vm4141_vm5, %v4056_v63 }
 0x54d   : > { %4916 = vst.msk [vmem:[#allocation2 + $0x10] sm:$0xff] %vm4913_vm9, %v4822_v26  ;;  %4843 = vrot.lane.b32.xlu0 %v5991_v6, %s6581_s9  ;;  %v6029_v26 = vld [vmem:[%s6700_s5 + $0x158] sm:$0xff] }
 0x54e   : > { %4268 = vrot.lane.b32.xlu1 %v6055_v58, %s6578_s29 }
 0x54f   : > { %v4824_v22 = vpop.permute.xlu1 %4823  ;;  %v4247_v62 = vpop.permute.xlu0 %4246 }
 0x550   : > { %4917 = vst.msk [vmem:[#allocation2 + $0x18] sm:$0xff] %vm4913_vm9, %v4824_v22 }
 0x551   : > { %4339 = vst.msk [vmem:[#allocation2 + $0x20] sm:$0xff] %vm4334_vm6, %v4247_v62  ;;  %4459 = vrot.lane.b32.xlu0 %v6086_v29, %s6579_s11  ;;  %v6060_v29 = vld [vmem:[%s6700_s5 + $0x151] sm:$0xff] }
 0x552   : > { %3883 = vrot.lane.b32.xlu1 %v5992_v10, %s6576_s10 }
 0x553   : > { %v4440_v7 = vpop.permute.xlu1 %4439  ;;  %v4249_v9 = vpop.permute.xlu0 %4248 }
 0x554   : > { %v4948_v15 = vld [vmem:[#allocation2 + $0x10] sm:$0xff]  ;;  %4532 = vst.msk [vmem:[#allocation2 + $0x20] sm:$0xff] %vm4527_vm7, %v4440_v7 }
 0x555   : > { %4340 = vst.msk [vmem:[#allocation2 + $0x28] sm:$0xff] %vm4334_vm6, %v4249_v9  ;;  %6259 = vmatprep.mubr.f32.mxu0 %v4948_v15  ;;  %4461 = vrot.lane.b32.xlu0 %v6087_v23, %s6579_s11  ;;  %v6061_v23 = vld [vmem:[%s6700_s5 + $0x159] sm:$0xff] }
 0x556   : > { %4652 = vrot.lane.b32.xlu1 %v8563_v33, %s6580_s27  ;;  %v6025_v33 = vld [vmem:[%s6700_s5 + $0x128] sm:$0xff]  ;;  %v6092_v15 = vld [vmem:[%s6700_s5 + $0x152] sm:$0xff] }
 0x557   : > { %v4633_v14 = vpop.permute.xlu1 %4632  ;;  %v4442_v52 = vpop.permute.xlu0 %4441  ;;  %v4949_v45 = vld [vmem:[#allocation2 + $0x18] sm:$0xff] }
 0x558   : > { %4725 = vst.msk [vmem:[#allocation2 + $0x20] sm:$0xff] %vm4720_vm8, %v4633_v14  ;;  %6260 = vmatmul.mubr.f32.gmra.mrb[2].mxu0 %v4949_v45  ;;  %v6093_v45 = vld [vmem:[%s6700_s5 + $0x15a] sm:$0xff] }
 0x559   : > { %4533 = vst.msk [vmem:[#allocation2 + $0x28] sm:$0xff] %vm4527_vm7, %v4442_v52  ;;  %3885 = vrot.lane.b32.xlu0 %v5993_v57, %s6576_s10 }
 0x55a   : > { %4077 = vrot.lane.b32.xlu1 %v6024_v51, %s6577_s14 }
 0x55b   : > { %v4635_v46 = vpop.permute.xlu1 %4634  ;;  %v4058_v13 = vpop.permute.xlu0 %4057 }
 0x55c   : > { %4726 = vst.msk [vmem:[#allocation2 + $0x28] sm:$0xff] %vm4720_vm8, %v4635_v46  ;;  %v6124_v46 = vld [vmem:[%s6700_s5 + $0x153] sm:$0xff] }
 0x55d   : > { %4148 = vst.msk [vmem:[#allocation2 + $0x30] sm:$0xff] %vm4141_vm5, %v4058_v13  ;;  %4654 = vrot.lane.b32.xlu0 %v8560_v32, %s6580_s27 }
 0x55e   : > { %4845 = vrot.lane.b32.xlu1 %v5992_v10, %s6581_s9 }
 0x55f   : > { %v4060_v61 = vpop.permute.xlu1 %4059  ;;  %v4826_v1 = vpop.permute.xlu0 %4825 }
 0x560   : > { %4149 = vst.msk [vmem:[#allocation2 + $0x38] sm:$0xff] %vm4141_vm5, %v4060_v61  ;;  %v6030_v61 = vld [vmem:[%s6700_s5 + $0x168] sm:$0xff] }
 0x561   : > { %4918 = vst.msk [vmem:[#allocation2 + $0x20] sm:$0xff] %vm4913_vm9, %v4826_v1  ;;  %4079 = vrot.lane.b32.xlu0 %v6025_v33, %s6577_s14 }
 0x562   : > { %4270 = vrot.lane.b32.xlu1 %v6056_v60, %s6578_s29  ;;  %v5999_v60 = vld [vmem:[%s6700_s5 + $0x15c] sm:$0xff] }
 0x563   : > { %v4828_v17 = vpop.permute.xlu1 %4827  ;;  %v4251_v32 = vpop.permute.xlu0 %4250 }
 0x564   : > { %4919 = vst.msk [vmem:[#allocation2 + $0x28] sm:$0xff] %vm4913_vm9, %v4828_v17  ;;  %v6125_v17 = vld [vmem:[%s6700_s5 + $0x15b] sm:$0xff] }
 0x565   : > { %4341 = vst.msk [vmem:[#allocation2 + $0x30] sm:$0xff] %vm4334_vm6, %v4251_v32  ;;  %4847 = vrot.lane.b32.xlu0 %v5993_v57, %s6581_s9  ;;  %v5998_v57 = vld [vmem:[%s6700_s5 + $0x154] sm:$0xff] }
 0x566   : > { %4272 = vrot.lane.b32.xlu1 %v6057_v34, %s6578_s29 }
 0x567   : > { %v4444_v0 = vpop.permute.xlu1 %4443  ;;  %v4253_v19 = vpop.permute.xlu0 %4252 }
 0x568   : > { %v4950_v24 = vld [vmem:[#allocation2 + $0x20] sm:$0xff]  ;;  %4534 = vst.msk [vmem:[#allocation2 + $0x30] sm:$0xff] %vm4527_vm7, %v4444_v0  ;;  %v6062_v0 = vld [vmem:[%s6700_s5 + $0x169] sm:$0xff] }
 0x569   : > { %4342 = vst.msk [vmem:[#allocation2 + $0x38] sm:$0xff] %vm4334_vm6, %v4253_v19  ;;  %6262 = vmatprep.mubr.f32.mxu0 %v4950_v24  ;;  %4463 = vrot.lane.b32.xlu0 %v6088_v31, %s6579_s11 }
 0x56a   : > { %3887 = vrot.lane.b32.xlu1 %v5994_v2, %s6576_s10 }
 0x56b   : > { %v4637_v28 = vpop.permute.xlu1 %4636  ;;  %v4446_v35 = vpop.permute.xlu0 %4445  ;;  %v4951_v56 = vld [vmem:[#allocation2 + $0x28] sm:$0xff] }
 0x56c   : > { %4727 = vst.msk [vmem:[#allocation2 + $0x30] sm:$0xff] %vm4720_vm8, %v4637_v28  ;;  %6263 = vmatmul.mubr.f32.gmra.mrb[4].mxu0 %v4951_v56  ;;  %v6094_v56 = vld [vmem:[%s6700_s5 + $0x16a] sm:$0xff] }
 0x56d   : > { %4535 = vst.msk [vmem:[#allocation2 + $0x38] sm:$0xff] %vm4527_vm7, %v4446_v35  ;;  %4465 = vrot.lane.b32.xlu0 %v6089_v12, %s6579_s11 }
 0x56e   : > { %4656 = vrot.lane.b32.xlu1 %v6120_v25, %s6580_s27  ;;  %v6063_v25 = vld [vmem:[%s6700_s5 + $0x171] sm:$0xff] }
 0x56f   : > { %v4639_v36 = vpop.permute.xlu1 %4638  ;;  %v4062_v21 = vpop.permute.xlu0 %4061 }
 0x570   : > { %4728 = vst.msk [vmem:[#allocation2 + $0x38] sm:$0xff] %vm4720_vm8, %v4639_v36 }
 0x571   : > { %4150 = vst.msk [vmem:[#allocation2 + $0x40] sm:$0xff] %vm4141_vm5, %v4062_v21  ;;  %3889 = vrot.lane.b32.xlu0 %v5995_v11, %s6576_s10 }
 0x572   : > { %4081 = vrot.lane.b32.xlu1 %v6026_v38, %s6577_s14 }
 0x573   : > { %v4064_v39 = vpop.permute.xlu1 %4063  ;;  %v4830_v41 = vpop.permute.xlu0 %4829 }
 0x574   : > { %4151 = vst.msk [vmem:[#allocation2 + $0x48] sm:$0xff] %vm4141_vm5, %v4064_v39  ;;  %v6126_v39 = vld [vmem:[%s6700_s5 + $0x16b] sm:$0xff] }
 0x575   : > { %4920 = vst.msk [vmem:[#allocation2 + $0x30] sm:$0xff] %vm4913_vm9, %v4830_v41  ;;  %4658 = vrot.lane.b32.xlu0 %v6121_v37, %s6580_s27  ;;  %v6095_v37 = vld [vmem:[%s6700_s5 + $0x172] sm:$0xff] }
 0x576   : > { %4849 = vrot.lane.b32.xlu1 %v5994_v2, %s6581_s9  ;;  %v6031_v2 = vld [vmem:[%s6700_s5 + $0x170] sm:$0xff] }
 0x577   : > { %v4832_v43 = vpop.permute.xlu1 %4831  ;;  %v4255_v40 = vpop.permute.xlu0 %4254 }
 0x578   : > { %4921 = vst.msk [vmem:[#allocation2 + $0x38] sm:$0xff] %vm4913_vm9, %v4832_v43  ;;  %v6032_v43 = vld [vmem:[%s6700_s5 + $0x180] sm:$0xff] }
 0x579   : > { %4343 = vst.msk [vmem:[#allocation2 + $0x40] sm:$0xff] %vm4334_vm6, %v4255_v40  ;;  %4083 = vrot.lane.b32.xlu0 %v6027_v42, %s6577_s14 }
 0x57a   : > { %4274 = vrot.lane.b32.xlu1 %v6058_v20, %s6578_s29  ;;  %v6001_v20 = vld [vmem:[%s6700_s5 + $0x174] sm:$0xff] }
 0x57b   : > { %v4257_v18 = vpop.permute.xlu0 %4256  ;;  %v4448_v47 = vpop.permute.xlu1 %4447 }
 0x57c   : > { %v4952_v48 = vld [vmem:[#allocation2 + $0x30] sm:$0xff]  ;;  %4344 = vst.msk [vmem:[#allocation2 + $0x48] sm:$0xff] %vm4334_vm6, %v4257_v18 }
 0x57d   : > { %4536 = vst.msk [vmem:[#allocation2 + $0x40] sm:$0xff] %vm4527_vm7, %v4448_v47  ;;  %6265 = vmatprep.mubr.f32.mxu0 %v4952_v48  ;;  %4851 = vrot.lane.b32.xlu0 %v5995_v11, %s6581_s9  ;;  %v6000_v11 = vld [vmem:[%s6700_s5 + $0x16c] sm:$0xff] }
 0x57e   : > { %4276 = vrot.lane.b32.xlu1 %v6059_v44, %s6578_s29  ;;  %v6127_v18 = vld [vmem:[%s6700_s5 + $0x173] sm:$0xff] }
 0x57f   : > { %v4450_v6 = vpop.permute.xlu0 %4449  ;;  %v4641_v49 = vpop.permute.xlu1 %4640  ;;  %v4953_v55 = vld [vmem:[#allocation2 + $0x38] sm:$0xff] }
 0x580   : > { %4537 = vst.msk [vmem:[#allocation2 + $0x48] sm:$0xff] %vm4527_vm7, %v4450_v6  ;;  %6266 = vmatmul.mubr.f32.gmra.mrb[6].mxu0 %v4953_v55 }
 0x581   : > { %4729 = vst.msk [vmem:[#allocation2 + $0x40] sm:$0xff] %vm4720_vm8, %v4641_v49  ;;  %4467 = vrot.lane.b32.xlu0 %v6090_v59, %s6579_s11  ;;  %v6033_v59 = vld [vmem:[%s6700_s5 + $0x188] sm:$0xff] }
 0x582   : > { %3891 = vrot.lane.b32.xlu1 %v5996_v16, %s6576_s10 }
 0x583   : > { %v3874_v54 = vpop.permute.xlu0 %3873  ;;  %v4066_v4 = vpop.permute.xlu1 %4065 }
 0x584   : > { %3959 = vst.msk [vmem:[#allocation2 + $0x58] sm:$0xff] %vm3947_vm4, %v3874_v54 }
 0x585   : > { %4152 = vst.msk [vmem:[#allocation2 + $0x50] sm:$0xff] %vm4141_vm5, %v4066_v4  ;;  %4469 = vrot.lane.b32.xlu0 %v6091_v3, %s6579_s11  ;;  %v6065_v3 = vld [vmem:[%s6700_s5 + $0x189] sm:$0xff] }
 0x586   : > { %4660 = vrot.lane.b32.xlu1 %v6122_v53, %s6580_s27  ;;  %v6096_v4 = vld [vmem:[%s6700_s5 + $0x182] sm:$0xff] }
 0x587   : > { %v4643_v5 = vpop.permute.xlu0 %4642  ;;  %v4834_v8 = vpop.permute.xlu1 %4833 }
 0x588   : > { %4730 = vst.msk [vmem:[#allocation2 + $0x48] sm:$0xff] %vm4720_vm8, %v4643_v5 }
 0x589   : > { %4922 = vst.msk [vmem:[#allocation2 + $0x40] sm:$0xff] %vm4913_vm9, %v4834_v8  ;;  %3893 = vrot.lane.b32.xlu0 %v5997_v27, %s6576_s10 }
 0x58a   : > { %4085 = vrot.lane.b32.xlu1 %v6028_v50, %s6577_s14 }
 0x58b   : > { %v4068_v58 = vpop.permute.xlu0 %4067  ;;  %v4259_v63 = vpop.permute.xlu1 %4258 }
 0x58c   : > { %4153 = vst.msk [vmem:[#allocation2 + $0x58] sm:$0xff] %vm4141_vm5, %v4068_v58  ;;  %v6128_v58 = vld [vmem:[%s6700_s5 + $0x183] sm:$0xff] }
 0x58d   : > { %4345 = vst.msk [vmem:[#allocation2 + $0x50] sm:$0xff] %vm4334_vm6, %v4259_v63  ;;  %4662 = vrot.lane.b32.xlu0 %v6123_v30, %s6580_s27  ;;  %v6097_v30 = vld [vmem:[%s6700_s5 + $0x18a] sm:$0xff] }
 0x58e   : > { %4853 = vrot.lane.b32.xlu1 %v5996_v16, %s6581_s9  ;;  %v6064_v16 = vld [vmem:[%s6700_s5 + $0x181] sm:$0xff] }
 0x58f   : > { %v4836_v10 = vpop.permute.xlu0 %4835  ;;  %v4261_v22 = vpop.permute.xlu1 %4260 }
 0x590   : > { %v4954_v62 = vld [vmem:[#allocation2 + $0x40] sm:$0xff]  ;;  %4923 = vst.msk [vmem:[#allocation2 + $0x48] sm:$0xff] %vm4913_vm9, %v4836_v10  ;;  %v6034_v10 = vld [vmem:[%s6700_s5 + $0x198] sm:$0xff] }
 0x591   : > { %4346 = vst.msk [vmem:[#allocation2 + $0x58] sm:$0xff] %vm4334_vm6, %v4261_v22  ;;  %6268 = vmatprep.mubr.f32.mxu0 %v4954_v62  ;;  %4087 = vrot.lane.b32.xlu0 %v6029_v26, %s6577_s14 }
 0x592   : > { %4278 = vrot.lane.b32.xlu1 %v6060_v29, %s6578_s29  ;;  %v6003_v29 = vld [vmem:[%s6700_s5 + $0x18c] sm:$0xff] }
 0x593   : > { %v4452_v7 = vpop.permute.xlu0 %4451  ;;  %v3876_v9 = vpop.permute.xlu1 %3875 }
 0x594   : > { %4538 = vst.msk [vmem:[#allocation2 + $0x50] sm:$0xff] %vm4527_vm7, %v4452_v7 }
 0x595   : > { %3960 = vst.msk [vmem:[#allocation2 + $0x60] sm:$0xff] %vm3947_vm4, %v3876_v9  ;;  %4855 = vrot.lane.b32.xlu0 %v5997_v27, %s6581_s9  ;;  %v6002_v27 = vld [vmem:[%s6700_s5 + $0x184] sm:$0xff] }
 0x596   : > { %4280 = vrot.lane.b32.xlu1 %v6061_v23, %s6578_s29  ;;  %v6129_v23 = vld [vmem:[%s6700_s5 + $0x18b] sm:$0xff] }
 0x597   : > { %v4454_v51 = vpop.permute.xlu0 %4453  ;;  %v4645_v14 = vpop.permute.xlu1 %4644  ;;  %v4955_v52 = vld [vmem:[#allocation2 + $0x48] sm:$0xff] }
 0x598   : > { %4539 = vst.msk [vmem:[#allocation2 + $0x58] sm:$0xff] %vm4527_vm7, %v4454_v51  ;;  %6269 = vmatmul.mubr.f32.gmra.mrb[8].mxu0 %v4955_v52 }
 0x599   : > { %4731 = vst.msk [vmem:[#allocation2 + $0x50] sm:$0xff] %vm4720_vm8, %v4645_v14  ;;  %4471 = vrot.lane.b32.xlu0 %v6092_v15, %s6579_s11  ;;  %v6035_v15 = vld [vmem:[%s6700_s5 + $0x1a0] sm:$0xff] }
 0x59a   : > { %3895 = vrot.lane.b32.xlu1 %v5998_v57, %s6576_s10 }
 0x59b   : > { %v3878_v13 = vpop.permute.xlu0 %3877  ;;  %v4070_v33 = vpop.permute.xlu1 %4069 }
 0x59c   : > { %3961 = vst.msk [vmem:[#allocation2 + $0x68] sm:$0xff] %vm3947_vm4, %v3878_v13 }
 0x59d   : > { %4154 = vst.msk [vmem:[#allocation2 + $0x60] sm:$0xff] %vm4141_vm5, %v4070_v33  ;;  %4473 = vrot.lane.b32.xlu0 %v6093_v45, %s6579_s11  ;;  %v6067_v45 = vld [vmem:[%s6700_s5 + $0x1a1] sm:$0xff] }
 0x59e   : > { %4664 = vrot.lane.b32.xlu1 %v6124_v46, %s6580_s27  ;;  %v6098_v33 = vld [vmem:[%s6700_s5 + $0x19a] sm:$0xff] }
 0x59f   : > { %v4647_v1 = vpop.permute.xlu0 %4646  ;;  %v4838_v34 = vpop.permute.xlu1 %4837 }
 0x5a0   : > { %4732 = vst.msk [vmem:[#allocation2 + $0x58] sm:$0xff] %vm4720_vm8, %v4647_v1 }
 0x5a1   : > { %4924 = vst.msk [vmem:[#allocation2 + $0x50] sm:$0xff] %vm4913_vm9, %v4838_v34  ;;  %3897 = vrot.lane.b32.xlu0 %v5999_v60, %s6576_s10 }
 0x5a2   : > { %4089 = vrot.lane.b32.xlu1 %v6030_v61, %s6577_s14 }
 0x5a3   : > { %v4072_v32 = vpop.permute.xlu0 %4071  ;;  %v4263_v31 = vpop.permute.xlu1 %4262 }
 0x5a4   : > { %4155 = vst.msk [vmem:[#allocation2 + $0x68] sm:$0xff] %vm4141_vm5, %v4072_v32  ;;  %v6130_v32 = vld [vmem:[%s6700_s5 + $0x19b] sm:$0xff] }
 0x5a5   : > { %4347 = vst.msk [vmem:[#allocation2 + $0x60] sm:$0xff] %vm4334_vm6, %v4263_v31  ;;  %4666 = vrot.lane.b32.xlu0 %v6125_v17, %s6580_s27  ;;  %v6099_v17 = vld [vmem:[%s6700_s5 + $0x1a2] sm:$0xff] }
 0x5a6   : > { %4857 = vrot.lane.b32.xlu1 %v5998_v57, %s6581_s9  ;;  %v6066_v57 = vld [vmem:[%s6700_s5 + $0x199] sm:$0xff] }
 0x5a7   : > { %v4840_v19 = vpop.permute.xlu0 %4839  ;;  %v4265_v24 = vpop.permute.xlu1 %4264 }
 0x5a8   : > { %v4956_v12 = vld [vmem:[#allocation2 + $0x50] sm:$0xff]  ;;  %4925 = vst.msk [vmem:[#allocation2 + $0x58] sm:$0xff] %vm4913_vm9, %v4840_v19 }
 0x5a9   : > { %4348 = vst.msk [vmem:[#allocation2 + $0x68] sm:$0xff] %vm4334_vm6, %v4265_v24  ;;  %6271 = vmatprep.mubr.f32.mxu0 %v4956_v12  ;;  %4091 = vrot.lane.b32.xlu0 %v6031_v2, %s6577_s14  ;;  %v6036_v19 = vld [vmem:[%s6700_s5 + $0x1b0] sm:$0xff] }
 0x5aa   : > { %4282 = vrot.lane.b32.xlu1 %v6062_v0, %s6578_s29  ;;  %v6005_v0 = vld [vmem:[%s6700_s5 + $0x1a4] sm:$0xff] }
 0x5ab   : > { %v4456_v28 = vpop.permute.xlu0 %4455  ;;  %v3880_v35 = vpop.permute.xlu1 %3879 }
 0x5ac   : > { %4540 = vst.msk [vmem:[#allocation2 + $0x60] sm:$0xff] %vm4527_vm7, %v4456_v28 }
 0x5ad   : > { %3962 = vst.msk [vmem:[#allocation2 + $0x70] sm:$0xff] %vm3947_vm4, %v3880_v35  ;;  %4859 = vrot.lane.b32.xlu0 %v5999_v60, %s6581_s9  ;;  %v6004_v60 = vld [vmem:[%s6700_s5 + $0x19c] sm:$0xff] }
 0x5ae   : > { %4284 = vrot.lane.b32.xlu1 %v6063_v25, %s6578_s29  ;;  %v6131_v25 = vld [vmem:[%s6700_s5 + $0x1a3] sm:$0xff] }
 0x5af   : > { %v4458_v38 = vpop.permute.xlu0 %4457  ;;  %v4649_v36 = vpop.permute.xlu1 %4648  ;;  %v4957_v21 = vld [vmem:[#allocation2 + $0x58] sm:$0xff] }
 0x5b0   : > { %4541 = vst.msk [vmem:[#allocation2 + $0x68] sm:$0xff] %vm4527_vm7, %v4458_v38  ;;  %6272 = vmatmul.mubr.f32.gmra.mrb[10].mxu0 %v4957_v21 }
 0x5b1   : > { %4733 = vst.msk [vmem:[#allocation2 + $0x60] sm:$0xff] %vm4720_vm8, %v4649_v36  ;;  %4475 = vrot.lane.b32.xlu0 %v6094_v56, %s6579_s11  ;;  %v6037_v56 = vld [vmem:[%s6700_s5 + $0x1b8] sm:$0xff] }
 0x5b2   : > { %3899 = vrot.lane.b32.xlu1 %v6000_v11, %s6576_s10 }
 0x5b3   : > { %v3882_v41 = vpop.permute.xlu0 %3881 }
 0x5b4   : > { %v4074_v42 = vpop.permute.xlu1 %4073  ;;  %3963 = vst.msk [vmem:[#allocation2 + $0x78] sm:$0xff] %vm3947_vm4, %v3882_v41 }
 0x5b5   : > { %4156 = vst.msk [vmem:[#allocation2 + $0x70] sm:$0xff] %vm4141_vm5, %v4074_v42  ;;  %4477 = vrot.lane.b32.xlu0 %v6095_v37, %s6579_s11  ;;  %v6069_v37 = vld [vmem:[%s6700_s5 + $0x1b9] sm:$0xff] }
 0x5b6   : > { %4668 = vrot.lane.b32.xlu1 %v6126_v39, %s6580_s27  ;;  %v6100_v42 = vld [vmem:[%s6700_s5 + $0x1b2] sm:$0xff] }
 0x5b7   : > { %v4651_v40 = vpop.permute.xlu0 %4650 }
 0x5b8   : > { %v4842_v44 = vpop.permute.xlu1 %4841  ;;  %4734 = vst.msk [vmem:[#allocation2 + $0x68] sm:$0xff] %vm4720_vm8, %v4651_v40 }
 0x5b9   : > { %4926 = vst.msk [vmem:[#allocation2 + $0x60] sm:$0xff] %vm4913_vm9, %v4842_v44  ;;  %3901 = vrot.lane.b32.xlu0 %v6001_v20, %s6576_s10 }
 0x5ba   : > { %4093 = vrot.lane.b32.xlu1 %v6032_v43, %s6577_s14 }
 0x5bb   : > { %v4076_v47 = vpop.permute.xlu0 %4075 }
 0x5bc   : > { %v4267_v48 = vpop.permute.xlu1 %4266  ;;  %4157 = vst.msk [vmem:[#allocation2 + $0x78] sm:$0xff] %vm4141_vm5, %v4076_v47  ;;  %v6132_v47 = vld [vmem:[%s6700_s5 + $0x1b3] sm:$0xff] }
 0x5bd   : > { %4349 = vst.msk [vmem:[#allocation2 + $0x70] sm:$0xff] %vm4334_vm6, %v4267_v48  ;;  %4670 = vrot.lane.b32.xlu0 %v6127_v18, %s6580_s27  ;;  %v6101_v18 = vld [vmem:[%s6700_s5 + $0x1ba] sm:$0xff] }
 0x5be   : > { %4861 = vrot.lane.b32.xlu1 %v6000_v11, %s6581_s9  ;;  %v6068_v11 = vld [vmem:[%s6700_s5 + $0x1b1] sm:$0xff] }
 0x5bf   : > { %v4844_v6 = vpop.permute.xlu0 %4843 }
 0x5c0   : > { %v4269_v49 = vpop.permute.xlu1 %4268  ;;  %v4958_v55 = vld [vmem:[#allocation2 + $0x60] sm:$0xff]  ;;  %4927 = vst.msk [vmem:[#allocation2 + $0x68] sm:$0xff] %vm4913_vm9, %v4844_v6  ;;  %v6038_v6 = vld [vmem:[%s6700_s5 + $0x1c8] sm:$0xff] }
 0x5c1   : > { %4350 = vst.msk [vmem:[#allocation2 + $0x78] sm:$0xff] %vm4334_vm6, %v4269_v49  ;;  %6274 = vmatprep.mubr.f32.mxu0 %v4958_v55  ;;  %4095 = vrot.lane.b32.xlu0 %v6033_v59, %s6577_s14 }
 0x5c2   : > { %4286 = vrot.lane.b32.xlu1 %v6064_v16, %s6578_s29  ;;  %v6007_v16 = vld [vmem:[%s6700_s5 + $0x1bc] sm:$0xff] }
 0x5c3   : > { %v4460_v53 = vpop.permute.xlu0 %4459 }
 0x5c4   : > { %v3884_v54 = vpop.permute.xlu1 %3883  ;;  %4542 = vst.msk [vmem:[#allocation2 + $0x70] sm:$0xff] %vm4527_vm7, %v4460_v53 }
 0x5c5   : > { %3964 = vst.msk [vmem:[#allocation2 + $0x80] sm:$0xff] %vm3947_vm4, %v3884_v54  ;;  %4863 = vrot.lane.b32.xlu0 %v6001_v20, %s6581_s9  ;;  %v6006_v20 = vld [vmem:[%s6700_s5 + $0x1b4] sm:$0xff] }
 0x5c6   : > { %4288 = vrot.lane.b32.xlu1 %v6065_v3, %s6578_s29  ;;  %v6133_v3 = vld [vmem:[%s6700_s5 + $0x1bb] sm:$0xff] }
 0x5c7   : > { %v4462_v50 = vpop.permute.xlu0 %4461  ;;  %v4959_v8 = vld [vmem:[#allocation2 + $0x68] sm:$0xff] }
 0x5c8   : > { %v4653_v5 = vpop.permute.xlu1 %4652  ;;  %4543 = vst.msk [vmem:[#allocation2 + $0x78] sm:$0xff] %vm4527_vm7, %v4462_v50  ;;  %6275 = vmatmul.mubr.f32.gmra.mrb[12].mxu0 %v4959_v8 }
 0x5c9   : > { %4735 = vst.msk [vmem:[#allocation2 + $0x70] sm:$0xff] %vm4720_vm8, %v4653_v5  ;;  %4479 = vrot.lane.b32.xlu0 %v6096_v4, %s6579_s11  ;;  %v6039_v4 = vld [vmem:[%s6700_s5 + $0x1d0] sm:$0xff] }
 0x5ca   : > { %3903 = vrot.lane.b32.xlu1 %v6002_v27, %s6576_s10 }
 0x5cb   : > { %v3886_v63 = vpop.permute.xlu0 %3885 }
 0x5cc   : > { %v4078_v26 = vpop.permute.xlu1 %4077  ;;  %3965 = vst.msk [vmem:[#allocation2 + $0x88] sm:$0xff] %vm3947_vm4, %v3886_v63 }
 0x5cd   : > { %4158 = vst.msk [vmem:[#allocation2 + $0x80] sm:$0xff] %vm4141_vm5, %v4078_v26  ;;  %4481 = vrot.lane.b32.xlu0 %v6097_v30, %s6579_s11  ;;  %v6071_v30 = vld [vmem:[%s6700_s5 + $0x1d1] sm:$0xff] }
 0x5ce   : > { %4672 = vrot.lane.b32.xlu1 %v6128_v58, %s6580_s27  ;;  %v6102_v26 = vld [vmem:[%s6700_s5 + $0x1ca] sm:$0xff] }
 0x5cf   : > { %v4655_v22 = vpop.permute.xlu0 %4654 }
 0x5d0   : > { %v4846_v62 = vpop.permute.xlu1 %4845  ;;  %4736 = vst.msk [vmem:[#allocation2 + $0x78] sm:$0xff] %vm4720_vm8, %v4655_v22 }
 0x5d1   : > { %4928 = vst.msk [vmem:[#allocation2 + $0x70] sm:$0xff] %vm4913_vm9, %v4846_v62  ;;  %3905 = vrot.lane.b32.xlu0 %v6003_v29, %s6576_s10 }
 0x5d2   : > { %4097 = vrot.lane.b32.xlu1 %v6034_v10, %s6577_s14 }
 0x5d3   : > { %v4080_v7 = vpop.permute.xlu0 %4079 }
 0x5d4   : > { %v4271_v9 = vpop.permute.xlu1 %4270  ;;  %4159 = vst.msk [vmem:[#allocation2 + $0x88] sm:$0xff] %vm4141_vm5, %v4080_v7  ;;  %v6135_v7 = vld [vmem:[%s6700_s5 + $0x1d3] sm:$0xff] }
 0x5d5   : > { %4351 = vst.msk [vmem:[#allocation2 + $0x80] sm:$0xff] %vm4334_vm6, %v4271_v9  ;;  %4674 = vrot.lane.b32.xlu0 %v6129_v23, %s6580_s27  ;;  %v6134_v23 = vld [vmem:[%s6700_s5 + $0x1cb] sm:$0xff] }
 0x5d6   : > { %4865 = vrot.lane.b32.xlu1 %v6002_v27, %s6581_s9  ;;  %v6070_v27 = vld [vmem:[%s6700_s5 + $0x1c9] sm:$0xff] }
 0x5d7   : > { %v4848_v51 = vpop.permute.xlu0 %4847 }
 0x5d8   : > { %v4273_v14 = vpop.permute.xlu1 %4272  ;;  %v4960_v52 = vld [vmem:[#allocation2 + $0x70] sm:$0xff]  ;;  %4929 = vst.msk [vmem:[#allocation2 + $0x78] sm:$0xff] %vm4913_vm9, %v4848_v51 }
 0x5d9   : > { %4352 = vst.msk [vmem:[#allocation2 + $0x88] sm:$0xff] %vm4334_vm6, %v4273_v14  ;;  %6277 = vmatprep.mubr.f32.mxu0 %v4960_v52  ;;  %4099 = vrot.lane.b32.xlu0 %v6035_v15, %s6577_s14  ;;  %v6167_v51 = vld [vmem:[%s6700_s5 + $0x1d4] sm:$0xff] }
 0x5da   : > { %4290 = vrot.lane.b32.xlu1 %v6066_v57, %s6578_s29  ;;  %v6166_v57 = vld [vmem:[%s6700_s5 + $0x1cc] sm:$0xff] }
 0x5db   : > { %v4464_v46 = vpop.permute.xlu0 %4463 }
 0x5dc   : > { %v3888_v13 = vpop.permute.xlu1 %3887  ;;  %4544 = vst.msk [vmem:[#allocation2 + $0x80] sm:$0xff] %vm4527_vm7, %v4464_v46 }
 0x5dd   : > { %3966 = vst.msk [vmem:[#allocation2 + $0x90] sm:$0xff] %vm3947_vm4, %v3888_v13  ;;  %4867 = vrot.lane.b32.xlu0 %v6003_v29, %s6581_s9  ;;  %v6103_v29 = vld [vmem:[%s6700_s5 + $0x1d2] sm:$0xff]  ;;  %s6175_s5 = sshll.u32 %s6632_s19, 12 }
 0x5de   : > { %4292 = vrot.lane.b32.xlu1 %v6067_v45, %s6578_s29  ;;  %s9342_s22 = scalar_lea.hbm %s9462_s2, %s6175_s5 }
 0x5df   : > { %v4466_v61 = vpop.permute.xlu0 %4465  ;;  %v4961_v34 = vld [vmem:[#allocation2 + $0x78] sm:$0xff] }
 0x5e0   : > { %v4657_v1 = vpop.permute.xlu1 %4656  ;;  %4545 = vst.msk [vmem:[#allocation2 + $0x88] sm:$0xff] %vm4527_vm7, %v4466_v61  ;;  %6278 = vmatmul.mubr.f32.gmra.mrb[14].mxu0 %v4961_v34 }
 0x5e1   : > { %4737 = vst.msk [vmem:[#allocation2 + $0x80] sm:$0xff] %vm4720_vm8, %v4657_v1  ;;  %4483 = vrot.lane.b32.xlu0 %v6098_v33, %s6579_s11 }
 0x5e2   : > { %3907 = vrot.lane.b32.xlu1 %v6004_v60, %s6576_s10 }
 0x5e3   : > { %v3890_v31 = vpop.permute.xlu0 %3889 }
 0x5e4   : > { %v4082_v2 = vpop.permute.xlu1 %4081  ;;  %3967 = vst.msk [vmem:[#allocation2 + $0x98] sm:$0xff] %vm3947_vm4, %v3890_v31 }
 0x5e5   : > { %4160 = vst.msk [vmem:[#allocation2 + $0x90] sm:$0xff] %vm4141_vm5, %v4082_v2  ;;  %4485 = vrot.lane.b32.xlu0 %v6099_v17, %s6579_s11 }
 0x5e6   : > { %4676 = vrot.lane.b32.xlu1 %v6130_v32, %s6580_s27 }
 0x5e7   : > { %v4659_v24 = vpop.permute.xlu0 %4658 }
 0x5e8   : > { %v4850_v12 = vpop.permute.xlu1 %4849  ;;  %4738 = vst.msk [vmem:[#allocation2 + $0x88] sm:$0xff] %vm4720_vm8, %v4659_v24 }
 0x5e9   : > { %4930 = vst.msk [vmem:[#allocation2 + $0x80] sm:$0xff] %vm4913_vm9, %v4850_v12  ;;  %3909 = vrot.lane.b32.xlu0 %v6005_v0, %s6576_s10 }
 0x5ea   : > { %4101 = vrot.lane.b32.xlu1 %v6036_v19, %s6577_s14 }
 0x5eb   : > { %v4084_v28 = vpop.permute.xlu0 %4083 }
 0x5ec   : > { %v4275_v35 = vpop.permute.xlu1 %4274  ;;  %4161 = vst.msk [vmem:[#allocation2 + $0x98] sm:$0xff] %vm4141_vm5, %v4084_v28 }
 0x5ed   : > { %4353 = vst.msk [vmem:[#allocation2 + $0x90] sm:$0xff] %vm4334_vm6, %v4275_v35  ;;  %4678 = vrot.lane.b32.xlu0 %v6131_v25, %s6580_s27 }
 0x5ee   : > { %4869 = vrot.lane.b32.xlu1 %v6004_v60, %s6581_s9 }
 0x5ef   : > { %v4852_v38 = vpop.permute.xlu0 %4851 }
 0x5f0   : > { %v4277_v36 = vpop.permute.xlu1 %4276  ;;  %v4962_v21 = vld [vmem:[#allocation2 + $0x80] sm:$0xff]  ;;  %4931 = vst.msk [vmem:[#allocation2 + $0x88] sm:$0xff] %vm4913_vm9, %v4852_v38 }
 0x5f1   : > { %4354 = vst.msk [vmem:[#allocation2 + $0x98] sm:$0xff] %vm4334_vm6, %v4277_v36  ;;  %6280 = vmatprep.mubr.f32.mxu1 %v4962_v21  ;;  %4103 = vrot.lane.b32.xlu0 %v6037_v56, %s6577_s14 }
 0x5f2   : > { %4294 = vrot.lane.b32.xlu1 %v6068_v11, %s6578_s29 }
 0x5f3   : > { %v4468_v39 = vpop.permute.xlu0 %4467 }
 0x5f4   : > { %v3892_v41 = vpop.permute.xlu1 %3891  ;;  %4546 = vst.msk [vmem:[#allocation2 + $0x90] sm:$0xff] %vm4527_vm7, %v4468_v39 }
 0x5f5   : > { %3968 = vst.msk [vmem:[#allocation2 + $0xa0] sm:$0xff] %vm3947_vm4, %v3892_v41  ;;  %4871 = vrot.lane.b32.xlu0 %v6005_v0, %s6581_s9 }
 0x5f6   : > { %4296 = vrot.lane.b32.xlu1 %v6069_v37, %s6578_s29 }
 0x5f7   : > { %v4470_v43 = vpop.permute.xlu0 %4469  ;;  %v4963_v44 = vld [vmem:[#allocation2 + $0x88] sm:$0xff] }
 0x5f8   : > { %v4661_v40 = vpop.permute.xlu1 %4660  ;;  %4547 = vst.msk [vmem:[#allocation2 + $0x98] sm:$0xff] %vm4527_vm7, %v4470_v43  ;;  %6281 = vmatmul.mubr.f32.vlgmr.msra.gmra.mrb[0].mxu1 %v4963_v44 }
 0x5f9   : > { %4739 = vst.msk [vmem:[#allocation2 + $0x90] sm:$0xff] %vm4720_vm8, %v4661_v40  ;;  %4487 = vrot.lane.b32.xlu0 %v6100_v42, %s6579_s11 }
 0x5fa   : > { %3911 = vrot.lane.b32.xlu1 %v6006_v20, %s6576_s10 }
 0x5fb   : > { %v3894_v48 = vpop.permute.xlu0 %3893 }
 0x5fc   : > { %v4086_v59 = vpop.permute.xlu1 %4085  ;;  %3969 = vst.msk [vmem:[#allocation2 + $0xa8] sm:$0xff] %vm3947_vm4, %v3894_v48 }
 0x5fd   : > { %4162 = vst.msk [vmem:[#allocation2 + $0xa0] sm:$0xff] %vm4141_vm5, %v4086_v59  ;;  %4489 = vrot.lane.b32.xlu0 %v6101_v18, %s6579_s11 }
 0x5fe   : > { %4680 = vrot.lane.b32.xlu1 %v6132_v47, %s6580_s27 }
 0x5ff   : > { %v4663_v49 = vpop.permute.xlu0 %4662 }
 0x600   : > { %v4854_v55 = vpop.permute.xlu1 %4853  ;;  %4740 = vst.msk [vmem:[#allocation2 + $0x98] sm:$0xff] %vm4720_vm8, %v4663_v49 }
 0x601   : > { %4932 = vst.msk [vmem:[#allocation2 + $0x90] sm:$0xff] %vm4913_vm9, %v4854_v55  ;;  %3913 = vrot.lane.b32.xlu0 %v6007_v16, %s6576_s10  ;;  %s9228_s10 = sand.u32 1, %s6547_s16  }
 0x602   : > { %4105 = vrot.lane.b32.xlu1 %v6038_v6, %s6577_s14  ;;  %s5360_s23 = scalar_lea.sflag [#allocation4], %s9228_s10 }
 0x603   : > { %v4088_v53 = vpop.permute.xlu0 %4087 }
 0x604   : > { %v4279_v54 = vpop.permute.xlu1 %4278  ;;  %4163 = vst.msk [vmem:[#allocation2 + $0xa8] sm:$0xff] %vm4141_vm5, %v4088_v53 }
 0x605   : > { %4355 = vst.msk [vmem:[#allocation2 + $0xa0] sm:$0xff] %vm4334_vm6, %v4279_v54  ;;  %4682 = vrot.lane.b32.xlu0 %v6133_v3, %s6580_s27 }
 0x606   : > { %4873 = vrot.lane.b32.xlu1 %v6006_v20, %s6581_s9 }
 0x607   : > { %v4856_v50 = vpop.permute.xlu0 %4855 }
 0x608   : > { %v4281_v5 = vpop.permute.xlu1 %4280  ;;  %v4964_v8 = vld [vmem:[#allocation2 + $0x90] sm:$0xff]  ;;  %4933 = vst.msk [vmem:[#allocation2 + $0x98] sm:$0xff] %vm4913_vm9, %v4856_v50 }
 0x609   : > { %4356 = vst.msk [vmem:[#allocation2 + $0xa8] sm:$0xff] %vm4334_vm6, %v4281_v5  ;;  %6283 = vmatprep.mubr.f32.mxu1 %v4964_v8  ;;  %4107 = vrot.lane.b32.xlu0 %v6039_v4, %s6577_s14  ;;  %s5526_s14 = sshll.u32 %s9228_s10, 8 }
 0x60a   : > { %4298 = vrot.lane.b32.xlu1 %v6070_v27, %s6578_s29 }
 0x60b   : > { %v4472_v58 = vpop.permute.xlu0 %4471 }
 0x60c   : > { %v3896_v63 = vpop.permute.xlu1 %3895  ;;  %4548 = vst.msk [vmem:[#allocation2 + $0xa0] sm:$0xff] %vm4527_vm7, %v4472_v58 }
 0x60d   : > { %3970 = vst.msk [vmem:[#allocation2 + $0xb0] sm:$0xff] %vm3947_vm4, %v3896_v63  ;;  %4875 = vrot.lane.b32.xlu0 %v6007_v16, %s6581_s9 }
 0x60e   : > { %4300 = vrot.lane.b32.xlu1 %v6071_v30, %s6578_s29  ;;  %s9244_s29 = scalar_lea.vmem [#allocation3], %s5526_s14 }
 0x60f   : > { %v4474_v10 = vpop.permute.xlu0 %4473  ;;  %v4965_v62 = vld [vmem:[#allocation2 + $0x98] sm:$0xff] }
 0x610   : > { %v4665_v22 = vpop.permute.xlu1 %4664  ;;  %4549 = vst.msk [vmem:[#allocation2 + $0xa8] sm:$0xff] %vm4527_vm7, %v4474_v10  ;;  %6284 = vmatmul.mubr.f32.gmra.mrb[2].mxu1 %v4965_v62 }
 0x611   : > { %4741 = vst.msk [vmem:[#allocation2 + $0xa0] sm:$0xff] %vm4720_vm8, %v4665_v22  ;;  %4491 = vrot.lane.b32.xlu0 %v6102_v26, %s6579_s11 }
 0x612   : > { %4493 = vrot.lane.b32.xlu1 %v6103_v29, %s6579_s11  ;;  %s5381_s11 = sshll.u32 %s9244_s29, 4  ;;  %s9344_s11 = int_to_ptr.vmem [resolvable:$true] %s5381_s11 }
 0x613   : > { %v3898_v9 = vpop.permute.xlu0 %3897  ;;  %p6440_p0 = scmp.lt.s32.totalorder %s9344_s11, %s6438_s30 }
 0x614   : > { %v4090_v15 = vpop.permute.xlu1 %4089  ;;  %3971 = vst.msk [vmem:[#allocation2 + $0xb8] sm:$0xff] %vm3947_vm4, %v3898_v9 }
 0x615   : > { %4164 = vst.msk [vmem:[#allocation2 + $0xb0] sm:$0xff] %vm4141_vm5, %v4090_v15  ;;  %4684 = vrot.lane.b32.xlu0 %v6134_v23, %s6580_s27 }
 0x616   : > { %4686 = vrot.lane.b32.xlu1 %v6135_v7, %s6580_s27  ;;  %s6433_s27 = scalar_lea.vmem %s9344_s11, 4096 }
 0x617   : > { %v4667_v14 = vpop.permute.xlu0 %4666  ;;  %v6258_v52 = vpop.f32.mrb[0].mxu0  ;;  %p6434_p11 = scmp.ne.s32.totalorder %s9344_s11, %s6433_s27  ;;  %p6441_p1 = scmp.lt.s32.totalorder %s6439_s6, %s6433_s27 }
 0x618   : > { %4742 = vst.msk [vmem:[#allocation2 + $0xa8] sm:$0xff] %vm4720_vm8, %v4667_v14  ;;  %5220 = vst [vmem:[%s9244_s29 + $0x8] sm:$0xff] %v6258_v52  ;;  %v5290_v45 = vmul.f32 %v6258_v52, %v6258_v52  ;;  %v4858_v46 = vpop.permute.xlu1 %4857  ;;  %v5060_v13 = vpop.f32.mrb[1].mxu0 }
 0x619   : > { %4934 = vst.msk [vmem:[#allocation2 + $0xa0] sm:$0xff] %vm4913_vm9, %v4858_v46  ;;  %5219 = vst [vmem:[%s9244_s29] sm:$0xff] %v5060_v13  ;;  %v5251_v33 = vadd.f32 %v6258_v52, %v5060_v13  ;;  %v5289_v60 = vmul.f32 %v5060_v13, %v5060_v13  ;;  %4877 = vrot.lane.b32.xlu0 %v6166_v57, %s6581_s9  ;;  %p6435_p12 = pnand %p6434_p11, %p6651_p5  ;;  %p6442_p2 = por %p6441_p1, %p6440_p0 }
 0x61a   : > { %4879 = vrot.lane.b32.xlu1 %v6167_v51, %s6581_s9 }
 0x61b   : > { %v5321_v61 = vadd.f32 %v5290_v45, %v5289_v60  ;;  %v4092_v1 = vpop.permute.xlu0 %4091  ;;  %p6436_p13 = pneg %p6435_p12 }
 0x61c   : > { %4165 = vst.msk [vmem:[#allocation2 + $0xb8] sm:$0xff] %vm4141_vm5, %v4092_v1  ;;  %v4283_v34 = vpop.permute.xlu1 %4282 }
 0x61d   : > { %4357 = vst.msk [vmem:[#allocation2 + $0xb0] sm:$0xff] %vm4334_vm6, %v4283_v34  ;;  %p6443_p3 = pnand %p6442_p2, %p6436_p13 }
 0x61f   : > { %v4860_v17 = vpop.permute.xlu0 %4859 }
 0x620   : > { %4935 = vst.msk [vmem:[#allocation2 + $0xa8] sm:$0xff] %vm4913_vm9, %v4860_v17  ;;  %v4285_v32 = vpop.permute.xlu1 %4284  ;;  %v4966_v31 = vld [vmem:[#allocation2 + $0xa0] sm:$0xff] }
 0x621   : > { %4358 = vst.msk [vmem:[#allocation2 + $0xb8] sm:$0xff] %vm4334_vm6, %v4285_v32  ;;  %6286 = vmatprep.mubr.f32.mxu1 %v4966_v31 }
 0x623   : > { %v4476_v2 = vpop.permute.xlu0 %4475 }
 0x624   : > { %4550 = vst.msk [vmem:[#allocation2 + $0xb0] sm:$0xff] %vm4527_vm7, %v4476_v2  ;;  %v3900_v0 = vpop.permute.xlu1 %3899 }
 0x625   : > { %3972 = vst.msk [vmem:[#allocation2 + $0xc0] sm:$0xff] %vm3947_vm4, %v3900_v0 }
 0x627   : > { %v4478_v19 = vpop.permute.xlu0 %4477  ;;  %v4967_v24 = vld [vmem:[#allocation2 + $0xa8] sm:$0xff] }
 0x628   : > { %4551 = vst.msk [vmem:[#allocation2 + $0xb8] sm:$0xff] %vm4527_vm7, %v4478_v19  ;;  %v4669_v12 = vpop.permute.xlu1 %4668  ;;  %6287 = vmatmul.mubr.f32.gmra.mrb[4].mxu1 %v4967_v24 }
 0x629   : > { %4743 = vst.msk [vmem:[#allocation2 + $0xb0] sm:$0xff] %vm4720_vm8, %v4669_v12 }
 0x62b   : > { %v3902_v25 = vpop.permute.xlu0 %3901  ;;  %v6261_v28 = vpop.f32.mrb[2].mxu0 }
 0x62c   : > { %3973 = vst.msk [vmem:[#allocation2 + $0xc8] sm:$0xff] %vm3947_vm4, %v3902_v25  ;;  %5222 = vst [vmem:[%s9244_s29 + $0x18] sm:$0xff] %v6261_v28  ;;  %v4094_v35 = vpop.permute.xlu1 %4093  ;;  %v5070_v56 = vpop.f32.mrb[3].mxu0  ;;  %v5292_v36 = vmul.f32 %v6261_v28, %v6261_v28 }
 0x62d   : > { %4166 = vst.msk [vmem:[#allocation2 + $0xc0] sm:$0xff] %vm4141_vm5, %v4094_v35  ;;  %5221 = vst [vmem:[%s9244_s29 + $0x10] sm:$0xff] %v5070_v56  ;;  %v5252_v11 = vadd.f32 %v5251_v33, %v5070_v56  ;;  %v5291_v38 = vmul.f32 %v5070_v56, %v5070_v56 }
 0x62f   : > { %v5322_v21 = vadd.f32 %v5321_v61, %v5291_v38  ;;  %v4671_v37 = vpop.permute.xlu0 %4670  ;;  %v5253_v39 = vadd.f32 %v6261_v28, %v5252_v11 }
 0x630   : > { %4744 = vst.msk [vmem:[#allocation2 + $0xb8] sm:$0xff] %vm4720_vm8, %v4671_v37  ;;  %v4862_v41 = vpop.permute.xlu1 %4861 }
 0x631   : > { %4936 = vst.msk [vmem:[#allocation2 + $0xb0] sm:$0xff] %vm4913_vm9, %v4862_v41  ;;  %v5323_v42 = vadd.f32 %v5322_v21, %v5292_v36 }
 0x633   : > { %v4096_v20 = vpop.permute.xlu0 %4095 }
 0x634   : > { %4167 = vst.msk [vmem:[#allocation2 + $0xc8] sm:$0xff] %vm4141_vm5, %v4096_v20  ;;  %v4287_v43 = vpop.permute.xlu1 %4286 }
 0x635   : > { %4359 = vst.msk [vmem:[#allocation2 + $0xc0] sm:$0xff] %vm4334_vm6, %v4287_v43 }
 0x637   : > { %v4864_v40 = vpop.permute.xlu0 %4863 }
 0x638   : > { %4937 = vst.msk [vmem:[#allocation2 + $0xb8] sm:$0xff] %vm4913_vm9, %v4864_v40  ;;  %v4289_v44 = vpop.permute.xlu1 %4288  ;;  %v4968_v18 = vld [vmem:[#allocation2 + $0xb0] sm:$0xff] }
 0x639   : > { %4360 = vst.msk [vmem:[#allocation2 + $0xc8] sm:$0xff] %vm4334_vm6, %v4289_v44  ;;  %6289 = vmatprep.mubr.f32.mxu1 %v4968_v18 }
 0x63b   : > { %v4480_v47 = vpop.permute.xlu0 %4479 }
 0x63c   : > { %4552 = vst.msk [vmem:[#allocation2 + $0xc0] sm:$0xff] %vm4527_vm7, %v4480_v47  ;;  %v3904_v48 = vpop.permute.xlu1 %3903 }
 0x63d   : > { %3974 = vst.msk [vmem:[#allocation2 + $0xd0] sm:$0xff] %vm3947_vm4, %v3904_v48 }
 0x63f   : > { %v4482_v59 = vpop.permute.xlu0 %4481  ;;  %v6264_v16 = vpop.f32.mrb[4].mxu0  ;;  %v4969_v6 = vld [vmem:[#allocation2 + $0xb8] sm:$0xff] }
 0x640   : > { %4553 = vst.msk [vmem:[#allocation2 + $0xc8] sm:$0xff] %vm4527_vm7, %v4482_v59  ;;  %5224 = vst [vmem:[%s9244_s29 + $0x28] sm:$0xff] %v6264_v16  ;;  %v4673_v49 = vpop.permute.xlu1 %4672  ;;  %v5080_v55 = vpop.f32.mrb[5].mxu0  ;;  %6290 = vmatmul.mubr.f32.gmra.mrb[6].mxu1 %v4969_v6  ;;  %v5294_v54 = vmul.f32 %v6264_v16, %v6264_v16 }
 0x641   : > { %4745 = vst.msk [vmem:[#allocation2 + $0xc0] sm:$0xff] %vm4720_vm8, %v4673_v49  ;;  %5223 = vst [vmem:[%s9244_s29 + $0x20] sm:$0xff] %v5080_v55  ;;  %v5254_v3 = vadd.f32 %v5253_v39, %v5080_v55  ;;  %v5293_v53 = vmul.f32 %v5080_v55, %v5080_v55 }
 0x643   : > { %v5324_v4 = vadd.f32 %v5323_v42, %v5293_v53  ;;  %v3906_v27 = vpop.permute.xlu0 %3905  ;;  %v5255_v50 = vadd.f32 %v6264_v16, %v5254_v3 }
 0x644   : > { %3975 = vst.msk [vmem:[#allocation2 + $0xd8] sm:$0xff] %vm3947_vm4, %v3906_v27  ;;  %v4098_v5 = vpop.permute.xlu1 %4097 }
 0x645   : > { %4168 = vst.msk [vmem:[#allocation2 + $0xd0] sm:$0xff] %vm4141_vm5, %v4098_v5  ;;  %v5325_v8 = vadd.f32 %v5324_v4, %v5294_v54 }
 0x647   : > { %v4675_v30 = vpop.permute.xlu0 %4674 }
 0x648   : > { %4746 = vst.msk [vmem:[#allocation2 + $0xc8] sm:$0xff] %vm4720_vm8, %v4675_v30  ;;  %v4866_v58 = vpop.permute.xlu1 %4865 }
 0x649   : > { %4938 = vst.msk [vmem:[#allocation2 + $0xc0] sm:$0xff] %vm4913_vm9, %v4866_v58 }
 0x64b   : > { %v4100_v63 = vpop.permute.xlu0 %4099 }
 0x64c   : > { %4169 = vst.msk [vmem:[#allocation2 + $0xd8] sm:$0xff] %vm4141_vm5, %v4100_v63  ;;  %v4291_v26 = vpop.permute.xlu1 %4290 }
 0x64d   : > { %4361 = vst.msk [vmem:[#allocation2 + $0xd0] sm:$0xff] %vm4334_vm6, %v4291_v26 }
 0x64f   : > { %v4868_v29 = vpop.permute.xlu0 %4867 }
 0x650   : > { %4939 = vst.msk [vmem:[#allocation2 + $0xc8] sm:$0xff] %vm4913_vm9, %v4868_v29  ;;  %v4293_v10 = vpop.permute.xlu1 %4292  ;;  %v4970_v22 = vld [vmem:[#allocation2 + $0xc0] sm:$0xff] }
 0x651   : > { %4362 = vst.msk [vmem:[#allocation2 + $0xd8] sm:$0xff] %vm4334_vm6, %v4293_v10  ;;  %6292 = vmatprep.mubr.f32.mxu1 %v4970_v22 }
 0x653   : > { %v4484_v62 = vpop.permute.xlu0 %4483  ;;  %v6267_v23 = vpop.f32.mrb[6].mxu0 }
 0x654   : > { %4554 = vst.msk [vmem:[#allocation2 + $0xd0] sm:$0xff] %vm4527_vm7, %v4484_v62  ;;  %5226 = vst [vmem:[%s9244_s29 + $0x38] sm:$0xff] %v6267_v23  ;;  %v3908_v7 = vpop.permute.xlu1 %3907  ;;  %v5090_v9 = vpop.f32.mrb[7].mxu0  ;;  %v5296_v51 = vmul.f32 %v6267_v23, %v6267_v23 }
 0x655   : > { %3976 = vst.msk [vmem:[#allocation2 + $0xe0] sm:$0xff] %vm3947_vm4, %v3908_v7  ;;  %5225 = vst [vmem:[%s9244_s29 + $0x30] sm:$0xff] %v5090_v9  ;;  %v5256_v15 = vadd.f32 %v5255_v50, %v5090_v9  ;;  %v5295_v57 = vmul.f32 %v5090_v9, %v5090_v9 }
 0x657   : > { %v5326_v14 = vadd.f32 %v5325_v8, %v5295_v57  ;;  %v4486_v52 = vpop.permute.xlu0 %4485  ;;  %v4971_v45 = vld [vmem:[#allocation2 + $0xc8] sm:$0xff]  ;;  %v5257_v46 = vadd.f32 %v6267_v23, %v5256_v15 }
 0x658   : > { %4555 = vst.msk [vmem:[#allocation2 + $0xd8] sm:$0xff] %vm4527_vm7, %v4486_v52  ;;  %v4677_v13 = vpop.permute.xlu1 %4676  ;;  %6293 = vmatmul.mubr.f32.gmra.mrb[8].mxu1 %v4971_v45 }
 0x659   : > { %4747 = vst.msk [vmem:[#allocation2 + $0xd0] sm:$0xff] %vm4720_vm8, %v4677_v13  ;;  %v5327_v33 = vadd.f32 %v5326_v14, %v5296_v51 }
 0x65b   : > { %v3910_v60 = vpop.permute.xlu0 %3909 }
 0x65c   : > { %3977 = vst.msk [vmem:[#allocation2 + $0xe8] sm:$0xff] %vm3947_vm4, %v3910_v60  ;;  %v4102_v61 = vpop.permute.xlu1 %4101 }
 0x65d   : > { %4170 = vst.msk [vmem:[#allocation2 + $0xe0] sm:$0xff] %vm4141_vm5, %v4102_v61 }
 0x65f   : > { %v4679_v1 = vpop.permute.xlu0 %4678 }
 0x660   : > { %4748 = vst.msk [vmem:[#allocation2 + $0xd8] sm:$0xff] %vm4720_vm8, %v4679_v1  ;;  %v4870_v34 = vpop.permute.xlu1 %4869 }
 0x661   : > { %4940 = vst.msk [vmem:[#allocation2 + $0xd0] sm:$0xff] %vm4913_vm9, %v4870_v34 }
 0x663   : > { %v4104_v17 = vpop.permute.xlu0 %4103 }
 0x664   : > { %4171 = vst.msk [vmem:[#allocation2 + $0xe8] sm:$0xff] %vm4141_vm5, %v4104_v17  ;;  %v4295_v32 = vpop.permute.xlu1 %4294 }
 0x665   : > { %4363 = vst.msk [vmem:[#allocation2 + $0xe0] sm:$0xff] %vm4334_vm6, %v4295_v32 }
 0x667   : > { %v4872_v31 = vpop.permute.xlu0 %4871 }
 0x668   : > { %4941 = vst.msk [vmem:[#allocation2 + $0xd8] sm:$0xff] %vm4913_vm9, %v4872_v31  ;;  %v4297_v2 = vpop.permute.xlu1 %4296  ;;  %v4972_v0 = vld [vmem:[#allocation2 + $0xd0] sm:$0xff] }
 0x669   : > { %4364 = vst.msk [vmem:[#allocation2 + $0xe8] sm:$0xff] %vm4334_vm6, %v4297_v2  ;;  %6295 = vmatprep.mubr.f32.mxu1 %v4972_v0 }
 0x66b   : > { %v4488_v19 = vpop.permute.xlu0 %4487  ;;  %v6270_v24 = vpop.f32.mrb[8].mxu0 }
 0x66c   : > { %4556 = vst.msk [vmem:[#allocation2 + $0xe0] sm:$0xff] %vm4527_vm7, %v4488_v19  ;;  %5228 = vst [vmem:[%s9244_s29 + $0x48] sm:$0xff] %v6270_v24  ;;  %v3912_v12 = vpop.permute.xlu1 %3911  ;;  %v5100_v25 = vpop.f32.mrb[9].mxu0  ;;  %v5298_v56 = vmul.f32 %v6270_v24, %v6270_v24 }
 0x66d   : > { %3978 = vst.msk [vmem:[#allocation2 + $0xf0] sm:$0xff] %vm3947_vm4, %v3912_v12  ;;  %5227 = vst [vmem:[%s9244_s29 + $0x40] sm:$0xff] %v5100_v25  ;;  %v5258_v28 = vadd.f32 %v5257_v46, %v5100_v25  ;;  %v5297_v35 = vmul.f32 %v5100_v25, %v5100_v25 }
 0x66f   : > { %v5328_v11 = vadd.f32 %v5327_v33, %v5297_v35  ;;  %v4490_v38 = vpop.permute.xlu0 %4489  ;;  %v4973_v36 = vld [vmem:[#allocation2 + $0xd8] sm:$0xff]  ;;  %v5259_v21 = vadd.f32 %v6270_v24, %v5258_v28 }
 0x670   : > { %4557 = vst.msk [vmem:[#allocation2 + $0xe8] sm:$0xff] %vm4527_vm7, %v4490_v38  ;;  %v4681_v37 = vpop.permute.xlu1 %4680  ;;  %6296 = vmatmul.mubr.f32.gmra.mrb[10].mxu1 %v4973_v36 }
 0x671   : > { %4749 = vst.msk [vmem:[#allocation2 + $0xe0] sm:$0xff] %vm4720_vm8, %v4681_v37  ;;  %v5329_v39 = vadd.f32 %v5328_v11, %v5298_v56 }
 0x673   : > { %v3914_v41 = vpop.permute.xlu0 %3913 }
 0x674   : > { %3979 = vst.msk [vmem:[#allocation2 + $0xf8] sm:$0xff] %vm3947_vm4, %v3914_v41  ;;  %v4106_v42 = vpop.permute.xlu1 %4105 }
 0x675   : > { %4172 = vst.msk [vmem:[#allocation2 + $0xf0] sm:$0xff] %vm4141_vm5, %v4106_v42 }
 0x677   : > { %v4683_v20 = vpop.permute.xlu0 %4682 }
 0x678   : > { %4750 = vst.msk [vmem:[#allocation2 + $0xe8] sm:$0xff] %vm4720_vm8, %v4683_v20  ;;  %v4874_v43 = vpop.permute.xlu1 %4873 }
 0x679   : > { %4942 = vst.msk [vmem:[#allocation2 + $0xe0] sm:$0xff] %vm4913_vm9, %v4874_v43 }
 0x67b   : > { %v4108_v40 = vpop.permute.xlu0 %4107 }
 0x67c   : > { %4173 = vst.msk [vmem:[#allocation2 + $0xf8] sm:$0xff] %vm4141_vm5, %v4108_v40  ;;  %v4299_v44 = vpop.permute.xlu1 %4298 }
 0x67d   : > { %4365 = vst.msk [vmem:[#allocation2 + $0xf0] sm:$0xff] %vm4334_vm6, %v4299_v44 }
 0x67f   : > { %v4876_v18 = vpop.permute.xlu0 %4875 }
 0x680   : > { %4943 = vst.msk [vmem:[#allocation2 + $0xe8] sm:$0xff] %vm4913_vm9, %v4876_v18  ;;  %v4301_v47 = vpop.permute.xlu1 %4300  ;;  %v4974_v48 = vld [vmem:[#allocation2 + $0xe0] sm:$0xff] }
 0x681   : > { %4366 = vst.msk [vmem:[#allocation2 + $0xf8] sm:$0xff] %vm4334_vm6, %v4301_v47  ;;  %6298 = vmatprep.mubr.f32.mxu1 %v4974_v48 }
 0x683   : > { %v4492_v59 = vpop.permute.xlu0 %4491  ;;  %v6273_v16 = vpop.f32.mrb[10].mxu0 }
 0x684   : > { %4558 = vst.msk [vmem:[#allocation2 + $0xf0] sm:$0xff] %vm4527_vm7, %v4492_v59  ;;  %5230 = vst [vmem:[%s9244_s29 + $0x58] sm:$0xff] %v6273_v16  ;;  %v4494_v6 = vpop.permute.xlu1 %4493  ;;  %v5110_v49 = vpop.f32.mrb[11].mxu0  ;;  %v5300_v53 = vmul.f32 %v6273_v16, %v6273_v16 }
 0x685   : > { %4559 = vst.msk [vmem:[#allocation2 + $0xf8] sm:$0xff] %vm4527_vm7, %v4494_v6  ;;  %5229 = vst [vmem:[%s9244_s29 + $0x50] sm:$0xff] %v5110_v49  ;;  %v5260_v55 = vadd.f32 %v5259_v21, %v5110_v49  ;;  %v5299_v3 = vmul.f32 %v5110_v49, %v5110_v49 }
 0x687   : > { %v5330_v54 = vadd.f32 %v5329_v39, %v5299_v3  ;;  %v4685_v4 = vpop.permute.xlu0 %4684  ;;  %v4975_v27 = vld [vmem:[#allocation2 + $0xe8] sm:$0xff]  ;;  %v5261_v50 = vadd.f32 %v6273_v16, %v5260_v55 }
 0x688   : > { %4751 = vst.msk [vmem:[#allocation2 + $0xf0] sm:$0xff] %vm4720_vm8, %v4685_v4  ;;  %v4687_v5 = vpop.permute.xlu1 %4686  ;;  %6299 = vmatmul.mubr.f32.gmra.mrb[12].mxu1 %v4975_v27 }
 0x689   : > { %4752 = vst.msk [vmem:[#allocation2 + $0xf8] sm:$0xff] %vm4720_vm8, %v4687_v5  ;;  %v5331_v8 = vadd.f32 %v5330_v54, %v5300_v53 }
 0x68b   : > { %v4878_v30 = vpop.permute.xlu0 %4877 }
 0x68c   : > { %4944 = vst.msk [vmem:[#allocation2 + $0xf0] sm:$0xff] %vm4913_vm9, %v4878_v30  ;;  %v4880_v58 = vpop.permute.xlu1 %4879 }
 0x68d   : > { %4945 = vst.msk [vmem:[#allocation2 + $0xf8] sm:$0xff] %vm4913_vm9, %v4880_v58 }
 0x693   : > { %v4976_v63 = vld [vmem:[#allocation2 + $0xf0] sm:$0xff] }
 0x694   : > { %6301 = vmatprep.mubr.f32.mxu1 %v4976_v63  ;;  %v4977_v26 = vld [vmem:[#allocation2 + $0xf8] sm:$0xff] }
 0x695   : > { %6302 = vmatmul.mubr.f32.gmra.mrb[14].mxu1 %v4977_v26 }
 0x69b   : > { %v6276_v29 = vpop.f32.mrb[12].mxu0 }
 0x69c   : > { %5232 = vst [vmem:[%s9244_s29 + $0x68] sm:$0xff] %v6276_v29  ;;  %v5120_v10 = vpop.f32.mrb[13].mxu0  ;;  %v5302_v23 = vmul.f32 %v6276_v29, %v6276_v29 }
 0x69d   : > { %5231 = vst [vmem:[%s9244_s29 + $0x60] sm:$0xff] %v5120_v10  ;;  %v5262_v22 = vadd.f32 %v5261_v50, %v5120_v10  ;;  %v5301_v62 = vmul.f32 %v5120_v10, %v5120_v10 }
 0x69f   : > { %v5332_v7 = vadd.f32 %v5331_v8, %v5301_v62  ;;  %v5263_v9 = vadd.f32 %v6276_v29, %v5262_v22 }
 0x6a1   : > { %v5333_v15 = vadd.f32 %v5332_v7, %v5302_v23 }
 0x6b3   : > { %v6279_v57 = vpop.f32.mrb[14].mxu0 }
 0x6b4   : > { %5234 = vst [vmem:[%s9244_s29 + $0x78] sm:$0xff] %v6279_v57  ;;  %v5130_v51 = vpop.f32.mrb[15].mxu0  ;;  %v5304_v45 = vmul.f32 %v6279_v57, %v6279_v57 }
 0x6b5   : > { %5233 = vst [vmem:[%s9244_s29 + $0x70] sm:$0xff] %v5130_v51  ;;  %v5264_v14 = vadd.f32 %v5263_v9, %v5130_v51  ;;  %v5303_v52 = vmul.f32 %v5130_v51, %v5130_v51 }
 0x6b7   : > { %v5265_v46 = vadd.f32 %v6279_v57, %v5264_v14  ;;  %v5334_v13 = vadd.f32 %v5333_v15, %v5303_v52 }
 0x6b9   : > { %v5335_v33 = vadd.f32 %v5334_v13, %v5304_v45 }
 0x6cb   : > { %v6282_v60 = vpop.f32.mrb[0].mxu1 }
 0x6cc   : > { %5236 = vst [vmem:[%s9244_s29 + $0x88] sm:$0xff] %v6282_v60  ;;  %v5140_v61 = vpop.f32.mrb[1].mxu1  ;;  %v5306_v17 = vmul.f32 %v6282_v60, %v6282_v60 }
 0x6cd   : > { %5235 = vst [vmem:[%s9244_s29 + $0x80] sm:$0xff] %v5140_v61  ;;  %v5266_v1 = vadd.f32 %v5265_v46, %v5140_v61  ;;  %v5305_v34 = vmul.f32 %v5140_v61, %v5140_v61 }
 0x6cf   : > { %v5336_v32 = vadd.f32 %v5335_v33, %v5305_v34  ;;  %v5267_v31 = vadd.f32 %v6282_v60, %v5266_v1 }
 0x6d1   : > { %v5337_v2 = vadd.f32 %v5336_v32, %v5306_v17 }
 0x6e3   : > { %v6285_v0 = vpop.f32.mrb[2].mxu1 }
 0x6e4   : > { %5238 = vst [vmem:[%s9244_s29 + $0x98] sm:$0xff] %v6285_v0  ;;  %v5150_v19 = vpop.f32.mrb[3].mxu1  ;;  %v5308_v25 = vmul.f32 %v6285_v0, %v6285_v0 }
 0x6e5   : > { %5237 = vst [vmem:[%s9244_s29 + $0x90] sm:$0xff] %v5150_v19  ;;  %v5268_v24 = vadd.f32 %v5267_v31, %v5150_v19  ;;  %v5307_v12 = vmul.f32 %v5150_v19, %v5150_v19 }
 0x6e7   : > { %v5338_v28 = vadd.f32 %v5337_v2, %v5307_v12  ;;  %v5269_v35 = vadd.f32 %v6285_v0, %v5268_v24 }
 0x6e9   : > { %v5339_v56 = vadd.f32 %v5338_v28, %v5308_v25 }
 0x6fb   : > { %v6288_v11 = vpop.f32.mrb[4].mxu1 }
 0x6fc   : > { %5240 = vst [vmem:[%s9244_s29 + $0xa8] sm:$0xff] %v6288_v11  ;;  %v5160_v38 = vpop.f32.mrb[5].mxu1  ;;  %v5310_v37 = vmul.f32 %v6288_v11, %v6288_v11 }
 0x6fd   : > { %5239 = vst [vmem:[%s9244_s29 + $0xa0] sm:$0xff] %v5160_v38  ;;  %v5270_v36 = vadd.f32 %v5269_v35, %v5160_v38  ;;  %v5309_v21 = vmul.f32 %v5160_v38, %v5160_v38 }
 0x6ff   : > { %v5340_v39 = vadd.f32 %v5339_v56, %v5309_v21  ;;  %v5271_v41 = vadd.f32 %v6288_v11, %v5270_v36 }
 0x701   : > { %v5341_v42 = vadd.f32 %v5340_v39, %v5310_v37 }
 0x713   : > { %v6291_v20 = vpop.f32.mrb[6].mxu1 }
 0x714   : > { %5242 = vst [vmem:[%s9244_s29 + $0xb8] sm:$0xff] %v6291_v20  ;;  %v5170_v43 = vpop.f32.mrb[7].mxu1  ;;  %v5312_v18 = vmul.f32 %v6291_v20, %v6291_v20 }
 0x715   : > { %5241 = vst [vmem:[%s9244_s29 + $0xb0] sm:$0xff] %v5170_v43  ;;  %v5272_v40 = vadd.f32 %v5271_v41, %v5170_v43  ;;  %v5311_v44 = vmul.f32 %v5170_v43, %v5170_v43 }
 0x717   : > { %v5342_v47 = vadd.f32 %v5341_v42, %v5311_v44  ;;  %v5273_v48 = vadd.f32 %v6291_v20, %v5272_v40 }
 0x719   : > { %v5343_v59 = vadd.f32 %v5342_v47, %v5312_v18 }
 0x72b   : > { %v6294_v16 = vpop.f32.mrb[8].mxu1 }
 0x72c   : > { %5244 = vst [vmem:[%s9244_s29 + $0xc8] sm:$0xff] %v6294_v16  ;;  %v5180_v6 = vpop.f32.mrb[9].mxu1  ;;  %v5314_v3 = vmul.f32 %v6294_v16, %v6294_v16 }
 0x72d   : > { %5243 = vst [vmem:[%s9244_s29 + $0xc0] sm:$0xff] %v5180_v6  ;;  %v5274_v49 = vadd.f32 %v5273_v48, %v5180_v6  ;;  %v5313_v55 = vmul.f32 %v5180_v6, %v5180_v6 }
 0x72f   : > { %v5344_v53 = vadd.f32 %v5343_v59, %v5313_v55  ;;  %v5275_v54 = vadd.f32 %v6294_v16, %v5274_v49 }
 0x731   : > { %v5345_v4 = vadd.f32 %v5344_v53, %v5314_v3 }
 0x743   : > { %v6297_v27 = vpop.f32.mrb[10].mxu1 }
 0x744   : > { %5246 = vst [vmem:[%s9244_s29 + $0xd8] sm:$0xff] %v6297_v27  ;;  %v5190_v50 = vpop.f32.mrb[11].mxu1  ;;  %v5316_v30 = vmul.f32 %v6297_v27, %v6297_v27 }
 0x745   : > { %5245 = vst [vmem:[%s9244_s29 + $0xd0] sm:$0xff] %v5190_v50  ;;  %v5276_v5 = vadd.f32 %v5275_v54, %v5190_v50  ;;  %v5315_v8 = vmul.f32 %v5190_v50, %v5190_v50 }
 0x747   : > { %v5346_v58 = vadd.f32 %v5345_v4, %v5315_v8  ;;  %v5277_v63 = vadd.f32 %v6297_v27, %v5276_v5 }
 0x749   : > { %v5347_v26 = vadd.f32 %v5346_v58, %v5316_v30 }
 0x75b   : > { %v6300_v29 = vpop.f32.mrb[12].mxu1 }
 0x75c   : > { %5248 = vst [vmem:[%s9244_s29 + $0xe8] sm:$0xff] %v6300_v29  ;;  %v5200_v10 = vpop.f32.mrb[13].mxu1  ;;  %v5318_v23 = vmul.f32 %v6300_v29, %v6300_v29 }
 0x75d   : > { %5247 = vst [vmem:[%s9244_s29 + $0xe0] sm:$0xff] %v5200_v10  ;;  %v5278_v22 = vadd.f32 %v5277_v63, %v5200_v10  ;;  %v5317_v62 = vmul.f32 %v5200_v10, %v5200_v10 }
 0x75f   : > { %v5348_v7 = vadd.f32 %v5347_v26, %v5317_v62  ;;  %v5279_v9 = vadd.f32 %v6300_v29, %v5278_v22 }
 0x761   : > { %v5349_v15 = vadd.f32 %v5348_v7, %v5318_v23 }
 0x768   : > { %v6303_v57 = vpop.f32.mrb[14].mxu1 }
 0x769   : > { %5250 = vst [vmem:[%s9244_s29 + $0xf8] sm:$0xff] %v6303_v57  ;;  %v5210_v51 = vpop.f32.mrb[15].mxu1 }
 0x76a   : > { %5249 = vst [vmem:[%s9244_s29 + $0xf0] sm:$0xff] %v5210_v51  ;;  %v5280_v14 = vadd.f32 %v5279_v9, %v5210_v51  ;;  %v5319_v52 = vmul.f32 %v5210_v51, %v5210_v51 }
 0x76b   : > { %6446 = shalt.err (!%p6443_p3)
}
 0x76c   : > { %s6447_s8 = scalar_lea.hbm %s9342_s22, 4096  ;;  %s6451_s29 = scalar_lea.hbm %s9462_s2, 8192 }
 0x76d   : > { %p6448_p4 = scmp.ne.s32.totalorder %s9342_s22, %s6447_s8  ;;  %p6452_p9 = scmp.lt.u32.totalorder %s9342_s22, %s9462_s2 }
 0x76e   : > { %p6453_p10 = scmp.lt.u32.totalorder %s6451_s29, %s6447_s8  ;;  %p6455_p12 = scmp.lt.u32.totalorder %s6447_s8, %s9342_s22 }
 0x76f   : > { %p6449_p7 = pnand %p6448_p4, %p6651_p5 }
 0x770   : > { %p6454_p11 = por %p6453_p10, %p6452_p9 }
 0x771   : > { %p6450_p8 = pneg %p6449_p7 }
 0x772   : > { %p6456_p13 = por %p6455_p12, %p6454_p11 }
 0x774   : > { %p6457_p0 = pnand %p6456_p13, %p6450_p8 }
 0x776   : > { %6460 = shalt.err (!%p6457_p0)
}
 0x777   : > { %s6583_s13 = smov 128   ;;  %v5320_v45 = vmul.f32 %v6303_v57, %v6303_v57  ;;  %v5281_v46 = vadd.f32 %v6303_v57, %v5280_v14  ;;  %v5350_v13 = vadd.f32 %v5349_v15, %v5319_v52  ;;  %s5364_s27 = sand.u32 1, %s6632_s19  }
 0x778   : > { %6353 = dma.vmem_to_hbm [thread:$0]  (%p6651_p5), %s9344_s11, 4096, %s9342_s22, %s5360_s23, %s6583_s13, %s6583_s13, %s6559_s7  }
 0x779   : > { %v5282_v33 = vrot.slane %v5281_v46, 4  ;;  %v5351_v60 = vadd.f32 %v5350_v13, %v5320_v45  ;;  %s6171_s28 = sshll.u32 %s6632_s19, 4  ;;  %s200_s30 = scalar_lea.vmem [#allocation5], %s9228_s10 }
 0x77a   : > { %s5397_s6 = sshll.u32 %s200_s30, 4  ;;  %s206_s7 = scalar_lea.vmem [#allocation7], %s9228_s10  ;;  %s9384_s6 = int_to_ptr.vmem [resolvable:$true] %s5397_s6 }
 0x77b   : > { %v5283_v61 = vadd.f32 %v5282_v33, %v5281_v46  ;;  %v5352_v1 = vrot.slane %v5351_v60, 4  ;;  %s5410_s11 = sshll.u32 %s206_s7, 4  ;;  %s9382_s8 = scalar_lea.hbm %s9463_s3, %s6171_s28  ;;  %s9391_s11 = int_to_ptr.vmem [resolvable:$true] %s5410_s11 }
 0x77c   : > { %s9389_s14 = scalar_lea.hbm %s9464_s4, %s6171_s28  ;;  %s9393_s29 = scalar_lea.sflag [#allocation6], %s5364_s27 }
 0x77d   : > { %v5284_v34 = vrot.slane %v5283_v61, 2  ;;  %v5353_v17 = vadd.f32 %v5352_v1, %v5351_v60  ;;  %s6461_s5 = scalar_lea.vmem %s9384_s6, 16  ;;  %s6584_s12 = smov [#allocation5]  }
 0x77e   : > { %p6462_p1 = scmp.ne.s32.totalorder %s9384_s6, %s6461_s5  ;;  %s6465_s13 = sshll.u32 %s6584_s12, 4  ;;  %s6466_s13 = int_to_ptr.vmem [resolvable:$false] %s6465_s13 }
 0x77f   : > { %v5354_v32 = vrot.slane %v5353_v17, 2  ;;  %v5285_v31 = vadd.f32 %v5284_v34, %v5283_v61  ;;  %s6467_s22 = scalar_lea.vmem %s6466_s13, 32  ;;  %p6468_p4 = scmp.lt.s32.totalorder %s9384_s6, %s6466_s13 }
 0x780   : > { %p6463_p2 = pnand %p6462_p1, %p6651_p5  ;;  %p6469_p7 = scmp.lt.s32.totalorder %s6467_s22, %s6461_s5 }
 0x781   : > { %v5286_v2 = vrot.slane %v5285_v31, 1  ;;  %v5355_v0 = vadd.f32 %v5354_v32, %v5353_v17 }
 0x782   : > { %p6464_p3 = pneg %p6463_p2  ;;  %p6470_p8 = por %p6469_p7, %p6468_p4 }
 0x783   : > { %v5287_v19 = vadd.f32 %v5286_v2, %v5285_v31  ;;  %v5356_v24 = vrot.slane %v5355_v0, 1 }
 0x784   : > { %p6471_p9 = pnand %p6470_p8, %p6464_p3 }
 0x785   : > { %5288 = vst [vmem:[%s200_s30] sm:$0x1] %v5287_v19  ;;  %v5357_v12 = vadd.f32 %v5356_v24, %v5355_v0 }
 0x786   : > { %6474 = shalt.err (!%p6471_p9)
}
 0x787   : > { %s6475_s27 = scalar_lea.hbm %s9382_s8, 16  ;;  %s6479_s23 = scalar_lea.hbm %s9463_s3, 32 }
 0x788   : > { %p6476_p10 = scmp.ne.s32.totalorder %s9382_s8, %s6475_s27  ;;  %p6480_p13 = scmp.lt.u32.totalorder %s9382_s8, %s9463_s3 }
 0x789   : > { %p6481_p0 = scmp.lt.u32.totalorder %s6479_s23, %s6475_s27  ;;  %p6483_p2 = scmp.lt.u32.totalorder %s6475_s27, %s9382_s8 }
 0x78a   : > { %p6477_p11 = pnand %p6476_p10, %p6651_p5 }
 0x78b   : > { %p6482_p1 = por %p6481_p0, %p6480_p13 }
 0x78c   : > { %p6478_p12 = pneg %p6477_p11 }
 0x78d   : > { %p6484_p3 = por %p6483_p2, %p6482_p1 }
 0x78f   : > { %p6485_p4 = pnand %p6484_p3, %p6478_p12 }
 0x791   : > { %6488 = shalt.err (!%p6485_p4)
}
 0x792   : > { %6354 = dma.vmem_to_hbm [thread:$0]  (%p6651_p5), %s9384_s6, 16, %s9382_s8, %s9393_s29   ;;  %5358 = vst [vmem:[%s206_s7] sm:$0x1] %v5357_v12 }
 0x793   : > { %s6489_s5 = scalar_lea.vmem %s9391_s11, 16  ;;  %s6585_s12 = smov [#allocation7]  }
 0x794   : > { %p6490_p7 = scmp.ne.s32.totalorder %s9391_s11, %s6489_s5  ;;  %s6493_s13 = sshll.u32 %s6585_s12, 4  ;;  %s6494_s13 = int_to_ptr.vmem [resolvable:$false] %s6493_s13 }
 0x795   : > { %s6495_s22 = scalar_lea.vmem %s6494_s13, 32  ;;  %p6496_p10 = scmp.lt.s32.totalorder %s9391_s11, %s6494_s13 }
 0x796   : > { %p6491_p8 = pnand %p6490_p7, %p6651_p5  ;;  %p6497_p11 = scmp.lt.s32.totalorder %s6495_s22, %s6489_s5 }
 0x798   : > { %p6492_p9 = pneg %p6491_p8  ;;  %p6498_p12 = por %p6497_p11, %p6496_p10 }
 0x79a   : > { %p6499_p13 = pnand %p6498_p12, %p6492_p9 }
 0x79c   : > { %6502 = shalt.err (!%p6499_p13)
}
 0x79d   : > { %s6503_s10 = scalar_lea.hbm %s9389_s14, 16  ;;  %s6507_s8 = scalar_lea.hbm %s9464_s4, 32 }
 0x79e   : > { %p6504_p0 = scmp.ne.s32.totalorder %s9389_s14, %s6503_s10  ;;  %p6508_p3 = scmp.lt.u32.totalorder %s9389_s14, %s9464_s4 }
 0x79f   : > { %p6509_p4 = scmp.lt.u32.totalorder %s6507_s8, %s6503_s10  ;;  %p6511_p8 = scmp.lt.u32.totalorder %s6503_s10, %s9389_s14 }
 0x7a0   : > { %p6505_p1 = pnand %p6504_p0, %p6651_p5 }
 0x7a1   : > { %p6510_p7 = por %p6509_p4, %p6508_p3 }
 0x7a2   : > { %p6506_p2 = pneg %p6505_p1 }
 0x7a3   : > { %p6512_p9 = por %p6511_p8, %p6510_p7 }
 0x7a5   : > { %p6513_p10 = pnand %p6512_p9, %p6506_p2 }
 0x7a7   : > { %6516 = shalt.err (!%p6513_p10)
}
 0x7a8   : > { %6355 = dma.vmem_to_hbm [thread:$0]  (%p6651_p5), %s9391_s11, 16, %s9389_s14, %s9393_s29  }
 0x7a9 PF: > { %p6369_p11 = scmp.ge.s32.totalorder %s6555_s18, 2  ;;  %s5422_s30 = sand.u32 1, %s6543_s15  }
 0x7aa   : > { %s5423_s23 = scalar_lea.sflag [#allocation4], %s5422_s30 }
 0x7ab   : > { %p6360_p12 = pnand %p6369_p11, %p6655_p6 }
 0x7ad   : > { %6534 = dma.done.wait (!%p6360_p12), %s5423_s23, 4096  }
 0x7ae   : > { %6536 = vsyncadd (!%p6360_p12), %s5423_s23, 4294963200  ;;  %s5431_s19 = sand.u32 1, %s5522_s20  }
 0x7af   : > { %s5432_s9 = scalar_lea.sflag [#allocation6], %s5431_s19 }
 0x7b0   : > { %6538 = dma.done.wait (!%p6360_p12), %s5432_s9, 32  }
 0x7b1   : > { %6540 = vsyncadd (!%p6360_p12), %s5432_s9, 4294967264  ;;  %p18_p5 = scmp.ge.s32.totalorder %s6636_s21, 4   ;;  %s9467_s15 = smov %s6547_s16 }
 0x7b2   : > { %s9468_s16 = smov %s6551_s17  ;;  %s9469_s17 = smov %s6649_s24 }
 0x7b3   : > { %s9470_s18 = smov %s6636_s21  ;;  %20 = sbr.rel (!%p18_p5) target bundleno = 5 (0x5), region = 99 }
 0x7ba   :  { %5444 = vsyncpa [#allocation4], 1 }
 0x7bb   :  { %5446 = vsyncpa [#allocation4 + $0x1], 1 }
 0x7bc   :  { %5447 = vsyncpa [#allocation6], 1 }
 0x7bd   :  { %5449 = vsyncpa [#allocation6 + $0x1], 1 }

</bundles_post_ra>
